<compile_context>
chip_gen: v5e
topology: v5e:2x2
jax: 0.10.0
libtpu: 0.0.40
codegen_flags: <defaults>
</compile_context>

<pallas_src>
import functools

import numpy as np
import jax
import jax.numpy as jnp
from jax import lax
from jax.experimental import pallas as pl
from jax.experimental.pallas import tpu as pltpu

_EPS = 1e-5
_VMEM = pl.BlockSpec(memory_space=pltpu.MemorySpace.VMEM)
_PAR1 = pltpu.CompilerParams(dimension_semantics=("parallel",))


# ---------------------------------------------------------------------------
# host-side constant builders (trace-time numpy; tiny)
# ---------------------------------------------------------------------------
def _mask3d(s, pad):
    """(Sp, 1, Sp*Sp) f32 mask: 1 at real voxels, 0 at zero padding."""
    sp = s + 2 * pad
    m = np.zeros((sp, sp, sp), np.float32)
    m[pad:pad + s, pad:pad + s, pad:pad + s] = 1.0
    return jnp.asarray(m.reshape(sp, 1, sp * sp))


def _select_mat(hp, k, stride, ho, pad_next, hn):
    """(q_dense, hn*hn) 0/1 matrix: dense window-start index -> position inside
    the zero-padded plane of the next stage (select + stride + embed in one dot)."""
    q = (hp - k) * hp + (hp - k + 1)
    s = np.zeros((q, hn * hn), np.float32)
    for i in range(ho):
        for j in range(ho):
            s[i * stride * hp + j * stride, (i + pad_next) * hn + (j + pad_next)] = 1.0
    return jnp.asarray(s)


def _adapt_select(pitch, s_in):
    """(La, (s_in//2)^2) selector for AdaptiveMaxPool3d(2) on evenly divisible sizes."""
    so = s_in // 2
    la = (s_in - 2) * pitch + s_in - 1
    s = np.zeros((la, so * so), np.float32)
    for i in range(so):
        for j in range(so):
            s[2 * i * pitch + 2 * j, i * so + j] = 1.0
    return jnp.asarray(s)


def _conv3_weight_matrix(w):
    """PyTorch (Cout, Cin, 3,3,3) -> (Cout, 27*Cin).
    Row order (kh*3+kw)*3*Cin + kd*Cin + ci matches the in-kernel im2col slab."""
    cout, cin = w.shape[0], w.shape[1]
    wt = jnp.transpose(w, (3, 4, 2, 1, 0))          # (kh, kw, kd, ci, co)
    return wt.reshape(27 * cin, cout).T


def _affine(mean, var, gamma, beta):
    scale = gamma * lax.rsqrt(var + _EPS)
    shift = beta - mean * scale
    c = scale.shape[0]
    return scale.reshape(c, 1), shift.reshape(c, 1)


def _finish_stats(ssum, ssq, count):
    s = jnp.sum(ssum, axis=0)[:, 0]
    q = jnp.sum(ssq, axis=0)[:, 0]
    mean = s / count
    var = jnp.maximum(q / count - mean * mean, 0.0)
    return mean, var


# ---------------------------------------------------------------------------
# Pallas kernels (all values are (channels_on_sublanes, spatial_on_lanes))
# ---------------------------------------------------------------------------
def _stage1_kernel(s_out, p_in, p_out, c_out,
                   x_ref, m_ref, sc_ref, sh_ref, w_ref, s_ref,
                   out_ref, sum_ref, sq_ref):
    """BN1 affine + ReLU + MaxPool3d(3,2,1) + Conv3d(1x1), one batch element.
    Output is embedded into the zero-padded layout stage 2 consumes; per-channel
    sum / sum-of-squares (BN2 partial stats) are emitted alongside."""
    q = (p_in - 3) * p_in + (p_in - 2)

    def bn_plane(dd):
        return jnp.maximum(x_ref[dd] * sc_ref[...] + sh_ref[...], 0.0) * m_ref[dd]

    zeros = jnp.zeros((c_out, p_out * p_out), jnp.float32)
    out_ref[0] = zeros
    out_ref[p_out - 1] = zeros
    ssum = jnp.zeros((c_out, 1), jnp.float32)
    ssq = jnp.zeros((c_out, 1), jnp.float32)
    for do in range(s_out):
        # max over the 3 depth planes first (max commutes), then 9 lane shifts
        zm = jnp.maximum(jnp.maximum(bn_plane(2 * do), bn_plane(2 * do + 1)),
                         bn_plane(2 * do + 2))
        pooled = None
        for kh in range(3):
            for kw in range(3):
                off = kh * p_in + kw
                v = zm[:, off:off + q]
                pooled = v if pooled is None else jnp.maximum(pooled, v)
        sel = jnp.dot(pooled, s_ref[...], preferred_element_type=jnp.float32)   # (C, p_out^2)
        o = jnp.dot(w_ref[...], sel, preferred_element_type=jnp.float32)        # (Cout, p_out^2)
        out_ref[do + 1] = o
        ssum = ssum + jnp.sum(o, axis=1, keepdims=True)
        ssq = ssq + jnp.sum(o * o, axis=1, keepdims=True)
    sum_ref[...] = ssum
    sq_ref[...] = ssq


def _stage2_kernel(s_sp, p_in, p_out, c,
                   x_ref, m_ref, sc_ref, sh_ref, w_ref, s_ref,
                   out_ref, sum_ref, sq_ref):
    """BN2 affine + ReLU + Conv3d(3x3x3, pad=1) via an in-VMEM im2col slab
    (single K = 27*C MXU dot per output depth).  Output is embedded into the
    zero-padded layout the stage-3 max pool consumes; BN3 partial stats emitted."""
    q = (p_in - 3) * p_in + (p_in - 2)

    def bn_plane(dd):
        return jnp.maximum(x_ref[dd] * sc_ref[...] + sh_ref[...], 0.0) * m_ref[dd]

    zeros = jnp.zeros((c, p_out * p_out), jnp.float32)
    out_ref[0] = zeros
    out_ref[p_out - 1] = zeros
    ssum = jnp.zeros((c, 1), jnp.float32)
    ssq = jnp.zeros((c, 1), jnp.float32)
    for d in range(s_sp):
        y3 = jnp.concatenate([bn_plane(d), bn_plane(d + 1), bn_plane(d + 2)], axis=0)
        slab = jnp.concatenate(
            [y3[:, kh * p_in + kw:kh * p_in + kw + q]
             for kh in range(3) for kw in range(3)], axis=0)                    # (27C, q)
        conv = jnp.dot(w_ref[...], slab, preferred_element_type=jnp.float32)    # (C, q)
        o = jnp.dot(conv, s_ref[...], preferred_element_type=jnp.float32)       # (C, p_out^2)
        out_ref[d + 1] = o
        ssum = ssum + jnp.sum(o, axis=1, keepdims=True)
        ssq = ssq + jnp.sum(o * o, axis=1, keepdims=True)
    sum_ref[...] = ssum
    sq_ref[...] = ssq


def _stage3_kernel(s_mid, p_in, p_mid, c,
                   x_ref, m_ref, sc_ref, sh_ref, sp_ref, w_ref, sa_ref, out_ref):
    """BN3 affine + ReLU + MaxPool3d(3,2,1) + Conv3d(3x3x3, pad=1) + ReLU +
    AdaptiveMaxPool3d(2), fused per batch element entirely in VMEM."""
    q_in = (p_in - 3) * p_in + (p_in - 2)
    q_mid = (p_mid - 3) * p_mid + (p_mid - 2)
    la = (s_mid - 2) * p_mid + s_mid - 1
    s_fin = s_mid // 2

    def bn_plane(dd):
        return jnp.maximum(x_ref[dd] * sc_ref[...] + sh_ref[...], 0.0) * m_ref[dd]

    # --- MaxPool(3,2,1), embedded into a zero-padded volume for the next conv.
    zeros_mid = jnp.zeros((c, p_mid * p_mid), jnp.float32)
    pooled = [zeros_mid]
    for do in range(s_mid):
        zm = jnp.maximum(jnp.maximum(bn_plane(2 * do), bn_plane(2 * do + 1)),
                         bn_plane(2 * do + 2))
        pm = None
        for kh in range(3):
            for kw in range(3):
                off = kh * p_in + kw
                v = zm[:, off:off + q_in]
                pm = v if pm is None else jnp.maximum(pm, v)
        pooled.append(jnp.dot(pm, sp_ref[...], preferred_element_type=jnp.float32))
    pooled.append(zeros_mid)

    # --- Conv3d(3x3x3, pad=1) + ReLU via im2col (K = 27*C).
    conv_planes = []
    for d in range(s_mid):
        y3 = jnp.concatenate(pooled[d:d + 3], axis=0)                           # (3C, p_mid^2)
        slab = jnp.concatenate(
            [y3[:, kh * p_mid + kw:kh * p_mid + kw + q_mid]
             for kh in range(3) for kw in range(3)], axis=0)                    # (27C, q_mid)
        conv_planes.append(jnp.maximum(
            jnp.dot(w_ref[...], slab, preferred_element_type=jnp.float32), 0.0))

    # --- AdaptiveMaxPool3d(2) == MaxPool3d(2, 2) for evenly divisible sizes.
    for dd in range(s_fin):
        zz = jnp.maximum(conv_planes[2 * dd], conv_planes[2 * dd + 1])
        m4 = None
        for ih in range(2):
            for iw in range(2):
                off = ih * p_mid + iw
                v = zz[:, off:off + la]
                m4 = v if m4 is None else jnp.maximum(m4, v)
        out_ref[dd] = jnp.dot(m4, sa_ref[...], preferred_element_type=jnp.float32)


def _fc_bn_kernel(x_ref, w_ref, b_ref, g_ref, beta_ref, o_ref):
    """Linear + training-mode BatchNorm1d on a tiny (N, F) input."""
    y = jnp.dot(x_ref[...], w_ref[...], preferred_element_type=jnp.float32) + b_ref[...]
    mean = jnp.mean(y, axis=0, keepdims=True)
    var = jnp.maximum(jnp.mean(y * y, axis=0, keepdims=True) - mean * mean, 0.0)
    o_ref[...] = (y - mean) * lax.rsqrt(var + _EPS) * g_ref[...] + beta_ref[...]


def fc_batchnorm(x, w, b, gamma, beta):
    n = x.shape[0]
    p = w.shape[1]
    return pl.pallas_call(
        _fc_bn_kernel,
        out_shape=jax.ShapeDtypeStruct((n, p), jnp.float32),
        in_specs=[_VMEM] * 5,
        out_specs=_VMEM,
    )(x, w, b.reshape(1, p), gamma.reshape(1, p), beta.reshape(1, p))


# ---------------------------------------------------------------------------
# Forward pass
# ---------------------------------------------------------------------------
def localization3d_forward(x_ncdhw, params):
    x = x_ncdhw.astype(jnp.float32)
    n, c_in, d0, h0, w0 = x.shape
    assert d0 == h0 == w0, "cubic input assumed"
    s0 = d0
    c_out = params["conv1_w"].shape[0]
    n_par = params["fc_w"].shape[0]

    s1 = (s0 + 2 - 3) // 2 + 1           # after MaxPool(3,2,1)
    s2 = (s1 + 2 - 3) // 2 + 1           # after second MaxPool(3,2,1)
    assert s2 % 2 == 0 and s2 >= 2, "AdaptiveMaxPool3d(2) path needs an even cubic size"
    # TODO(synk): general AdaptiveMaxPool3d (overlapping bins for odd sizes) not implemented.
    s_fin = s2 // 2

    p0, p1, p2 = s0 + 2, s1 + 2, s2 + 2  # zero-padded plane sizes per stage
    q0 = (p0 - 3) * p0 + (p0 - 2)
    q1 = (p1 - 3) * p1 + (p1 - 2)
    la = (s2 - 2) * p2 + s2 - 1

    # ---- BN1 batch stats: plain XLA reduction over the raw input (tiny) ----
    mean1 = jnp.mean(x, axis=(0, 2, 3, 4))
    var1 = jnp.maximum(jnp.mean(x * x, axis=(0, 2, 3, 4)) - mean1 * mean1, 0.0)
    sc1, sh1 = _affine(mean1, var1, params["bn1_g"], params["bn1_b"])

    # ---- lane-dense layout: (N, Dp, C, Hp*Wp), spatial on lanes -------------
    xt = jnp.transpose(x, (0, 2, 1, 3, 4))
    xp = jnp.pad(xt, ((0, 0), (1, 1), (0, 0), (1, 1), (1, 1)))
    xp = xp.reshape(n, p0, c_in, p0 * p0)

    mask0 = _mask3d(s0, 1)
    mask1 = _mask3d(s1, 1)
    sel_pool1 = _select_mat(p0, 3, 2, s1, 1, p1)
    sel_conv2 = _select_mat(p1, 3, 1, s1, 1, p1)
    sel_pool2 = _select_mat(p1, 3, 2, s2, 1, p2)
    sel_adapt = _adapt_select(p2, s2)

    w1 = params["conv1_w"].reshape(c_out, c_in)
    w2 = _conv3_weight_matrix(params["conv2_w"])
    w3 = _conv3_weight_matrix(params["conv3_w"])

    # ---- stage 1: BN1+ReLU+MaxPool(3,2,1)+Conv1x1 (+ BN2 partial stats) -----
    a2, ps2, qs2 = pl.pallas_call(
        functools.partial(_stage1_kernel, s1, p0, p1, c_out),
        grid=(n,),
        in_specs=[
            pl.BlockSpec((None, p0, c_in, p0 * p0), lambda b: (b, 0, 0, 0)),
            pl.BlockSpec((p0, 1, p0 * p0), lambda b: (0, 0, 0)),
            pl.BlockSpec((c_in, 1), lambda b: (0, 0)),
            pl.BlockSpec((c_in, 1), lambda b: (0, 0)),
            pl.BlockSpec((c_out, c_in), lambda b: (0, 0)),
            pl.BlockSpec((q0, p1 * p1), lambda b: (0, 0)),
        ],
        out_specs=[
            pl.BlockSpec((None, p1, c_out, p1 * p1), lambda b: (b, 0, 0, 0)),
            pl.BlockSpec((None, c_out, 1), lambda b: (b, 0, 0)),
            pl.BlockSpec((None, c_out, 1), lambda b: (b, 0, 0)),
        ],
        out_shape=[
            jax.ShapeDtypeStruct((n, p1, c_out, p1 * p1), jnp.float32),
            jax.ShapeDtypeStruct((n, c_out, 1), jnp.float32),
            jax.ShapeDtypeStruct((n, c_out, 1), jnp.float32),
        ],
        compiler_params=_PAR1,
    )(xp, mask0, sc1, sh1, w1, sel_pool1)

    mean2, var2 = _finish_stats(ps2, qs2, n * s1 ** 3)
    sc2, sh2 = _affine(mean2, var2, params["bn2_g"], params["bn2_b"])

    # ---- stage 2: BN2+ReLU+Conv3x3x3 (im2col, K=27*C) (+ BN3 partial stats) -
    a3, ps3, qs3 = pl.pallas_call(
        functools.partial(_stage2_kernel, s1, p1, p1, c_out),
        grid=(n,),
        in_specs=[
            pl.BlockSpec((None, p1, c_out, p1 * p1), lambda b: (b, 0, 0, 0)),
            pl.BlockSpec((p1, 1, p1 * p1), lambda b: (0, 0, 0)),
            pl.BlockSpec((c_out, 1), lambda b: (0, 0)),
            pl.BlockSpec((c_out, 1), lambda b: (0, 0)),
            pl.BlockSpec((c_out, 27 * c_out), lambda b: (0, 0)),
            pl.BlockSpec((q1, p1 * p1), lambda b: (0, 0)),
        ],
        out_specs=[
            pl.BlockSpec((None, p1, c_out, p1 * p1), lambda b: (b, 0, 0, 0)),
            pl.BlockSpec((None, c_out, 1), lambda b: (b, 0, 0)),
            pl.BlockSpec((None, c_out, 1), lambda b: (b, 0, 0)),
        ],
        out_shape=[
            jax.ShapeDtypeStruct((n, p1, c_out, p1 * p1), jnp.float32),
            jax.ShapeDtypeStruct((n, c_out, 1), jnp.float32),
            jax.ShapeDtypeStruct((n, c_out, 1), jnp.float32),
        ],
        compiler_params=_PAR1,
    )(a2, mask1, sc2, sh2, w2, sel_conv2)

    mean3, var3 = _finish_stats(ps3, qs3, n * s1 ** 3)
    sc3, sh3 = _affine(mean3, var3, params["bn3_g"], params["bn3_b"])

    # ---- stage 3: BN3+ReLU+MaxPool(3,2,1)+Conv3x3x3+ReLU+AdaptiveMaxPool(2) -
    y = pl.pallas_call(
        functools.partial(_stage3_kernel, s2, p1, p2, c_out),
        grid=(n,),
        in_specs=[
            pl.BlockSpec((None, p1, c_out, p1 * p1), lambda b: (b, 0, 0, 0)),
            pl.BlockSpec((p1, 1, p1 * p1), lambda b: (0, 0, 0)),
            pl.BlockSpec((c_out, 1), lambda b: (0, 0)),
            pl.BlockSpec((c_out, 1), lambda b: (0, 0)),
            pl.BlockSpec((q1, p2 * p2), lambda b: (0, 0)),
            pl.BlockSpec((c_out, 27 * c_out), lambda b: (0, 0)),
            pl.BlockSpec((la, s_fin * s_fin), lambda b: (0, 0)),
        ],
        out_specs=pl.BlockSpec((None, s_fin, c_out, s_fin * s_fin),
                               lambda b: (b, 0, 0, 0)),
        out_shape=jax.ShapeDtypeStruct((n, s_fin, c_out, s_fin * s_fin), jnp.float32),
        compiler_params=_PAR1,
    )(a3, mask1, sc3, sh3, sel_pool2, w3, sel_adapt)

    # ---- flatten in PyTorch NCDHW order, then fused Linear + BatchNorm1d ----
    flat = jnp.transpose(y, (0, 2, 1, 3)).reshape(n, c_out * s_fin ** 3)
    out = fc_batchnorm(flat, params["fc_w"].T, params["fc_b"],
                       params["bnfc_g"], params["bnfc_b"])

    # torch.split(out, 1, 1)
    return tuple(out[:, i:i + 1] for i in range(n_par))


# ---------------------------------------------------------------------------
# Deterministic parameter init (synthetic; matches PyTorch module shapes)
# ---------------------------------------------------------------------------
def init_params(key, in_channels, out_channels, num_params):
    ks = jax.random.split(key, 5)
    f32 = jnp.float32
    return {
        "bn1_g": jnp.ones((in_channels,), f32),
        "bn1_b": jnp.zeros((in_channels,), f32),
        "conv1_w": 0.10 * jax.random.normal(ks[0], (out_channels, in_channels, 1, 1, 1), f32),
        "bn2_g": jnp.ones((out_channels,), f32),
        "bn2_b": jnp.zeros((out_channels,), f32),
        "conv2_w": 0.05 * jax.random.normal(ks[1], (out_channels, out_channels, 3, 3, 3), f32),
        "bn3_g": jnp.ones((out_channels,), f32),
        "bn3_b": jnp.zeros((out_channels,), f32),
        "conv3_w": 0.05 * jax.random.normal(ks[2], (out_channels, out_channels, 3, 3, 3), f32),
        "fc_w": 0.10 * jax.random.normal(ks[3], (num_params, out_channels * 8), f32),
        "fc_b": 0.10 * jax.random.normal(ks[4], (num_params,), f32),
        "bnfc_g": jnp.ones((num_params,), f32),
        "bnfc_b": jnp.zeros((num_params,), f32),
    }


if __name__ == "__main__":
    in_channels, out_channels, num_params = 4, 8, 6
    N, S = 2, 16

    root = jax.random.PRNGKey(0)
    k_x, k_p = jax.random.split(root)
    x = jax.random.normal(k_x, (N, in_channels, S, S, S), jnp.float32)  # NCDHW
    params = init_params(k_p, in_channels, out_channels, num_params)

    fwd = jax.jit(localization3d_forward)
    outs = jax.block_until_ready(fwd(x, params))

    assert len(outs) == num_params
    assert all(o.shape == (N, 1) for o in outs)
    print("KERNEL_OK")
</pallas_src>

<mosaic_0001>
module attributes {stable_mosaic.version = 11 : i64} {
  func.func @_stage1_kernel(%arg0: i32, %arg1: memref<1x18x4x324xf32, #tpu.memory_space<vmem>>, %arg2: memref<18x1x324xf32, #tpu.memory_space<vmem>>, %arg3: memref<4x1xf32, #tpu.memory_space<vmem>>, %arg4: memref<4x1xf32, #tpu.memory_space<vmem>>, %arg5: memref<8x4xf32, #tpu.memory_space<vmem>>, %arg6: memref<286x100xf32, #tpu.memory_space<vmem>>, %arg7: memref<1x10x8x100xf32, #tpu.memory_space<vmem>>, %arg8: memref<1x8x1xf32, #tpu.memory_space<vmem>>, %arg9: memref<1x8x1xf32, #tpu.memory_space<vmem>>) attributes {dimension_semantics = [#tpu.dimension_semantics<parallel>], iteration_bounds = array<i64: 2>, scalar_prefetch = 0 : i64, scratch_operands = 0 : i64, tpu.core_type = #tpu.core_type<tc>, window_params = [{transform_indices = @transform_0, window_bounds = array<i64: 1, 18, 4, 324>}, {pipeline_mode = #tpu.pipeline_mode<synchronous>, transform_indices = @transform_1, window_bounds = array<i64: 18, 1, 324>}, {pipeline_mode = #tpu.pipeline_mode<synchronous>, transform_indices = @transform_2, window_bounds = array<i64: 4, 1>}, {pipeline_mode = #tpu.pipeline_mode<synchronous>, transform_indices = @transform_3, window_bounds = array<i64: 4, 1>}, {pipeline_mode = #tpu.pipeline_mode<synchronous>, transform_indices = @transform_4, window_bounds = array<i64: 8, 4>}, {pipeline_mode = #tpu.pipeline_mode<synchronous>, transform_indices = @transform_5, window_bounds = array<i64: 286, 100>}, {transform_indices = @transform_6, window_bounds = array<i64: 1, 10, 8, 100>}, {transform_indices = @transform_7, window_bounds = array<i64: 1, 8, 1>}, {transform_indices = @transform_8, window_bounds = array<i64: 1, 8, 1>}]} {
    %cst = arith.constant 0.000000e+00 : f32
    %0 = vector.broadcast %cst : f32 to vector<8x100xf32>
    %c0 = arith.constant 0 : index
    %c0_0 = arith.constant 0 : index
    %c0_1 = arith.constant 0 : index
    %c0_2 = arith.constant 0 : index
    %1 = vector.load %arg7[%c0, %c0_0, %c0_1, %c0_2] : memref<1x10x8x100xf32, #tpu.memory_space<vmem>>, vector<1x1x8x100xf32>
    %2 = vector.shape_cast %1 : vector<1x1x8x100xf32> to vector<8x100xf32>
    %3 = vector.shape_cast %0 : vector<8x100xf32> to vector<1x1x8x100xf32>
    tpu.vector_store %arg7[%c0, %c0_0, %c0_1, %c0_2], %3 {strides = array<i32>} : memref<1x10x8x100xf32, #tpu.memory_space<vmem>>, vector<1x1x8x100xf32>,
    %c0_3 = arith.constant 0 : index
    %c9 = arith.constant 9 : index
    %c0_4 = arith.constant 0 : index
    %c0_5 = arith.constant 0 : index
    %4 = vector.load %arg7[%c0_3, %c9, %c0_4, %c0_5] : memref<1x10x8x100xf32, #tpu.memory_space<vmem>>, vector<1x1x8x100xf32>
    %5 = vector.shape_cast %4 : vector<1x1x8x100xf32> to vector<8x100xf32>
    %6 = vector.shape_cast %0 : vector<8x100xf32> to vector<1x1x8x100xf32>
    tpu.vector_store %arg7[%c0_3, %c9, %c0_4, %c0_5], %6 {strides = array<i32>} : memref<1x10x8x100xf32, #tpu.memory_space<vmem>>, vector<1x1x8x100xf32>,
    %cst_6 = arith.constant 0.000000e+00 : f32
    %7 = vector.broadcast %cst_6 : f32 to vector<8x1xf32>
    %cst_7 = arith.constant 0.000000e+00 : f32
    %8 = vector.broadcast %cst_7 : f32 to vector<8x1xf32>
    %c0_8 = arith.constant 0 : index
    %c0_9 = arith.constant 0 : index
    %c0_10 = arith.constant 0 : index
    %c0_11 = arith.constant 0 : index
    %9 = vector.load %arg1[%c0_8, %c0_9, %c0_10, %c0_11] : memref<1x18x4x324xf32, #tpu.memory_space<vmem>>, vector<1x1x4x324xf32>
    %10 = vector.shape_cast %9 : vector<1x1x4x324xf32> to vector<4x324xf32>
    %c0_12 = arith.constant 0 : index
    %c0_13 = arith.constant 0 : index
    %11 = vector.load %arg3[%c0_12, %c0_13] : memref<4x1xf32, #tpu.memory_space<vmem>>, vector<4x1xf32>
    %12 = vector.broadcast %11 : vector<4x1xf32> to vector<4x324xf32>
    %13 = arith.mulf %10, %12 : vector<4x324xf32>
    %c0_14 = arith.constant 0 : index
    %c0_15 = arith.constant 0 : index
    %14 = vector.load %arg4[%c0_14, %c0_15] : memref<4x1xf32, #tpu.memory_space<vmem>>, vector<4x1xf32>
    %15 = vector.broadcast %14 : vector<4x1xf32> to vector<4x324xf32>
    %16 = arith.addf %13, %15 : vector<4x324xf32>
    %cst_16 = arith.constant 0.000000e+00 : f32
    %17 = vector.broadcast %cst_16 : f32 to vector<4x324xf32>
    %18 = arith.maximumf %16, %17 : vector<4x324xf32>
    %c0_17 = arith.constant 0 : index
    %c0_18 = arith.constant 0 : index
    %c0_19 = arith.constant 0 : index
    %19 = vector.load %arg2[%c0_17, %c0_18, %c0_19] : memref<18x1x324xf32, #tpu.memory_space<vmem>>, vector<1x1x324xf32>
    %20 = vector.shape_cast %19 : vector<1x1x324xf32> to vector<1x324xf32>
    %21 = vector.broadcast %20 : vector<1x324xf32> to vector<4x324xf32>
    %22 = arith.mulf %18, %21 : vector<4x324xf32>
    %c0_20 = arith.constant 0 : index
    %c1 = arith.constant 1 : index
    %c0_21 = arith.constant 0 : index
    %c0_22 = arith.constant 0 : index
    %23 = vector.load %arg1[%c0_20, %c1, %c0_21, %c0_22] : memref<1x18x4x324xf32, #tpu.memory_space<vmem>>, vector<1x1x4x324xf32>
    %24 = vector.shape_cast %23 : vector<1x1x4x324xf32> to vector<4x324xf32>
    %c0_23 = arith.constant 0 : index
    %c0_24 = arith.constant 0 : index
    %25 = vector.load %arg3[%c0_23, %c0_24] : memref<4x1xf32, #tpu.memory_space<vmem>>, vector<4x1xf32>
    %26 = vector.broadcast %25 : vector<4x1xf32> to vector<4x324xf32>
    %27 = arith.mulf %24, %26 : vector<4x324xf32>
    %c0_25 = arith.constant 0 : index
    %c0_26 = arith.constant 0 : index
    %28 = vector.load %arg4[%c0_25, %c0_26] : memref<4x1xf32, #tpu.memory_space<vmem>>, vector<4x1xf32>
    %29 = vector.broadcast %28 : vector<4x1xf32> to vector<4x324xf32>
    %30 = arith.addf %27, %29 : vector<4x324xf32>
    %cst_27 = arith.constant 0.000000e+00 : f32
    %31 = vector.broadcast %cst_27 : f32 to vector<4x324xf32>
    %32 = arith.maximumf %30, %31 : vector<4x324xf32>
    %c1_28 = arith.constant 1 : index
    %c0_29 = arith.constant 0 : index
    %c0_30 = arith.constant 0 : index
    %33 = vector.load %arg2[%c1_28, %c0_29, %c0_30] : memref<18x1x324xf32, #tpu.memory_space<vmem>>, vector<1x1x324xf32>
    %34 = vector.shape_cast %33 : vector<1x1x324xf32> to vector<1x324xf32>
    %35 = vector.broadcast %34 : vector<1x324xf32> to vector<4x324xf32>
    %36 = arith.mulf %32, %35 : vector<4x324xf32>
    %37 = arith.maximumf %22, %36 : vector<4x324xf32>
    %c0_31 = arith.constant 0 : index
    %c2 = arith.constant 2 : index
    %c0_32 = arith.constant 0 : index
    %c0_33 = arith.constant 0 : index
    %38 = vector.load %arg1[%c0_31, %c2, %c0_32, %c0_33] : memref<1x18x4x324xf32, #tpu.memory_space<vmem>>, vector<1x1x4x324xf32>
    %39 = vector.shape_cast %38 : vector<1x1x4x324xf32> to vector<4x324xf32>
    %c0_34 = arith.constant 0 : index
    %c0_35 = arith.constant 0 : index
    %40 = vector.load %arg3[%c0_34, %c0_35] : memref<4x1xf32, #tpu.memory_space<vmem>>, vector<4x1xf32>
    %41 = vector.broadcast %40 : vector<4x1xf32> to vector<4x324xf32>
    %42 = arith.mulf %39, %41 : vector<4x324xf32>
    %c0_36 = arith.constant 0 : index
    %c0_37 = arith.constant 0 : index
    %43 = vector.load %arg4[%c0_36, %c0_37] : memref<4x1xf32, #tpu.memory_space<vmem>>, vector<4x1xf32>
    %44 = vector.broadcast %43 : vector<4x1xf32> to vector<4x324xf32>
    %45 = arith.addf %42, %44 : vector<4x324xf32>
    %cst_38 = arith.constant 0.000000e+00 : f32
    %46 = vector.broadcast %cst_38 : f32 to vector<4x324xf32>
    %47 = arith.maximumf %45, %46 : vector<4x324xf32>
    %c2_39 = arith.constant 2 : index
    %c0_40 = arith.constant 0 : index
    %c0_41 = arith.constant 0 : index
    %48 = vector.load %arg2[%c2_39, %c0_40, %c0_41] : memref<18x1x324xf32, #tpu.memory_space<vmem>>, vector<1x1x324xf32>
    %49 = vector.shape_cast %48 : vector<1x1x324xf32> to vector<1x324xf32>
    %50 = vector.broadcast %49 : vector<1x324xf32> to vector<4x324xf32>
    %51 = arith.mulf %47, %50 : vector<4x324xf32>
    %52 = arith.maximumf %37, %51 : vector<4x324xf32>
    %53 = vector.extract_strided_slice %52 {offsets = [0, 0], sizes = [4, 286], strides = [1, 1]} : vector<4x324xf32> to vector<4x286xf32>
    %54 = vector.extract_strided_slice %52 {offsets = [0, 1], sizes = [4, 286], strides = [1, 1]} : vector<4x324xf32> to vector<4x286xf32>
    %55 = arith.maximumf %53, %54 : vector<4x286xf32>
    %56 = vector.extract_strided_slice %52 {offsets = [0, 2], sizes = [4, 286], strides = [1, 1]} : vector<4x324xf32> to vector<4x286xf32>
    %57 = arith.maximumf %55, %56 : vector<4x286xf32>
    %58 = vector.extract_strided_slice %52 {offsets = [0, 18], sizes = [4, 286], strides = [1, 1]} : vector<4x324xf32> to vector<4x286xf32>
    %59 = arith.maximumf %57, %58 : vector<4x286xf32>
    %60 = vector.extract_strided_slice %52 {offsets = [0, 19], sizes = [4, 286], strides = [1, 1]} : vector<4x324xf32> to vector<4x286xf32>
    %61 = arith.maximumf %59, %60 : vector<4x286xf32>
    %62 = vector.extract_strided_slice %52 {offsets = [0, 20], sizes = [4, 286], strides = [1, 1]} : vector<4x324xf32> to vector<4x286xf32>
    %63 = arith.maximumf %61, %62 : vector<4x286xf32>
    %64 = vector.extract_strided_slice %52 {offsets = [0, 36], sizes = [4, 286], strides = [1, 1]} : vector<4x324xf32> to vector<4x286xf32>
    %65 = arith.maximumf %63, %64 : vector<4x286xf32>
    %66 = vector.extract_strided_slice %52 {offsets = [0, 37], sizes = [4, 286], strides = [1, 1]} : vector<4x324xf32> to vector<4x286xf32>
    %67 = arith.maximumf %65, %66 : vector<4x286xf32>
    %68 = vector.extract_strided_slice %52 {offsets = [0, 38], sizes = [4, 286], strides = [1, 1]} : vector<4x324xf32> to vector<4x286xf32>
    %69 = arith.maximumf %67, %68 : vector<4x286xf32>
    %c0_42 = arith.constant 0 : index
    %c0_43 = arith.constant 0 : index
    %70 = vector.load %arg6[%c0_42, %c0_43] : memref<286x100xf32, #tpu.memory_space<vmem>>, vector<286x100xf32>
    %cst_44 = arith.constant dense<0.000000e+00> : vector<4x100xf32>
    %71 = tpu.matmul %69, %70, %cst_44 {dimension_numbers = #tpu.dot_dimension_numbers<[1], [0], [0], [1], [0, 0, 1, 1], [], []>} : vector<4x286xf32>, vector<286x100xf32>, vector<4x100xf32> -> vector<4x100xf32>
    %c0_45 = arith.constant 0 : index
    %c0_46 = arith.constant 0 : index
    %72 = vector.load %arg5[%c0_45, %c0_46] : memref<8x4xf32, #tpu.memory_space<vmem>>, vector<8x4xf32>
    %cst_47 = arith.constant dense<0.000000e+00> : vector<8x100xf32>
    %73 = tpu.matmul %72, %71, %cst_47 {dimension_numbers = #tpu.dot_dimension_numbers<[1], [0], [0], [1], [0, 0, 1, 1], [], []>} : vector<8x4xf32>, vector<4x100xf32>, vector<8x100xf32> -> vector<8x100xf32>
    %c0_48 = arith.constant 0 : index
    %c1_49 = arith.constant 1 : index
    %c0_50 = arith.constant 0 : index
    %c0_51 = arith.constant 0 : index
    %74 = vector.load %arg7[%c0_48, %c1_49, %c0_50, %c0_51] : memref<1x10x8x100xf32, #tpu.memory_space<vmem>>, vector<1x1x8x100xf32>
    %75 = vector.shape_cast %74 : vector<1x1x8x100xf32> to vector<8x100xf32>
    %76 = vector.shape_cast %73 : vector<8x100xf32> to vector<1x1x8x100xf32>
    tpu.vector_store %arg7[%c0_48, %c1_49, %c0_50, %c0_51], %76 {strides = array<i32>} : memref<1x10x8x100xf32, #tpu.memory_space<vmem>>, vector<1x1x8x100xf32>,
    %cst_52 = arith.constant dense<0.000000e+00> : vector<8xf32>
    %77 = vector.multi_reduction <add>, %73, %cst_52 [1] : vector<8x100xf32> to vector<8xf32>
    %78 = vector.shape_cast %77 : vector<8xf32> to vector<8x1xf32>
    %79 = arith.addf %7, %78 : vector<8x1xf32>
    %80 = arith.mulf %73, %73 : vector<8x100xf32>
    %cst_53 = arith.constant dense<0.000000e+00> : vector<8xf32>
    %81 = vector.multi_reduction <add>, %80, %cst_53 [1] : vector<8x100xf32> to vector<8xf32>
    %82 = vector.shape_cast %81 : vector<8xf32> to vector<8x1xf32>
    %83 = arith.addf %8, %82 : vector<8x1xf32>
    %c0_54 = arith.constant 0 : index
    %c2_55 = arith.constant 2 : index
    %c0_56 = arith.constant 0 : index
    %c0_57 = arith.constant 0 : index
    %84 = vector.load %arg1[%c0_54, %c2_55, %c0_56, %c0_57] : memref<1x18x4x324xf32, #tpu.memory_space<vmem>>, vector<1x1x4x324xf32>
    %85 = vector.shape_cast %84 : vector<1x1x4x324xf32> to vector<4x324xf32>
    %c0_58 = arith.constant 0 : index
    %c0_59 = arith.constant 0 : index
    %86 = vector.load %arg3[%c0_58, %c0_59] : memref<4x1xf32, #tpu.memory_space<vmem>>, vector<4x1xf32>
    %87 = vector.broadcast %86 : vector<4x1xf32> to vector<4x324xf32>
    %88 = arith.mulf %85, %87 : vector<4x324xf32>
    %c0_60 = arith.constant 0 : index
    %c0_61 = arith.constant 0 : index
    %89 = vector.load %arg4[%c0_60, %c0_61] : memref<4x1xf32, #tpu.memory_space<vmem>>, vector<4x1xf32>
    %90 = vector.broadcast %89 : vector<4x1xf32> to vector<4x324xf32>
    %91 = arith.addf %88, %90 : vector<4x324xf32>
    %cst_62 = arith.constant 0.000000e+00 : f32
    %92 = vector.broadcast %cst_62 : f32 to vector<4x324xf32>
    %93 = arith.maximumf %91, %92 : vector<4x324xf32>
    %c2_63 = arith.constant 2 : index
    %c0_64 = arith.constant 0 : index
    %c0_65 = arith.constant 0 : index
    %94 = vector.load %arg2[%c2_63, %c0_64, %c0_65] : memref<18x1x324xf32, #tpu.memory_space<vmem>>, vector<1x1x324xf32>
    %95 = vector.shape_cast %94 : vector<1x1x324xf32> to vector<1x324xf32>
    %96 = vector.broadcast %95 : vector<1x324xf32> to vector<4x324xf32>
    %97 = arith.mulf %93, %96 : vector<4x324xf32>
    %c0_66 = arith.constant 0 : index
    %c3 = arith.constant 3 : index
    %c0_67 = arith.constant 0 : index
    %c0_68 = arith.constant 0 : index
    %98 = vector.load %arg1[%c0_66, %c3, %c0_67, %c0_68] : memref<1x18x4x324xf32, #tpu.memory_space<vmem>>, vector<1x1x4x324xf32>
    %99 = vector.shape_cast %98 : vector<1x1x4x324xf32> to vector<4x324xf32>
    %c0_69 = arith.constant 0 : index
    %c0_70 = arith.constant 0 : index
    %100 = vector.load %arg3[%c0_69, %c0_70] : memref<4x1xf32, #tpu.memory_space<vmem>>, vector<4x1xf32>
    %101 = vector.broadcast %100 : vector<4x1xf32> to vector<4x324xf32>
    %102 = arith.mulf %99, %101 : vector<4x324xf32>
    %c0_71 = arith.constant 0 : index
    %c0_72 = arith.constant 0 : index
    %103 = vector.load %arg4[%c0_71, %c0_72] : memref<4x1xf32, #tpu.memory_space<vmem>>, vector<4x1xf32>
    %104 = vector.broadcast %103 : vector<4x1xf32> to vector<4x324xf32>
    %105 = arith.addf %102, %104 : vector<4x324xf32>
    %cst_73 = arith.constant 0.000000e+00 : f32
    %106 = vector.broadcast %cst_73 : f32 to vector<4x324xf32>
    %107 = arith.maximumf %105, %106 : vector<4x324xf32>
    %c3_74 = arith.constant 3 : index
    %c0_75 = arith.constant 0 : index
    %c0_76 = arith.constant 0 : index
    %108 = vector.load %arg2[%c3_74, %c0_75, %c0_76] : memref<18x1x324xf32, #tpu.memory_space<vmem>>, vector<1x1x324xf32>
    %109 = vector.shape_cast %108 : vector<1x1x324xf32> to vector<1x324xf32>
    %110 = vector.broadcast %109 : vector<1x324xf32> to vector<4x324xf32>
    %111 = arith.mulf %107, %110 : vector<4x324xf32>
    %112 = arith.maximumf %97, %111 : vector<4x324xf32>
    %c0_77 = arith.constant 0 : index
    %c4 = arith.constant 4 : index
    %c0_78 = arith.constant 0 : index
    %c0_79 = arith.constant 0 : index
    %113 = vector.load %arg1[%c0_77, %c4, %c0_78, %c0_79] : memref<1x18x4x324xf32, #tpu.memory_space<vmem>>, vector<1x1x4x324xf32>
    %114 = vector.shape_cast %113 : vector<1x1x4x324xf32> to vector<4x324xf32>
    %c0_80 = arith.constant 0 : index
    %c0_81 = arith.constant 0 : index
    %115 = vector.load %arg3[%c0_80, %c0_81] : memref<4x1xf32, #tpu.memory_space<vmem>>, vector<4x1xf32>
    %116 = vector.broadcast %115 : vector<4x1xf32> to vector<4x324xf32>
    %117 = arith.mulf %114, %116 : vector<4x324xf32>
    %c0_82 = arith.constant 0 : index
    %c0_83 = arith.constant 0 : index
    %118 = vector.load %arg4[%c0_82, %c0_83] : memref<4x1xf32, #tpu.memory_space<vmem>>, vector<4x1xf32>
    %119 = vector.broadcast %118 : vector<4x1xf32> to vector<4x324xf32>
    %120 = arith.addf %117, %119 : vector<4x324xf32>
    %cst_84 = arith.constant 0.000000e+00 : f32
    %121 = vector.broadcast %cst_84 : f32 to vector<4x324xf32>
    %122 = arith.maximumf %120, %121 : vector<4x324xf32>
    %c4_85 = arith.constant 4 : index
    %c0_86 = arith.constant 0 : index
    %c0_87 = arith.constant 0 : index
    %123 = vector.load %arg2[%c4_85, %c0_86, %c0_87] : memref<18x1x324xf32, #tpu.memory_space<vmem>>, vector<1x1x324xf32>
    %124 = vector.shape_cast %123 : vector<1x1x324xf32> to vector<1x324xf32>
    %125 = vector.broadcast %124 : vector<1x324xf32> to vector<4x324xf32>
    %126 = arith.mulf %122, %125 : vector<4x324xf32>
    %127 = arith.maximumf %112, %126 : vector<4x324xf32>
    %128 = vector.extract_strided_slice %127 {offsets = [0, 0], sizes = [4, 286], strides = [1, 1]} : vector<4x324xf32> to vector<4x286xf32>
    %129 = vector.extract_strided_slice %127 {offsets = [0, 1], sizes = [4, 286], strides = [1, 1]} : vector<4x324xf32> to vector<4x286xf32>
    %130 = arith.maximumf %128, %129 : vector<4x286xf32>
    %131 = vector.extract_strided_slice %127 {offsets = [0, 2], sizes = [4, 286], strides = [1, 1]} : vector<4x324xf32> to vector<4x286xf32>
    %132 = arith.maximumf %130, %131 : vector<4x286xf32>
    %133 = vector.extract_strided_slice %127 {offsets = [0, 18], sizes = [4, 286], strides = [1, 1]} : vector<4x324xf32> to vector<4x286xf32>
    %134 = arith.maximumf %132, %133 : vector<4x286xf32>
    %135 = vector.extract_strided_slice %127 {offsets = [0, 19], sizes = [4, 286], strides = [1, 1]} : vector<4x324xf32> to vector<4x286xf32>
    %136 = arith.maximumf %134, %135 : vector<4x286xf32>
    %137 = vector.extract_strided_slice %127 {offsets = [0, 20], sizes = [4, 286], strides = [1, 1]} : vector<4x324xf32> to vector<4x286xf32>
    %138 = arith.maximumf %136, %137 : vector<4x286xf32>
    %139 = vector.extract_strided_slice %127 {offsets = [0, 36], sizes = [4, 286], strides = [1, 1]} : vector<4x324xf32> to vector<4x286xf32>
    %140 = arith.maximumf %138, %139 : vector<4x286xf32>
    %141 = vector.extract_strided_slice %127 {offsets = [0, 37], sizes = [4, 286], strides = [1, 1]} : vector<4x324xf32> to vector<4x286xf32>
    %142 = arith.maximumf %140, %141 : vector<4x286xf32>
    %143 = vector.extract_strided_slice %127 {offsets = [0, 38], sizes = [4, 286], strides = [1, 1]} : vector<4x324xf32> to vector<4x286xf32>
    %144 = arith.maximumf %142, %143 : vector<4x286xf32>
    %c0_88 = arith.constant 0 : index
    %c0_89 = arith.constant 0 : index
    %145 = vector.load %arg6[%c0_88, %c0_89] : memref<286x100xf32, #tpu.memory_space<vmem>>, vector<286x100xf32>
    %cst_90 = arith.constant dense<0.000000e+00> : vector<4x100xf32>
    %146 = tpu.matmul %144, %145, %cst_90 {dimension_numbers = #tpu.dot_dimension_numbers<[1], [0], [0], [1], [0, 0, 1, 1], [], []>} : vector<4x286xf32>, vector<286x100xf32>, vector<4x100xf32> -> vector<4x100xf32>
    %c0_91 = arith.constant 0 : index
    %c0_92 = arith.constant 0 : index
    %147 = vector.load %arg5[%c0_91, %c0_92] : memref<8x4xf32, #tpu.memory_space<vmem>>, vector<8x4xf32>
    %cst_93 = arith.constant dense<0.000000e+00> : vector<8x100xf32>
    %148 = tpu.matmul %147, %146, %cst_93 {dimension_numbers = #tpu.dot_dimension_numbers<[1], [0], [0], [1], [0, 0, 1, 1], [], []>} : vector<8x4xf32>, vector<4x100xf32>, vector<8x100xf32> -> vector<8x100xf32>
    %c0_94 = arith.constant 0 : index
    %c2_95 = arith.constant 2 : index
    %c0_96 = arith.constant 0 : index
    %c0_97 = arith.constant 0 : index
    %149 = vector.load %arg7[%c0_94, %c2_95, %c0_96, %c0_97] : memref<1x10x8x100xf32, #tpu.memory_space<vmem>>, vector<1x1x8x100xf32>
    %150 = vector.shape_cast %149 : vector<1x1x8x100xf32> to vector<8x100xf32>
    %151 = vector.shape_cast %148 : vector<8x100xf32> to vector<1x1x8x100xf32>
    tpu.vector_store %arg7[%c0_94, %c2_95, %c0_96, %c0_97], %151 {strides = array<i32>} : memref<1x10x8x100xf32, #tpu.memory_space<vmem>>, vector<1x1x8x100xf32>,
    %cst_98 = arith.constant dense<0.000000e+00> : vector<8xf32>
    %152 = vector.multi_reduction <add>, %148, %cst_98 [1] : vector<8x100xf32> to vector<8xf32>
    %153 = vector.shape_cast %152 : vector<8xf32> to vector<8x1xf32>
    %154 = arith.addf %79, %153 : vector<8x1xf32>
    %155 = arith.mulf %148, %148 : vector<8x100xf32>
    %cst_99 = arith.constant dense<0.000000e+00> : vector<8xf32>
    %156 = vector.multi_reduction <add>, %155, %cst_99 [1] : vector<8x100xf32> to vector<8xf32>
    %157 = vector.shape_cast %156 : vector<8xf32> to vector<8x1xf32>
    %158 = arith.addf %83, %157 : vector<8x1xf32>
    %c0_100 = arith.constant 0 : index
    %c4_101 = arith.constant 4 : index
    %c0_102 = arith.constant 0 : index
    %c0_103 = arith.constant 0 : index
    %159 = vector.load %arg1[%c0_100, %c4_101, %c0_102, %c0_103] : memref<1x18x4x324xf32, #tpu.memory_space<vmem>>, vector<1x1x4x324xf32>
    %160 = vector.shape_cast %159 : vector<1x1x4x324xf32> to vector<4x324xf32>
    %c0_104 = arith.constant 0 : index
    %c0_105 = arith.constant 0 : index
    %161 = vector.load %arg3[%c0_104, %c0_105] : memref<4x1xf32, #tpu.memory_space<vmem>>, vector<4x1xf32>
    %162 = vector.broadcast %161 : vector<4x1xf32> to vector<4x324xf32>
    %163 = arith.mulf %160, %162 : vector<4x324xf32>
    %c0_106 = arith.constant 0 : index
    %c0_107 = arith.constant 0 : index
    %164 = vector.load %arg4[%c0_106, %c0_107] : memref<4x1xf32, #tpu.memory_space<vmem>>, vector<4x1xf32>
    %165 = vector.broadcast %164 : vector<4x1xf32> to vector<4x324xf32>
    %166 = arith.addf %163, %165 : vector<4x324xf32>
    %cst_108 = arith.constant 0.000000e+00 : f32
    %167 = vector.broadcast %cst_108 : f32 to vector<4x324xf32>
    %168 = arith.maximumf %166, %167 : vector<4x324xf32>
    %c4_109 = arith.constant 4 : index
    %c0_110 = arith.constant 0 : index
    %c0_111 = arith.constant 0 : index
    %169 = vector.load %arg2[%c4_109, %c0_110, %c0_111] : memref<18x1x324xf32, #tpu.memory_space<vmem>>, vector<1x1x324xf32>
    %170 = vector.shape_cast %169 : vector<1x1x324xf32> to vector<1x324xf32>
    %171 = vector.broadcast %170 : vector<1x324xf32> to vector<4x324xf32>
    %172 = arith.mulf %168, %171 : vector<4x324xf32>
    %c0_112 = arith.constant 0 : index
    %c5 = arith.constant 5 : index
    %c0_113 = arith.constant 0 : index
    %c0_114 = arith.constant 0 : index
    %173 = vector.load %arg1[%c0_112, %c5, %c0_113, %c0_114] : memref<1x18x4x324xf32, #tpu.memory_space<vmem>>, vector<1x1x4x324xf32>
    %174 = vector.shape_cast %173 : vector<1x1x4x324xf32> to vector<4x324xf32>
    %c0_115 = arith.constant 0 : index
    %c0_116 = arith.constant 0 : index
    %175 = vector.load %arg3[%c0_115, %c0_116] : memref<4x1xf32, #tpu.memory_space<vmem>>, vector<4x1xf32>
    %176 = vector.broadcast %175 : vector<4x1xf32> to vector<4x324xf32>
    %177 = arith.mulf %174, %176 : vector<4x324xf32>
    %c0_117 = arith.constant 0 : index
    %c0_118 = arith.constant 0 : index
    %178 = vector.load %arg4[%c0_117, %c0_118] : memref<4x1xf32, #tpu.memory_space<vmem>>, vector<4x1xf32>
    %179 = vector.broadcast %178 : vector<4x1xf32> to vector<4x324xf32>
    %180 = arith.addf %177, %179 : vector<4x324xf32>
    %cst_119 = arith.constant 0.000000e+00 : f32
    %181 = vector.broadcast %cst_119 : f32 to vector<4x324xf32>
    %182 = arith.maximumf %180, %181 : vector<4x324xf32>
    %c5_120 = arith.constant 5 : index
    %c0_121 = arith.constant 0 : index
    %c0_122 = arith.constant 0 : index
    %183 = vector.load %arg2[%c5_120, %c0_121, %c0_122] : memref<18x1x324xf32, #tpu.memory_space<vmem>>, vector<1x1x324xf32>
    %184 = vector.shape_cast %183 : vector<1x1x324xf32> to vector<1x324xf32>
    %185 = vector.broadcast %184 : vector<1x324xf32> to vector<4x324xf32>
    %186 = arith.mulf %182, %185 : vector<4x324xf32>
    %187 = arith.maximumf %172, %186 : vector<4x324xf32>
    %c0_123 = arith.constant 0 : index
    %c6 = arith.constant 6 : index
    %c0_124 = arith.constant 0 : index
    %c0_125 = arith.constant 0 : index
    %188 = vector.load %arg1[%c0_123, %c6, %c0_124, %c0_125] : memref<1x18x4x324xf32, #tpu.memory_space<vmem>>, vector<1x1x4x324xf32>
    %189 = vector.shape_cast %188 : vector<1x1x4x324xf32> to vector<4x324xf32>
    %c0_126 = arith.constant 0 : index
    %c0_127 = arith.constant 0 : index
    %190 = vector.load %arg3[%c0_126, %c0_127] : memref<4x1xf32, #tpu.memory_space<vmem>>, vector<4x1xf32>
    %191 = vector.broadcast %190 : vector<4x1xf32> to vector<4x324xf32>
    %192 = arith.mulf %189, %191 : vector<4x324xf32>
    %c0_128 = arith.constant 0 : index
    %c0_129 = arith.constant 0 : index
    %193 = vector.load %arg4[%c0_128, %c0_129] : memref<4x1xf32, #tpu.memory_space<vmem>>, vector<4x1xf32>
    %194 = vector.broadcast %193 : vector<4x1xf32> to vector<4x324xf32>
    %195 = arith.addf %192, %194 : vector<4x324xf32>
    %cst_130 = arith.constant 0.000000e+00 : f32
    %196 = vector.broadcast %cst_130 : f32 to vector<4x324xf32>
    %197 = arith.maximumf %195, %196 : vector<4x324xf32>
    %c6_131 = arith.constant 6 : index
    %c0_132 = arith.constant 0 : index
    %c0_133 = arith.constant 0 : index
    %198 = vector.load %arg2[%c6_131, %c0_132, %c0_133] : memref<18x1x324xf32, #tpu.memory_space<vmem>>, vector<1x1x324xf32>
    %199 = vector.shape_cast %198 : vector<1x1x324xf32> to vector<1x324xf32>
    %200 = vector.broadcast %199 : vector<1x324xf32> to vector<4x324xf32>
    %201 = arith.mulf %197, %200 : vector<4x324xf32>
    %202 = arith.maximumf %187, %201 : vector<4x324xf32>
    %203 = vector.extract_strided_slice %202 {offsets = [0, 0], sizes = [4, 286], strides = [1, 1]} : vector<4x324xf32> to vector<4x286xf32>
    %204 = vector.extract_strided_slice %202 {offsets = [0, 1], sizes = [4, 286], strides = [1, 1]} : vector<4x324xf32> to vector<4x286xf32>
    %205 = arith.maximumf %203, %204 : vector<4x286xf32>
    %206 = vector.extract_strided_slice %202 {offsets = [0, 2], sizes = [4, 286], strides = [1, 1]} : vector<4x324xf32> to vector<4x286xf32>
    %207 = arith.maximumf %205, %206 : vector<4x286xf32>
    %208 = vector.extract_strided_slice %202 {offsets = [0, 18], sizes = [4, 286], strides = [1, 1]} : vector<4x324xf32> to vector<4x286xf32>
    %209 = arith.maximumf %207, %208 : vector<4x286xf32>
    %210 = vector.extract_strided_slice %202 {offsets = [0, 19], sizes = [4, 286], strides = [1, 1]} : vector<4x324xf32> to vector<4x286xf32>
    %211 = arith.maximumf %209, %210 : vector<4x286xf32>
    %212 = vector.extract_strided_slice %202 {offsets = [0, 20], sizes = [4, 286], strides = [1, 1]} : vector<4x324xf32> to vector<4x286xf32>
    %213 = arith.maximumf %211, %212 : vector<4x286xf32>
    %214 = vector.extract_strided_slice %202 {offsets = [0, 36], sizes = [4, 286], strides = [1, 1]} : vector<4x324xf32> to vector<4x286xf32>
    %215 = arith.maximumf %213, %214 : vector<4x286xf32>
    %216 = vector.extract_strided_slice %202 {offsets = [0, 37], sizes = [4, 286], strides = [1, 1]} : vector<4x324xf32> to vector<4x286xf32>
    %217 = arith.maximumf %215, %216 : vector<4x286xf32>
    %218 = vector.extract_strided_slice %202 {offsets = [0, 38], sizes = [4, 286], strides = [1, 1]} : vector<4x324xf32> to vector<4x286xf32>
    %219 = arith.maximumf %217, %218 : vector<4x286xf32>
    %c0_134 = arith.constant 0 : index
    %c0_135 = arith.constant 0 : index
    %220 = vector.load %arg6[%c0_134, %c0_135] : memref<286x100xf32, #tpu.memory_space<vmem>>, vector<286x100xf32>
    %cst_136 = arith.constant dense<0.000000e+00> : vector<4x100xf32>
    %221 = tpu.matmul %219, %220, %cst_136 {dimension_numbers = #tpu.dot_dimension_numbers<[1], [0], [0], [1], [0, 0, 1, 1], [], []>} : vector<4x286xf32>, vector<286x100xf32>, vector<4x100xf32> -> vector<4x100xf32>
    %c0_137 = arith.constant 0 : index
    %c0_138 = arith.constant 0 : index
    %222 = vector.load %arg5[%c0_137, %c0_138] : memref<8x4xf32, #tpu.memory_space<vmem>>, vector<8x4xf32>
    %cst_139 = arith.constant dense<0.000000e+00> : vector<8x100xf32>
    %223 = tpu.matmul %222, %221, %cst_139 {dimension_numbers = #tpu.dot_dimension_numbers<[1], [0], [0], [1], [0, 0, 1, 1], [], []>} : vector<8x4xf32>, vector<4x100xf32>, vector<8x100xf32> -> vector<8x100xf32>
    %c0_140 = arith.constant 0 : index
    %c3_141 = arith.constant 3 : index
    %c0_142 = arith.constant 0 : index
    %c0_143 = arith.constant 0 : index
    %224 = vector.load %arg7[%c0_140, %c3_141, %c0_142, %c0_143] : memref<1x10x8x100xf32, #tpu.memory_space<vmem>>, vector<1x1x8x100xf32>
    %225 = vector.shape_cast %224 : vector<1x1x8x100xf32> to vector<8x100xf32>
    %226 = vector.shape_cast %223 : vector<8x100xf32> to vector<1x1x8x100xf32>
    tpu.vector_store %arg7[%c0_140, %c3_141, %c0_142, %c0_143], %226 {strides = array<i32>} : memref<1x10x8x100xf32, #tpu.memory_space<vmem>>, vector<1x1x8x100xf32>,
    %cst_144 = arith.constant dense<0.000000e+00> : vector<8xf32>
    %227 = vector.multi_reduction <add>, %223, %cst_144 [1] : vector<8x100xf32> to vector<8xf32>
    %228 = vector.shape_cast %227 : vector<8xf32> to vector<8x1xf32>
    %229 = arith.addf %154, %228 : vector<8x1xf32>
    %230 = arith.mulf %223, %223 : vector<8x100xf32>
    %cst_145 = arith.constant dense<0.000000e+00> : vector<8xf32>
    %231 = vector.multi_reduction <add>, %230, %cst_145 [1] : vector<8x100xf32> to vector<8xf32>
    %232 = vector.shape_cast %231 : vector<8xf32> to vector<8x1xf32>
    %233 = arith.addf %158, %232 : vector<8x1xf32>
    %c0_146 = arith.constant 0 : index
    %c6_147 = arith.constant 6 : index
    %c0_148 = arith.constant 0 : index
    %c0_149 = arith.constant 0 : index
    %234 = vector.load %arg1[%c0_146, %c6_147, %c0_148, %c0_149] : memref<1x18x4x324xf32, #tpu.memory_space<vmem>>, vector<1x1x4x324xf32>
    %235 = vector.shape_cast %234 : vector<1x1x4x324xf32> to vector<4x324xf32>
    %c0_150 = arith.constant 0 : index
    %c0_151 = arith.constant 0 : index
    %236 = vector.load %arg3[%c0_150, %c0_151] : memref<4x1xf32, #tpu.memory_space<vmem>>, vector<4x1xf32>
    %237 = vector.broadcast %236 : vector<4x1xf32> to vector<4x324xf32>
    %238 = arith.mulf %235, %237 : vector<4x324xf32>
    %c0_152 = arith.constant 0 : index
    %c0_153 = arith.constant 0 : index
    %239 = vector.load %arg4[%c0_152, %c0_153] : memref<4x1xf32, #tpu.memory_space<vmem>>, vector<4x1xf32>
    %240 = vector.broadcast %239 : vector<4x1xf32> to vector<4x324xf32>
    %241 = arith.addf %238, %240 : vector<4x324xf32>
    %cst_154 = arith.constant 0.000000e+00 : f32
    %242 = vector.broadcast %cst_154 : f32 to vector<4x324xf32>
    %243 = arith.maximumf %241, %242 : vector<4x324xf32>
    %c6_155 = arith.constant 6 : index
    %c0_156 = arith.constant 0 : index
    %c0_157 = arith.constant 0 : index
    %244 = vector.load %arg2[%c6_155, %c0_156, %c0_157] : memref<18x1x324xf32, #tpu.memory_space<vmem>>, vector<1x1x324xf32>
    %245 = vector.shape_cast %244 : vector<1x1x324xf32> to vector<1x324xf32>
    %246 = vector.broadcast %245 : vector<1x324xf32> to vector<4x324xf32>
    %247 = arith.mulf %243, %246 : vector<4x324xf32>
    %c0_158 = arith.constant 0 : index
    %c7 = arith.constant 7 : index
    %c0_159 = arith.constant 0 : index
    %c0_160 = arith.constant 0 : index
    %248 = vector.load %arg1[%c0_158, %c7, %c0_159, %c0_160] : memref<1x18x4x324xf32, #tpu.memory_space<vmem>>, vector<1x1x4x324xf32>
    %249 = vector.shape_cast %248 : vector<1x1x4x324xf32> to vector<4x324xf32>
    %c0_161 = arith.constant 0 : index
    %c0_162 = arith.constant 0 : index
    %250 = vector.load %arg3[%c0_161, %c0_162] : memref<4x1xf32, #tpu.memory_space<vmem>>, vector<4x1xf32>
    %251 = vector.broadcast %250 : vector<4x1xf32> to vector<4x324xf32>
    %252 = arith.mulf %249, %251 : vector<4x324xf32>
    %c0_163 = arith.constant 0 : index
    %c0_164 = arith.constant 0 : index
    %253 = vector.load %arg4[%c0_163, %c0_164] : memref<4x1xf32, #tpu.memory_space<vmem>>, vector<4x1xf32>
    %254 = vector.broadcast %253 : vector<4x1xf32> to vector<4x324xf32>
    %255 = arith.addf %252, %254 : vector<4x324xf32>
    %cst_165 = arith.constant 0.000000e+00 : f32
    %256 = vector.broadcast %cst_165 : f32 to vector<4x324xf32>
    %257 = arith.maximumf %255, %256 : vector<4x324xf32>
    %c7_166 = arith.constant 7 : index
    %c0_167 = arith.constant 0 : index
    %c0_168 = arith.constant 0 : index
    %258 = vector.load %arg2[%c7_166, %c0_167, %c0_168] : memref<18x1x324xf32, #tpu.memory_space<vmem>>, vector<1x1x324xf32>
    %259 = vector.shape_cast %258 : vector<1x1x324xf32> to vector<1x324xf32>
    %260 = vector.broadcast %259 : vector<1x324xf32> to vector<4x324xf32>
    %261 = arith.mulf %257, %260 : vector<4x324xf32>
    %262 = arith.maximumf %247, %261 : vector<4x324xf32>
    %c0_169 = arith.constant 0 : index
    %c8 = arith.constant 8 : index
    %c0_170 = arith.constant 0 : index
    %c0_171 = arith.constant 0 : index
    %263 = vector.load %arg1[%c0_169, %c8, %c0_170, %c0_171] : memref<1x18x4x324xf32, #tpu.memory_space<vmem>>, vector<1x1x4x324xf32>
    %264 = vector.shape_cast %263 : vector<1x1x4x324xf32> to vector<4x324xf32>
    %c0_172 = arith.constant 0 : index
    %c0_173 = arith.constant 0 : index
    %265 = vector.load %arg3[%c0_172, %c0_173] : memref<4x1xf32, #tpu.memory_space<vmem>>, vector<4x1xf32>
    %266 = vector.broadcast %265 : vector<4x1xf32> to vector<4x324xf32>
    %267 = arith.mulf %264, %266 : vector<4x324xf32>
    %c0_174 = arith.constant 0 : index
    %c0_175 = arith.constant 0 : index
    %268 = vector.load %arg4[%c0_174, %c0_175] : memref<4x1xf32, #tpu.memory_space<vmem>>, vector<4x1xf32>
    %269 = vector.broadcast %268 : vector<4x1xf32> to vector<4x324xf32>
    %270 = arith.addf %267, %269 : vector<4x324xf32>
    %cst_176 = arith.constant 0.000000e+00 : f32
    %271 = vector.broadcast %cst_176 : f32 to vector<4x324xf32>
    %272 = arith.maximumf %270, %271 : vector<4x324xf32>
    %c8_177 = arith.constant 8 : index
    %c0_178 = arith.constant 0 : index
    %c0_179 = arith.constant 0 : index
    %273 = vector.load %arg2[%c8_177, %c0_178, %c0_179] : memref<18x1x324xf32, #tpu.memory_space<vmem>>, vector<1x1x324xf32>
    %274 = vector.shape_cast %273 : vector<1x1x324xf32> to vector<1x324xf32>
    %275 = vector.broadcast %274 : vector<1x324xf32> to vector<4x324xf32>
    %276 = arith.mulf %272, %275 : vector<4x324xf32>
    %277 = arith.maximumf %262, %276 : vector<4x324xf32>
    %278 = vector.extract_strided_slice %277 {offsets = [0, 0], sizes = [4, 286], strides = [1, 1]} : vector<4x324xf32> to vector<4x286xf32>
    %279 = vector.extract_strided_slice %277 {offsets = [0, 1], sizes = [4, 286], strides = [1, 1]} : vector<4x324xf32> to vector<4x286xf32>
    %280 = arith.maximumf %278, %279 : vector<4x286xf32>
    %281 = vector.extract_strided_slice %277 {offsets = [0, 2], sizes = [4, 286], strides = [1, 1]} : vector<4x324xf32> to vector<4x286xf32>
    %282 = arith.maximumf %280, %281 : vector<4x286xf32>
    %283 = vector.extract_strided_slice %277 {offsets = [0, 18], sizes = [4, 286], strides = [1, 1]} : vector<4x324xf32> to vector<4x286xf32>
    %284 = arith.maximumf %282, %283 : vector<4x286xf32>
    %285 = vector.extract_strided_slice %277 {offsets = [0, 19], sizes = [4, 286], strides = [1, 1]} : vector<4x324xf32> to vector<4x286xf32>
    %286 = arith.maximumf %284, %285 : vector<4x286xf32>
    %287 = vector.extract_strided_slice %277 {offsets = [0, 20], sizes = [4, 286], strides = [1, 1]} : vector<4x324xf32> to vector<4x286xf32>
    %288 = arith.maximumf %286, %287 : vector<4x286xf32>
    %289 = vector.extract_strided_slice %277 {offsets = [0, 36], sizes = [4, 286], strides = [1, 1]} : vector<4x324xf32> to vector<4x286xf32>
    %290 = arith.maximumf %288, %289 : vector<4x286xf32>
    %291 = vector.extract_strided_slice %277 {offsets = [0, 37], sizes = [4, 286], strides = [1, 1]} : vector<4x324xf32> to vector<4x286xf32>
    %292 = arith.maximumf %290, %291 : vector<4x286xf32>
    %293 = vector.extract_strided_slice %277 {offsets = [0, 38], sizes = [4, 286], strides = [1, 1]} : vector<4x324xf32> to vector<4x286xf32>
    %294 = arith.maximumf %292, %293 : vector<4x286xf32>
    %c0_180 = arith.constant 0 : index
    %c0_181 = arith.constant 0 : index
    %295 = vector.load %arg6[%c0_180, %c0_181] : memref<286x100xf32, #tpu.memory_space<vmem>>, vector<286x100xf32>
    %cst_182 = arith.constant dense<0.000000e+00> : vector<4x100xf32>
    %296 = tpu.matmul %294, %295, %cst_182 {dimension_numbers = #tpu.dot_dimension_numbers<[1], [0], [0], [1], [0, 0, 1, 1], [], []>} : vector<4x286xf32>, vector<286x100xf32>, vector<4x100xf32> -> vector<4x100xf32>
    %c0_183 = arith.constant 0 : index
    %c0_184 = arith.constant 0 : index
    %297 = vector.load %arg5[%c0_183, %c0_184] : memref<8x4xf32, #tpu.memory_space<vmem>>, vector<8x4xf32>
    %cst_185 = arith.constant dense<0.000000e+00> : vector<8x100xf32>
    %298 = tpu.matmul %297, %296, %cst_185 {dimension_numbers = #tpu.dot_dimension_numbers<[1], [0], [0], [1], [0, 0, 1, 1], [], []>} : vector<8x4xf32>, vector<4x100xf32>, vector<8x100xf32> -> vector<8x100xf32>
    %c0_186 = arith.constant 0 : index
    %c4_187 = arith.constant 4 : index
    %c0_188 = arith.constant 0 : index
    %c0_189 = arith.constant 0 : index
    %299 = vector.load %arg7[%c0_186, %c4_187, %c0_188, %c0_189] : memref<1x10x8x100xf32, #tpu.memory_space<vmem>>, vector<1x1x8x100xf32>
    %300 = vector.shape_cast %299 : vector<1x1x8x100xf32> to vector<8x100xf32>
    %301 = vector.shape_cast %298 : vector<8x100xf32> to vector<1x1x8x100xf32>
    tpu.vector_store %arg7[%c0_186, %c4_187, %c0_188, %c0_189], %301 {strides = array<i32>} : memref<1x10x8x100xf32, #tpu.memory_space<vmem>>, vector<1x1x8x100xf32>,
    %cst_190 = arith.constant dense<0.000000e+00> : vector<8xf32>
    %302 = vector.multi_reduction <add>, %298, %cst_190 [1] : vector<8x100xf32> to vector<8xf32>
    %303 = vector.shape_cast %302 : vector<8xf32> to vector<8x1xf32>
    %304 = arith.addf %229, %303 : vector<8x1xf32>
    %305 = arith.mulf %298, %298 : vector<8x100xf32>
    %cst_191 = arith.constant dense<0.000000e+00> : vector<8xf32>
    %306 = vector.multi_reduction <add>, %305, %cst_191 [1] : vector<8x100xf32> to vector<8xf32>
    %307 = vector.shape_cast %306 : vector<8xf32> to vector<8x1xf32>
    %308 = arith.addf %233, %307 : vector<8x1xf32>
    %c0_192 = arith.constant 0 : index
    %c8_193 = arith.constant 8 : index
    %c0_194 = arith.constant 0 : index
    %c0_195 = arith.constant 0 : index
    %309 = vector.load %arg1[%c0_192, %c8_193, %c0_194, %c0_195] : memref<1x18x4x324xf32, #tpu.memory_space<vmem>>, vector<1x1x4x324xf32>
    %310 = vector.shape_cast %309 : vector<1x1x4x324xf32> to vector<4x324xf32>
    %c0_196 = arith.constant 0 : index
    %c0_197 = arith.constant 0 : index
    %311 = vector.load %arg3[%c0_196, %c0_197] : memref<4x1xf32, #tpu.memory_space<vmem>>, vector<4x1xf32>
    %312 = vector.broadcast %311 : vector<4x1xf32> to vector<4x324xf32>
    %313 = arith.mulf %310, %312 : vector<4x324xf32>
    %c0_198 = arith.constant 0 : index
    %c0_199 = arith.constant 0 : index
    %314 = vector.load %arg4[%c0_198, %c0_199] : memref<4x1xf32, #tpu.memory_space<vmem>>, vector<4x1xf32>
    %315 = vector.broadcast %314 : vector<4x1xf32> to vector<4x324xf32>
    %316 = arith.addf %313, %315 : vector<4x324xf32>
    %cst_200 = arith.constant 0.000000e+00 : f32
    %317 = vector.broadcast %cst_200 : f32 to vector<4x324xf32>
    %318 = arith.maximumf %316, %317 : vector<4x324xf32>
    %c8_201 = arith.constant 8 : index
    %c0_202 = arith.constant 0 : index
    %c0_203 = arith.constant 0 : index
    %319 = vector.load %arg2[%c8_201, %c0_202, %c0_203] : memref<18x1x324xf32, #tpu.memory_space<vmem>>, vector<1x1x324xf32>
    %320 = vector.shape_cast %319 : vector<1x1x324xf32> to vector<1x324xf32>
    %321 = vector.broadcast %320 : vector<1x324xf32> to vector<4x324xf32>
    %322 = arith.mulf %318, %321 : vector<4x324xf32>
    %c0_204 = arith.constant 0 : index
    %c9_205 = arith.constant 9 : index
    %c0_206 = arith.constant 0 : index
    %c0_207 = arith.constant 0 : index
    %323 = vector.load %arg1[%c0_204, %c9_205, %c0_206, %c0_207] : memref<1x18x4x324xf32, #tpu.memory_space<vmem>>, vector<1x1x4x324xf32>
    %324 = vector.shape_cast %323 : vector<1x1x4x324xf32> to vector<4x324xf32>
    %c0_208 = arith.constant 0 : index
    %c0_209 = arith.constant 0 : index
    %325 = vector.load %arg3[%c0_208, %c0_209] : memref<4x1xf32, #tpu.memory_space<vmem>>, vector<4x1xf32>
    %326 = vector.broadcast %325 : vector<4x1xf32> to vector<4x324xf32>
    %327 = arith.mulf %324, %326 : vector<4x324xf32>
    %c0_210 = arith.constant 0 : index
    %c0_211 = arith.constant 0 : index
    %328 = vector.load %arg4[%c0_210, %c0_211] : memref<4x1xf32, #tpu.memory_space<vmem>>, vector<4x1xf32>
    %329 = vector.broadcast %328 : vector<4x1xf32> to vector<4x324xf32>
    %330 = arith.addf %327, %329 : vector<4x324xf32>
    %cst_212 = arith.constant 0.000000e+00 : f32
    %331 = vector.broadcast %cst_212 : f32 to vector<4x324xf32>
    %332 = arith.maximumf %330, %331 : vector<4x324xf32>
    %c9_213 = arith.constant 9 : index
    %c0_214 = arith.constant 0 : index
    %c0_215 = arith.constant 0 : index
    %333 = vector.load %arg2[%c9_213, %c0_214, %c0_215] : memref<18x1x324xf32, #tpu.memory_space<vmem>>, vector<1x1x324xf32>
    %334 = vector.shape_cast %333 : vector<1x1x324xf32> to vector<1x324xf32>
    %335 = vector.broadcast %334 : vector<1x324xf32> to vector<4x324xf32>
    %336 = arith.mulf %332, %335 : vector<4x324xf32>
    %337 = arith.maximumf %322, %336 : vector<4x324xf32>
    %c0_216 = arith.constant 0 : index
    %c10 = arith.constant 10 : index
    %c0_217 = arith.constant 0 : index
    %c0_218 = arith.constant 0 : index
    %338 = vector.load %arg1[%c0_216, %c10, %c0_217, %c0_218] : memref<1x18x4x324xf32, #tpu.memory_space<vmem>>, vector<1x1x4x324xf32>
    %339 = vector.shape_cast %338 : vector<1x1x4x324xf32> to vector<4x324xf32>
    %c0_219 = arith.constant 0 : index
    %c0_220 = arith.constant 0 : index
    %340 = vector.load %arg3[%c0_219, %c0_220] : memref<4x1xf32, #tpu.memory_space<vmem>>, vector<4x1xf32>
    %341 = vector.broadcast %340 : vector<4x1xf32> to vector<4x324xf32>
    %342 = arith.mulf %339, %341 : vector<4x324xf32>
    %c0_221 = arith.constant 0 : index
    %c0_222 = arith.constant 0 : index
    %343 = vector.load %arg4[%c0_221, %c0_222] : memref<4x1xf32, #tpu.memory_space<vmem>>, vector<4x1xf32>
    %344 = vector.broadcast %343 : vector<4x1xf32> to vector<4x324xf32>
    %345 = arith.addf %342, %344 : vector<4x324xf32>
    %cst_223 = arith.constant 0.000000e+00 : f32
    %346 = vector.broadcast %cst_223 : f32 to vector<4x324xf32>
    %347 = arith.maximumf %345, %346 : vector<4x324xf32>
    %c10_224 = arith.constant 10 : index
    %c0_225 = arith.constant 0 : index
    %c0_226 = arith.constant 0 : index
    %348 = vector.load %arg2[%c10_224, %c0_225, %c0_226] : memref<18x1x324xf32, #tpu.memory_space<vmem>>, vector<1x1x324xf32>
    %349 = vector.shape_cast %348 : vector<1x1x324xf32> to vector<1x324xf32>
    %350 = vector.broadcast %349 : vector<1x324xf32> to vector<4x324xf32>
    %351 = arith.mulf %347, %350 : vector<4x324xf32>
    %352 = arith.maximumf %337, %351 : vector<4x324xf32>
    %353 = vector.extract_strided_slice %352 {offsets = [0, 0], sizes = [4, 286], strides = [1, 1]} : vector<4x324xf32> to vector<4x286xf32>
    %354 = vector.extract_strided_slice %352 {offsets = [0, 1], sizes = [4, 286], strides = [1, 1]} : vector<4x324xf32> to vector<4x286xf32>
    %355 = arith.maximumf %353, %354 : vector<4x286xf32>
    %356 = vector.extract_strided_slice %352 {offsets = [0, 2], sizes = [4, 286], strides = [1, 1]} : vector<4x324xf32> to vector<4x286xf32>
    %357 = arith.maximumf %355, %356 : vector<4x286xf32>
    %358 = vector.extract_strided_slice %352 {offsets = [0, 18], sizes = [4, 286], strides = [1, 1]} : vector<4x324xf32> to vector<4x286xf32>
    %359 = arith.maximumf %357, %358 : vector<4x286xf32>
    %360 = vector.extract_strided_slice %352 {offsets = [0, 19], sizes = [4, 286], strides = [1, 1]} : vector<4x324xf32> to vector<4x286xf32>
    %361 = arith.maximumf %359, %360 : vector<4x286xf32>
    %362 = vector.extract_strided_slice %352 {offsets = [0, 20], sizes = [4, 286], strides = [1, 1]} : vector<4x324xf32> to vector<4x286xf32>
    %363 = arith.maximumf %361, %362 : vector<4x286xf32>
    %364 = vector.extract_strided_slice %352 {offsets = [0, 36], sizes = [4, 286], strides = [1, 1]} : vector<4x324xf32> to vector<4x286xf32>
    %365 = arith.maximumf %363, %364 : vector<4x286xf32>
    %366 = vector.extract_strided_slice %352 {offsets = [0, 37], sizes = [4, 286], strides = [1, 1]} : vector<4x324xf32> to vector<4x286xf32>
    %367 = arith.maximumf %365, %366 : vector<4x286xf32>
    %368 = vector.extract_strided_slice %352 {offsets = [0, 38], sizes = [4, 286], strides = [1, 1]} : vector<4x324xf32> to vector<4x286xf32>
    %369 = arith.maximumf %367, %368 : vector<4x286xf32>
    %c0_227 = arith.constant 0 : index
    %c0_228 = arith.constant 0 : index
    %370 = vector.load %arg6[%c0_227, %c0_228] : memref<286x100xf32, #tpu.memory_space<vmem>>, vector<286x100xf32>
    %cst_229 = arith.constant dense<0.000000e+00> : vector<4x100xf32>
    %371 = tpu.matmul %369, %370, %cst_229 {dimension_numbers = #tpu.dot_dimension_numbers<[1], [0], [0], [1], [0, 0, 1, 1], [], []>} : vector<4x286xf32>, vector<286x100xf32>, vector<4x100xf32> -> vector<4x100xf32>
    %c0_230 = arith.constant 0 : index
    %c0_231 = arith.constant 0 : index
    %372 = vector.load %arg5[%c0_230, %c0_231] : memref<8x4xf32, #tpu.memory_space<vmem>>, vector<8x4xf32>
    %cst_232 = arith.constant dense<0.000000e+00> : vector<8x100xf32>
    %373 = tpu.matmul %372, %371, %cst_232 {dimension_numbers = #tpu.dot_dimension_numbers<[1], [0], [0], [1], [0, 0, 1, 1], [], []>} : vector<8x4xf32>, vector<4x100xf32>, vector<8x100xf32> -> vector<8x100xf32>
    %c0_233 = arith.constant 0 : index
    %c5_234 = arith.constant 5 : index
    %c0_235 = arith.constant 0 : index
    %c0_236 = arith.constant 0 : index
    %374 = vector.load %arg7[%c0_233, %c5_234, %c0_235, %c0_236] : memref<1x10x8x100xf32, #tpu.memory_space<vmem>>, vector<1x1x8x100xf32>
    %375 = vector.shape_cast %374 : vector<1x1x8x100xf32> to vector<8x100xf32>
    %376 = vector.shape_cast %373 : vector<8x100xf32> to vector<1x1x8x100xf32>
    tpu.vector_store %arg7[%c0_233, %c5_234, %c0_235, %c0_236], %376 {strides = array<i32>} : memref<1x10x8x100xf32, #tpu.memory_space<vmem>>, vector<1x1x8x100xf32>,
    %cst_237 = arith.constant dense<0.000000e+00> : vector<8xf32>
    %377 = vector.multi_reduction <add>, %373, %cst_237 [1] : vector<8x100xf32> to vector<8xf32>
    %378 = vector.shape_cast %377 : vector<8xf32> to vector<8x1xf32>
    %379 = arith.addf %304, %378 : vector<8x1xf32>
    %380 = arith.mulf %373, %373 : vector<8x100xf32>
    %cst_238 = arith.constant dense<0.000000e+00> : vector<8xf32>
    %381 = vector.multi_reduction <add>, %380, %cst_238 [1] : vector<8x100xf32> to vector<8xf32>
    %382 = vector.shape_cast %381 : vector<8xf32> to vector<8x1xf32>
    %383 = arith.addf %308, %382 : vector<8x1xf32>
    %c0_239 = arith.constant 0 : index
    %c10_240 = arith.constant 10 : index
    %c0_241 = arith.constant 0 : index
    %c0_242 = arith.constant 0 : index
    %384 = vector.load %arg1[%c0_239, %c10_240, %c0_241, %c0_242] : memref<1x18x4x324xf32, #tpu.memory_space<vmem>>, vector<1x1x4x324xf32>
    %385 = vector.shape_cast %384 : vector<1x1x4x324xf32> to vector<4x324xf32>
    %c0_243 = arith.constant 0 : index
    %c0_244 = arith.constant 0 : index
    %386 = vector.load %arg3[%c0_243, %c0_244] : memref<4x1xf32, #tpu.memory_space<vmem>>, vector<4x1xf32>
    %387 = vector.broadcast %386 : vector<4x1xf32> to vector<4x324xf32>
    %388 = arith.mulf %385, %387 : vector<4x324xf32>
    %c0_245 = arith.constant 0 : index
    %c0_246 = arith.constant 0 : index
    %389 = vector.load %arg4[%c0_245, %c0_246] : memref<4x1xf32, #tpu.memory_space<vmem>>, vector<4x1xf32>
    %390 = vector.broadcast %389 : vector<4x1xf32> to vector<4x324xf32>
    %391 = arith.addf %388, %390 : vector<4x324xf32>
    %cst_247 = arith.constant 0.000000e+00 : f32
    %392 = vector.broadcast %cst_247 : f32 to vector<4x324xf32>
    %393 = arith.maximumf %391, %392 : vector<4x324xf32>
    %c10_248 = arith.constant 10 : index
    %c0_249 = arith.constant 0 : index
    %c0_250 = arith.constant 0 : index
    %394 = vector.load %arg2[%c10_248, %c0_249, %c0_250] : memref<18x1x324xf32, #tpu.memory_space<vmem>>, vector<1x1x324xf32>
    %395 = vector.shape_cast %394 : vector<1x1x324xf32> to vector<1x324xf32>
    %396 = vector.broadcast %395 : vector<1x324xf32> to vector<4x324xf32>
    %397 = arith.mulf %393, %396 : vector<4x324xf32>
    %c0_251 = arith.constant 0 : index
    %c11 = arith.constant 11 : index
    %c0_252 = arith.constant 0 : index
    %c0_253 = arith.constant 0 : index
    %398 = vector.load %arg1[%c0_251, %c11, %c0_252, %c0_253] : memref<1x18x4x324xf32, #tpu.memory_space<vmem>>, vector<1x1x4x324xf32>
    %399 = vector.shape_cast %398 : vector<1x1x4x324xf32> to vector<4x324xf32>
    %c0_254 = arith.constant 0 : index
    %c0_255 = arith.constant 0 : index
    %400 = vector.load %arg3[%c0_254, %c0_255] : memref<4x1xf32, #tpu.memory_space<vmem>>, vector<4x1xf32>
    %401 = vector.broadcast %400 : vector<4x1xf32> to vector<4x324xf32>
    %402 = arith.mulf %399, %401 : vector<4x324xf32>
    %c0_256 = arith.constant 0 : index
    %c0_257 = arith.constant 0 : index
    %403 = vector.load %arg4[%c0_256, %c0_257] : memref<4x1xf32, #tpu.memory_space<vmem>>, vector<4x1xf32>
    %404 = vector.broadcast %403 : vector<4x1xf32> to vector<4x324xf32>
    %405 = arith.addf %402, %404 : vector<4x324xf32>
    %cst_258 = arith.constant 0.000000e+00 : f32
    %406 = vector.broadcast %cst_258 : f32 to vector<4x324xf32>
    %407 = arith.maximumf %405, %406 : vector<4x324xf32>
    %c11_259 = arith.constant 11 : index
    %c0_260 = arith.constant 0 : index
    %c0_261 = arith.constant 0 : index
    %408 = vector.load %arg2[%c11_259, %c0_260, %c0_261] : memref<18x1x324xf32, #tpu.memory_space<vmem>>, vector<1x1x324xf32>
    %409 = vector.shape_cast %408 : vector<1x1x324xf32> to vector<1x324xf32>
    %410 = vector.broadcast %409 : vector<1x324xf32> to vector<4x324xf32>
    %411 = arith.mulf %407, %410 : vector<4x324xf32>
    %412 = arith.maximumf %397, %411 : vector<4x324xf32>
    %c0_262 = arith.constant 0 : index
    %c12 = arith.constant 12 : index
    %c0_263 = arith.constant 0 : index
    %c0_264 = arith.constant 0 : index
    %413 = vector.load %arg1[%c0_262, %c12, %c0_263, %c0_264] : memref<1x18x4x324xf32, #tpu.memory_space<vmem>>, vector<1x1x4x324xf32>
    %414 = vector.shape_cast %413 : vector<1x1x4x324xf32> to vector<4x324xf32>
    %c0_265 = arith.constant 0 : index
    %c0_266 = arith.constant 0 : index
    %415 = vector.load %arg3[%c0_265, %c0_266] : memref<4x1xf32, #tpu.memory_space<vmem>>, vector<4x1xf32>
    %416 = vector.broadcast %415 : vector<4x1xf32> to vector<4x324xf32>
    %417 = arith.mulf %414, %416 : vector<4x324xf32>
    %c0_267 = arith.constant 0 : index
    %c0_268 = arith.constant 0 : index
    %418 = vector.load %arg4[%c0_267, %c0_268] : memref<4x1xf32, #tpu.memory_space<vmem>>, vector<4x1xf32>
    %419 = vector.broadcast %418 : vector<4x1xf32> to vector<4x324xf32>
    %420 = arith.addf %417, %419 : vector<4x324xf32>
    %cst_269 = arith.constant 0.000000e+00 : f32
    %421 = vector.broadcast %cst_269 : f32 to vector<4x324xf32>
    %422 = arith.maximumf %420, %421 : vector<4x324xf32>
    %c12_270 = arith.constant 12 : index
    %c0_271 = arith.constant 0 : index
    %c0_272 = arith.constant 0 : index
    %423 = vector.load %arg2[%c12_270, %c0_271, %c0_272] : memref<18x1x324xf32, #tpu.memory_space<vmem>>, vector<1x1x324xf32>
    %424 = vector.shape_cast %423 : vector<1x1x324xf32> to vector<1x324xf32>
    %425 = vector.broadcast %424 : vector<1x324xf32> to vector<4x324xf32>
    %426 = arith.mulf %422, %425 : vector<4x324xf32>
    %427 = arith.maximumf %412, %426 : vector<4x324xf32>
    %428 = vector.extract_strided_slice %427 {offsets = [0, 0], sizes = [4, 286], strides = [1, 1]} : vector<4x324xf32> to vector<4x286xf32>
    %429 = vector.extract_strided_slice %427 {offsets = [0, 1], sizes = [4, 286], strides = [1, 1]} : vector<4x324xf32> to vector<4x286xf32>
    %430 = arith.maximumf %428, %429 : vector<4x286xf32>
    %431 = vector.extract_strided_slice %427 {offsets = [0, 2], sizes = [4, 286], strides = [1, 1]} : vector<4x324xf32> to vector<4x286xf32>
    %432 = arith.maximumf %430, %431 : vector<4x286xf32>
    %433 = vector.extract_strided_slice %427 {offsets = [0, 18], sizes = [4, 286], strides = [1, 1]} : vector<4x324xf32> to vector<4x286xf32>
    %434 = arith.maximumf %432, %433 : vector<4x286xf32>
    %435 = vector.extract_strided_slice %427 {offsets = [0, 19], sizes = [4, 286], strides = [1, 1]} : vector<4x324xf32> to vector<4x286xf32>
    %436 = arith.maximumf %434, %435 : vector<4x286xf32>
    %437 = vector.extract_strided_slice %427 {offsets = [0, 20], sizes = [4, 286], strides = [1, 1]} : vector<4x324xf32> to vector<4x286xf32>
    %438 = arith.maximumf %436, %437 : vector<4x286xf32>
    %439 = vector.extract_strided_slice %427 {offsets = [0, 36], sizes = [4, 286], strides = [1, 1]} : vector<4x324xf32> to vector<4x286xf32>
    %440 = arith.maximumf %438, %439 : vector<4x286xf32>
    %441 = vector.extract_strided_slice %427 {offsets = [0, 37], sizes = [4, 286], strides = [1, 1]} : vector<4x324xf32> to vector<4x286xf32>
    %442 = arith.maximumf %440, %441 : vector<4x286xf32>
    %443 = vector.extract_strided_slice %427 {offsets = [0, 38], sizes = [4, 286], strides = [1, 1]} : vector<4x324xf32> to vector<4x286xf32>
    %444 = arith.maximumf %442, %443 : vector<4x286xf32>
    %c0_273 = arith.constant 0 : index
    %c0_274 = arith.constant 0 : index
    %445 = vector.load %arg6[%c0_273, %c0_274] : memref<286x100xf32, #tpu.memory_space<vmem>>, vector<286x100xf32>
    %cst_275 = arith.constant dense<0.000000e+00> : vector<4x100xf32>
    %446 = tpu.matmul %444, %445, %cst_275 {dimension_numbers = #tpu.dot_dimension_numbers<[1], [0], [0], [1], [0, 0, 1, 1], [], []>} : vector<4x286xf32>, vector<286x100xf32>, vector<4x100xf32> -> vector<4x100xf32>
    %c0_276 = arith.constant 0 : index
    %c0_277 = arith.constant 0 : index
    %447 = vector.load %arg5[%c0_276, %c0_277] : memref<8x4xf32, #tpu.memory_space<vmem>>, vector<8x4xf32>
    %cst_278 = arith.constant dense<0.000000e+00> : vector<8x100xf32>
    %448 = tpu.matmul %447, %446, %cst_278 {dimension_numbers = #tpu.dot_dimension_numbers<[1], [0], [0], [1], [0, 0, 1, 1], [], []>} : vector<8x4xf32>, vector<4x100xf32>, vector<8x100xf32> -> vector<8x100xf32>
    %c0_279 = arith.constant 0 : index
    %c6_280 = arith.constant 6 : index
    %c0_281 = arith.constant 0 : index
    %c0_282 = arith.constant 0 : index
    %449 = vector.load %arg7[%c0_279, %c6_280, %c0_281, %c0_282] : memref<1x10x8x100xf32, #tpu.memory_space<vmem>>, vector<1x1x8x100xf32>
    %450 = vector.shape_cast %449 : vector<1x1x8x100xf32> to vector<8x100xf32>
    %451 = vector.shape_cast %448 : vector<8x100xf32> to vector<1x1x8x100xf32>
    tpu.vector_store %arg7[%c0_279, %c6_280, %c0_281, %c0_282], %451 {strides = array<i32>} : memref<1x10x8x100xf32, #tpu.memory_space<vmem>>, vector<1x1x8x100xf32>,
    %cst_283 = arith.constant dense<0.000000e+00> : vector<8xf32>
    %452 = vector.multi_reduction <add>, %448, %cst_283 [1] : vector<8x100xf32> to vector<8xf32>
    %453 = vector.shape_cast %452 : vector<8xf32> to vector<8x1xf32>
    %454 = arith.addf %379, %453 : vector<8x1xf32>
    %455 = arith.mulf %448, %448 : vector<8x100xf32>
    %cst_284 = arith.constant dense<0.000000e+00> : vector<8xf32>
    %456 = vector.multi_reduction <add>, %455, %cst_284 [1] : vector<8x100xf32> to vector<8xf32>
    %457 = vector.shape_cast %456 : vector<8xf32> to vector<8x1xf32>
    %458 = arith.addf %383, %457 : vector<8x1xf32>
    %c0_285 = arith.constant 0 : index
    %c12_286 = arith.constant 12 : index
    %c0_287 = arith.constant 0 : index
    %c0_288 = arith.constant 0 : index
    %459 = vector.load %arg1[%c0_285, %c12_286, %c0_287, %c0_288] : memref<1x18x4x324xf32, #tpu.memory_space<vmem>>, vector<1x1x4x324xf32>
    %460 = vector.shape_cast %459 : vector<1x1x4x324xf32> to vector<4x324xf32>
    %c0_289 = arith.constant 0 : index
    %c0_290 = arith.constant 0 : index
    %461 = vector.load %arg3[%c0_289, %c0_290] : memref<4x1xf32, #tpu.memory_space<vmem>>, vector<4x1xf32>
    %462 = vector.broadcast %461 : vector<4x1xf32> to vector<4x324xf32>
    %463 = arith.mulf %460, %462 : vector<4x324xf32>
    %c0_291 = arith.constant 0 : index
    %c0_292 = arith.constant 0 : index
    %464 = vector.load %arg4[%c0_291, %c0_292] : memref<4x1xf32, #tpu.memory_space<vmem>>, vector<4x1xf32>
    %465 = vector.broadcast %464 : vector<4x1xf32> to vector<4x324xf32>
    %466 = arith.addf %463, %465 : vector<4x324xf32>
    %cst_293 = arith.constant 0.000000e+00 : f32
    %467 = vector.broadcast %cst_293 : f32 to vector<4x324xf32>
    %468 = arith.maximumf %466, %467 : vector<4x324xf32>
    %c12_294 = arith.constant 12 : index
    %c0_295 = arith.constant 0 : index
    %c0_296 = arith.constant 0 : index
    %469 = vector.load %arg2[%c12_294, %c0_295, %c0_296] : memref<18x1x324xf32, #tpu.memory_space<vmem>>, vector<1x1x324xf32>
    %470 = vector.shape_cast %469 : vector<1x1x324xf32> to vector<1x324xf32>
    %471 = vector.broadcast %470 : vector<1x324xf32> to vector<4x324xf32>
    %472 = arith.mulf %468, %471 : vector<4x324xf32>
    %c0_297 = arith.constant 0 : index
    %c13 = arith.constant 13 : index
    %c0_298 = arith.constant 0 : index
    %c0_299 = arith.constant 0 : index
    %473 = vector.load %arg1[%c0_297, %c13, %c0_298, %c0_299] : memref<1x18x4x324xf32, #tpu.memory_space<vmem>>, vector<1x1x4x324xf32>
    %474 = vector.shape_cast %473 : vector<1x1x4x324xf32> to vector<4x324xf32>
    %c0_300 = arith.constant 0 : index
    %c0_301 = arith.constant 0 : index
    %475 = vector.load %arg3[%c0_300, %c0_301] : memref<4x1xf32, #tpu.memory_space<vmem>>, vector<4x1xf32>
    %476 = vector.broadcast %475 : vector<4x1xf32> to vector<4x324xf32>
    %477 = arith.mulf %474, %476 : vector<4x324xf32>
    %c0_302 = arith.constant 0 : index
    %c0_303 = arith.constant 0 : index
    %478 = vector.load %arg4[%c0_302, %c0_303] : memref<4x1xf32, #tpu.memory_space<vmem>>, vector<4x1xf32>
    %479 = vector.broadcast %478 : vector<4x1xf32> to vector<4x324xf32>
    %480 = arith.addf %477, %479 : vector<4x324xf32>
    %cst_304 = arith.constant 0.000000e+00 : f32
    %481 = vector.broadcast %cst_304 : f32 to vector<4x324xf32>
    %482 = arith.maximumf %480, %481 : vector<4x324xf32>
    %c13_305 = arith.constant 13 : index
    %c0_306 = arith.constant 0 : index
    %c0_307 = arith.constant 0 : index
    %483 = vector.load %arg2[%c13_305, %c0_306, %c0_307] : memref<18x1x324xf32, #tpu.memory_space<vmem>>, vector<1x1x324xf32>
    %484 = vector.shape_cast %483 : vector<1x1x324xf32> to vector<1x324xf32>
    %485 = vector.broadcast %484 : vector<1x324xf32> to vector<4x324xf32>
    %486 = arith.mulf %482, %485 : vector<4x324xf32>
    %487 = arith.maximumf %472, %486 : vector<4x324xf32>
    %c0_308 = arith.constant 0 : index
    %c14 = arith.constant 14 : index
    %c0_309 = arith.constant 0 : index
    %c0_310 = arith.constant 0 : index
    %488 = vector.load %arg1[%c0_308, %c14, %c0_309, %c0_310] : memref<1x18x4x324xf32, #tpu.memory_space<vmem>>, vector<1x1x4x324xf32>
    %489 = vector.shape_cast %488 : vector<1x1x4x324xf32> to vector<4x324xf32>
    %c0_311 = arith.constant 0 : index
    %c0_312 = arith.constant 0 : index
    %490 = vector.load %arg3[%c0_311, %c0_312] : memref<4x1xf32, #tpu.memory_space<vmem>>, vector<4x1xf32>
    %491 = vector.broadcast %490 : vector<4x1xf32> to vector<4x324xf32>
    %492 = arith.mulf %489, %491 : vector<4x324xf32>
    %c0_313 = arith.constant 0 : index
    %c0_314 = arith.constant 0 : index
    %493 = vector.load %arg4[%c0_313, %c0_314] : memref<4x1xf32, #tpu.memory_space<vmem>>, vector<4x1xf32>
    %494 = vector.broadcast %493 : vector<4x1xf32> to vector<4x324xf32>
    %495 = arith.addf %492, %494 : vector<4x324xf32>
    %cst_315 = arith.constant 0.000000e+00 : f32
    %496 = vector.broadcast %cst_315 : f32 to vector<4x324xf32>
    %497 = arith.maximumf %495, %496 : vector<4x324xf32>
    %c14_316 = arith.constant 14 : index
    %c0_317 = arith.constant 0 : index
    %c0_318 = arith.constant 0 : index
    %498 = vector.load %arg2[%c14_316, %c0_317, %c0_318] : memref<18x1x324xf32, #tpu.memory_space<vmem>>, vector<1x1x324xf32>
    %499 = vector.shape_cast %498 : vector<1x1x324xf32> to vector<1x324xf32>
    %500 = vector.broadcast %499 : vector<1x324xf32> to vector<4x324xf32>
    %501 = arith.mulf %497, %500 : vector<4x324xf32>
    %502 = arith.maximumf %487, %501 : vector<4x324xf32>
    %503 = vector.extract_strided_slice %502 {offsets = [0, 0], sizes = [4, 286], strides = [1, 1]} : vector<4x324xf32> to vector<4x286xf32>
    %504 = vector.extract_strided_slice %502 {offsets = [0, 1], sizes = [4, 286], strides = [1, 1]} : vector<4x324xf32> to vector<4x286xf32>
    %505 = arith.maximumf %503, %504 : vector<4x286xf32>
    %506 = vector.extract_strided_slice %502 {offsets = [0, 2], sizes = [4, 286], strides = [1, 1]} : vector<4x324xf32> to vector<4x286xf32>
    %507 = arith.maximumf %505, %506 : vector<4x286xf32>
    %508 = vector.extract_strided_slice %502 {offsets = [0, 18], sizes = [4, 286], strides = [1, 1]} : vector<4x324xf32> to vector<4x286xf32>
    %509 = arith.maximumf %507, %508 : vector<4x286xf32>
    %510 = vector.extract_strided_slice %502 {offsets = [0, 19], sizes = [4, 286], strides = [1, 1]} : vector<4x324xf32> to vector<4x286xf32>
    %511 = arith.maximumf %509, %510 : vector<4x286xf32>
    %512 = vector.extract_strided_slice %502 {offsets = [0, 20], sizes = [4, 286], strides = [1, 1]} : vector<4x324xf32> to vector<4x286xf32>
    %513 = arith.maximumf %511, %512 : vector<4x286xf32>
    %514 = vector.extract_strided_slice %502 {offsets = [0, 36], sizes = [4, 286], strides = [1, 1]} : vector<4x324xf32> to vector<4x286xf32>
    %515 = arith.maximumf %513, %514 : vector<4x286xf32>
    %516 = vector.extract_strided_slice %502 {offsets = [0, 37], sizes = [4, 286], strides = [1, 1]} : vector<4x324xf32> to vector<4x286xf32>
    %517 = arith.maximumf %515, %516 : vector<4x286xf32>
    %518 = vector.extract_strided_slice %502 {offsets = [0, 38], sizes = [4, 286], strides = [1, 1]} : vector<4x324xf32> to vector<4x286xf32>
    %519 = arith.maximumf %517, %518 : vector<4x286xf32>
    %c0_319 = arith.constant 0 : index
    %c0_320 = arith.constant 0 : index
    %520 = vector.load %arg6[%c0_319, %c0_320] : memref<286x100xf32, #tpu.memory_space<vmem>>, vector<286x100xf32>
    %cst_321 = arith.constant dense<0.000000e+00> : vector<4x100xf32>
    %521 = tpu.matmul %519, %520, %cst_321 {dimension_numbers = #tpu.dot_dimension_numbers<[1], [0], [0], [1], [0, 0, 1, 1], [], []>} : vector<4x286xf32>, vector<286x100xf32>, vector<4x100xf32> -> vector<4x100xf32>
    %c0_322 = arith.constant 0 : index
    %c0_323 = arith.constant 0 : index
    %522 = vector.load %arg5[%c0_322, %c0_323] : memref<8x4xf32, #tpu.memory_space<vmem>>, vector<8x4xf32>
    %cst_324 = arith.constant dense<0.000000e+00> : vector<8x100xf32>
    %523 = tpu.matmul %522, %521, %cst_324 {dimension_numbers = #tpu.dot_dimension_numbers<[1], [0], [0], [1], [0, 0, 1, 1], [], []>} : vector<8x4xf32>, vector<4x100xf32>, vector<8x100xf32> -> vector<8x100xf32>
    %c0_325 = arith.constant 0 : index
    %c7_326 = arith.constant 7 : index
    %c0_327 = arith.constant 0 : index
    %c0_328 = arith.constant 0 : index
    %524 = vector.load %arg7[%c0_325, %c7_326, %c0_327, %c0_328] : memref<1x10x8x100xf32, #tpu.memory_space<vmem>>, vector<1x1x8x100xf32>
    %525 = vector.shape_cast %524 : vector<1x1x8x100xf32> to vector<8x100xf32>
    %526 = vector.shape_cast %523 : vector<8x100xf32> to vector<1x1x8x100xf32>
    tpu.vector_store %arg7[%c0_325, %c7_326, %c0_327, %c0_328], %526 {strides = array<i32>} : memref<1x10x8x100xf32, #tpu.memory_space<vmem>>, vector<1x1x8x100xf32>,
    %cst_329 = arith.constant dense<0.000000e+00> : vector<8xf32>
    %527 = vector.multi_reduction <add>, %523, %cst_329 [1] : vector<8x100xf32> to vector<8xf32>
    %528 = vector.shape_cast %527 : vector<8xf32> to vector<8x1xf32>
    %529 = arith.addf %454, %528 : vector<8x1xf32>
    %530 = arith.mulf %523, %523 : vector<8x100xf32>
    %cst_330 = arith.constant dense<0.000000e+00> : vector<8xf32>
    %531 = vector.multi_reduction <add>, %530, %cst_330 [1] : vector<8x100xf32> to vector<8xf32>
    %532 = vector.shape_cast %531 : vector<8xf32> to vector<8x1xf32>
    %533 = arith.addf %458, %532 : vector<8x1xf32>
    %c0_331 = arith.constant 0 : index
    %c14_332 = arith.constant 14 : index
    %c0_333 = arith.constant 0 : index
    %c0_334 = arith.constant 0 : index
    %534 = vector.load %arg1[%c0_331, %c14_332, %c0_333, %c0_334] : memref<1x18x4x324xf32, #tpu.memory_space<vmem>>, vector<1x1x4x324xf32>
    %535 = vector.shape_cast %534 : vector<1x1x4x324xf32> to vector<4x324xf32>
    %c0_335 = arith.constant 0 : index
    %c0_336 = arith.constant 0 : index
    %536 = vector.load %arg3[%c0_335, %c0_336] : memref<4x1xf32, #tpu.memory_space<vmem>>, vector<4x1xf32>
    %537 = vector.broadcast %536 : vector<4x1xf32> to vector<4x324xf32>
    %538 = arith.mulf %535, %537 : vector<4x324xf32>
    %c0_337 = arith.constant 0 : index
    %c0_338 = arith.constant 0 : index
    %539 = vector.load %arg4[%c0_337, %c0_338] : memref<4x1xf32, #tpu.memory_space<vmem>>, vector<4x1xf32>
    %540 = vector.broadcast %539 : vector<4x1xf32> to vector<4x324xf32>
    %541 = arith.addf %538, %540 : vector<4x324xf32>
    %cst_339 = arith.constant 0.000000e+00 : f32
    %542 = vector.broadcast %cst_339 : f32 to vector<4x324xf32>
    %543 = arith.maximumf %541, %542 : vector<4x324xf32>
    %c14_340 = arith.constant 14 : index
    %c0_341 = arith.constant 0 : index
    %c0_342 = arith.constant 0 : index
    %544 = vector.load %arg2[%c14_340, %c0_341, %c0_342] : memref<18x1x324xf32, #tpu.memory_space<vmem>>, vector<1x1x324xf32>
    %545 = vector.shape_cast %544 : vector<1x1x324xf32> to vector<1x324xf32>
    %546 = vector.broadcast %545 : vector<1x324xf32> to vector<4x324xf32>
    %547 = arith.mulf %543, %546 : vector<4x324xf32>
    %c0_343 = arith.constant 0 : index
    %c15 = arith.constant 15 : index
    %c0_344 = arith.constant 0 : index
    %c0_345 = arith.constant 0 : index
    %548 = vector.load %arg1[%c0_343, %c15, %c0_344, %c0_345] : memref<1x18x4x324xf32, #tpu.memory_space<vmem>>, vector<1x1x4x324xf32>
    %549 = vector.shape_cast %548 : vector<1x1x4x324xf32> to vector<4x324xf32>
    %c0_346 = arith.constant 0 : index
    %c0_347 = arith.constant 0 : index
    %550 = vector.load %arg3[%c0_346, %c0_347] : memref<4x1xf32, #tpu.memory_space<vmem>>, vector<4x1xf32>
    %551 = vector.broadcast %550 : vector<4x1xf32> to vector<4x324xf32>
    %552 = arith.mulf %549, %551 : vector<4x324xf32>
    %c0_348 = arith.constant 0 : index
    %c0_349 = arith.constant 0 : index
    %553 = vector.load %arg4[%c0_348, %c0_349] : memref<4x1xf32, #tpu.memory_space<vmem>>, vector<4x1xf32>
    %554 = vector.broadcast %553 : vector<4x1xf32> to vector<4x324xf32>
    %555 = arith.addf %552, %554 : vector<4x324xf32>
    %cst_350 = arith.constant 0.000000e+00 : f32
    %556 = vector.broadcast %cst_350 : f32 to vector<4x324xf32>
    %557 = arith.maximumf %555, %556 : vector<4x324xf32>
    %c15_351 = arith.constant 15 : index
    %c0_352 = arith.constant 0 : index
    %c0_353 = arith.constant 0 : index
    %558 = vector.load %arg2[%c15_351, %c0_352, %c0_353] : memref<18x1x324xf32, #tpu.memory_space<vmem>>, vector<1x1x324xf32>
    %559 = vector.shape_cast %558 : vector<1x1x324xf32> to vector<1x324xf32>
    %560 = vector.broadcast %559 : vector<1x324xf32> to vector<4x324xf32>
    %561 = arith.mulf %557, %560 : vector<4x324xf32>
    %562 = arith.maximumf %547, %561 : vector<4x324xf32>
    %c0_354 = arith.constant 0 : index
    %c16 = arith.constant 16 : index
    %c0_355 = arith.constant 0 : index
    %c0_356 = arith.constant 0 : index
    %563 = vector.load %arg1[%c0_354, %c16, %c0_355, %c0_356] : memref<1x18x4x324xf32, #tpu.memory_space<vmem>>, vector<1x1x4x324xf32>
    %564 = vector.shape_cast %563 : vector<1x1x4x324xf32> to vector<4x324xf32>
    %c0_357 = arith.constant 0 : index
    %c0_358 = arith.constant 0 : index
    %565 = vector.load %arg3[%c0_357, %c0_358] : memref<4x1xf32, #tpu.memory_space<vmem>>, vector<4x1xf32>
    %566 = vector.broadcast %565 : vector<4x1xf32> to vector<4x324xf32>
    %567 = arith.mulf %564, %566 : vector<4x324xf32>
    %c0_359 = arith.constant 0 : index
    %c0_360 = arith.constant 0 : index
    %568 = vector.load %arg4[%c0_359, %c0_360] : memref<4x1xf32, #tpu.memory_space<vmem>>, vector<4x1xf32>
    %569 = vector.broadcast %568 : vector<4x1xf32> to vector<4x324xf32>
    %570 = arith.addf %567, %569 : vector<4x324xf32>
    %cst_361 = arith.constant 0.000000e+00 : f32
    %571 = vector.broadcast %cst_361 : f32 to vector<4x324xf32>
    %572 = arith.maximumf %570, %571 : vector<4x324xf32>
    %c16_362 = arith.constant 16 : index
    %c0_363 = arith.constant 0 : index
    %c0_364 = arith.constant 0 : index
    %573 = vector.load %arg2[%c16_362, %c0_363, %c0_364] : memref<18x1x324xf32, #tpu.memory_space<vmem>>, vector<1x1x324xf32>
    %574 = vector.shape_cast %573 : vector<1x1x324xf32> to vector<1x324xf32>
    %575 = vector.broadcast %574 : vector<1x324xf32> to vector<4x324xf32>
    %576 = arith.mulf %572, %575 : vector<4x324xf32>
    %577 = arith.maximumf %562, %576 : vector<4x324xf32>
    %578 = vector.extract_strided_slice %577 {offsets = [0, 0], sizes = [4, 286], strides = [1, 1]} : vector<4x324xf32> to vector<4x286xf32>
    %579 = vector.extract_strided_slice %577 {offsets = [0, 1], sizes = [4, 286], strides = [1, 1]} : vector<4x324xf32> to vector<4x286xf32>
    %580 = arith.maximumf %578, %579 : vector<4x286xf32>
    %581 = vector.extract_strided_slice %577 {offsets = [0, 2], sizes = [4, 286], strides = [1, 1]} : vector<4x324xf32> to vector<4x286xf32>
    %582 = arith.maximumf %580, %581 : vector<4x286xf32>
    %583 = vector.extract_strided_slice %577 {offsets = [0, 18], sizes = [4, 286], strides = [1, 1]} : vector<4x324xf32> to vector<4x286xf32>
    %584 = arith.maximumf %582, %583 : vector<4x286xf32>
    %585 = vector.extract_strided_slice %577 {offsets = [0, 19], sizes = [4, 286], strides = [1, 1]} : vector<4x324xf32> to vector<4x286xf32>
    %586 = arith.maximumf %584, %585 : vector<4x286xf32>
    %587 = vector.extract_strided_slice %577 {offsets = [0, 20], sizes = [4, 286], strides = [1, 1]} : vector<4x324xf32> to vector<4x286xf32>
    %588 = arith.maximumf %586, %587 : vector<4x286xf32>
    %589 = vector.extract_strided_slice %577 {offsets = [0, 36], sizes = [4, 286], strides = [1, 1]} : vector<4x324xf32> to vector<4x286xf32>
    %590 = arith.maximumf %588, %589 : vector<4x286xf32>
    %591 = vector.extract_strided_slice %577 {offsets = [0, 37], sizes = [4, 286], strides = [1, 1]} : vector<4x324xf32> to vector<4x286xf32>
    %592 = arith.maximumf %590, %591 : vector<4x286xf32>
    %593 = vector.extract_strided_slice %577 {offsets = [0, 38], sizes = [4, 286], strides = [1, 1]} : vector<4x324xf32> to vector<4x286xf32>
    %594 = arith.maximumf %592, %593 : vector<4x286xf32>
    %c0_365 = arith.constant 0 : index
    %c0_366 = arith.constant 0 : index
    %595 = vector.load %arg6[%c0_365, %c0_366] : memref<286x100xf32, #tpu.memory_space<vmem>>, vector<286x100xf32>
    %cst_367 = arith.constant dense<0.000000e+00> : vector<4x100xf32>
    %596 = tpu.matmul %594, %595, %cst_367 {dimension_numbers = #tpu.dot_dimension_numbers<[1], [0], [0], [1], [0, 0, 1, 1], [], []>} : vector<4x286xf32>, vector<286x100xf32>, vector<4x100xf32> -> vector<4x100xf32>
    %c0_368 = arith.constant 0 : index
    %c0_369 = arith.constant 0 : index
    %597 = vector.load %arg5[%c0_368, %c0_369] : memref<8x4xf32, #tpu.memory_space<vmem>>, vector<8x4xf32>
    %cst_370 = arith.constant dense<0.000000e+00> : vector<8x100xf32>
    %598 = tpu.matmul %597, %596, %cst_370 {dimension_numbers = #tpu.dot_dimension_numbers<[1], [0], [0], [1], [0, 0, 1, 1], [], []>} : vector<8x4xf32>, vector<4x100xf32>, vector<8x100xf32> -> vector<8x100xf32>
    %c0_371 = arith.constant 0 : index
    %c8_372 = arith.constant 8 : index
    %c0_373 = arith.constant 0 : index
    %c0_374 = arith.constant 0 : index
    %599 = vector.load %arg7[%c0_371, %c8_372, %c0_373, %c0_374] : memref<1x10x8x100xf32, #tpu.memory_space<vmem>>, vector<1x1x8x100xf32>
    %600 = vector.shape_cast %599 : vector<1x1x8x100xf32> to vector<8x100xf32>
    %601 = vector.shape_cast %598 : vector<8x100xf32> to vector<1x1x8x100xf32>
    tpu.vector_store %arg7[%c0_371, %c8_372, %c0_373, %c0_374], %601 {strides = array<i32>} : memref<1x10x8x100xf32, #tpu.memory_space<vmem>>, vector<1x1x8x100xf32>,
    %cst_375 = arith.constant dense<0.000000e+00> : vector<8xf32>
    %602 = vector.multi_reduction <add>, %598, %cst_375 [1] : vector<8x100xf32> to vector<8xf32>
    %603 = vector.shape_cast %602 : vector<8xf32> to vector<8x1xf32>
    %604 = arith.addf %529, %603 : vector<8x1xf32>
    %605 = arith.mulf %598, %598 : vector<8x100xf32>
    %cst_376 = arith.constant dense<0.000000e+00> : vector<8xf32>
    %606 = vector.multi_reduction <add>, %605, %cst_376 [1] : vector<8x100xf32> to vector<8xf32>
    %607 = vector.shape_cast %606 : vector<8xf32> to vector<8x1xf32>
    %608 = arith.addf %533, %607 : vector<8x1xf32>
    %c0_377 = arith.constant 0 : index
    %c0_378 = arith.constant 0 : index
    %c0_379 = arith.constant 0 : index
    %609 = vector.load %arg8[%c0_377, %c0_378, %c0_379] : memref<1x8x1xf32, #tpu.memory_space<vmem>>, vector<1x8x1xf32>
    %610 = vector.shape_cast %609 : vector<1x8x1xf32> to vector<8x1xf32>
    %611 = vector.shape_cast %604 : vector<8x1xf32> to vector<1x8x1xf32>
    tpu.vector_store %arg8[%c0_377, %c0_378, %c0_379], %611 {strides = array<i32>} : memref<1x8x1xf32, #tpu.memory_space<vmem>>, vector<1x8x1xf32>,
    %c0_380 = arith.constant 0 : index
    %c0_381 = arith.constant 0 : index
    %c0_382 = arith.constant 0 : index
    %612 = vector.load %arg9[%c0_380, %c0_381, %c0_382] : memref<1x8x1xf32, #tpu.memory_space<vmem>>, vector<1x8x1xf32>
    %613 = vector.shape_cast %612 : vector<1x8x1xf32> to vector<8x1xf32>
    %614 = vector.shape_cast %608 : vector<8x1xf32> to vector<1x8x1xf32>
    tpu.vector_store %arg9[%c0_380, %c0_381, %c0_382], %614 {strides = array<i32>} : memref<1x8x1xf32, #tpu.memory_space<vmem>>, vector<1x8x1xf32>,
    return
  }
  func.func @transform_0(%arg0: i32) -> (i32, i32, i32, i32) {
    %c0_i32 = arith.constant 0 : i32
    %c0_i32_0 = arith.constant 0 : i32
    %c0_i32_1 = arith.constant 0 : i32
    %c0_i32_2 = arith.constant 0 : i32
    return %arg0, %c0_i32, %c0_i32_0, %c0_i32_1 : i32, i32, i32, i32
  }
  func.func @transform_1(%arg0: i32) -> (i32, i32, i32) {
    %c0_i32 = arith.constant 0 : i32
    %c0_i32_0 = arith.constant 0 : i32
    %c0_i32_1 = arith.constant 0 : i32
    %c0_i32_2 = arith.constant 0 : i32
    return %c0_i32, %c0_i32_0, %c0_i32_1 : i32, i32, i32
  }
  func.func @transform_2(%arg0: i32) -> (i32, i32) {
    %c0_i32 = arith.constant 0 : i32
    %c0_i32_0 = arith.constant 0 : i32
    %c0_i32_1 = arith.constant 0 : i32
    return %c0_i32, %c0_i32_0 : i32, i32
  }
  func.func @transform_3(%arg0: i32) -> (i32, i32) {
    %c0_i32 = arith.constant 0 : i32
    %c0_i32_0 = arith.constant 0 : i32
    %c0_i32_1 = arith.constant 0 : i32
    return %c0_i32, %c0_i32_0 : i32, i32
  }
  func.func @transform_4(%arg0: i32) -> (i32, i32) {
    %c0_i32 = arith.constant 0 : i32
    %c0_i32_0 = arith.constant 0 : i32
    %c0_i32_1 = arith.constant 0 : i32
    return %c0_i32, %c0_i32_0 : i32, i32
  }
  func.func @transform_5(%arg0: i32) -> (i32, i32) {
    %c0_i32 = arith.constant 0 : i32
    %c0_i32_0 = arith.constant 0 : i32
    %c0_i32_1 = arith.constant 0 : i32
    return %c0_i32, %c0_i32_0 : i32, i32
  }
  func.func @transform_6(%arg0: i32) -> (i32, i32, i32, i32) {
    %c0_i32 = arith.constant 0 : i32
    %c0_i32_0 = arith.constant 0 : i32
    %c0_i32_1 = arith.constant 0 : i32
    %c0_i32_2 = arith.constant 0 : i32
    return %arg0, %c0_i32, %c0_i32_0, %c0_i32_1 : i32, i32, i32, i32
  }
  func.func @transform_7(%arg0: i32) -> (i32, i32, i32) {
    %c0_i32 = arith.constant 0 : i32
    %c0_i32_0 = arith.constant 0 : i32
    %c0_i32_1 = arith.constant 0 : i32
    return %arg0, %c0_i32, %c0_i32_0 : i32, i32, i32
  }
  func.func @transform_8(%arg0: i32) -> (i32, i32, i32) {
    %c0_i32 = arith.constant 0 : i32
    %c0_i32_0 = arith.constant 0 : i32
    %c0_i32_1 = arith.constant 0 : i32
    return %arg0, %c0_i32, %c0_i32_0 : i32, i32, i32
  }
}

module attributes {stable_mosaic.version = 11 : i64} {
  func.func @_stage3_kernel(%arg0: i32, %arg1: memref<1x10x8x100xf32, #tpu.memory_space<vmem>>, %arg2: memref<10x1x100xf32, #tpu.memory_space<vmem>>, %arg3: memref<8x1xf32, #tpu.memory_space<vmem>>, %arg4: memref<8x1xf32, #tpu.memory_space<vmem>>, %arg5: memref<78x36xf32, #tpu.memory_space<vmem>>, %arg6: memref<8x216xf32, #tpu.memory_space<vmem>>, %arg7: memref<15x4xf32, #tpu.memory_space<vmem>>, %arg8: memref<1x2x8x4xf32, #tpu.memory_space<vmem>>) attributes {dimension_semantics = [#tpu.dimension_semantics<parallel>], iteration_bounds = array<i64: 2>, scalar_prefetch = 0 : i64, scratch_operands = 0 : i64, tpu.core_type = #tpu.core_type<tc>, window_params = [{transform_indices = @transform_0, window_bounds = array<i64: 1, 10, 8, 100>}, {pipeline_mode = #tpu.pipeline_mode<synchronous>, transform_indices = @transform_1, window_bounds = array<i64: 10, 1, 100>}, {pipeline_mode = #tpu.pipeline_mode<synchronous>, transform_indices = @transform_2, window_bounds = array<i64: 8, 1>}, {pipeline_mode = #tpu.pipeline_mode<synchronous>, transform_indices = @transform_3, window_bounds = array<i64: 8, 1>}, {pipeline_mode = #tpu.pipeline_mode<synchronous>, transform_indices = @transform_4, window_bounds = array<i64: 78, 36>}, {pipeline_mode = #tpu.pipeline_mode<synchronous>, transform_indices = @transform_5, window_bounds = array<i64: 8, 216>}, {pipeline_mode = #tpu.pipeline_mode<synchronous>, transform_indices = @transform_6, window_bounds = array<i64: 15, 4>}, {transform_indices = @transform_7, window_bounds = array<i64: 1, 2, 8, 4>}]} {
    %cst = arith.constant 0.000000e+00 : f32
    %0 = vector.broadcast %cst : f32 to vector<8x36xf32>
    %c0 = arith.constant 0 : index
    %c0_0 = arith.constant 0 : index
    %c0_1 = arith.constant 0 : index
    %c0_2 = arith.constant 0 : index
    %1 = vector.load %arg1[%c0, %c0_0, %c0_1, %c0_2] : memref<1x10x8x100xf32, #tpu.memory_space<vmem>>, vector<1x1x8x100xf32>
    %2 = vector.shape_cast %1 : vector<1x1x8x100xf32> to vector<8x100xf32>
    %c0_3 = arith.constant 0 : index
    %c0_4 = arith.constant 0 : index
    %3 = vector.load %arg3[%c0_3, %c0_4] : memref<8x1xf32, #tpu.memory_space<vmem>>, vector<8x1xf32>
    %4 = vector.broadcast %3 : vector<8x1xf32> to vector<8x100xf32>
    %5 = arith.mulf %2, %4 : vector<8x100xf32>
    %c0_5 = arith.constant 0 : index
    %c0_6 = arith.constant 0 : index
    %6 = vector.load %arg4[%c0_5, %c0_6] : memref<8x1xf32, #tpu.memory_space<vmem>>, vector<8x1xf32>
    %7 = vector.broadcast %6 : vector<8x1xf32> to vector<8x100xf32>
    %8 = arith.addf %5, %7 : vector<8x100xf32>
    %cst_7 = arith.constant 0.000000e+00 : f32
    %9 = vector.broadcast %cst_7 : f32 to vector<8x100xf32>
    %10 = arith.maximumf %8, %9 : vector<8x100xf32>
    %c0_8 = arith.constant 0 : index
    %c0_9 = arith.constant 0 : index
    %c0_10 = arith.constant 0 : index
    %11 = vector.load %arg2[%c0_8, %c0_9, %c0_10] : memref<10x1x100xf32, #tpu.memory_space<vmem>>, vector<1x1x100xf32>
    %12 = vector.shape_cast %11 : vector<1x1x100xf32> to vector<1x100xf32>
    %13 = vector.broadcast %12 : vector<1x100xf32> to vector<8x100xf32>
    %14 = arith.mulf %10, %13 : vector<8x100xf32>
    %c0_11 = arith.constant 0 : index
    %c1 = arith.constant 1 : index
    %c0_12 = arith.constant 0 : index
    %c0_13 = arith.constant 0 : index
    %15 = vector.load %arg1[%c0_11, %c1, %c0_12, %c0_13] : memref<1x10x8x100xf32, #tpu.memory_space<vmem>>, vector<1x1x8x100xf32>
    %16 = vector.shape_cast %15 : vector<1x1x8x100xf32> to vector<8x100xf32>
    %c0_14 = arith.constant 0 : index
    %c0_15 = arith.constant 0 : index
    %17 = vector.load %arg3[%c0_14, %c0_15] : memref<8x1xf32, #tpu.memory_space<vmem>>, vector<8x1xf32>
    %18 = vector.broadcast %17 : vector<8x1xf32> to vector<8x100xf32>
    %19 = arith.mulf %16, %18 : vector<8x100xf32>
    %c0_16 = arith.constant 0 : index
    %c0_17 = arith.constant 0 : index
    %20 = vector.load %arg4[%c0_16, %c0_17] : memref<8x1xf32, #tpu.memory_space<vmem>>, vector<8x1xf32>
    %21 = vector.broadcast %20 : vector<8x1xf32> to vector<8x100xf32>
    %22 = arith.addf %19, %21 : vector<8x100xf32>
    %cst_18 = arith.constant 0.000000e+00 : f32
    %23 = vector.broadcast %cst_18 : f32 to vector<8x100xf32>
    %24 = arith.maximumf %22, %23 : vector<8x100xf32>
    %c1_19 = arith.constant 1 : index
    %c0_20 = arith.constant 0 : index
    %c0_21 = arith.constant 0 : index
    %25 = vector.load %arg2[%c1_19, %c0_20, %c0_21] : memref<10x1x100xf32, #tpu.memory_space<vmem>>, vector<1x1x100xf32>
    %26 = vector.shape_cast %25 : vector<1x1x100xf32> to vector<1x100xf32>
    %27 = vector.broadcast %26 : vector<1x100xf32> to vector<8x100xf32>
    %28 = arith.mulf %24, %27 : vector<8x100xf32>
    %29 = arith.maximumf %14, %28 : vector<8x100xf32>
    %c0_22 = arith.constant 0 : index
    %c2 = arith.constant 2 : index
    %c0_23 = arith.constant 0 : index
    %c0_24 = arith.constant 0 : index
    %30 = vector.load %arg1[%c0_22, %c2, %c0_23, %c0_24] : memref<1x10x8x100xf32, #tpu.memory_space<vmem>>, vector<1x1x8x100xf32>
    %31 = vector.shape_cast %30 : vector<1x1x8x100xf32> to vector<8x100xf32>
    %c0_25 = arith.constant 0 : index
    %c0_26 = arith.constant 0 : index
    %32 = vector.load %arg3[%c0_25, %c0_26] : memref<8x1xf32, #tpu.memory_space<vmem>>, vector<8x1xf32>
    %33 = vector.broadcast %32 : vector<8x1xf32> to vector<8x100xf32>
    %34 = arith.mulf %31, %33 : vector<8x100xf32>
    %c0_27 = arith.constant 0 : index
    %c0_28 = arith.constant 0 : index
    %35 = vector.load %arg4[%c0_27, %c0_28] : memref<8x1xf32, #tpu.memory_space<vmem>>, vector<8x1xf32>
    %36 = vector.broadcast %35 : vector<8x1xf32> to vector<8x100xf32>
    %37 = arith.addf %34, %36 : vector<8x100xf32>
    %cst_29 = arith.constant 0.000000e+00 : f32
    %38 = vector.broadcast %cst_29 : f32 to vector<8x100xf32>
    %39 = arith.maximumf %37, %38 : vector<8x100xf32>
    %c2_30 = arith.constant 2 : index
    %c0_31 = arith.constant 0 : index
    %c0_32 = arith.constant 0 : index
    %40 = vector.load %arg2[%c2_30, %c0_31, %c0_32] : memref<10x1x100xf32, #tpu.memory_space<vmem>>, vector<1x1x100xf32>
    %41 = vector.shape_cast %40 : vector<1x1x100xf32> to vector<1x100xf32>
    %42 = vector.broadcast %41 : vector<1x100xf32> to vector<8x100xf32>
    %43 = arith.mulf %39, %42 : vector<8x100xf32>
    %44 = arith.maximumf %29, %43 : vector<8x100xf32>
    %45 = vector.extract_strided_slice %44 {offsets = [0, 0], sizes = [8, 78], strides = [1, 1]} : vector<8x100xf32> to vector<8x78xf32>
    %46 = vector.extract_strided_slice %44 {offsets = [0, 1], sizes = [8, 78], strides = [1, 1]} : vector<8x100xf32> to vector<8x78xf32>
    %47 = arith.maximumf %45, %46 : vector<8x78xf32>
    %48 = vector.extract_strided_slice %44 {offsets = [0, 2], sizes = [8, 78], strides = [1, 1]} : vector<8x100xf32> to vector<8x78xf32>
    %49 = arith.maximumf %47, %48 : vector<8x78xf32>
    %50 = vector.extract_strided_slice %44 {offsets = [0, 10], sizes = [8, 78], strides = [1, 1]} : vector<8x100xf32> to vector<8x78xf32>
    %51 = arith.maximumf %49, %50 : vector<8x78xf32>
    %52 = vector.extract_strided_slice %44 {offsets = [0, 11], sizes = [8, 78], strides = [1, 1]} : vector<8x100xf32> to vector<8x78xf32>
    %53 = arith.maximumf %51, %52 : vector<8x78xf32>
    %54 = vector.extract_strided_slice %44 {offsets = [0, 12], sizes = [8, 78], strides = [1, 1]} : vector<8x100xf32> to vector<8x78xf32>
    %55 = arith.maximumf %53, %54 : vector<8x78xf32>
    %56 = vector.extract_strided_slice %44 {offsets = [0, 20], sizes = [8, 78], strides = [1, 1]} : vector<8x100xf32> to vector<8x78xf32>
    %57 = arith.maximumf %55, %56 : vector<8x78xf32>
    %58 = vector.extract_strided_slice %44 {offsets = [0, 21], sizes = [8, 78], strides = [1, 1]} : vector<8x100xf32> to vector<8x78xf32>
    %59 = arith.maximumf %57, %58 : vector<8x78xf32>
    %60 = vector.extract_strided_slice %44 {offsets = [0, 22], sizes = [8, 78], strides = [1, 1]} : vector<8x100xf32> to vector<8x78xf32>
    %61 = arith.maximumf %59, %60 : vector<8x78xf32>
    %c0_33 = arith.constant 0 : index
    %c0_34 = arith.constant 0 : index
    %62 = vector.load %arg5[%c0_33, %c0_34] : memref<78x36xf32, #tpu.memory_space<vmem>>, vector<78x36xf32>
    %cst_35 = arith.constant dense<0.000000e+00> : vector<8x36xf32>
    %63 = tpu.matmul %61, %62, %cst_35 {dimension_numbers = #tpu.dot_dimension_numbers<[1], [0], [0], [1], [0, 0, 1, 1], [], []>} : vector<8x78xf32>, vector<78x36xf32>, vector<8x36xf32> -> vector<8x36xf32>
    %c0_36 = arith.constant 0 : index
    %c2_37 = arith.constant 2 : index
    %c0_38 = arith.constant 0 : index
    %c0_39 = arith.constant 0 : index
    %64 = vector.load %arg1[%c0_36, %c2_37, %c0_38, %c0_39] : memref<1x10x8x100xf32, #tpu.memory_space<vmem>>, vector<1x1x8x100xf32>
    %65 = vector.shape_cast %64 : vector<1x1x8x100xf32> to vector<8x100xf32>
    %c0_40 = arith.constant 0 : index
    %c0_41 = arith.constant 0 : index
    %66 = vector.load %arg3[%c0_40, %c0_41] : memref<8x1xf32, #tpu.memory_space<vmem>>, vector<8x1xf32>
    %67 = vector.broadcast %66 : vector<8x1xf32> to vector<8x100xf32>
    %68 = arith.mulf %65, %67 : vector<8x100xf32>
    %c0_42 = arith.constant 0 : index
    %c0_43 = arith.constant 0 : index
    %69 = vector.load %arg4[%c0_42, %c0_43] : memref<8x1xf32, #tpu.memory_space<vmem>>, vector<8x1xf32>
    %70 = vector.broadcast %69 : vector<8x1xf32> to vector<8x100xf32>
    %71 = arith.addf %68, %70 : vector<8x100xf32>
    %cst_44 = arith.constant 0.000000e+00 : f32
    %72 = vector.broadcast %cst_44 : f32 to vector<8x100xf32>
    %73 = arith.maximumf %71, %72 : vector<8x100xf32>
    %c2_45 = arith.constant 2 : index
    %c0_46 = arith.constant 0 : index
    %c0_47 = arith.constant 0 : index
    %74 = vector.load %arg2[%c2_45, %c0_46, %c0_47] : memref<10x1x100xf32, #tpu.memory_space<vmem>>, vector<1x1x100xf32>
    %75 = vector.shape_cast %74 : vector<1x1x100xf32> to vector<1x100xf32>
    %76 = vector.broadcast %75 : vector<1x100xf32> to vector<8x100xf32>
    %77 = arith.mulf %73, %76 : vector<8x100xf32>
    %c0_48 = arith.constant 0 : index
    %c3 = arith.constant 3 : index
    %c0_49 = arith.constant 0 : index
    %c0_50 = arith.constant 0 : index
    %78 = vector.load %arg1[%c0_48, %c3, %c0_49, %c0_50] : memref<1x10x8x100xf32, #tpu.memory_space<vmem>>, vector<1x1x8x100xf32>
    %79 = vector.shape_cast %78 : vector<1x1x8x100xf32> to vector<8x100xf32>
    %c0_51 = arith.constant 0 : index
    %c0_52 = arith.constant 0 : index
    %80 = vector.load %arg3[%c0_51, %c0_52] : memref<8x1xf32, #tpu.memory_space<vmem>>, vector<8x1xf32>
    %81 = vector.broadcast %80 : vector<8x1xf32> to vector<8x100xf32>
    %82 = arith.mulf %79, %81 : vector<8x100xf32>
    %c0_53 = arith.constant 0 : index
    %c0_54 = arith.constant 0 : index
    %83 = vector.load %arg4[%c0_53, %c0_54] : memref<8x1xf32, #tpu.memory_space<vmem>>, vector<8x1xf32>
    %84 = vector.broadcast %83 : vector<8x1xf32> to vector<8x100xf32>
    %85 = arith.addf %82, %84 : vector<8x100xf32>
    %cst_55 = arith.constant 0.000000e+00 : f32
    %86 = vector.broadcast %cst_55 : f32 to vector<8x100xf32>
    %87 = arith.maximumf %85, %86 : vector<8x100xf32>
    %c3_56 = arith.constant 3 : index
    %c0_57 = arith.constant 0 : index
    %c0_58 = arith.constant 0 : index
    %88 = vector.load %arg2[%c3_56, %c0_57, %c0_58] : memref<10x1x100xf32, #tpu.memory_space<vmem>>, vector<1x1x100xf32>
    %89 = vector.shape_cast %88 : vector<1x1x100xf32> to vector<1x100xf32>
    %90 = vector.broadcast %89 : vector<1x100xf32> to vector<8x100xf32>
    %91 = arith.mulf %87, %90 : vector<8x100xf32>
    %92 = arith.maximumf %77, %91 : vector<8x100xf32>
    %c0_59 = arith.constant 0 : index
    %c4 = arith.constant 4 : index
    %c0_60 = arith.constant 0 : index
    %c0_61 = arith.constant 0 : index
    %93 = vector.load %arg1[%c0_59, %c4, %c0_60, %c0_61] : memref<1x10x8x100xf32, #tpu.memory_space<vmem>>, vector<1x1x8x100xf32>
    %94 = vector.shape_cast %93 : vector<1x1x8x100xf32> to vector<8x100xf32>
    %c0_62 = arith.constant 0 : index
    %c0_63 = arith.constant 0 : index
    %95 = vector.load %arg3[%c0_62, %c0_63] : memref<8x1xf32, #tpu.memory_space<vmem>>, vector<8x1xf32>
    %96 = vector.broadcast %95 : vector<8x1xf32> to vector<8x100xf32>
    %97 = arith.mulf %94, %96 : vector<8x100xf32>
    %c0_64 = arith.constant 0 : index
    %c0_65 = arith.constant 0 : index
    %98 = vector.load %arg4[%c0_64, %c0_65] : memref<8x1xf32, #tpu.memory_space<vmem>>, vector<8x1xf32>
    %99 = vector.broadcast %98 : vector<8x1xf32> to vector<8x100xf32>
    %100 = arith.addf %97, %99 : vector<8x100xf32>
    %cst_66 = arith.constant 0.000000e+00 : f32
    %101 = vector.broadcast %cst_66 : f32 to vector<8x100xf32>
    %102 = arith.maximumf %100, %101 : vector<8x100xf32>
    %c4_67 = arith.constant 4 : index
    %c0_68 = arith.constant 0 : index
    %c0_69 = arith.constant 0 : index
    %103 = vector.load %arg2[%c4_67, %c0_68, %c0_69] : memref<10x1x100xf32, #tpu.memory_space<vmem>>, vector<1x1x100xf32>
    %104 = vector.shape_cast %103 : vector<1x1x100xf32> to vector<1x100xf32>
    %105 = vector.broadcast %104 : vector<1x100xf32> to vector<8x100xf32>
    %106 = arith.mulf %102, %105 : vector<8x100xf32>
    %107 = arith.maximumf %92, %106 : vector<8x100xf32>
    %108 = vector.extract_strided_slice %107 {offsets = [0, 0], sizes = [8, 78], strides = [1, 1]} : vector<8x100xf32> to vector<8x78xf32>
    %109 = vector.extract_strided_slice %107 {offsets = [0, 1], sizes = [8, 78], strides = [1, 1]} : vector<8x100xf32> to vector<8x78xf32>
    %110 = arith.maximumf %108, %109 : vector<8x78xf32>
    %111 = vector.extract_strided_slice %107 {offsets = [0, 2], sizes = [8, 78], strides = [1, 1]} : vector<8x100xf32> to vector<8x78xf32>
    %112 = arith.maximumf %110, %111 : vector<8x78xf32>
    %113 = vector.extract_strided_slice %107 {offsets = [0, 10], sizes = [8, 78], strides = [1, 1]} : vector<8x100xf32> to vector<8x78xf32>
    %114 = arith.maximumf %112, %113 : vector<8x78xf32>
    %115 = vector.extract_strided_slice %107 {offsets = [0, 11], sizes = [8, 78], strides = [1, 1]} : vector<8x100xf32> to vector<8x78xf32>
    %116 = arith.maximumf %114, %115 : vector<8x78xf32>
    %117 = vector.extract_strided_slice %107 {offsets = [0, 12], sizes = [8, 78], strides = [1, 1]} : vector<8x100xf32> to vector<8x78xf32>
    %118 = arith.maximumf %116, %117 : vector<8x78xf32>
    %119 = vector.extract_strided_slice %107 {offsets = [0, 20], sizes = [8, 78], strides = [1, 1]} : vector<8x100xf32> to vector<8x78xf32>
    %120 = arith.maximumf %118, %119 : vector<8x78xf32>
    %121 = vector.extract_strided_slice %107 {offsets = [0, 21], sizes = [8, 78], strides = [1, 1]} : vector<8x100xf32> to vector<8x78xf32>
    %122 = arith.maximumf %120, %121 : vector<8x78xf32>
    %123 = vector.extract_strided_slice %107 {offsets = [0, 22], sizes = [8, 78], strides = [1, 1]} : vector<8x100xf32> to vector<8x78xf32>
    %124 = arith.maximumf %122, %123 : vector<8x78xf32>
    %c0_70 = arith.constant 0 : index
    %c0_71 = arith.constant 0 : index
    %125 = vector.load %arg5[%c0_70, %c0_71] : memref<78x36xf32, #tpu.memory_space<vmem>>, vector<78x36xf32>
    %cst_72 = arith.constant dense<0.000000e+00> : vector<8x36xf32>
    %126 = tpu.matmul %124, %125, %cst_72 {dimension_numbers = #tpu.dot_dimension_numbers<[1], [0], [0], [1], [0, 0, 1, 1], [], []>} : vector<8x78xf32>, vector<78x36xf32>, vector<8x36xf32> -> vector<8x36xf32>
    %c0_73 = arith.constant 0 : index
    %c4_74 = arith.constant 4 : index
    %c0_75 = arith.constant 0 : index
    %c0_76 = arith.constant 0 : index
    %127 = vector.load %arg1[%c0_73, %c4_74, %c0_75, %c0_76] : memref<1x10x8x100xf32, #tpu.memory_space<vmem>>, vector<1x1x8x100xf32>
    %128 = vector.shape_cast %127 : vector<1x1x8x100xf32> to vector<8x100xf32>
    %c0_77 = arith.constant 0 : index
    %c0_78 = arith.constant 0 : index
    %129 = vector.load %arg3[%c0_77, %c0_78] : memref<8x1xf32, #tpu.memory_space<vmem>>, vector<8x1xf32>
    %130 = vector.broadcast %129 : vector<8x1xf32> to vector<8x100xf32>
    %131 = arith.mulf %128, %130 : vector<8x100xf32>
    %c0_79 = arith.constant 0 : index
    %c0_80 = arith.constant 0 : index
    %132 = vector.load %arg4[%c0_79, %c0_80] : memref<8x1xf32, #tpu.memory_space<vmem>>, vector<8x1xf32>
    %133 = vector.broadcast %132 : vector<8x1xf32> to vector<8x100xf32>
    %134 = arith.addf %131, %133 : vector<8x100xf32>
    %cst_81 = arith.constant 0.000000e+00 : f32
    %135 = vector.broadcast %cst_81 : f32 to vector<8x100xf32>
    %136 = arith.maximumf %134, %135 : vector<8x100xf32>
    %c4_82 = arith.constant 4 : index
    %c0_83 = arith.constant 0 : index
    %c0_84 = arith.constant 0 : index
    %137 = vector.load %arg2[%c4_82, %c0_83, %c0_84] : memref<10x1x100xf32, #tpu.memory_space<vmem>>, vector<1x1x100xf32>
    %138 = vector.shape_cast %137 : vector<1x1x100xf32> to vector<1x100xf32>
    %139 = vector.broadcast %138 : vector<1x100xf32> to vector<8x100xf32>
    %140 = arith.mulf %136, %139 : vector<8x100xf32>
    %c0_85 = arith.constant 0 : index
    %c5 = arith.constant 5 : index
    %c0_86 = arith.constant 0 : index
    %c0_87 = arith.constant 0 : index
    %141 = vector.load %arg1[%c0_85, %c5, %c0_86, %c0_87] : memref<1x10x8x100xf32, #tpu.memory_space<vmem>>, vector<1x1x8x100xf32>
    %142 = vector.shape_cast %141 : vector<1x1x8x100xf32> to vector<8x100xf32>
    %c0_88 = arith.constant 0 : index
    %c0_89 = arith.constant 0 : index
    %143 = vector.load %arg3[%c0_88, %c0_89] : memref<8x1xf32, #tpu.memory_space<vmem>>, vector<8x1xf32>
    %144 = vector.broadcast %143 : vector<8x1xf32> to vector<8x100xf32>
    %145 = arith.mulf %142, %144 : vector<8x100xf32>
    %c0_90 = arith.constant 0 : index
    %c0_91 = arith.constant 0 : index
    %146 = vector.load %arg4[%c0_90, %c0_91] : memref<8x1xf32, #tpu.memory_space<vmem>>, vector<8x1xf32>
    %147 = vector.broadcast %146 : vector<8x1xf32> to vector<8x100xf32>
    %148 = arith.addf %145, %147 : vector<8x100xf32>
    %cst_92 = arith.constant 0.000000e+00 : f32
    %149 = vector.broadcast %cst_92 : f32 to vector<8x100xf32>
    %150 = arith.maximumf %148, %149 : vector<8x100xf32>
    %c5_93 = arith.constant 5 : index
    %c0_94 = arith.constant 0 : index
    %c0_95 = arith.constant 0 : index
    %151 = vector.load %arg2[%c5_93, %c0_94, %c0_95] : memref<10x1x100xf32, #tpu.memory_space<vmem>>, vector<1x1x100xf32>
    %152 = vector.shape_cast %151 : vector<1x1x100xf32> to vector<1x100xf32>
    %153 = vector.broadcast %152 : vector<1x100xf32> to vector<8x100xf32>
    %154 = arith.mulf %150, %153 : vector<8x100xf32>
    %155 = arith.maximumf %140, %154 : vector<8x100xf32>
    %c0_96 = arith.constant 0 : index
    %c6 = arith.constant 6 : index
    %c0_97 = arith.constant 0 : index
    %c0_98 = arith.constant 0 : index
    %156 = vector.load %arg1[%c0_96, %c6, %c0_97, %c0_98] : memref<1x10x8x100xf32, #tpu.memory_space<vmem>>, vector<1x1x8x100xf32>
    %157 = vector.shape_cast %156 : vector<1x1x8x100xf32> to vector<8x100xf32>
    %c0_99 = arith.constant 0 : index
    %c0_100 = arith.constant 0 : index
    %158 = vector.load %arg3[%c0_99, %c0_100] : memref<8x1xf32, #tpu.memory_space<vmem>>, vector<8x1xf32>
    %159 = vector.broadcast %158 : vector<8x1xf32> to vector<8x100xf32>
    %160 = arith.mulf %157, %159 : vector<8x100xf32>
    %c0_101 = arith.constant 0 : index
    %c0_102 = arith.constant 0 : index
    %161 = vector.load %arg4[%c0_101, %c0_102] : memref<8x1xf32, #tpu.memory_space<vmem>>, vector<8x1xf32>
    %162 = vector.broadcast %161 : vector<8x1xf32> to vector<8x100xf32>
    %163 = arith.addf %160, %162 : vector<8x100xf32>
    %cst_103 = arith.constant 0.000000e+00 : f32
    %164 = vector.broadcast %cst_103 : f32 to vector<8x100xf32>
    %165 = arith.maximumf %163, %164 : vector<8x100xf32>
    %c6_104 = arith.constant 6 : index
    %c0_105 = arith.constant 0 : index
    %c0_106 = arith.constant 0 : index
    %166 = vector.load %arg2[%c6_104, %c0_105, %c0_106] : memref<10x1x100xf32, #tpu.memory_space<vmem>>, vector<1x1x100xf32>
    %167 = vector.shape_cast %166 : vector<1x1x100xf32> to vector<1x100xf32>
    %168 = vector.broadcast %167 : vector<1x100xf32> to vector<8x100xf32>
    %169 = arith.mulf %165, %168 : vector<8x100xf32>
    %170 = arith.maximumf %155, %169 : vector<8x100xf32>
    %171 = vector.extract_strided_slice %170 {offsets = [0, 0], sizes = [8, 78], strides = [1, 1]} : vector<8x100xf32> to vector<8x78xf32>
    %172 = vector.extract_strided_slice %170 {offsets = [0, 1], sizes = [8, 78], strides = [1, 1]} : vector<8x100xf32> to vector<8x78xf32>
    %173 = arith.maximumf %171, %172 : vector<8x78xf32>
    %174 = vector.extract_strided_slice %170 {offsets = [0, 2], sizes = [8, 78], strides = [1, 1]} : vector<8x100xf32> to vector<8x78xf32>
    %175 = arith.maximumf %173, %174 : vector<8x78xf32>
    %176 = vector.extract_strided_slice %170 {offsets = [0, 10], sizes = [8, 78], strides = [1, 1]} : vector<8x100xf32> to vector<8x78xf32>
    %177 = arith.maximumf %175, %176 : vector<8x78xf32>
    %178 = vector.extract_strided_slice %170 {offsets = [0, 11], sizes = [8, 78], strides = [1, 1]} : vector<8x100xf32> to vector<8x78xf32>
    %179 = arith.maximumf %177, %178 : vector<8x78xf32>
    %180 = vector.extract_strided_slice %170 {offsets = [0, 12], sizes = [8, 78], strides = [1, 1]} : vector<8x100xf32> to vector<8x78xf32>
    %181 = arith.maximumf %179, %180 : vector<8x78xf32>
    %182 = vector.extract_strided_slice %170 {offsets = [0, 20], sizes = [8, 78], strides = [1, 1]} : vector<8x100xf32> to vector<8x78xf32>
    %183 = arith.maximumf %181, %182 : vector<8x78xf32>
    %184 = vector.extract_strided_slice %170 {offsets = [0, 21], sizes = [8, 78], strides = [1, 1]} : vector<8x100xf32> to vector<8x78xf32>
    %185 = arith.maximumf %183, %184 : vector<8x78xf32>
    %186 = vector.extract_strided_slice %170 {offsets = [0, 22], sizes = [8, 78], strides = [1, 1]} : vector<8x100xf32> to vector<8x78xf32>
    %187 = arith.maximumf %185, %186 : vector<8x78xf32>
    %c0_107 = arith.constant 0 : index
    %c0_108 = arith.constant 0 : index
    %188 = vector.load %arg5[%c0_107, %c0_108] : memref<78x36xf32, #tpu.memory_space<vmem>>, vector<78x36xf32>
    %cst_109 = arith.constant dense<0.000000e+00> : vector<8x36xf32>
    %189 = tpu.matmul %187, %188, %cst_109 {dimension_numbers = #tpu.dot_dimension_numbers<[1], [0], [0], [1], [0, 0, 1, 1], [], []>} : vector<8x78xf32>, vector<78x36xf32>, vector<8x36xf32> -> vector<8x36xf32>
    %c0_110 = arith.constant 0 : index
    %c6_111 = arith.constant 6 : index
    %c0_112 = arith.constant 0 : index
    %c0_113 = arith.constant 0 : index
    %190 = vector.load %arg1[%c0_110, %c6_111, %c0_112, %c0_113] : memref<1x10x8x100xf32, #tpu.memory_space<vmem>>, vector<1x1x8x100xf32>
    %191 = vector.shape_cast %190 : vector<1x1x8x100xf32> to vector<8x100xf32>
    %c0_114 = arith.constant 0 : index
    %c0_115 = arith.constant 0 : index
    %192 = vector.load %arg3[%c0_114, %c0_115] : memref<8x1xf32, #tpu.memory_space<vmem>>, vector<8x1xf32>
    %193 = vector.broadcast %192 : vector<8x1xf32> to vector<8x100xf32>
    %194 = arith.mulf %191, %193 : vector<8x100xf32>
    %c0_116 = arith.constant 0 : index
    %c0_117 = arith.constant 0 : index
    %195 = vector.load %arg4[%c0_116, %c0_117] : memref<8x1xf32, #tpu.memory_space<vmem>>, vector<8x1xf32>
    %196 = vector.broadcast %195 : vector<8x1xf32> to vector<8x100xf32>
    %197 = arith.addf %194, %196 : vector<8x100xf32>
    %cst_118 = arith.constant 0.000000e+00 : f32
    %198 = vector.broadcast %cst_118 : f32 to vector<8x100xf32>
    %199 = arith.maximumf %197, %198 : vector<8x100xf32>
    %c6_119 = arith.constant 6 : index
    %c0_120 = arith.constant 0 : index
    %c0_121 = arith.constant 0 : index
    %200 = vector.load %arg2[%c6_119, %c0_120, %c0_121] : memref<10x1x100xf32, #tpu.memory_space<vmem>>, vector<1x1x100xf32>
    %201 = vector.shape_cast %200 : vector<1x1x100xf32> to vector<1x100xf32>
    %202 = vector.broadcast %201 : vector<1x100xf32> to vector<8x100xf32>
    %203 = arith.mulf %199, %202 : vector<8x100xf32>
    %c0_122 = arith.constant 0 : index
    %c7 = arith.constant 7 : index
    %c0_123 = arith.constant 0 : index
    %c0_124 = arith.constant 0 : index
    %204 = vector.load %arg1[%c0_122, %c7, %c0_123, %c0_124] : memref<1x10x8x100xf32, #tpu.memory_space<vmem>>, vector<1x1x8x100xf32>
    %205 = vector.shape_cast %204 : vector<1x1x8x100xf32> to vector<8x100xf32>
    %c0_125 = arith.constant 0 : index
    %c0_126 = arith.constant 0 : index
    %206 = vector.load %arg3[%c0_125, %c0_126] : memref<8x1xf32, #tpu.memory_space<vmem>>, vector<8x1xf32>
    %207 = vector.broadcast %206 : vector<8x1xf32> to vector<8x100xf32>
    %208 = arith.mulf %205, %207 : vector<8x100xf32>
    %c0_127 = arith.constant 0 : index
    %c0_128 = arith.constant 0 : index
    %209 = vector.load %arg4[%c0_127, %c0_128] : memref<8x1xf32, #tpu.memory_space<vmem>>, vector<8x1xf32>
    %210 = vector.broadcast %209 : vector<8x1xf32> to vector<8x100xf32>
    %211 = arith.addf %208, %210 : vector<8x100xf32>
    %cst_129 = arith.constant 0.000000e+00 : f32
    %212 = vector.broadcast %cst_129 : f32 to vector<8x100xf32>
    %213 = arith.maximumf %211, %212 : vector<8x100xf32>
    %c7_130 = arith.constant 7 : index
    %c0_131 = arith.constant 0 : index
    %c0_132 = arith.constant 0 : index
    %214 = vector.load %arg2[%c7_130, %c0_131, %c0_132] : memref<10x1x100xf32, #tpu.memory_space<vmem>>, vector<1x1x100xf32>
    %215 = vector.shape_cast %214 : vector<1x1x100xf32> to vector<1x100xf32>
    %216 = vector.broadcast %215 : vector<1x100xf32> to vector<8x100xf32>
    %217 = arith.mulf %213, %216 : vector<8x100xf32>
    %218 = arith.maximumf %203, %217 : vector<8x100xf32>
    %c0_133 = arith.constant 0 : index
    %c8 = arith.constant 8 : index
    %c0_134 = arith.constant 0 : index
    %c0_135 = arith.constant 0 : index
    %219 = vector.load %arg1[%c0_133, %c8, %c0_134, %c0_135] : memref<1x10x8x100xf32, #tpu.memory_space<vmem>>, vector<1x1x8x100xf32>
    %220 = vector.shape_cast %219 : vector<1x1x8x100xf32> to vector<8x100xf32>
    %c0_136 = arith.constant 0 : index
    %c0_137 = arith.constant 0 : index
    %221 = vector.load %arg3[%c0_136, %c0_137] : memref<8x1xf32, #tpu.memory_space<vmem>>, vector<8x1xf32>
    %222 = vector.broadcast %221 : vector<8x1xf32> to vector<8x100xf32>
    %223 = arith.mulf %220, %222 : vector<8x100xf32>
    %c0_138 = arith.constant 0 : index
    %c0_139 = arith.constant 0 : index
    %224 = vector.load %arg4[%c0_138, %c0_139] : memref<8x1xf32, #tpu.memory_space<vmem>>, vector<8x1xf32>
    %225 = vector.broadcast %224 : vector<8x1xf32> to vector<8x100xf32>
    %226 = arith.addf %223, %225 : vector<8x100xf32>
    %cst_140 = arith.constant 0.000000e+00 : f32
    %227 = vector.broadcast %cst_140 : f32 to vector<8x100xf32>
    %228 = arith.maximumf %226, %227 : vector<8x100xf32>
    %c8_141 = arith.constant 8 : index
    %c0_142 = arith.constant 0 : index
    %c0_143 = arith.constant 0 : index
    %229 = vector.load %arg2[%c8_141, %c0_142, %c0_143] : memref<10x1x100xf32, #tpu.memory_space<vmem>>, vector<1x1x100xf32>
    %230 = vector.shape_cast %229 : vector<1x1x100xf32> to vector<1x100xf32>
    %231 = vector.broadcast %230 : vector<1x100xf32> to vector<8x100xf32>
    %232 = arith.mulf %228, %231 : vector<8x100xf32>
    %233 = arith.maximumf %218, %232 : vector<8x100xf32>
    %234 = vector.extract_strided_slice %233 {offsets = [0, 0], sizes = [8, 78], strides = [1, 1]} : vector<8x100xf32> to vector<8x78xf32>
    %235 = vector.extract_strided_slice %233 {offsets = [0, 1], sizes = [8, 78], strides = [1, 1]} : vector<8x100xf32> to vector<8x78xf32>
    %236 = arith.maximumf %234, %235 : vector<8x78xf32>
    %237 = vector.extract_strided_slice %233 {offsets = [0, 2], sizes = [8, 78], strides = [1, 1]} : vector<8x100xf32> to vector<8x78xf32>
    %238 = arith.maximumf %236, %237 : vector<8x78xf32>
    %239 = vector.extract_strided_slice %233 {offsets = [0, 10], sizes = [8, 78], strides = [1, 1]} : vector<8x100xf32> to vector<8x78xf32>
    %240 = arith.maximumf %238, %239 : vector<8x78xf32>
    %241 = vector.extract_strided_slice %233 {offsets = [0, 11], sizes = [8, 78], strides = [1, 1]} : vector<8x100xf32> to vector<8x78xf32>
    %242 = arith.maximumf %240, %241 : vector<8x78xf32>
    %243 = vector.extract_strided_slice %233 {offsets = [0, 12], sizes = [8, 78], strides = [1, 1]} : vector<8x100xf32> to vector<8x78xf32>
    %244 = arith.maximumf %242, %243 : vector<8x78xf32>
    %245 = vector.extract_strided_slice %233 {offsets = [0, 20], sizes = [8, 78], strides = [1, 1]} : vector<8x100xf32> to vector<8x78xf32>
    %246 = arith.maximumf %244, %245 : vector<8x78xf32>
    %247 = vector.extract_strided_slice %233 {offsets = [0, 21], sizes = [8, 78], strides = [1, 1]} : vector<8x100xf32> to vector<8x78xf32>
    %248 = arith.maximumf %246, %247 : vector<8x78xf32>
    %249 = vector.extract_strided_slice %233 {offsets = [0, 22], sizes = [8, 78], strides = [1, 1]} : vector<8x100xf32> to vector<8x78xf32>
    %250 = arith.maximumf %248, %249 : vector<8x78xf32>
    %c0_144 = arith.constant 0 : index
    %c0_145 = arith.constant 0 : index
    %251 = vector.load %arg5[%c0_144, %c0_145] : memref<78x36xf32, #tpu.memory_space<vmem>>, vector<78x36xf32>
    %cst_146 = arith.constant dense<0.000000e+00> : vector<8x36xf32>
    %252 = tpu.matmul %250, %251, %cst_146 {dimension_numbers = #tpu.dot_dimension_numbers<[1], [0], [0], [1], [0, 0, 1, 1], [], []>} : vector<8x78xf32>, vector<78x36xf32>, vector<8x36xf32> -> vector<8x36xf32>
    %253 = tpu.concatenate %0, %63, %126 in 0 : vector<8x36xf32>, vector<8x36xf32>, vector<8x36xf32> -> vector<24x36xf32>
    %254 = vector.extract_strided_slice %253 {offsets = [0, 0], sizes = [24, 22], strides = [1, 1]} : vector<24x36xf32> to vector<24x22xf32>
    %255 = vector.extract_strided_slice %253 {offsets = [0, 1], sizes = [24, 22], strides = [1, 1]} : vector<24x36xf32> to vector<24x22xf32>
    %256 = vector.extract_strided_slice %253 {offsets = [0, 2], sizes = [24, 22], strides = [1, 1]} : vector<24x36xf32> to vector<24x22xf32>
    %257 = vector.extract_strided_slice %253 {offsets = [0, 6], sizes = [24, 22], strides = [1, 1]} : vector<24x36xf32> to vector<24x22xf32>
    %258 = vector.extract_strided_slice %253 {offsets = [0, 7], sizes = [24, 22], strides = [1, 1]} : vector<24x36xf32> to vector<24x22xf32>
    %259 = vector.extract_strided_slice %253 {offsets = [0, 8], sizes = [24, 22], strides = [1, 1]} : vector<24x36xf32> to vector<24x22xf32>
    %260 = vector.extract_strided_slice %253 {offsets = [0, 12], sizes = [24, 22], strides = [1, 1]} : vector<24x36xf32> to vector<24x22xf32>
    %261 = vector.extract_strided_slice %253 {offsets = [0, 13], sizes = [24, 22], strides = [1, 1]} : vector<24x36xf32> to vector<24x22xf32>
    %262 = vector.extract_strided_slice %253 {offsets = [0, 14], sizes = [24, 22], strides = [1, 1]} : vector<24x36xf32> to vector<24x22xf32>
    %263 = tpu.concatenate %254, %255, %256, %257, %258, %259, %260, %261, %262 in 0 : vector<24x22xf32>, vector<24x22xf32>, vector<24x22xf32>, vector<24x22xf32>, vector<24x22xf32>, vector<24x22xf32>, vector<24x22xf32>, vector<24x22xf32>, vector<24x22xf32> -> vector<216x22xf32>
    %c0_147 = arith.constant 0 : index
    %c0_148 = arith.constant 0 : index
    %264 = vector.load %arg6[%c0_147, %c0_148] : memref<8x216xf32, #tpu.memory_space<vmem>>, vector<8x216xf32>
    %cst_149 = arith.constant dense<0.000000e+00> : vector<8x22xf32>
    %265 = tpu.matmul %264, %263, %cst_149 {dimension_numbers = #tpu.dot_dimension_numbers<[1], [0], [0], [1], [0, 0, 1, 1], [], []>} : vector<8x216xf32>, vector<216x22xf32>, vector<8x22xf32> -> vector<8x22xf32>
    %cst_150 = arith.constant 0.000000e+00 : f32
    %266 = vector.broadcast %cst_150 : f32 to vector<8x22xf32>
    %267 = arith.maximumf %265, %266 : vector<8x22xf32>
    %268 = tpu.concatenate %63, %126, %189 in 0 : vector<8x36xf32>, vector<8x36xf32>, vector<8x36xf32> -> vector<24x36xf32>
    %269 = vector.extract_strided_slice %268 {offsets = [0, 0], sizes = [24, 22], strides = [1, 1]} : vector<24x36xf32> to vector<24x22xf32>
    %270 = vector.extract_strided_slice %268 {offsets = [0, 1], sizes = [24, 22], strides = [1, 1]} : vector<24x36xf32> to vector<24x22xf32>
    %271 = vector.extract_strided_slice %268 {offsets = [0, 2], sizes = [24, 22], strides = [1, 1]} : vector<24x36xf32> to vector<24x22xf32>
    %272 = vector.extract_strided_slice %268 {offsets = [0, 6], sizes = [24, 22], strides = [1, 1]} : vector<24x36xf32> to vector<24x22xf32>
    %273 = vector.extract_strided_slice %268 {offsets = [0, 7], sizes = [24, 22], strides = [1, 1]} : vector<24x36xf32> to vector<24x22xf32>
    %274 = vector.extract_strided_slice %268 {offsets = [0, 8], sizes = [24, 22], strides = [1, 1]} : vector<24x36xf32> to vector<24x22xf32>
    %275 = vector.extract_strided_slice %268 {offsets = [0, 12], sizes = [24, 22], strides = [1, 1]} : vector<24x36xf32> to vector<24x22xf32>
    %276 = vector.extract_strided_slice %268 {offsets = [0, 13], sizes = [24, 22], strides = [1, 1]} : vector<24x36xf32> to vector<24x22xf32>
    %277 = vector.extract_strided_slice %268 {offsets = [0, 14], sizes = [24, 22], strides = [1, 1]} : vector<24x36xf32> to vector<24x22xf32>
    %278 = tpu.concatenate %269, %270, %271, %272, %273, %274, %275, %276, %277 in 0 : vector<24x22xf32>, vector<24x22xf32>, vector<24x22xf32>, vector<24x22xf32>, vector<24x22xf32>, vector<24x22xf32>, vector<24x22xf32>, vector<24x22xf32>, vector<24x22xf32> -> vector<216x22xf32>
    %c0_151 = arith.constant 0 : index
    %c0_152 = arith.constant 0 : index
    %279 = vector.load %arg6[%c0_151, %c0_152] : memref<8x216xf32, #tpu.memory_space<vmem>>, vector<8x216xf32>
    %cst_153 = arith.constant dense<0.000000e+00> : vector<8x22xf32>
    %280 = tpu.matmul %279, %278, %cst_153 {dimension_numbers = #tpu.dot_dimension_numbers<[1], [0], [0], [1], [0, 0, 1, 1], [], []>} : vector<8x216xf32>, vector<216x22xf32>, vector<8x22xf32> -> vector<8x22xf32>
    %cst_154 = arith.constant 0.000000e+00 : f32
    %281 = vector.broadcast %cst_154 : f32 to vector<8x22xf32>
    %282 = arith.maximumf %280, %281 : vector<8x22xf32>
    %283 = tpu.concatenate %126, %189, %252 in 0 : vector<8x36xf32>, vector<8x36xf32>, vector<8x36xf32> -> vector<24x36xf32>
    %284 = vector.extract_strided_slice %283 {offsets = [0, 0], sizes = [24, 22], strides = [1, 1]} : vector<24x36xf32> to vector<24x22xf32>
    %285 = vector.extract_strided_slice %283 {offsets = [0, 1], sizes = [24, 22], strides = [1, 1]} : vector<24x36xf32> to vector<24x22xf32>
    %286 = vector.extract_strided_slice %283 {offsets = [0, 2], sizes = [24, 22], strides = [1, 1]} : vector<24x36xf32> to vector<24x22xf32>
    %287 = vector.extract_strided_slice %283 {offsets = [0, 6], sizes = [24, 22], strides = [1, 1]} : vector<24x36xf32> to vector<24x22xf32>
    %288 = vector.extract_strided_slice %283 {offsets = [0, 7], sizes = [24, 22], strides = [1, 1]} : vector<24x36xf32> to vector<24x22xf32>
    %289 = vector.extract_strided_slice %283 {offsets = [0, 8], sizes = [24, 22], strides = [1, 1]} : vector<24x36xf32> to vector<24x22xf32>
    %290 = vector.extract_strided_slice %283 {offsets = [0, 12], sizes = [24, 22], strides = [1, 1]} : vector<24x36xf32> to vector<24x22xf32>
    %291 = vector.extract_strided_slice %283 {offsets = [0, 13], sizes = [24, 22], strides = [1, 1]} : vector<24x36xf32> to vector<24x22xf32>
    %292 = vector.extract_strided_slice %283 {offsets = [0, 14], sizes = [24, 22], strides = [1, 1]} : vector<24x36xf32> to vector<24x22xf32>
    %293 = tpu.concatenate %284, %285, %286, %287, %288, %289, %290, %291, %292 in 0 : vector<24x22xf32>, vector<24x22xf32>, vector<24x22xf32>, vector<24x22xf32>, vector<24x22xf32>, vector<24x22xf32>, vector<24x22xf32>, vector<24x22xf32>, vector<24x22xf32> -> vector<216x22xf32>
    %c0_155 = arith.constant 0 : index
    %c0_156 = arith.constant 0 : index
    %294 = vector.load %arg6[%c0_155, %c0_156] : memref<8x216xf32, #tpu.memory_space<vmem>>, vector<8x216xf32>
    %cst_157 = arith.constant dense<0.000000e+00> : vector<8x22xf32>
    %295 = tpu.matmul %294, %293, %cst_157 {dimension_numbers = #tpu.dot_dimension_numbers<[1], [0], [0], [1], [0, 0, 1, 1], [], []>} : vector<8x216xf32>, vector<216x22xf32>, vector<8x22xf32> -> vector<8x22xf32>
    %cst_158 = arith.constant 0.000000e+00 : f32
    %296 = vector.broadcast %cst_158 : f32 to vector<8x22xf32>
    %297 = arith.maximumf %295, %296 : vector<8x22xf32>
    %298 = tpu.concatenate %189, %252, %0 in 0 : vector<8x36xf32>, vector<8x36xf32>, vector<8x36xf32> -> vector<24x36xf32>
    %299 = vector.extract_strided_slice %298 {offsets = [0, 0], sizes = [24, 22], strides = [1, 1]} : vector<24x36xf32> to vector<24x22xf32>
    %300 = vector.extract_strided_slice %298 {offsets = [0, 1], sizes = [24, 22], strides = [1, 1]} : vector<24x36xf32> to vector<24x22xf32>
    %301 = vector.extract_strided_slice %298 {offsets = [0, 2], sizes = [24, 22], strides = [1, 1]} : vector<24x36xf32> to vector<24x22xf32>
    %302 = vector.extract_strided_slice %298 {offsets = [0, 6], sizes = [24, 22], strides = [1, 1]} : vector<24x36xf32> to vector<24x22xf32>
    %303 = vector.extract_strided_slice %298 {offsets = [0, 7], sizes = [24, 22], strides = [1, 1]} : vector<24x36xf32> to vector<24x22xf32>
    %304 = vector.extract_strided_slice %298 {offsets = [0, 8], sizes = [24, 22], strides = [1, 1]} : vector<24x36xf32> to vector<24x22xf32>
    %305 = vector.extract_strided_slice %298 {offsets = [0, 12], sizes = [24, 22], strides = [1, 1]} : vector<24x36xf32> to vector<24x22xf32>
    %306 = vector.extract_strided_slice %298 {offsets = [0, 13], sizes = [24, 22], strides = [1, 1]} : vector<24x36xf32> to vector<24x22xf32>
    %307 = vector.extract_strided_slice %298 {offsets = [0, 14], sizes = [24, 22], strides = [1, 1]} : vector<24x36xf32> to vector<24x22xf32>
    %308 = tpu.concatenate %299, %300, %301, %302, %303, %304, %305, %306, %307 in 0 : vector<24x22xf32>, vector<24x22xf32>, vector<24x22xf32>, vector<24x22xf32>, vector<24x22xf32>, vector<24x22xf32>, vector<24x22xf32>, vector<24x22xf32>, vector<24x22xf32> -> vector<216x22xf32>
    %c0_159 = arith.constant 0 : index
    %c0_160 = arith.constant 0 : index
    %309 = vector.load %arg6[%c0_159, %c0_160] : memref<8x216xf32, #tpu.memory_space<vmem>>, vector<8x216xf32>
    %cst_161 = arith.constant dense<0.000000e+00> : vector<8x22xf32>
    %310 = tpu.matmul %309, %308, %cst_161 {dimension_numbers = #tpu.dot_dimension_numbers<[1], [0], [0], [1], [0, 0, 1, 1], [], []>} : vector<8x216xf32>, vector<216x22xf32>, vector<8x22xf32> -> vector<8x22xf32>
    %cst_162 = arith.constant 0.000000e+00 : f32
    %311 = vector.broadcast %cst_162 : f32 to vector<8x22xf32>
    %312 = arith.maximumf %310, %311 : vector<8x22xf32>
    %313 = arith.maximumf %267, %282 : vector<8x22xf32>
    %314 = vector.extract_strided_slice %313 {offsets = [0, 0], sizes = [8, 15], strides = [1, 1]} : vector<8x22xf32> to vector<8x15xf32>
    %315 = vector.extract_strided_slice %313 {offsets = [0, 1], sizes = [8, 15], strides = [1, 1]} : vector<8x22xf32> to vector<8x15xf32>
    %316 = arith.maximumf %314, %315 : vector<8x15xf32>
    %317 = vector.extract_strided_slice %313 {offsets = [0, 6], sizes = [8, 15], strides = [1, 1]} : vector<8x22xf32> to vector<8x15xf32>
    %318 = arith.maximumf %316, %317 : vector<8x15xf32>
    %319 = vector.extract_strided_slice %313 {offsets = [0, 7], sizes = [8, 15], strides = [1, 1]} : vector<8x22xf32> to vector<8x15xf32>
    %320 = arith.maximumf %318, %319 : vector<8x15xf32>
    %c0_163 = arith.constant 0 : index
    %c0_164 = arith.constant 0 : index
    %321 = vector.load %arg7[%c0_163, %c0_164] : memref<15x4xf32, #tpu.memory_space<vmem>>, vector<15x4xf32>
    %cst_165 = arith.constant dense<0.000000e+00> : vector<8x4xf32>
    %322 = tpu.matmul %320, %321, %cst_165 {dimension_numbers = #tpu.dot_dimension_numbers<[1], [0], [0], [1], [0, 0, 1, 1], [], []>} : vector<8x15xf32>, vector<15x4xf32>, vector<8x4xf32> -> vector<8x4xf32>
    %c0_166 = arith.constant 0 : index
    %c0_167 = arith.constant 0 : index
    %c0_168 = arith.constant 0 : index
    %c0_169 = arith.constant 0 : index
    %323 = vector.load %arg8[%c0_166, %c0_167, %c0_168, %c0_169] : memref<1x2x8x4xf32, #tpu.memory_space<vmem>>, vector<1x1x8x4xf32>
    %324 = vector.shape_cast %323 : vector<1x1x8x4xf32> to vector<8x4xf32>
    %325 = vector.shape_cast %322 : vector<8x4xf32> to vector<1x1x8x4xf32>
    tpu.vector_store %arg8[%c0_166, %c0_167, %c0_168, %c0_169], %325 {strides = array<i32>} : memref<1x2x8x4xf32, #tpu.memory_space<vmem>>, vector<1x1x8x4xf32>,
    %326 = arith.maximumf %297, %312 : vector<8x22xf32>
    %327 = vector.extract_strided_slice %326 {offsets = [0, 0], sizes = [8, 15], strides = [1, 1]} : vector<8x22xf32> to vector<8x15xf32>
    %328 = vector.extract_strided_slice %326 {offsets = [0, 1], sizes = [8, 15], strides = [1, 1]} : vector<8x22xf32> to vector<8x15xf32>
    %329 = arith.maximumf %327, %328 : vector<8x15xf32>
    %330 = vector.extract_strided_slice %326 {offsets = [0, 6], sizes = [8, 15], strides = [1, 1]} : vector<8x22xf32> to vector<8x15xf32>
    %331 = arith.maximumf %329, %330 : vector<8x15xf32>
    %332 = vector.extract_strided_slice %326 {offsets = [0, 7], sizes = [8, 15], strides = [1, 1]} : vector<8x22xf32> to vector<8x15xf32>
    %333 = arith.maximumf %331, %332 : vector<8x15xf32>
    %c0_170 = arith.constant 0 : index
    %c0_171 = arith.constant 0 : index
    %334 = vector.load %arg7[%c0_170, %c0_171] : memref<15x4xf32, #tpu.memory_space<vmem>>, vector<15x4xf32>
    %cst_172 = arith.constant dense<0.000000e+00> : vector<8x4xf32>
    %335 = tpu.matmul %333, %334, %cst_172 {dimension_numbers = #tpu.dot_dimension_numbers<[1], [0], [0], [1], [0, 0, 1, 1], [], []>} : vector<8x15xf32>, vector<15x4xf32>, vector<8x4xf32> -> vector<8x4xf32>
    %c0_173 = arith.constant 0 : index
    %c1_174 = arith.constant 1 : index
    %c0_175 = arith.constant 0 : index
    %c0_176 = arith.constant 0 : index
    %336 = vector.load %arg8[%c0_173, %c1_174, %c0_175, %c0_176] : memref<1x2x8x4xf32, #tpu.memory_space<vmem>>, vector<1x1x8x4xf32>
    %337 = vector.shape_cast %336 : vector<1x1x8x4xf32> to vector<8x4xf32>
    %338 = vector.shape_cast %335 : vector<8x4xf32> to vector<1x1x8x4xf32>
    tpu.vector_store %arg8[%c0_173, %c1_174, %c0_175, %c0_176], %338 {strides = array<i32>} : memref<1x2x8x4xf32, #tpu.memory_space<vmem>>, vector<1x1x8x4xf32>,
    return
  }
  func.func @transform_0(%arg0: i32) -> (i32, i32, i32, i32) {
    %c0_i32 = arith.constant 0 : i32
    %c0_i32_0 = arith.constant 0 : i32
    %c0_i32_1 = arith.constant 0 : i32
    %c0_i32_2 = arith.constant 0 : i32
    return %arg0, %c0_i32, %c0_i32_0, %c0_i32_1 : i32, i32, i32, i32
  }
  func.func @transform_1(%arg0: i32) -> (i32, i32, i32) {
    %c0_i32 = arith.constant 0 : i32
    %c0_i32_0 = arith.constant 0 : i32
    %c0_i32_1 = arith.constant 0 : i32
    %c0_i32_2 = arith.constant 0 : i32
    return %c0_i32, %c0_i32_0, %c0_i32_1 : i32, i32, i32
  }
  func.func @transform_2(%arg0: i32) -> (i32, i32) {
    %c0_i32 = arith.constant 0 : i32
    %c0_i32_0 = arith.constant 0 : i32
    %c0_i32_1 = arith.constant 0 : i32
    return %c0_i32, %c0_i32_0 : i32, i32
  }
  func.func @transform_3(%arg0: i32) -> (i32, i32) {
    %c0_i32 = arith.constant 0 : i32
    %c0_i32_0 = arith.constant 0 : i32
    %c0_i32_1 = arith.constant 0 : i32
    return %c0_i32, %c0_i32_0 : i32, i32
  }
  func.func @transform_4(%arg0: i32) -> (i32, i32) {
    %c0_i32 = arith.constant 0 : i32
    %c0_i32_0 = arith.constant 0 : i32
    %c0_i32_1 = arith.constant 0 : i32
    return %c0_i32, %c0_i32_0 : i32, i32
  }
  func.func @transform_5(%arg0: i32) -> (i32, i32) {
    %c0_i32 = arith.constant 0 : i32
    %c0_i32_0 = arith.constant 0 : i32
    %c0_i32_1 = arith.constant 0 : i32
    return %c0_i32, %c0_i32_0 : i32, i32
  }
  func.func @transform_6(%arg0: i32) -> (i32, i32) {
    %c0_i32 = arith.constant 0 : i32
    %c0_i32_0 = arith.constant 0 : i32
    %c0_i32_1 = arith.constant 0 : i32
    return %c0_i32, %c0_i32_0 : i32, i32
  }
  func.func @transform_7(%arg0: i32) -> (i32, i32, i32, i32) {
    %c0_i32 = arith.constant 0 : i32
    %c0_i32_0 = arith.constant 0 : i32
    %c0_i32_1 = arith.constant 0 : i32
    %c0_i32_2 = arith.constant 0 : i32
    return %arg0, %c0_i32, %c0_i32_0, %c0_i32_1 : i32, i32, i32, i32
  }
}

module attributes {stable_mosaic.version = 11 : i64} {
  func.func @_stage2_kernel(%arg0: i32, %arg1: memref<1x10x8x100xf32, #tpu.memory_space<vmem>>, %arg2: memref<10x1x100xf32, #tpu.memory_space<vmem>>, %arg3: memref<8x1xf32, #tpu.memory_space<vmem>>, %arg4: memref<8x1xf32, #tpu.memory_space<vmem>>, %arg5: memref<8x216xf32, #tpu.memory_space<vmem>>, %arg6: memref<78x100xf32, #tpu.memory_space<vmem>>, %arg7: memref<1x10x8x100xf32, #tpu.memory_space<vmem>>, %arg8: memref<1x8x1xf32, #tpu.memory_space<vmem>>, %arg9: memref<1x8x1xf32, #tpu.memory_space<vmem>>) attributes {dimension_semantics = [#tpu.dimension_semantics<parallel>], iteration_bounds = array<i64: 2>, scalar_prefetch = 0 : i64, scratch_operands = 0 : i64, tpu.core_type = #tpu.core_type<tc>, window_params = [{transform_indices = @transform_0, window_bounds = array<i64: 1, 10, 8, 100>}, {pipeline_mode = #tpu.pipeline_mode<synchronous>, transform_indices = @transform_1, window_bounds = array<i64: 10, 1, 100>}, {pipeline_mode = #tpu.pipeline_mode<synchronous>, transform_indices = @transform_2, window_bounds = array<i64: 8, 1>}, {pipeline_mode = #tpu.pipeline_mode<synchronous>, transform_indices = @transform_3, window_bounds = array<i64: 8, 1>}, {pipeline_mode = #tpu.pipeline_mode<synchronous>, transform_indices = @transform_4, window_bounds = array<i64: 8, 216>}, {pipeline_mode = #tpu.pipeline_mode<synchronous>, transform_indices = @transform_5, window_bounds = array<i64: 78, 100>}, {transform_indices = @transform_6, window_bounds = array<i64: 1, 10, 8, 100>}, {transform_indices = @transform_7, window_bounds = array<i64: 1, 8, 1>}, {transform_indices = @transform_8, window_bounds = array<i64: 1, 8, 1>}]} {
    %cst = arith.constant 0.000000e+00 : f32
    %0 = vector.broadcast %cst : f32 to vector<8x100xf32>
    %c0 = arith.constant 0 : index
    %c0_0 = arith.constant 0 : index
    %c0_1 = arith.constant 0 : index
    %c0_2 = arith.constant 0 : index
    %1 = vector.load %arg7[%c0, %c0_0, %c0_1, %c0_2] : memref<1x10x8x100xf32, #tpu.memory_space<vmem>>, vector<1x1x8x100xf32>
    %2 = vector.shape_cast %1 : vector<1x1x8x100xf32> to vector<8x100xf32>
    %3 = vector.shape_cast %0 : vector<8x100xf32> to vector<1x1x8x100xf32>
    tpu.vector_store %arg7[%c0, %c0_0, %c0_1, %c0_2], %3 {strides = array<i32>} : memref<1x10x8x100xf32, #tpu.memory_space<vmem>>, vector<1x1x8x100xf32>,
    %c0_3 = arith.constant 0 : index
    %c9 = arith.constant 9 : index
    %c0_4 = arith.constant 0 : index
    %c0_5 = arith.constant 0 : index
    %4 = vector.load %arg7[%c0_3, %c9, %c0_4, %c0_5] : memref<1x10x8x100xf32, #tpu.memory_space<vmem>>, vector<1x1x8x100xf32>
    %5 = vector.shape_cast %4 : vector<1x1x8x100xf32> to vector<8x100xf32>
    %6 = vector.shape_cast %0 : vector<8x100xf32> to vector<1x1x8x100xf32>
    tpu.vector_store %arg7[%c0_3, %c9, %c0_4, %c0_5], %6 {strides = array<i32>} : memref<1x10x8x100xf32, #tpu.memory_space<vmem>>, vector<1x1x8x100xf32>,
    %cst_6 = arith.constant 0.000000e+00 : f32
    %7 = vector.broadcast %cst_6 : f32 to vector<8x1xf32>
    %cst_7 = arith.constant 0.000000e+00 : f32
    %8 = vector.broadcast %cst_7 : f32 to vector<8x1xf32>
    %c0_8 = arith.constant 0 : index
    %c0_9 = arith.constant 0 : index
    %c0_10 = arith.constant 0 : index
    %c0_11 = arith.constant 0 : index
    %9 = vector.load %arg1[%c0_8, %c0_9, %c0_10, %c0_11] : memref<1x10x8x100xf32, #tpu.memory_space<vmem>>, vector<1x1x8x100xf32>
    %10 = vector.shape_cast %9 : vector<1x1x8x100xf32> to vector<8x100xf32>
    %c0_12 = arith.constant 0 : index
    %c0_13 = arith.constant 0 : index
    %11 = vector.load %arg3[%c0_12, %c0_13] : memref<8x1xf32, #tpu.memory_space<vmem>>, vector<8x1xf32>
    %12 = vector.broadcast %11 : vector<8x1xf32> to vector<8x100xf32>
    %13 = arith.mulf %10, %12 : vector<8x100xf32>
    %c0_14 = arith.constant 0 : index
    %c0_15 = arith.constant 0 : index
    %14 = vector.load %arg4[%c0_14, %c0_15] : memref<8x1xf32, #tpu.memory_space<vmem>>, vector<8x1xf32>
    %15 = vector.broadcast %14 : vector<8x1xf32> to vector<8x100xf32>
    %16 = arith.addf %13, %15 : vector<8x100xf32>
    %cst_16 = arith.constant 0.000000e+00 : f32
    %17 = vector.broadcast %cst_16 : f32 to vector<8x100xf32>
    %18 = arith.maximumf %16, %17 : vector<8x100xf32>
    %c0_17 = arith.constant 0 : index
    %c0_18 = arith.constant 0 : index
    %c0_19 = arith.constant 0 : index
    %19 = vector.load %arg2[%c0_17, %c0_18, %c0_19] : memref<10x1x100xf32, #tpu.memory_space<vmem>>, vector<1x1x100xf32>
    %20 = vector.shape_cast %19 : vector<1x1x100xf32> to vector<1x100xf32>
    %21 = vector.broadcast %20 : vector<1x100xf32> to vector<8x100xf32>
    %22 = arith.mulf %18, %21 : vector<8x100xf32>
    %c0_20 = arith.constant 0 : index
    %c1 = arith.constant 1 : index
    %c0_21 = arith.constant 0 : index
    %c0_22 = arith.constant 0 : index
    %23 = vector.load %arg1[%c0_20, %c1, %c0_21, %c0_22] : memref<1x10x8x100xf32, #tpu.memory_space<vmem>>, vector<1x1x8x100xf32>
    %24 = vector.shape_cast %23 : vector<1x1x8x100xf32> to vector<8x100xf32>
    %c0_23 = arith.constant 0 : index
    %c0_24 = arith.constant 0 : index
    %25 = vector.load %arg3[%c0_23, %c0_24] : memref<8x1xf32, #tpu.memory_space<vmem>>, vector<8x1xf32>
    %26 = vector.broadcast %25 : vector<8x1xf32> to vector<8x100xf32>
    %27 = arith.mulf %24, %26 : vector<8x100xf32>
    %c0_25 = arith.constant 0 : index
    %c0_26 = arith.constant 0 : index
    %28 = vector.load %arg4[%c0_25, %c0_26] : memref<8x1xf32, #tpu.memory_space<vmem>>, vector<8x1xf32>
    %29 = vector.broadcast %28 : vector<8x1xf32> to vector<8x100xf32>
    %30 = arith.addf %27, %29 : vector<8x100xf32>
    %cst_27 = arith.constant 0.000000e+00 : f32
    %31 = vector.broadcast %cst_27 : f32 to vector<8x100xf32>
    %32 = arith.maximumf %30, %31 : vector<8x100xf32>
    %c1_28 = arith.constant 1 : index
    %c0_29 = arith.constant 0 : index
    %c0_30 = arith.constant 0 : index
    %33 = vector.load %arg2[%c1_28, %c0_29, %c0_30] : memref<10x1x100xf32, #tpu.memory_space<vmem>>, vector<1x1x100xf32>
    %34 = vector.shape_cast %33 : vector<1x1x100xf32> to vector<1x100xf32>
    %35 = vector.broadcast %34 : vector<1x100xf32> to vector<8x100xf32>
    %36 = arith.mulf %32, %35 : vector<8x100xf32>
    %c0_31 = arith.constant 0 : index
    %c2 = arith.constant 2 : index
    %c0_32 = arith.constant 0 : index
    %c0_33 = arith.constant 0 : index
    %37 = vector.load %arg1[%c0_31, %c2, %c0_32, %c0_33] : memref<1x10x8x100xf32, #tpu.memory_space<vmem>>, vector<1x1x8x100xf32>
    %38 = vector.shape_cast %37 : vector<1x1x8x100xf32> to vector<8x100xf32>
    %c0_34 = arith.constant 0 : index
    %c0_35 = arith.constant 0 : index
    %39 = vector.load %arg3[%c0_34, %c0_35] : memref<8x1xf32, #tpu.memory_space<vmem>>, vector<8x1xf32>
    %40 = vector.broadcast %39 : vector<8x1xf32> to vector<8x100xf32>
    %41 = arith.mulf %38, %40 : vector<8x100xf32>
    %c0_36 = arith.constant 0 : index
    %c0_37 = arith.constant 0 : index
    %42 = vector.load %arg4[%c0_36, %c0_37] : memref<8x1xf32, #tpu.memory_space<vmem>>, vector<8x1xf32>
    %43 = vector.broadcast %42 : vector<8x1xf32> to vector<8x100xf32>
    %44 = arith.addf %41, %43 : vector<8x100xf32>
    %cst_38 = arith.constant 0.000000e+00 : f32
    %45 = vector.broadcast %cst_38 : f32 to vector<8x100xf32>
    %46 = arith.maximumf %44, %45 : vector<8x100xf32>
    %c2_39 = arith.constant 2 : index
    %c0_40 = arith.constant 0 : index
    %c0_41 = arith.constant 0 : index
    %47 = vector.load %arg2[%c2_39, %c0_40, %c0_41] : memref<10x1x100xf32, #tpu.memory_space<vmem>>, vector<1x1x100xf32>
    %48 = vector.shape_cast %47 : vector<1x1x100xf32> to vector<1x100xf32>
    %49 = vector.broadcast %48 : vector<1x100xf32> to vector<8x100xf32>
    %50 = arith.mulf %46, %49 : vector<8x100xf32>
    %51 = tpu.concatenate %22, %36, %50 in 0 : vector<8x100xf32>, vector<8x100xf32>, vector<8x100xf32> -> vector<24x100xf32>
    %52 = vector.extract_strided_slice %51 {offsets = [0, 0], sizes = [24, 78], strides = [1, 1]} : vector<24x100xf32> to vector<24x78xf32>
    %53 = vector.extract_strided_slice %51 {offsets = [0, 1], sizes = [24, 78], strides = [1, 1]} : vector<24x100xf32> to vector<24x78xf32>
    %54 = vector.extract_strided_slice %51 {offsets = [0, 2], sizes = [24, 78], strides = [1, 1]} : vector<24x100xf32> to vector<24x78xf32>
    %55 = vector.extract_strided_slice %51 {offsets = [0, 10], sizes = [24, 78], strides = [1, 1]} : vector<24x100xf32> to vector<24x78xf32>
    %56 = vector.extract_strided_slice %51 {offsets = [0, 11], sizes = [24, 78], strides = [1, 1]} : vector<24x100xf32> to vector<24x78xf32>
    %57 = vector.extract_strided_slice %51 {offsets = [0, 12], sizes = [24, 78], strides = [1, 1]} : vector<24x100xf32> to vector<24x78xf32>
    %58 = vector.extract_strided_slice %51 {offsets = [0, 20], sizes = [24, 78], strides = [1, 1]} : vector<24x100xf32> to vector<24x78xf32>
    %59 = vector.extract_strided_slice %51 {offsets = [0, 21], sizes = [24, 78], strides = [1, 1]} : vector<24x100xf32> to vector<24x78xf32>
    %60 = vector.extract_strided_slice %51 {offsets = [0, 22], sizes = [24, 78], strides = [1, 1]} : vector<24x100xf32> to vector<24x78xf32>
    %61 = tpu.concatenate %52, %53, %54, %55, %56, %57, %58, %59, %60 in 0 : vector<24x78xf32>, vector<24x78xf32>, vector<24x78xf32>, vector<24x78xf32>, vector<24x78xf32>, vector<24x78xf32>, vector<24x78xf32>, vector<24x78xf32>, vector<24x78xf32> -> vector<216x78xf32>
    %c0_42 = arith.constant 0 : index
    %c0_43 = arith.constant 0 : index
    %62 = vector.load %arg5[%c0_42, %c0_43] : memref<8x216xf32, #tpu.memory_space<vmem>>, vector<8x216xf32>
    %cst_44 = arith.constant dense<0.000000e+00> : vector<8x78xf32>
    %63 = tpu.matmul %62, %61, %cst_44 {dimension_numbers = #tpu.dot_dimension_numbers<[1], [0], [0], [1], [0, 0, 1, 1], [], []>} : vector<8x216xf32>, vector<216x78xf32>, vector<8x78xf32> -> vector<8x78xf32>
    %c0_45 = arith.constant 0 : index
    %c0_46 = arith.constant 0 : index
    %64 = vector.load %arg6[%c0_45, %c0_46] : memref<78x100xf32, #tpu.memory_space<vmem>>, vector<78x100xf32>
    %cst_47 = arith.constant dense<0.000000e+00> : vector<8x100xf32>
    %65 = tpu.matmul %63, %64, %cst_47 {dimension_numbers = #tpu.dot_dimension_numbers<[1], [0], [0], [1], [0, 0, 1, 1], [], []>} : vector<8x78xf32>, vector<78x100xf32>, vector<8x100xf32> -> vector<8x100xf32>
    %c0_48 = arith.constant 0 : index
    %c1_49 = arith.constant 1 : index
    %c0_50 = arith.constant 0 : index
    %c0_51 = arith.constant 0 : index
    %66 = vector.load %arg7[%c0_48, %c1_49, %c0_50, %c0_51] : memref<1x10x8x100xf32, #tpu.memory_space<vmem>>, vector<1x1x8x100xf32>
    %67 = vector.shape_cast %66 : vector<1x1x8x100xf32> to vector<8x100xf32>
    %68 = vector.shape_cast %65 : vector<8x100xf32> to vector<1x1x8x100xf32>
    tpu.vector_store %arg7[%c0_48, %c1_49, %c0_50, %c0_51], %68 {strides = array<i32>} : memref<1x10x8x100xf32, #tpu.memory_space<vmem>>, vector<1x1x8x100xf32>,
    %cst_52 = arith.constant dense<0.000000e+00> : vector<8xf32>
    %69 = vector.multi_reduction <add>, %65, %cst_52 [1] : vector<8x100xf32> to vector<8xf32>
    %70 = vector.shape_cast %69 : vector<8xf32> to vector<8x1xf32>
    %71 = arith.addf %7, %70 : vector<8x1xf32>
    %72 = arith.mulf %65, %65 : vector<8x100xf32>
    %cst_53 = arith.constant dense<0.000000e+00> : vector<8xf32>
    %73 = vector.multi_reduction <add>, %72, %cst_53 [1] : vector<8x100xf32> to vector<8xf32>
    %74 = vector.shape_cast %73 : vector<8xf32> to vector<8x1xf32>
    %75 = arith.addf %8, %74 : vector<8x1xf32>
    %c0_54 = arith.constant 0 : index
    %c1_55 = arith.constant 1 : index
    %c0_56 = arith.constant 0 : index
    %c0_57 = arith.constant 0 : index
    %76 = vector.load %arg1[%c0_54, %c1_55, %c0_56, %c0_57] : memref<1x10x8x100xf32, #tpu.memory_space<vmem>>, vector<1x1x8x100xf32>
    %77 = vector.shape_cast %76 : vector<1x1x8x100xf32> to vector<8x100xf32>
    %c0_58 = arith.constant 0 : index
    %c0_59 = arith.constant 0 : index
    %78 = vector.load %arg3[%c0_58, %c0_59] : memref<8x1xf32, #tpu.memory_space<vmem>>, vector<8x1xf32>
    %79 = vector.broadcast %78 : vector<8x1xf32> to vector<8x100xf32>
    %80 = arith.mulf %77, %79 : vector<8x100xf32>
    %c0_60 = arith.constant 0 : index
    %c0_61 = arith.constant 0 : index
    %81 = vector.load %arg4[%c0_60, %c0_61] : memref<8x1xf32, #tpu.memory_space<vmem>>, vector<8x1xf32>
    %82 = vector.broadcast %81 : vector<8x1xf32> to vector<8x100xf32>
    %83 = arith.addf %80, %82 : vector<8x100xf32>
    %cst_62 = arith.constant 0.000000e+00 : f32
    %84 = vector.broadcast %cst_62 : f32 to vector<8x100xf32>
    %85 = arith.maximumf %83, %84 : vector<8x100xf32>
    %c1_63 = arith.constant 1 : index
    %c0_64 = arith.constant 0 : index
    %c0_65 = arith.constant 0 : index
    %86 = vector.load %arg2[%c1_63, %c0_64, %c0_65] : memref<10x1x100xf32, #tpu.memory_space<vmem>>, vector<1x1x100xf32>
    %87 = vector.shape_cast %86 : vector<1x1x100xf32> to vector<1x100xf32>
    %88 = vector.broadcast %87 : vector<1x100xf32> to vector<8x100xf32>
    %89 = arith.mulf %85, %88 : vector<8x100xf32>
    %c0_66 = arith.constant 0 : index
    %c2_67 = arith.constant 2 : index
    %c0_68 = arith.constant 0 : index
    %c0_69 = arith.constant 0 : index
    %90 = vector.load %arg1[%c0_66, %c2_67, %c0_68, %c0_69] : memref<1x10x8x100xf32, #tpu.memory_space<vmem>>, vector<1x1x8x100xf32>
    %91 = vector.shape_cast %90 : vector<1x1x8x100xf32> to vector<8x100xf32>
    %c0_70 = arith.constant 0 : index
    %c0_71 = arith.constant 0 : index
    %92 = vector.load %arg3[%c0_70, %c0_71] : memref<8x1xf32, #tpu.memory_space<vmem>>, vector<8x1xf32>
    %93 = vector.broadcast %92 : vector<8x1xf32> to vector<8x100xf32>
    %94 = arith.mulf %91, %93 : vector<8x100xf32>
    %c0_72 = arith.constant 0 : index
    %c0_73 = arith.constant 0 : index
    %95 = vector.load %arg4[%c0_72, %c0_73] : memref<8x1xf32, #tpu.memory_space<vmem>>, vector<8x1xf32>
    %96 = vector.broadcast %95 : vector<8x1xf32> to vector<8x100xf32>
    %97 = arith.addf %94, %96 : vector<8x100xf32>
    %cst_74 = arith.constant 0.000000e+00 : f32
    %98 = vector.broadcast %cst_74 : f32 to vector<8x100xf32>
    %99 = arith.maximumf %97, %98 : vector<8x100xf32>
    %c2_75 = arith.constant 2 : index
    %c0_76 = arith.constant 0 : index
    %c0_77 = arith.constant 0 : index
    %100 = vector.load %arg2[%c2_75, %c0_76, %c0_77] : memref<10x1x100xf32, #tpu.memory_space<vmem>>, vector<1x1x100xf32>
    %101 = vector.shape_cast %100 : vector<1x1x100xf32> to vector<1x100xf32>
    %102 = vector.broadcast %101 : vector<1x100xf32> to vector<8x100xf32>
    %103 = arith.mulf %99, %102 : vector<8x100xf32>
    %c0_78 = arith.constant 0 : index
    %c3 = arith.constant 3 : index
    %c0_79 = arith.constant 0 : index
    %c0_80 = arith.constant 0 : index
    %104 = vector.load %arg1[%c0_78, %c3, %c0_79, %c0_80] : memref<1x10x8x100xf32, #tpu.memory_space<vmem>>, vector<1x1x8x100xf32>
    %105 = vector.shape_cast %104 : vector<1x1x8x100xf32> to vector<8x100xf32>
    %c0_81 = arith.constant 0 : index
    %c0_82 = arith.constant 0 : index
    %106 = vector.load %arg3[%c0_81, %c0_82] : memref<8x1xf32, #tpu.memory_space<vmem>>, vector<8x1xf32>
    %107 = vector.broadcast %106 : vector<8x1xf32> to vector<8x100xf32>
    %108 = arith.mulf %105, %107 : vector<8x100xf32>
    %c0_83 = arith.constant 0 : index
    %c0_84 = arith.constant 0 : index
    %109 = vector.load %arg4[%c0_83, %c0_84] : memref<8x1xf32, #tpu.memory_space<vmem>>, vector<8x1xf32>
    %110 = vector.broadcast %109 : vector<8x1xf32> to vector<8x100xf32>
    %111 = arith.addf %108, %110 : vector<8x100xf32>
    %cst_85 = arith.constant 0.000000e+00 : f32
    %112 = vector.broadcast %cst_85 : f32 to vector<8x100xf32>
    %113 = arith.maximumf %111, %112 : vector<8x100xf32>
    %c3_86 = arith.constant 3 : index
    %c0_87 = arith.constant 0 : index
    %c0_88 = arith.constant 0 : index
    %114 = vector.load %arg2[%c3_86, %c0_87, %c0_88] : memref<10x1x100xf32, #tpu.memory_space<vmem>>, vector<1x1x100xf32>
    %115 = vector.shape_cast %114 : vector<1x1x100xf32> to vector<1x100xf32>
    %116 = vector.broadcast %115 : vector<1x100xf32> to vector<8x100xf32>
    %117 = arith.mulf %113, %116 : vector<8x100xf32>
    %118 = tpu.concatenate %89, %103, %117 in 0 : vector<8x100xf32>, vector<8x100xf32>, vector<8x100xf32> -> vector<24x100xf32>
    %119 = vector.extract_strided_slice %118 {offsets = [0, 0], sizes = [24, 78], strides = [1, 1]} : vector<24x100xf32> to vector<24x78xf32>
    %120 = vector.extract_strided_slice %118 {offsets = [0, 1], sizes = [24, 78], strides = [1, 1]} : vector<24x100xf32> to vector<24x78xf32>
    %121 = vector.extract_strided_slice %118 {offsets = [0, 2], sizes = [24, 78], strides = [1, 1]} : vector<24x100xf32> to vector<24x78xf32>
    %122 = vector.extract_strided_slice %118 {offsets = [0, 10], sizes = [24, 78], strides = [1, 1]} : vector<24x100xf32> to vector<24x78xf32>
    %123 = vector.extract_strided_slice %118 {offsets = [0, 11], sizes = [24, 78], strides = [1, 1]} : vector<24x100xf32> to vector<24x78xf32>
    %124 = vector.extract_strided_slice %118 {offsets = [0, 12], sizes = [24, 78], strides = [1, 1]} : vector<24x100xf32> to vector<24x78xf32>
    %125 = vector.extract_strided_slice %118 {offsets = [0, 20], sizes = [24, 78], strides = [1, 1]} : vector<24x100xf32> to vector<24x78xf32>
    %126 = vector.extract_strided_slice %118 {offsets = [0, 21], sizes = [24, 78], strides = [1, 1]} : vector<24x100xf32> to vector<24x78xf32>
    %127 = vector.extract_strided_slice %118 {offsets = [0, 22], sizes = [24, 78], strides = [1, 1]} : vector<24x100xf32> to vector<24x78xf32>
    %128 = tpu.concatenate %119, %120, %121, %122, %123, %124, %125, %126, %127 in 0 : vector<24x78xf32>, vector<24x78xf32>, vector<24x78xf32>, vector<24x78xf32>, vector<24x78xf32>, vector<24x78xf32>, vector<24x78xf32>, vector<24x78xf32>, vector<24x78xf32> -> vector<216x78xf32>
    %c0_89 = arith.constant 0 : index
    %c0_90 = arith.constant 0 : index
    %129 = vector.load %arg5[%c0_89, %c0_90] : memref<8x216xf32, #tpu.memory_space<vmem>>, vector<8x216xf32>
    %cst_91 = arith.constant dense<0.000000e+00> : vector<8x78xf32>
    %130 = tpu.matmul %129, %128, %cst_91 {dimension_numbers = #tpu.dot_dimension_numbers<[1], [0], [0], [1], [0, 0, 1, 1], [], []>} : vector<8x216xf32>, vector<216x78xf32>, vector<8x78xf32> -> vector<8x78xf32>
    %c0_92 = arith.constant 0 : index
    %c0_93 = arith.constant 0 : index
    %131 = vector.load %arg6[%c0_92, %c0_93] : memref<78x100xf32, #tpu.memory_space<vmem>>, vector<78x100xf32>
    %cst_94 = arith.constant dense<0.000000e+00> : vector<8x100xf32>
    %132 = tpu.matmul %130, %131, %cst_94 {dimension_numbers = #tpu.dot_dimension_numbers<[1], [0], [0], [1], [0, 0, 1, 1], [], []>} : vector<8x78xf32>, vector<78x100xf32>, vector<8x100xf32> -> vector<8x100xf32>
    %c0_95 = arith.constant 0 : index
    %c2_96 = arith.constant 2 : index
    %c0_97 = arith.constant 0 : index
    %c0_98 = arith.constant 0 : index
    %133 = vector.load %arg7[%c0_95, %c2_96, %c0_97, %c0_98] : memref<1x10x8x100xf32, #tpu.memory_space<vmem>>, vector<1x1x8x100xf32>
    %134 = vector.shape_cast %133 : vector<1x1x8x100xf32> to vector<8x100xf32>
    %135 = vector.shape_cast %132 : vector<8x100xf32> to vector<1x1x8x100xf32>
    tpu.vector_store %arg7[%c0_95, %c2_96, %c0_97, %c0_98], %135 {strides = array<i32>} : memref<1x10x8x100xf32, #tpu.memory_space<vmem>>, vector<1x1x8x100xf32>,
    %cst_99 = arith.constant dense<0.000000e+00> : vector<8xf32>
    %136 = vector.multi_reduction <add>, %132, %cst_99 [1] : vector<8x100xf32> to vector<8xf32>
    %137 = vector.shape_cast %136 : vector<8xf32> to vector<8x1xf32>
    %138 = arith.addf %71, %137 : vector<8x1xf32>
    %139 = arith.mulf %132, %132 : vector<8x100xf32>
    %cst_100 = arith.constant dense<0.000000e+00> : vector<8xf32>
    %140 = vector.multi_reduction <add>, %139, %cst_100 [1] : vector<8x100xf32> to vector<8xf32>
    %141 = vector.shape_cast %140 : vector<8xf32> to vector<8x1xf32>
    %142 = arith.addf %75, %141 : vector<8x1xf32>
    %c0_101 = arith.constant 0 : index
    %c2_102 = arith.constant 2 : index
    %c0_103 = arith.constant 0 : index
    %c0_104 = arith.constant 0 : index
    %143 = vector.load %arg1[%c0_101, %c2_102, %c0_103, %c0_104] : memref<1x10x8x100xf32, #tpu.memory_space<vmem>>, vector<1x1x8x100xf32>
    %144 = vector.shape_cast %143 : vector<1x1x8x100xf32> to vector<8x100xf32>
    %c0_105 = arith.constant 0 : index
    %c0_106 = arith.constant 0 : index
    %145 = vector.load %arg3[%c0_105, %c0_106] : memref<8x1xf32, #tpu.memory_space<vmem>>, vector<8x1xf32>
    %146 = vector.broadcast %145 : vector<8x1xf32> to vector<8x100xf32>
    %147 = arith.mulf %144, %146 : vector<8x100xf32>
    %c0_107 = arith.constant 0 : index
    %c0_108 = arith.constant 0 : index
    %148 = vector.load %arg4[%c0_107, %c0_108] : memref<8x1xf32, #tpu.memory_space<vmem>>, vector<8x1xf32>
    %149 = vector.broadcast %148 : vector<8x1xf32> to vector<8x100xf32>
    %150 = arith.addf %147, %149 : vector<8x100xf32>
    %cst_109 = arith.constant 0.000000e+00 : f32
    %151 = vector.broadcast %cst_109 : f32 to vector<8x100xf32>
    %152 = arith.maximumf %150, %151 : vector<8x100xf32>
    %c2_110 = arith.constant 2 : index
    %c0_111 = arith.constant 0 : index
    %c0_112 = arith.constant 0 : index
    %153 = vector.load %arg2[%c2_110, %c0_111, %c0_112] : memref<10x1x100xf32, #tpu.memory_space<vmem>>, vector<1x1x100xf32>
    %154 = vector.shape_cast %153 : vector<1x1x100xf32> to vector<1x100xf32>
    %155 = vector.broadcast %154 : vector<1x100xf32> to vector<8x100xf32>
    %156 = arith.mulf %152, %155 : vector<8x100xf32>
    %c0_113 = arith.constant 0 : index
    %c3_114 = arith.constant 3 : index
    %c0_115 = arith.constant 0 : index
    %c0_116 = arith.constant 0 : index
    %157 = vector.load %arg1[%c0_113, %c3_114, %c0_115, %c0_116] : memref<1x10x8x100xf32, #tpu.memory_space<vmem>>, vector<1x1x8x100xf32>
    %158 = vector.shape_cast %157 : vector<1x1x8x100xf32> to vector<8x100xf32>
    %c0_117 = arith.constant 0 : index
    %c0_118 = arith.constant 0 : index
    %159 = vector.load %arg3[%c0_117, %c0_118] : memref<8x1xf32, #tpu.memory_space<vmem>>, vector<8x1xf32>
    %160 = vector.broadcast %159 : vector<8x1xf32> to vector<8x100xf32>
    %161 = arith.mulf %158, %160 : vector<8x100xf32>
    %c0_119 = arith.constant 0 : index
    %c0_120 = arith.constant 0 : index
    %162 = vector.load %arg4[%c0_119, %c0_120] : memref<8x1xf32, #tpu.memory_space<vmem>>, vector<8x1xf32>
    %163 = vector.broadcast %162 : vector<8x1xf32> to vector<8x100xf32>
    %164 = arith.addf %161, %163 : vector<8x100xf32>
    %cst_121 = arith.constant 0.000000e+00 : f32
    %165 = vector.broadcast %cst_121 : f32 to vector<8x100xf32>
    %166 = arith.maximumf %164, %165 : vector<8x100xf32>
    %c3_122 = arith.constant 3 : index
    %c0_123 = arith.constant 0 : index
    %c0_124 = arith.constant 0 : index
    %167 = vector.load %arg2[%c3_122, %c0_123, %c0_124] : memref<10x1x100xf32, #tpu.memory_space<vmem>>, vector<1x1x100xf32>
    %168 = vector.shape_cast %167 : vector<1x1x100xf32> to vector<1x100xf32>
    %169 = vector.broadcast %168 : vector<1x100xf32> to vector<8x100xf32>
    %170 = arith.mulf %166, %169 : vector<8x100xf32>
    %c0_125 = arith.constant 0 : index
    %c4 = arith.constant 4 : index
    %c0_126 = arith.constant 0 : index
    %c0_127 = arith.constant 0 : index
    %171 = vector.load %arg1[%c0_125, %c4, %c0_126, %c0_127] : memref<1x10x8x100xf32, #tpu.memory_space<vmem>>, vector<1x1x8x100xf32>
    %172 = vector.shape_cast %171 : vector<1x1x8x100xf32> to vector<8x100xf32>
    %c0_128 = arith.constant 0 : index
    %c0_129 = arith.constant 0 : index
    %173 = vector.load %arg3[%c0_128, %c0_129] : memref<8x1xf32, #tpu.memory_space<vmem>>, vector<8x1xf32>
    %174 = vector.broadcast %173 : vector<8x1xf32> to vector<8x100xf32>
    %175 = arith.mulf %172, %174 : vector<8x100xf32>
    %c0_130 = arith.constant 0 : index
    %c0_131 = arith.constant 0 : index
    %176 = vector.load %arg4[%c0_130, %c0_131] : memref<8x1xf32, #tpu.memory_space<vmem>>, vector<8x1xf32>
    %177 = vector.broadcast %176 : vector<8x1xf32> to vector<8x100xf32>
    %178 = arith.addf %175, %177 : vector<8x100xf32>
    %cst_132 = arith.constant 0.000000e+00 : f32
    %179 = vector.broadcast %cst_132 : f32 to vector<8x100xf32>
    %180 = arith.maximumf %178, %179 : vector<8x100xf32>
    %c4_133 = arith.constant 4 : index
    %c0_134 = arith.constant 0 : index
    %c0_135 = arith.constant 0 : index
    %181 = vector.load %arg2[%c4_133, %c0_134, %c0_135] : memref<10x1x100xf32, #tpu.memory_space<vmem>>, vector<1x1x100xf32>
    %182 = vector.shape_cast %181 : vector<1x1x100xf32> to vector<1x100xf32>
    %183 = vector.broadcast %182 : vector<1x100xf32> to vector<8x100xf32>
    %184 = arith.mulf %180, %183 : vector<8x100xf32>
    %185 = tpu.concatenate %156, %170, %184 in 0 : vector<8x100xf32>, vector<8x100xf32>, vector<8x100xf32> -> vector<24x100xf32>
    %186 = vector.extract_strided_slice %185 {offsets = [0, 0], sizes = [24, 78], strides = [1, 1]} : vector<24x100xf32> to vector<24x78xf32>
    %187 = vector.extract_strided_slice %185 {offsets = [0, 1], sizes = [24, 78], strides = [1, 1]} : vector<24x100xf32> to vector<24x78xf32>
    %188 = vector.extract_strided_slice %185 {offsets = [0, 2], sizes = [24, 78], strides = [1, 1]} : vector<24x100xf32> to vector<24x78xf32>
    %189 = vector.extract_strided_slice %185 {offsets = [0, 10], sizes = [24, 78], strides = [1, 1]} : vector<24x100xf32> to vector<24x78xf32>
    %190 = vector.extract_strided_slice %185 {offsets = [0, 11], sizes = [24, 78], strides = [1, 1]} : vector<24x100xf32> to vector<24x78xf32>
    %191 = vector.extract_strided_slice %185 {offsets = [0, 12], sizes = [24, 78], strides = [1, 1]} : vector<24x100xf32> to vector<24x78xf32>
    %192 = vector.extract_strided_slice %185 {offsets = [0, 20], sizes = [24, 78], strides = [1, 1]} : vector<24x100xf32> to vector<24x78xf32>
    %193 = vector.extract_strided_slice %185 {offsets = [0, 21], sizes = [24, 78], strides = [1, 1]} : vector<24x100xf32> to vector<24x78xf32>
    %194 = vector.extract_strided_slice %185 {offsets = [0, 22], sizes = [24, 78], strides = [1, 1]} : vector<24x100xf32> to vector<24x78xf32>
    %195 = tpu.concatenate %186, %187, %188, %189, %190, %191, %192, %193, %194 in 0 : vector<24x78xf32>, vector<24x78xf32>, vector<24x78xf32>, vector<24x78xf32>, vector<24x78xf32>, vector<24x78xf32>, vector<24x78xf32>, vector<24x78xf32>, vector<24x78xf32> -> vector<216x78xf32>
    %c0_136 = arith.constant 0 : index
    %c0_137 = arith.constant 0 : index
    %196 = vector.load %arg5[%c0_136, %c0_137] : memref<8x216xf32, #tpu.memory_space<vmem>>, vector<8x216xf32>
    %cst_138 = arith.constant dense<0.000000e+00> : vector<8x78xf32>
    %197 = tpu.matmul %196, %195, %cst_138 {dimension_numbers = #tpu.dot_dimension_numbers<[1], [0], [0], [1], [0, 0, 1, 1], [], []>} : vector<8x216xf32>, vector<216x78xf32>, vector<8x78xf32> -> vector<8x78xf32>
    %c0_139 = arith.constant 0 : index
    %c0_140 = arith.constant 0 : index
    %198 = vector.load %arg6[%c0_139, %c0_140] : memref<78x100xf32, #tpu.memory_space<vmem>>, vector<78x100xf32>
    %cst_141 = arith.constant dense<0.000000e+00> : vector<8x100xf32>
    %199 = tpu.matmul %197, %198, %cst_141 {dimension_numbers = #tpu.dot_dimension_numbers<[1], [0], [0], [1], [0, 0, 1, 1], [], []>} : vector<8x78xf32>, vector<78x100xf32>, vector<8x100xf32> -> vector<8x100xf32>
    %c0_142 = arith.constant 0 : index
    %c3_143 = arith.constant 3 : index
    %c0_144 = arith.constant 0 : index
    %c0_145 = arith.constant 0 : index
    %200 = vector.load %arg7[%c0_142, %c3_143, %c0_144, %c0_145] : memref<1x10x8x100xf32, #tpu.memory_space<vmem>>, vector<1x1x8x100xf32>
    %201 = vector.shape_cast %200 : vector<1x1x8x100xf32> to vector<8x100xf32>
    %202 = vector.shape_cast %199 : vector<8x100xf32> to vector<1x1x8x100xf32>
    tpu.vector_store %arg7[%c0_142, %c3_143, %c0_144, %c0_145], %202 {strides = array<i32>} : memref<1x10x8x100xf32, #tpu.memory_space<vmem>>, vector<1x1x8x100xf32>,
    %cst_146 = arith.constant dense<0.000000e+00> : vector<8xf32>
    %203 = vector.multi_reduction <add>, %199, %cst_146 [1] : vector<8x100xf32> to vector<8xf32>
    %204 = vector.shape_cast %203 : vector<8xf32> to vector<8x1xf32>
    %205 = arith.addf %138, %204 : vector<8x1xf32>
    %206 = arith.mulf %199, %199 : vector<8x100xf32>
    %cst_147 = arith.constant dense<0.000000e+00> : vector<8xf32>
    %207 = vector.multi_reduction <add>, %206, %cst_147 [1] : vector<8x100xf32> to vector<8xf32>
    %208 = vector.shape_cast %207 : vector<8xf32> to vector<8x1xf32>
    %209 = arith.addf %142, %208 : vector<8x1xf32>
    %c0_148 = arith.constant 0 : index
    %c3_149 = arith.constant 3 : index
    %c0_150 = arith.constant 0 : index
    %c0_151 = arith.constant 0 : index
    %210 = vector.load %arg1[%c0_148, %c3_149, %c0_150, %c0_151] : memref<1x10x8x100xf32, #tpu.memory_space<vmem>>, vector<1x1x8x100xf32>
    %211 = vector.shape_cast %210 : vector<1x1x8x100xf32> to vector<8x100xf32>
    %c0_152 = arith.constant 0 : index
    %c0_153 = arith.constant 0 : index
    %212 = vector.load %arg3[%c0_152, %c0_153] : memref<8x1xf32, #tpu.memory_space<vmem>>, vector<8x1xf32>
    %213 = vector.broadcast %212 : vector<8x1xf32> to vector<8x100xf32>
    %214 = arith.mulf %211, %213 : vector<8x100xf32>
    %c0_154 = arith.constant 0 : index
    %c0_155 = arith.constant 0 : index
    %215 = vector.load %arg4[%c0_154, %c0_155] : memref<8x1xf32, #tpu.memory_space<vmem>>, vector<8x1xf32>
    %216 = vector.broadcast %215 : vector<8x1xf32> to vector<8x100xf32>
    %217 = arith.addf %214, %216 : vector<8x100xf32>
    %cst_156 = arith.constant 0.000000e+00 : f32
    %218 = vector.broadcast %cst_156 : f32 to vector<8x100xf32>
    %219 = arith.maximumf %217, %218 : vector<8x100xf32>
    %c3_157 = arith.constant 3 : index
    %c0_158 = arith.constant 0 : index
    %c0_159 = arith.constant 0 : index
    %220 = vector.load %arg2[%c3_157, %c0_158, %c0_159] : memref<10x1x100xf32, #tpu.memory_space<vmem>>, vector<1x1x100xf32>
    %221 = vector.shape_cast %220 : vector<1x1x100xf32> to vector<1x100xf32>
    %222 = vector.broadcast %221 : vector<1x100xf32> to vector<8x100xf32>
    %223 = arith.mulf %219, %222 : vector<8x100xf32>
    %c0_160 = arith.constant 0 : index
    %c4_161 = arith.constant 4 : index
    %c0_162 = arith.constant 0 : index
    %c0_163 = arith.constant 0 : index
    %224 = vector.load %arg1[%c0_160, %c4_161, %c0_162, %c0_163] : memref<1x10x8x100xf32, #tpu.memory_space<vmem>>, vector<1x1x8x100xf32>
    %225 = vector.shape_cast %224 : vector<1x1x8x100xf32> to vector<8x100xf32>
    %c0_164 = arith.constant 0 : index
    %c0_165 = arith.constant 0 : index
    %226 = vector.load %arg3[%c0_164, %c0_165] : memref<8x1xf32, #tpu.memory_space<vmem>>, vector<8x1xf32>
    %227 = vector.broadcast %226 : vector<8x1xf32> to vector<8x100xf32>
    %228 = arith.mulf %225, %227 : vector<8x100xf32>
    %c0_166 = arith.constant 0 : index
    %c0_167 = arith.constant 0 : index
    %229 = vector.load %arg4[%c0_166, %c0_167] : memref<8x1xf32, #tpu.memory_space<vmem>>, vector<8x1xf32>
    %230 = vector.broadcast %229 : vector<8x1xf32> to vector<8x100xf32>
    %231 = arith.addf %228, %230 : vector<8x100xf32>
    %cst_168 = arith.constant 0.000000e+00 : f32
    %232 = vector.broadcast %cst_168 : f32 to vector<8x100xf32>
    %233 = arith.maximumf %231, %232 : vector<8x100xf32>
    %c4_169 = arith.constant 4 : index
    %c0_170 = arith.constant 0 : index
    %c0_171 = arith.constant 0 : index
    %234 = vector.load %arg2[%c4_169, %c0_170, %c0_171] : memref<10x1x100xf32, #tpu.memory_space<vmem>>, vector<1x1x100xf32>
    %235 = vector.shape_cast %234 : vector<1x1x100xf32> to vector<1x100xf32>
    %236 = vector.broadcast %235 : vector<1x100xf32> to vector<8x100xf32>
    %237 = arith.mulf %233, %236 : vector<8x100xf32>
    %c0_172 = arith.constant 0 : index
    %c5 = arith.constant 5 : index
    %c0_173 = arith.constant 0 : index
    %c0_174 = arith.constant 0 : index
    %238 = vector.load %arg1[%c0_172, %c5, %c0_173, %c0_174] : memref<1x10x8x100xf32, #tpu.memory_space<vmem>>, vector<1x1x8x100xf32>
    %239 = vector.shape_cast %238 : vector<1x1x8x100xf32> to vector<8x100xf32>
    %c0_175 = arith.constant 0 : index
    %c0_176 = arith.constant 0 : index
    %240 = vector.load %arg3[%c0_175, %c0_176] : memref<8x1xf32, #tpu.memory_space<vmem>>, vector<8x1xf32>
    %241 = vector.broadcast %240 : vector<8x1xf32> to vector<8x100xf32>
    %242 = arith.mulf %239, %241 : vector<8x100xf32>
    %c0_177 = arith.constant 0 : index
    %c0_178 = arith.constant 0 : index
    %243 = vector.load %arg4[%c0_177, %c0_178] : memref<8x1xf32, #tpu.memory_space<vmem>>, vector<8x1xf32>
    %244 = vector.broadcast %243 : vector<8x1xf32> to vector<8x100xf32>
    %245 = arith.addf %242, %244 : vector<8x100xf32>
    %cst_179 = arith.constant 0.000000e+00 : f32
    %246 = vector.broadcast %cst_179 : f32 to vector<8x100xf32>
    %247 = arith.maximumf %245, %246 : vector<8x100xf32>
    %c5_180 = arith.constant 5 : index
    %c0_181 = arith.constant 0 : index
    %c0_182 = arith.constant 0 : index
    %248 = vector.load %arg2[%c5_180, %c0_181, %c0_182] : memref<10x1x100xf32, #tpu.memory_space<vmem>>, vector<1x1x100xf32>
    %249 = vector.shape_cast %248 : vector<1x1x100xf32> to vector<1x100xf32>
    %250 = vector.broadcast %249 : vector<1x100xf32> to vector<8x100xf32>
    %251 = arith.mulf %247, %250 : vector<8x100xf32>
    %252 = tpu.concatenate %223, %237, %251 in 0 : vector<8x100xf32>, vector<8x100xf32>, vector<8x100xf32> -> vector<24x100xf32>
    %253 = vector.extract_strided_slice %252 {offsets = [0, 0], sizes = [24, 78], strides = [1, 1]} : vector<24x100xf32> to vector<24x78xf32>
    %254 = vector.extract_strided_slice %252 {offsets = [0, 1], sizes = [24, 78], strides = [1, 1]} : vector<24x100xf32> to vector<24x78xf32>
    %255 = vector.extract_strided_slice %252 {offsets = [0, 2], sizes = [24, 78], strides = [1, 1]} : vector<24x100xf32> to vector<24x78xf32>
    %256 = vector.extract_strided_slice %252 {offsets = [0, 10], sizes = [24, 78], strides = [1, 1]} : vector<24x100xf32> to vector<24x78xf32>
    %257 = vector.extract_strided_slice %252 {offsets = [0, 11], sizes = [24, 78], strides = [1, 1]} : vector<24x100xf32> to vector<24x78xf32>
    %258 = vector.extract_strided_slice %252 {offsets = [0, 12], sizes = [24, 78], strides = [1, 1]} : vector<24x100xf32> to vector<24x78xf32>
    %259 = vector.extract_strided_slice %252 {offsets = [0, 20], sizes = [24, 78], strides = [1, 1]} : vector<24x100xf32> to vector<24x78xf32>
    %260 = vector.extract_strided_slice %252 {offsets = [0, 21], sizes = [24, 78], strides = [1, 1]} : vector<24x100xf32> to vector<24x78xf32>
    %261 = vector.extract_strided_slice %252 {offsets = [0, 22], sizes = [24, 78], strides = [1, 1]} : vector<24x100xf32> to vector<24x78xf32>
    %262 = tpu.concatenate %253, %254, %255, %256, %257, %258, %259, %260, %261 in 0 : vector<24x78xf32>, vector<24x78xf32>, vector<24x78xf32>, vector<24x78xf32>, vector<24x78xf32>, vector<24x78xf32>, vector<24x78xf32>, vector<24x78xf32>, vector<24x78xf32> -> vector<216x78xf32>
    %c0_183 = arith.constant 0 : index
    %c0_184 = arith.constant 0 : index
    %263 = vector.load %arg5[%c0_183, %c0_184] : memref<8x216xf32, #tpu.memory_space<vmem>>, vector<8x216xf32>
    %cst_185 = arith.constant dense<0.000000e+00> : vector<8x78xf32>
    %264 = tpu.matmul %263, %262, %cst_185 {dimension_numbers = #tpu.dot_dimension_numbers<[1], [0], [0], [1], [0, 0, 1, 1], [], []>} : vector<8x216xf32>, vector<216x78xf32>, vector<8x78xf32> -> vector<8x78xf32>
    %c0_186 = arith.constant 0 : index
    %c0_187 = arith.constant 0 : index
    %265 = vector.load %arg6[%c0_186, %c0_187] : memref<78x100xf32, #tpu.memory_space<vmem>>, vector<78x100xf32>
    %cst_188 = arith.constant dense<0.000000e+00> : vector<8x100xf32>
    %266 = tpu.matmul %264, %265, %cst_188 {dimension_numbers = #tpu.dot_dimension_numbers<[1], [0], [0], [1], [0, 0, 1, 1], [], []>} : vector<8x78xf32>, vector<78x100xf32>, vector<8x100xf32> -> vector<8x100xf32>
    %c0_189 = arith.constant 0 : index
    %c4_190 = arith.constant 4 : index
    %c0_191 = arith.constant 0 : index
    %c0_192 = arith.constant 0 : index
    %267 = vector.load %arg7[%c0_189, %c4_190, %c0_191, %c0_192] : memref<1x10x8x100xf32, #tpu.memory_space<vmem>>, vector<1x1x8x100xf32>
    %268 = vector.shape_cast %267 : vector<1x1x8x100xf32> to vector<8x100xf32>
    %269 = vector.shape_cast %266 : vector<8x100xf32> to vector<1x1x8x100xf32>
    tpu.vector_store %arg7[%c0_189, %c4_190, %c0_191, %c0_192], %269 {strides = array<i32>} : memref<1x10x8x100xf32, #tpu.memory_space<vmem>>, vector<1x1x8x100xf32>,
    %cst_193 = arith.constant dense<0.000000e+00> : vector<8xf32>
    %270 = vector.multi_reduction <add>, %266, %cst_193 [1] : vector<8x100xf32> to vector<8xf32>
    %271 = vector.shape_cast %270 : vector<8xf32> to vector<8x1xf32>
    %272 = arith.addf %205, %271 : vector<8x1xf32>
    %273 = arith.mulf %266, %266 : vector<8x100xf32>
    %cst_194 = arith.constant dense<0.000000e+00> : vector<8xf32>
    %274 = vector.multi_reduction <add>, %273, %cst_194 [1] : vector<8x100xf32> to vector<8xf32>
    %275 = vector.shape_cast %274 : vector<8xf32> to vector<8x1xf32>
    %276 = arith.addf %209, %275 : vector<8x1xf32>
    %c0_195 = arith.constant 0 : index
    %c4_196 = arith.constant 4 : index
    %c0_197 = arith.constant 0 : index
    %c0_198 = arith.constant 0 : index
    %277 = vector.load %arg1[%c0_195, %c4_196, %c0_197, %c0_198] : memref<1x10x8x100xf32, #tpu.memory_space<vmem>>, vector<1x1x8x100xf32>
    %278 = vector.shape_cast %277 : vector<1x1x8x100xf32> to vector<8x100xf32>
    %c0_199 = arith.constant 0 : index
    %c0_200 = arith.constant 0 : index
    %279 = vector.load %arg3[%c0_199, %c0_200] : memref<8x1xf32, #tpu.memory_space<vmem>>, vector<8x1xf32>
    %280 = vector.broadcast %279 : vector<8x1xf32> to vector<8x100xf32>
    %281 = arith.mulf %278, %280 : vector<8x100xf32>
    %c0_201 = arith.constant 0 : index
    %c0_202 = arith.constant 0 : index
    %282 = vector.load %arg4[%c0_201, %c0_202] : memref<8x1xf32, #tpu.memory_space<vmem>>, vector<8x1xf32>
    %283 = vector.broadcast %282 : vector<8x1xf32> to vector<8x100xf32>
    %284 = arith.addf %281, %283 : vector<8x100xf32>
    %cst_203 = arith.constant 0.000000e+00 : f32
    %285 = vector.broadcast %cst_203 : f32 to vector<8x100xf32>
    %286 = arith.maximumf %284, %285 : vector<8x100xf32>
    %c4_204 = arith.constant 4 : index
    %c0_205 = arith.constant 0 : index
    %c0_206 = arith.constant 0 : index
    %287 = vector.load %arg2[%c4_204, %c0_205, %c0_206] : memref<10x1x100xf32, #tpu.memory_space<vmem>>, vector<1x1x100xf32>
    %288 = vector.shape_cast %287 : vector<1x1x100xf32> to vector<1x100xf32>
    %289 = vector.broadcast %288 : vector<1x100xf32> to vector<8x100xf32>
    %290 = arith.mulf %286, %289 : vector<8x100xf32>
    %c0_207 = arith.constant 0 : index
    %c5_208 = arith.constant 5 : index
    %c0_209 = arith.constant 0 : index
    %c0_210 = arith.constant 0 : index
    %291 = vector.load %arg1[%c0_207, %c5_208, %c0_209, %c0_210] : memref<1x10x8x100xf32, #tpu.memory_space<vmem>>, vector<1x1x8x100xf32>
    %292 = vector.shape_cast %291 : vector<1x1x8x100xf32> to vector<8x100xf32>
    %c0_211 = arith.constant 0 : index
    %c0_212 = arith.constant 0 : index
    %293 = vector.load %arg3[%c0_211, %c0_212] : memref<8x1xf32, #tpu.memory_space<vmem>>, vector<8x1xf32>
    %294 = vector.broadcast %293 : vector<8x1xf32> to vector<8x100xf32>
    %295 = arith.mulf %292, %294 : vector<8x100xf32>
    %c0_213 = arith.constant 0 : index
    %c0_214 = arith.constant 0 : index
    %296 = vector.load %arg4[%c0_213, %c0_214] : memref<8x1xf32, #tpu.memory_space<vmem>>, vector<8x1xf32>
    %297 = vector.broadcast %296 : vector<8x1xf32> to vector<8x100xf32>
    %298 = arith.addf %295, %297 : vector<8x100xf32>
    %cst_215 = arith.constant 0.000000e+00 : f32
    %299 = vector.broadcast %cst_215 : f32 to vector<8x100xf32>
    %300 = arith.maximumf %298, %299 : vector<8x100xf32>
    %c5_216 = arith.constant 5 : index
    %c0_217 = arith.constant 0 : index
    %c0_218 = arith.constant 0 : index
    %301 = vector.load %arg2[%c5_216, %c0_217, %c0_218] : memref<10x1x100xf32, #tpu.memory_space<vmem>>, vector<1x1x100xf32>
    %302 = vector.shape_cast %301 : vector<1x1x100xf32> to vector<1x100xf32>
    %303 = vector.broadcast %302 : vector<1x100xf32> to vector<8x100xf32>
    %304 = arith.mulf %300, %303 : vector<8x100xf32>
    %c0_219 = arith.constant 0 : index
    %c6 = arith.constant 6 : index
    %c0_220 = arith.constant 0 : index
    %c0_221 = arith.constant 0 : index
    %305 = vector.load %arg1[%c0_219, %c6, %c0_220, %c0_221] : memref<1x10x8x100xf32, #tpu.memory_space<vmem>>, vector<1x1x8x100xf32>
    %306 = vector.shape_cast %305 : vector<1x1x8x100xf32> to vector<8x100xf32>
    %c0_222 = arith.constant 0 : index
    %c0_223 = arith.constant 0 : index
    %307 = vector.load %arg3[%c0_222, %c0_223] : memref<8x1xf32, #tpu.memory_space<vmem>>, vector<8x1xf32>
    %308 = vector.broadcast %307 : vector<8x1xf32> to vector<8x100xf32>
    %309 = arith.mulf %306, %308 : vector<8x100xf32>
    %c0_224 = arith.constant 0 : index
    %c0_225 = arith.constant 0 : index
    %310 = vector.load %arg4[%c0_224, %c0_225] : memref<8x1xf32, #tpu.memory_space<vmem>>, vector<8x1xf32>
    %311 = vector.broadcast %310 : vector<8x1xf32> to vector<8x100xf32>
    %312 = arith.addf %309, %311 : vector<8x100xf32>
    %cst_226 = arith.constant 0.000000e+00 : f32
    %313 = vector.broadcast %cst_226 : f32 to vector<8x100xf32>
    %314 = arith.maximumf %312, %313 : vector<8x100xf32>
    %c6_227 = arith.constant 6 : index
    %c0_228 = arith.constant 0 : index
    %c0_229 = arith.constant 0 : index
    %315 = vector.load %arg2[%c6_227, %c0_228, %c0_229] : memref<10x1x100xf32, #tpu.memory_space<vmem>>, vector<1x1x100xf32>
    %316 = vector.shape_cast %315 : vector<1x1x100xf32> to vector<1x100xf32>
    %317 = vector.broadcast %316 : vector<1x100xf32> to vector<8x100xf32>
    %318 = arith.mulf %314, %317 : vector<8x100xf32>
    %319 = tpu.concatenate %290, %304, %318 in 0 : vector<8x100xf32>, vector<8x100xf32>, vector<8x100xf32> -> vector<24x100xf32>
    %320 = vector.extract_strided_slice %319 {offsets = [0, 0], sizes = [24, 78], strides = [1, 1]} : vector<24x100xf32> to vector<24x78xf32>
    %321 = vector.extract_strided_slice %319 {offsets = [0, 1], sizes = [24, 78], strides = [1, 1]} : vector<24x100xf32> to vector<24x78xf32>
    %322 = vector.extract_strided_slice %319 {offsets = [0, 2], sizes = [24, 78], strides = [1, 1]} : vector<24x100xf32> to vector<24x78xf32>
    %323 = vector.extract_strided_slice %319 {offsets = [0, 10], sizes = [24, 78], strides = [1, 1]} : vector<24x100xf32> to vector<24x78xf32>
    %324 = vector.extract_strided_slice %319 {offsets = [0, 11], sizes = [24, 78], strides = [1, 1]} : vector<24x100xf32> to vector<24x78xf32>
    %325 = vector.extract_strided_slice %319 {offsets = [0, 12], sizes = [24, 78], strides = [1, 1]} : vector<24x100xf32> to vector<24x78xf32>
    %326 = vector.extract_strided_slice %319 {offsets = [0, 20], sizes = [24, 78], strides = [1, 1]} : vector<24x100xf32> to vector<24x78xf32>
    %327 = vector.extract_strided_slice %319 {offsets = [0, 21], sizes = [24, 78], strides = [1, 1]} : vector<24x100xf32> to vector<24x78xf32>
    %328 = vector.extract_strided_slice %319 {offsets = [0, 22], sizes = [24, 78], strides = [1, 1]} : vector<24x100xf32> to vector<24x78xf32>
    %329 = tpu.concatenate %320, %321, %322, %323, %324, %325, %326, %327, %328 in 0 : vector<24x78xf32>, vector<24x78xf32>, vector<24x78xf32>, vector<24x78xf32>, vector<24x78xf32>, vector<24x78xf32>, vector<24x78xf32>, vector<24x78xf32>, vector<24x78xf32> -> vector<216x78xf32>
    %c0_230 = arith.constant 0 : index
    %c0_231 = arith.constant 0 : index
    %330 = vector.load %arg5[%c0_230, %c0_231] : memref<8x216xf32, #tpu.memory_space<vmem>>, vector<8x216xf32>
    %cst_232 = arith.constant dense<0.000000e+00> : vector<8x78xf32>
    %331 = tpu.matmul %330, %329, %cst_232 {dimension_numbers = #tpu.dot_dimension_numbers<[1], [0], [0], [1], [0, 0, 1, 1], [], []>} : vector<8x216xf32>, vector<216x78xf32>, vector<8x78xf32> -> vector<8x78xf32>
    %c0_233 = arith.constant 0 : index
    %c0_234 = arith.constant 0 : index
    %332 = vector.load %arg6[%c0_233, %c0_234] : memref<78x100xf32, #tpu.memory_space<vmem>>, vector<78x100xf32>
    %cst_235 = arith.constant dense<0.000000e+00> : vector<8x100xf32>
    %333 = tpu.matmul %331, %332, %cst_235 {dimension_numbers = #tpu.dot_dimension_numbers<[1], [0], [0], [1], [0, 0, 1, 1], [], []>} : vector<8x78xf32>, vector<78x100xf32>, vector<8x100xf32> -> vector<8x100xf32>
    %c0_236 = arith.constant 0 : index
    %c5_237 = arith.constant 5 : index
    %c0_238 = arith.constant 0 : index
    %c0_239 = arith.constant 0 : index
    %334 = vector.load %arg7[%c0_236, %c5_237, %c0_238, %c0_239] : memref<1x10x8x100xf32, #tpu.memory_space<vmem>>, vector<1x1x8x100xf32>
    %335 = vector.shape_cast %334 : vector<1x1x8x100xf32> to vector<8x100xf32>
    %336 = vector.shape_cast %333 : vector<8x100xf32> to vector<1x1x8x100xf32>
    tpu.vector_store %arg7[%c0_236, %c5_237, %c0_238, %c0_239], %336 {strides = array<i32>} : memref<1x10x8x100xf32, #tpu.memory_space<vmem>>, vector<1x1x8x100xf32>,
    %cst_240 = arith.constant dense<0.000000e+00> : vector<8xf32>
    %337 = vector.multi_reduction <add>, %333, %cst_240 [1] : vector<8x100xf32> to vector<8xf32>
    %338 = vector.shape_cast %337 : vector<8xf32> to vector<8x1xf32>
    %339 = arith.addf %272, %338 : vector<8x1xf32>
    %340 = arith.mulf %333, %333 : vector<8x100xf32>
    %cst_241 = arith.constant dense<0.000000e+00> : vector<8xf32>
    %341 = vector.multi_reduction <add>, %340, %cst_241 [1] : vector<8x100xf32> to vector<8xf32>
    %342 = vector.shape_cast %341 : vector<8xf32> to vector<8x1xf32>
    %343 = arith.addf %276, %342 : vector<8x1xf32>
    %c0_242 = arith.constant 0 : index
    %c5_243 = arith.constant 5 : index
    %c0_244 = arith.constant 0 : index
    %c0_245 = arith.constant 0 : index
    %344 = vector.load %arg1[%c0_242, %c5_243, %c0_244, %c0_245] : memref<1x10x8x100xf32, #tpu.memory_space<vmem>>, vector<1x1x8x100xf32>
    %345 = vector.shape_cast %344 : vector<1x1x8x100xf32> to vector<8x100xf32>
    %c0_246 = arith.constant 0 : index
    %c0_247 = arith.constant 0 : index
    %346 = vector.load %arg3[%c0_246, %c0_247] : memref<8x1xf32, #tpu.memory_space<vmem>>, vector<8x1xf32>
    %347 = vector.broadcast %346 : vector<8x1xf32> to vector<8x100xf32>
    %348 = arith.mulf %345, %347 : vector<8x100xf32>
    %c0_248 = arith.constant 0 : index
    %c0_249 = arith.constant 0 : index
    %349 = vector.load %arg4[%c0_248, %c0_249] : memref<8x1xf32, #tpu.memory_space<vmem>>, vector<8x1xf32>
    %350 = vector.broadcast %349 : vector<8x1xf32> to vector<8x100xf32>
    %351 = arith.addf %348, %350 : vector<8x100xf32>
    %cst_250 = arith.constant 0.000000e+00 : f32
    %352 = vector.broadcast %cst_250 : f32 to vector<8x100xf32>
    %353 = arith.maximumf %351, %352 : vector<8x100xf32>
    %c5_251 = arith.constant 5 : index
    %c0_252 = arith.constant 0 : index
    %c0_253 = arith.constant 0 : index
    %354 = vector.load %arg2[%c5_251, %c0_252, %c0_253] : memref<10x1x100xf32, #tpu.memory_space<vmem>>, vector<1x1x100xf32>
    %355 = vector.shape_cast %354 : vector<1x1x100xf32> to vector<1x100xf32>
    %356 = vector.broadcast %355 : vector<1x100xf32> to vector<8x100xf32>
    %357 = arith.mulf %353, %356 : vector<8x100xf32>
    %c0_254 = arith.constant 0 : index
    %c6_255 = arith.constant 6 : index
    %c0_256 = arith.constant 0 : index
    %c0_257 = arith.constant 0 : index
    %358 = vector.load %arg1[%c0_254, %c6_255, %c0_256, %c0_257] : memref<1x10x8x100xf32, #tpu.memory_space<vmem>>, vector<1x1x8x100xf32>
    %359 = vector.shape_cast %358 : vector<1x1x8x100xf32> to vector<8x100xf32>
    %c0_258 = arith.constant 0 : index
    %c0_259 = arith.constant 0 : index
    %360 = vector.load %arg3[%c0_258, %c0_259] : memref<8x1xf32, #tpu.memory_space<vmem>>, vector<8x1xf32>
    %361 = vector.broadcast %360 : vector<8x1xf32> to vector<8x100xf32>
    %362 = arith.mulf %359, %361 : vector<8x100xf32>
    %c0_260 = arith.constant 0 : index
    %c0_261 = arith.constant 0 : index
    %363 = vector.load %arg4[%c0_260, %c0_261] : memref<8x1xf32, #tpu.memory_space<vmem>>, vector<8x1xf32>
    %364 = vector.broadcast %363 : vector<8x1xf32> to vector<8x100xf32>
    %365 = arith.addf %362, %364 : vector<8x100xf32>
    %cst_262 = arith.constant 0.000000e+00 : f32
    %366 = vector.broadcast %cst_262 : f32 to vector<8x100xf32>
    %367 = arith.maximumf %365, %366 : vector<8x100xf32>
    %c6_263 = arith.constant 6 : index
    %c0_264 = arith.constant 0 : index
    %c0_265 = arith.constant 0 : index
    %368 = vector.load %arg2[%c6_263, %c0_264, %c0_265] : memref<10x1x100xf32, #tpu.memory_space<vmem>>, vector<1x1x100xf32>
    %369 = vector.shape_cast %368 : vector<1x1x100xf32> to vector<1x100xf32>
    %370 = vector.broadcast %369 : vector<1x100xf32> to vector<8x100xf32>
    %371 = arith.mulf %367, %370 : vector<8x100xf32>
    %c0_266 = arith.constant 0 : index
    %c7 = arith.constant 7 : index
    %c0_267 = arith.constant 0 : index
    %c0_268 = arith.constant 0 : index
    %372 = vector.load %arg1[%c0_266, %c7, %c0_267, %c0_268] : memref<1x10x8x100xf32, #tpu.memory_space<vmem>>, vector<1x1x8x100xf32>
    %373 = vector.shape_cast %372 : vector<1x1x8x100xf32> to vector<8x100xf32>
    %c0_269 = arith.constant 0 : index
    %c0_270 = arith.constant 0 : index
    %374 = vector.load %arg3[%c0_269, %c0_270] : memref<8x1xf32, #tpu.memory_space<vmem>>, vector<8x1xf32>
    %375 = vector.broadcast %374 : vector<8x1xf32> to vector<8x100xf32>
    %376 = arith.mulf %373, %375 : vector<8x100xf32>
    %c0_271 = arith.constant 0 : index
    %c0_272 = arith.constant 0 : index
    %377 = vector.load %arg4[%c0_271, %c0_272] : memref<8x1xf32, #tpu.memory_space<vmem>>, vector<8x1xf32>
    %378 = vector.broadcast %377 : vector<8x1xf32> to vector<8x100xf32>
    %379 = arith.addf %376, %378 : vector<8x100xf32>
    %cst_273 = arith.constant 0.000000e+00 : f32
    %380 = vector.broadcast %cst_273 : f32 to vector<8x100xf32>
    %381 = arith.maximumf %379, %380 : vector<8x100xf32>
    %c7_274 = arith.constant 7 : index
    %c0_275 = arith.constant 0 : index
    %c0_276 = arith.constant 0 : index
    %382 = vector.load %arg2[%c7_274, %c0_275, %c0_276] : memref<10x1x100xf32, #tpu.memory_space<vmem>>, vector<1x1x100xf32>
    %383 = vector.shape_cast %382 : vector<1x1x100xf32> to vector<1x100xf32>
    %384 = vector.broadcast %383 : vector<1x100xf32> to vector<8x100xf32>
    %385 = arith.mulf %381, %384 : vector<8x100xf32>
    %386 = tpu.concatenate %357, %371, %385 in 0 : vector<8x100xf32>, vector<8x100xf32>, vector<8x100xf32> -> vector<24x100xf32>
    %387 = vector.extract_strided_slice %386 {offsets = [0, 0], sizes = [24, 78], strides = [1, 1]} : vector<24x100xf32> to vector<24x78xf32>
    %388 = vector.extract_strided_slice %386 {offsets = [0, 1], sizes = [24, 78], strides = [1, 1]} : vector<24x100xf32> to vector<24x78xf32>
    %389 = vector.extract_strided_slice %386 {offsets = [0, 2], sizes = [24, 78], strides = [1, 1]} : vector<24x100xf32> to vector<24x78xf32>
    %390 = vector.extract_strided_slice %386 {offsets = [0, 10], sizes = [24, 78], strides = [1, 1]} : vector<24x100xf32> to vector<24x78xf32>
    %391 = vector.extract_strided_slice %386 {offsets = [0, 11], sizes = [24, 78], strides = [1, 1]} : vector<24x100xf32> to vector<24x78xf32>
    %392 = vector.extract_strided_slice %386 {offsets = [0, 12], sizes = [24, 78], strides = [1, 1]} : vector<24x100xf32> to vector<24x78xf32>
    %393 = vector.extract_strided_slice %386 {offsets = [0, 20], sizes = [24, 78], strides = [1, 1]} : vector<24x100xf32> to vector<24x78xf32>
    %394 = vector.extract_strided_slice %386 {offsets = [0, 21], sizes = [24, 78], strides = [1, 1]} : vector<24x100xf32> to vector<24x78xf32>
    %395 = vector.extract_strided_slice %386 {offsets = [0, 22], sizes = [24, 78], strides = [1, 1]} : vector<24x100xf32> to vector<24x78xf32>
    %396 = tpu.concatenate %387, %388, %389, %390, %391, %392, %393, %394, %395 in 0 : vector<24x78xf32>, vector<24x78xf32>, vector<24x78xf32>, vector<24x78xf32>, vector<24x78xf32>, vector<24x78xf32>, vector<24x78xf32>, vector<24x78xf32>, vector<24x78xf32> -> vector<216x78xf32>
    %c0_277 = arith.constant 0 : index
    %c0_278 = arith.constant 0 : index
    %397 = vector.load %arg5[%c0_277, %c0_278] : memref<8x216xf32, #tpu.memory_space<vmem>>, vector<8x216xf32>
    %cst_279 = arith.constant dense<0.000000e+00> : vector<8x78xf32>
    %398 = tpu.matmul %397, %396, %cst_279 {dimension_numbers = #tpu.dot_dimension_numbers<[1], [0], [0], [1], [0, 0, 1, 1], [], []>} : vector<8x216xf32>, vector<216x78xf32>, vector<8x78xf32> -> vector<8x78xf32>
    %c0_280 = arith.constant 0 : index
    %c0_281 = arith.constant 0 : index
    %399 = vector.load %arg6[%c0_280, %c0_281] : memref<78x100xf32, #tpu.memory_space<vmem>>, vector<78x100xf32>
    %cst_282 = arith.constant dense<0.000000e+00> : vector<8x100xf32>
    %400 = tpu.matmul %398, %399, %cst_282 {dimension_numbers = #tpu.dot_dimension_numbers<[1], [0], [0], [1], [0, 0, 1, 1], [], []>} : vector<8x78xf32>, vector<78x100xf32>, vector<8x100xf32> -> vector<8x100xf32>
    %c0_283 = arith.constant 0 : index
    %c6_284 = arith.constant 6 : index
    %c0_285 = arith.constant 0 : index
    %c0_286 = arith.constant 0 : index
    %401 = vector.load %arg7[%c0_283, %c6_284, %c0_285, %c0_286] : memref<1x10x8x100xf32, #tpu.memory_space<vmem>>, vector<1x1x8x100xf32>
    %402 = vector.shape_cast %401 : vector<1x1x8x100xf32> to vector<8x100xf32>
    %403 = vector.shape_cast %400 : vector<8x100xf32> to vector<1x1x8x100xf32>
    tpu.vector_store %arg7[%c0_283, %c6_284, %c0_285, %c0_286], %403 {strides = array<i32>} : memref<1x10x8x100xf32, #tpu.memory_space<vmem>>, vector<1x1x8x100xf32>,
    %cst_287 = arith.constant dense<0.000000e+00> : vector<8xf32>
    %404 = vector.multi_reduction <add>, %400, %cst_287 [1] : vector<8x100xf32> to vector<8xf32>
    %405 = vector.shape_cast %404 : vector<8xf32> to vector<8x1xf32>
    %406 = arith.addf %339, %405 : vector<8x1xf32>
    %407 = arith.mulf %400, %400 : vector<8x100xf32>
    %cst_288 = arith.constant dense<0.000000e+00> : vector<8xf32>
    %408 = vector.multi_reduction <add>, %407, %cst_288 [1] : vector<8x100xf32> to vector<8xf32>
    %409 = vector.shape_cast %408 : vector<8xf32> to vector<8x1xf32>
    %410 = arith.addf %343, %409 : vector<8x1xf32>
    %c0_289 = arith.constant 0 : index
    %c6_290 = arith.constant 6 : index
    %c0_291 = arith.constant 0 : index
    %c0_292 = arith.constant 0 : index
    %411 = vector.load %arg1[%c0_289, %c6_290, %c0_291, %c0_292] : memref<1x10x8x100xf32, #tpu.memory_space<vmem>>, vector<1x1x8x100xf32>
    %412 = vector.shape_cast %411 : vector<1x1x8x100xf32> to vector<8x100xf32>
    %c0_293 = arith.constant 0 : index
    %c0_294 = arith.constant 0 : index
    %413 = vector.load %arg3[%c0_293, %c0_294] : memref<8x1xf32, #tpu.memory_space<vmem>>, vector<8x1xf32>
    %414 = vector.broadcast %413 : vector<8x1xf32> to vector<8x100xf32>
    %415 = arith.mulf %412, %414 : vector<8x100xf32>
    %c0_295 = arith.constant 0 : index
    %c0_296 = arith.constant 0 : index
    %416 = vector.load %arg4[%c0_295, %c0_296] : memref<8x1xf32, #tpu.memory_space<vmem>>, vector<8x1xf32>
    %417 = vector.broadcast %416 : vector<8x1xf32> to vector<8x100xf32>
    %418 = arith.addf %415, %417 : vector<8x100xf32>
    %cst_297 = arith.constant 0.000000e+00 : f32
    %419 = vector.broadcast %cst_297 : f32 to vector<8x100xf32>
    %420 = arith.maximumf %418, %419 : vector<8x100xf32>
    %c6_298 = arith.constant 6 : index
    %c0_299 = arith.constant 0 : index
    %c0_300 = arith.constant 0 : index
    %421 = vector.load %arg2[%c6_298, %c0_299, %c0_300] : memref<10x1x100xf32, #tpu.memory_space<vmem>>, vector<1x1x100xf32>
    %422 = vector.shape_cast %421 : vector<1x1x100xf32> to vector<1x100xf32>
    %423 = vector.broadcast %422 : vector<1x100xf32> to vector<8x100xf32>
    %424 = arith.mulf %420, %423 : vector<8x100xf32>
    %c0_301 = arith.constant 0 : index
    %c7_302 = arith.constant 7 : index
    %c0_303 = arith.constant 0 : index
    %c0_304 = arith.constant 0 : index
    %425 = vector.load %arg1[%c0_301, %c7_302, %c0_303, %c0_304] : memref<1x10x8x100xf32, #tpu.memory_space<vmem>>, vector<1x1x8x100xf32>
    %426 = vector.shape_cast %425 : vector<1x1x8x100xf32> to vector<8x100xf32>
    %c0_305 = arith.constant 0 : index
    %c0_306 = arith.constant 0 : index
    %427 = vector.load %arg3[%c0_305, %c0_306] : memref<8x1xf32, #tpu.memory_space<vmem>>, vector<8x1xf32>
    %428 = vector.broadcast %427 : vector<8x1xf32> to vector<8x100xf32>
    %429 = arith.mulf %426, %428 : vector<8x100xf32>
    %c0_307 = arith.constant 0 : index
    %c0_308 = arith.constant 0 : index
    %430 = vector.load %arg4[%c0_307, %c0_308] : memref<8x1xf32, #tpu.memory_space<vmem>>, vector<8x1xf32>
    %431 = vector.broadcast %430 : vector<8x1xf32> to vector<8x100xf32>
    %432 = arith.addf %429, %431 : vector<8x100xf32>
    %cst_309 = arith.constant 0.000000e+00 : f32
    %433 = vector.broadcast %cst_309 : f32 to vector<8x100xf32>
    %434 = arith.maximumf %432, %433 : vector<8x100xf32>
    %c7_310 = arith.constant 7 : index
    %c0_311 = arith.constant 0 : index
    %c0_312 = arith.constant 0 : index
    %435 = vector.load %arg2[%c7_310, %c0_311, %c0_312] : memref<10x1x100xf32, #tpu.memory_space<vmem>>, vector<1x1x100xf32>
    %436 = vector.shape_cast %435 : vector<1x1x100xf32> to vector<1x100xf32>
    %437 = vector.broadcast %436 : vector<1x100xf32> to vector<8x100xf32>
    %438 = arith.mulf %434, %437 : vector<8x100xf32>
    %c0_313 = arith.constant 0 : index
    %c8 = arith.constant 8 : index
    %c0_314 = arith.constant 0 : index
    %c0_315 = arith.constant 0 : index
    %439 = vector.load %arg1[%c0_313, %c8, %c0_314, %c0_315] : memref<1x10x8x100xf32, #tpu.memory_space<vmem>>, vector<1x1x8x100xf32>
    %440 = vector.shape_cast %439 : vector<1x1x8x100xf32> to vector<8x100xf32>
    %c0_316 = arith.constant 0 : index
    %c0_317 = arith.constant 0 : index
    %441 = vector.load %arg3[%c0_316, %c0_317] : memref<8x1xf32, #tpu.memory_space<vmem>>, vector<8x1xf32>
    %442 = vector.broadcast %441 : vector<8x1xf32> to vector<8x100xf32>
    %443 = arith.mulf %440, %442 : vector<8x100xf32>
    %c0_318 = arith.constant 0 : index
    %c0_319 = arith.constant 0 : index
    %444 = vector.load %arg4[%c0_318, %c0_319] : memref<8x1xf32, #tpu.memory_space<vmem>>, vector<8x1xf32>
    %445 = vector.broadcast %444 : vector<8x1xf32> to vector<8x100xf32>
    %446 = arith.addf %443, %445 : vector<8x100xf32>
    %cst_320 = arith.constant 0.000000e+00 : f32
    %447 = vector.broadcast %cst_320 : f32 to vector<8x100xf32>
    %448 = arith.maximumf %446, %447 : vector<8x100xf32>
    %c8_321 = arith.constant 8 : index
    %c0_322 = arith.constant 0 : index
    %c0_323 = arith.constant 0 : index
    %449 = vector.load %arg2[%c8_321, %c0_322, %c0_323] : memref<10x1x100xf32, #tpu.memory_space<vmem>>, vector<1x1x100xf32>
    %450 = vector.shape_cast %449 : vector<1x1x100xf32> to vector<1x100xf32>
    %451 = vector.broadcast %450 : vector<1x100xf32> to vector<8x100xf32>
    %452 = arith.mulf %448, %451 : vector<8x100xf32>
    %453 = tpu.concatenate %424, %438, %452 in 0 : vector<8x100xf32>, vector<8x100xf32>, vector<8x100xf32> -> vector<24x100xf32>
    %454 = vector.extract_strided_slice %453 {offsets = [0, 0], sizes = [24, 78], strides = [1, 1]} : vector<24x100xf32> to vector<24x78xf32>
    %455 = vector.extract_strided_slice %453 {offsets = [0, 1], sizes = [24, 78], strides = [1, 1]} : vector<24x100xf32> to vector<24x78xf32>
    %456 = vector.extract_strided_slice %453 {offsets = [0, 2], sizes = [24, 78], strides = [1, 1]} : vector<24x100xf32> to vector<24x78xf32>
    %457 = vector.extract_strided_slice %453 {offsets = [0, 10], sizes = [24, 78], strides = [1, 1]} : vector<24x100xf32> to vector<24x78xf32>
    %458 = vector.extract_strided_slice %453 {offsets = [0, 11], sizes = [24, 78], strides = [1, 1]} : vector<24x100xf32> to vector<24x78xf32>
    %459 = vector.extract_strided_slice %453 {offsets = [0, 12], sizes = [24, 78], strides = [1, 1]} : vector<24x100xf32> to vector<24x78xf32>
    %460 = vector.extract_strided_slice %453 {offsets = [0, 20], sizes = [24, 78], strides = [1, 1]} : vector<24x100xf32> to vector<24x78xf32>
    %461 = vector.extract_strided_slice %453 {offsets = [0, 21], sizes = [24, 78], strides = [1, 1]} : vector<24x100xf32> to vector<24x78xf32>
    %462 = vector.extract_strided_slice %453 {offsets = [0, 22], sizes = [24, 78], strides = [1, 1]} : vector<24x100xf32> to vector<24x78xf32>
    %463 = tpu.concatenate %454, %455, %456, %457, %458, %459, %460, %461, %462 in 0 : vector<24x78xf32>, vector<24x78xf32>, vector<24x78xf32>, vector<24x78xf32>, vector<24x78xf32>, vector<24x78xf32>, vector<24x78xf32>, vector<24x78xf32>, vector<24x78xf32> -> vector<216x78xf32>
    %c0_324 = arith.constant 0 : index
    %c0_325 = arith.constant 0 : index
    %464 = vector.load %arg5[%c0_324, %c0_325] : memref<8x216xf32, #tpu.memory_space<vmem>>, vector<8x216xf32>
    %cst_326 = arith.constant dense<0.000000e+00> : vector<8x78xf32>
    %465 = tpu.matmul %464, %463, %cst_326 {dimension_numbers = #tpu.dot_dimension_numbers<[1], [0], [0], [1], [0, 0, 1, 1], [], []>} : vector<8x216xf32>, vector<216x78xf32>, vector<8x78xf32> -> vector<8x78xf32>
    %c0_327 = arith.constant 0 : index
    %c0_328 = arith.constant 0 : index
    %466 = vector.load %arg6[%c0_327, %c0_328] : memref<78x100xf32, #tpu.memory_space<vmem>>, vector<78x100xf32>
    %cst_329 = arith.constant dense<0.000000e+00> : vector<8x100xf32>
    %467 = tpu.matmul %465, %466, %cst_329 {dimension_numbers = #tpu.dot_dimension_numbers<[1], [0], [0], [1], [0, 0, 1, 1], [], []>} : vector<8x78xf32>, vector<78x100xf32>, vector<8x100xf32> -> vector<8x100xf32>
    %c0_330 = arith.constant 0 : index
    %c7_331 = arith.constant 7 : index
    %c0_332 = arith.constant 0 : index
    %c0_333 = arith.constant 0 : index
    %468 = vector.load %arg7[%c0_330, %c7_331, %c0_332, %c0_333] : memref<1x10x8x100xf32, #tpu.memory_space<vmem>>, vector<1x1x8x100xf32>
    %469 = vector.shape_cast %468 : vector<1x1x8x100xf32> to vector<8x100xf32>
    %470 = vector.shape_cast %467 : vector<8x100xf32> to vector<1x1x8x100xf32>
    tpu.vector_store %arg7[%c0_330, %c7_331, %c0_332, %c0_333], %470 {strides = array<i32>} : memref<1x10x8x100xf32, #tpu.memory_space<vmem>>, vector<1x1x8x100xf32>,
    %cst_334 = arith.constant dense<0.000000e+00> : vector<8xf32>
    %471 = vector.multi_reduction <add>, %467, %cst_334 [1] : vector<8x100xf32> to vector<8xf32>
    %472 = vector.shape_cast %471 : vector<8xf32> to vector<8x1xf32>
    %473 = arith.addf %406, %472 : vector<8x1xf32>
    %474 = arith.mulf %467, %467 : vector<8x100xf32>
    %cst_335 = arith.constant dense<0.000000e+00> : vector<8xf32>
    %475 = vector.multi_reduction <add>, %474, %cst_335 [1] : vector<8x100xf32> to vector<8xf32>
    %476 = vector.shape_cast %475 : vector<8xf32> to vector<8x1xf32>
    %477 = arith.addf %410, %476 : vector<8x1xf32>
    %c0_336 = arith.constant 0 : index
    %c7_337 = arith.constant 7 : index
    %c0_338 = arith.constant 0 : index
    %c0_339 = arith.constant 0 : index
    %478 = vector.load %arg1[%c0_336, %c7_337, %c0_338, %c0_339] : memref<1x10x8x100xf32, #tpu.memory_space<vmem>>, vector<1x1x8x100xf32>
    %479 = vector.shape_cast %478 : vector<1x1x8x100xf32> to vector<8x100xf32>
    %c0_340 = arith.constant 0 : index
    %c0_341 = arith.constant 0 : index
    %480 = vector.load %arg3[%c0_340, %c0_341] : memref<8x1xf32, #tpu.memory_space<vmem>>, vector<8x1xf32>
    %481 = vector.broadcast %480 : vector<8x1xf32> to vector<8x100xf32>
    %482 = arith.mulf %479, %481 : vector<8x100xf32>
    %c0_342 = arith.constant 0 : index
    %c0_343 = arith.constant 0 : index
    %483 = vector.load %arg4[%c0_342, %c0_343] : memref<8x1xf32, #tpu.memory_space<vmem>>, vector<8x1xf32>
    %484 = vector.broadcast %483 : vector<8x1xf32> to vector<8x100xf32>
    %485 = arith.addf %482, %484 : vector<8x100xf32>
    %cst_344 = arith.constant 0.000000e+00 : f32
    %486 = vector.broadcast %cst_344 : f32 to vector<8x100xf32>
    %487 = arith.maximumf %485, %486 : vector<8x100xf32>
    %c7_345 = arith.constant 7 : index
    %c0_346 = arith.constant 0 : index
    %c0_347 = arith.constant 0 : index
    %488 = vector.load %arg2[%c7_345, %c0_346, %c0_347] : memref<10x1x100xf32, #tpu.memory_space<vmem>>, vector<1x1x100xf32>
    %489 = vector.shape_cast %488 : vector<1x1x100xf32> to vector<1x100xf32>
    %490 = vector.broadcast %489 : vector<1x100xf32> to vector<8x100xf32>
    %491 = arith.mulf %487, %490 : vector<8x100xf32>
    %c0_348 = arith.constant 0 : index
    %c8_349 = arith.constant 8 : index
    %c0_350 = arith.constant 0 : index
    %c0_351 = arith.constant 0 : index
    %492 = vector.load %arg1[%c0_348, %c8_349, %c0_350, %c0_351] : memref<1x10x8x100xf32, #tpu.memory_space<vmem>>, vector<1x1x8x100xf32>
    %493 = vector.shape_cast %492 : vector<1x1x8x100xf32> to vector<8x100xf32>
    %c0_352 = arith.constant 0 : index
    %c0_353 = arith.constant 0 : index
    %494 = vector.load %arg3[%c0_352, %c0_353] : memref<8x1xf32, #tpu.memory_space<vmem>>, vector<8x1xf32>
    %495 = vector.broadcast %494 : vector<8x1xf32> to vector<8x100xf32>
    %496 = arith.mulf %493, %495 : vector<8x100xf32>
    %c0_354 = arith.constant 0 : index
    %c0_355 = arith.constant 0 : index
    %497 = vector.load %arg4[%c0_354, %c0_355] : memref<8x1xf32, #tpu.memory_space<vmem>>, vector<8x1xf32>
    %498 = vector.broadcast %497 : vector<8x1xf32> to vector<8x100xf32>
    %499 = arith.addf %496, %498 : vector<8x100xf32>
    %cst_356 = arith.constant 0.000000e+00 : f32
    %500 = vector.broadcast %cst_356 : f32 to vector<8x100xf32>
    %501 = arith.maximumf %499, %500 : vector<8x100xf32>
    %c8_357 = arith.constant 8 : index
    %c0_358 = arith.constant 0 : index
    %c0_359 = arith.constant 0 : index
    %502 = vector.load %arg2[%c8_357, %c0_358, %c0_359] : memref<10x1x100xf32, #tpu.memory_space<vmem>>, vector<1x1x100xf32>
    %503 = vector.shape_cast %502 : vector<1x1x100xf32> to vector<1x100xf32>
    %504 = vector.broadcast %503 : vector<1x100xf32> to vector<8x100xf32>
    %505 = arith.mulf %501, %504 : vector<8x100xf32>
    %c0_360 = arith.constant 0 : index
    %c9_361 = arith.constant 9 : index
    %c0_362 = arith.constant 0 : index
    %c0_363 = arith.constant 0 : index
    %506 = vector.load %arg1[%c0_360, %c9_361, %c0_362, %c0_363] : memref<1x10x8x100xf32, #tpu.memory_space<vmem>>, vector<1x1x8x100xf32>
    %507 = vector.shape_cast %506 : vector<1x1x8x100xf32> to vector<8x100xf32>
    %c0_364 = arith.constant 0 : index
    %c0_365 = arith.constant 0 : index
    %508 = vector.load %arg3[%c0_364, %c0_365] : memref<8x1xf32, #tpu.memory_space<vmem>>, vector<8x1xf32>
    %509 = vector.broadcast %508 : vector<8x1xf32> to vector<8x100xf32>
    %510 = arith.mulf %507, %509 : vector<8x100xf32>
    %c0_366 = arith.constant 0 : index
    %c0_367 = arith.constant 0 : index
    %511 = vector.load %arg4[%c0_366, %c0_367] : memref<8x1xf32, #tpu.memory_space<vmem>>, vector<8x1xf32>
    %512 = vector.broadcast %511 : vector<8x1xf32> to vector<8x100xf32>
    %513 = arith.addf %510, %512 : vector<8x100xf32>
    %cst_368 = arith.constant 0.000000e+00 : f32
    %514 = vector.broadcast %cst_368 : f32 to vector<8x100xf32>
    %515 = arith.maximumf %513, %514 : vector<8x100xf32>
    %c9_369 = arith.constant 9 : index
    %c0_370 = arith.constant 0 : index
    %c0_371 = arith.constant 0 : index
    %516 = vector.load %arg2[%c9_369, %c0_370, %c0_371] : memref<10x1x100xf32, #tpu.memory_space<vmem>>, vector<1x1x100xf32>
    %517 = vector.shape_cast %516 : vector<1x1x100xf32> to vector<1x100xf32>
    %518 = vector.broadcast %517 : vector<1x100xf32> to vector<8x100xf32>
    %519 = arith.mulf %515, %518 : vector<8x100xf32>
    %520 = tpu.concatenate %491, %505, %519 in 0 : vector<8x100xf32>, vector<8x100xf32>, vector<8x100xf32> -> vector<24x100xf32>
    %521 = vector.extract_strided_slice %520 {offsets = [0, 0], sizes = [24, 78], strides = [1, 1]} : vector<24x100xf32> to vector<24x78xf32>
    %522 = vector.extract_strided_slice %520 {offsets = [0, 1], sizes = [24, 78], strides = [1, 1]} : vector<24x100xf32> to vector<24x78xf32>
    %523 = vector.extract_strided_slice %520 {offsets = [0, 2], sizes = [24, 78], strides = [1, 1]} : vector<24x100xf32> to vector<24x78xf32>
    %524 = vector.extract_strided_slice %520 {offsets = [0, 10], sizes = [24, 78], strides = [1, 1]} : vector<24x100xf32> to vector<24x78xf32>
    %525 = vector.extract_strided_slice %520 {offsets = [0, 11], sizes = [24, 78], strides = [1, 1]} : vector<24x100xf32> to vector<24x78xf32>
    %526 = vector.extract_strided_slice %520 {offsets = [0, 12], sizes = [24, 78], strides = [1, 1]} : vector<24x100xf32> to vector<24x78xf32>
    %527 = vector.extract_strided_slice %520 {offsets = [0, 20], sizes = [24, 78], strides = [1, 1]} : vector<24x100xf32> to vector<24x78xf32>
    %528 = vector.extract_strided_slice %520 {offsets = [0, 21], sizes = [24, 78], strides = [1, 1]} : vector<24x100xf32> to vector<24x78xf32>
    %529 = vector.extract_strided_slice %520 {offsets = [0, 22], sizes = [24, 78], strides = [1, 1]} : vector<24x100xf32> to vector<24x78xf32>
    %530 = tpu.concatenate %521, %522, %523, %524, %525, %526, %527, %528, %529 in 0 : vector<24x78xf32>, vector<24x78xf32>, vector<24x78xf32>, vector<24x78xf32>, vector<24x78xf32>, vector<24x78xf32>, vector<24x78xf32>, vector<24x78xf32>, vector<24x78xf32> -> vector<216x78xf32>
    %c0_372 = arith.constant 0 : index
    %c0_373 = arith.constant 0 : index
    %531 = vector.load %arg5[%c0_372, %c0_373] : memref<8x216xf32, #tpu.memory_space<vmem>>, vector<8x216xf32>
    %cst_374 = arith.constant dense<0.000000e+00> : vector<8x78xf32>
    %532 = tpu.matmul %531, %530, %cst_374 {dimension_numbers = #tpu.dot_dimension_numbers<[1], [0], [0], [1], [0, 0, 1, 1], [], []>} : vector<8x216xf32>, vector<216x78xf32>, vector<8x78xf32> -> vector<8x78xf32>
    %c0_375 = arith.constant 0 : index
    %c0_376 = arith.constant 0 : index
    %533 = vector.load %arg6[%c0_375, %c0_376] : memref<78x100xf32, #tpu.memory_space<vmem>>, vector<78x100xf32>
    %cst_377 = arith.constant dense<0.000000e+00> : vector<8x100xf32>
    %534 = tpu.matmul %532, %533, %cst_377 {dimension_numbers = #tpu.dot_dimension_numbers<[1], [0], [0], [1], [0, 0, 1, 1], [], []>} : vector<8x78xf32>, vector<78x100xf32>, vector<8x100xf32> -> vector<8x100xf32>
    %c0_378 = arith.constant 0 : index
    %c8_379 = arith.constant 8 : index
    %c0_380 = arith.constant 0 : index
    %c0_381 = arith.constant 0 : index
    %535 = vector.load %arg7[%c0_378, %c8_379, %c0_380, %c0_381] : memref<1x10x8x100xf32, #tpu.memory_space<vmem>>, vector<1x1x8x100xf32>
    %536 = vector.shape_cast %535 : vector<1x1x8x100xf32> to vector<8x100xf32>
    %537 = vector.shape_cast %534 : vector<8x100xf32> to vector<1x1x8x100xf32>
    tpu.vector_store %arg7[%c0_378, %c8_379, %c0_380, %c0_381], %537 {strides = array<i32>} : memref<1x10x8x100xf32, #tpu.memory_space<vmem>>, vector<1x1x8x100xf32>,
    %cst_382 = arith.constant dense<0.000000e+00> : vector<8xf32>
    %538 = vector.multi_reduction <add>, %534, %cst_382 [1] : vector<8x100xf32> to vector<8xf32>
    %539 = vector.shape_cast %538 : vector<8xf32> to vector<8x1xf32>
    %540 = arith.addf %473, %539 : vector<8x1xf32>
    %541 = arith.mulf %534, %534 : vector<8x100xf32>
    %cst_383 = arith.constant dense<0.000000e+00> : vector<8xf32>
    %542 = vector.multi_reduction <add>, %541, %cst_383 [1] : vector<8x100xf32> to vector<8xf32>
    %543 = vector.shape_cast %542 : vector<8xf32> to vector<8x1xf32>
    %544 = arith.addf %477, %543 : vector<8x1xf32>
    %c0_384 = arith.constant 0 : index
    %c0_385 = arith.constant 0 : index
    %c0_386 = arith.constant 0 : index
    %545 = vector.load %arg8[%c0_384, %c0_385, %c0_386] : memref<1x8x1xf32, #tpu.memory_space<vmem>>, vector<1x8x1xf32>
    %546 = vector.shape_cast %545 : vector<1x8x1xf32> to vector<8x1xf32>
    %547 = vector.shape_cast %540 : vector<8x1xf32> to vector<1x8x1xf32>
    tpu.vector_store %arg8[%c0_384, %c0_385, %c0_386], %547 {strides = array<i32>} : memref<1x8x1xf32, #tpu.memory_space<vmem>>, vector<1x8x1xf32>,
    %c0_387 = arith.constant 0 : index
    %c0_388 = arith.constant 0 : index
    %c0_389 = arith.constant 0 : index
    %548 = vector.load %arg9[%c0_387, %c0_388, %c0_389] : memref<1x8x1xf32, #tpu.memory_space<vmem>>, vector<1x8x1xf32>
    %549 = vector.shape_cast %548 : vector<1x8x1xf32> to vector<8x1xf32>
    %550 = vector.shape_cast %544 : vector<8x1xf32> to vector<1x8x1xf32>
    tpu.vector_store %arg9[%c0_387, %c0_388, %c0_389], %550 {strides = array<i32>} : memref<1x8x1xf32, #tpu.memory_space<vmem>>, vector<1x8x1xf32>,
    return
  }
  func.func @transform_0(%arg0: i32) -> (i32, i32, i32, i32) {
    %c0_i32 = arith.constant 0 : i32
    %c0_i32_0 = arith.constant 0 : i32
    %c0_i32_1 = arith.constant 0 : i32
    %c0_i32_2 = arith.constant 0 : i32
    return %arg0, %c0_i32, %c0_i32_0, %c0_i32_1 : i32, i32, i32, i32
  }
  func.func @transform_1(%arg0: i32) -> (i32, i32, i32) {
    %c0_i32 = arith.constant 0 : i32
    %c0_i32_0 = arith.constant 0 : i32
    %c0_i32_1 = arith.constant 0 : i32
    %c0_i32_2 = arith.constant 0 : i32
    return %c0_i32, %c0_i32_0, %c0_i32_1 : i32, i32, i32
  }
  func.func @transform_2(%arg0: i32) -> (i32, i32) {
    %c0_i32 = arith.constant 0 : i32
    %c0_i32_0 = arith.constant 0 : i32
    %c0_i32_1 = arith.constant 0 : i32
    return %c0_i32, %c0_i32_0 : i32, i32
  }
  func.func @transform_3(%arg0: i32) -> (i32, i32) {
    %c0_i32 = arith.constant 0 : i32
    %c0_i32_0 = arith.constant 0 : i32
    %c0_i32_1 = arith.constant 0 : i32
    return %c0_i32, %c0_i32_0 : i32, i32
  }
  func.func @transform_4(%arg0: i32) -> (i32, i32) {
    %c0_i32 = arith.constant 0 : i32
    %c0_i32_0 = arith.constant 0 : i32
    %c0_i32_1 = arith.constant 0 : i32
    return %c0_i32, %c0_i32_0 : i32, i32
  }
  func.func @transform_5(%arg0: i32) -> (i32, i32) {
    %c0_i32 = arith.constant 0 : i32
    %c0_i32_0 = arith.constant 0 : i32
    %c0_i32_1 = arith.constant 0 : i32
    return %c0_i32, %c0_i32_0 : i32, i32
  }
  func.func @transform_6(%arg0: i32) -> (i32, i32, i32, i32) {
    %c0_i32 = arith.constant 0 : i32
    %c0_i32_0 = arith.constant 0 : i32
    %c0_i32_1 = arith.constant 0 : i32
    %c0_i32_2 = arith.constant 0 : i32
    return %arg0, %c0_i32, %c0_i32_0, %c0_i32_1 : i32, i32, i32, i32
  }
  func.func @transform_7(%arg0: i32) -> (i32, i32, i32) {
    %c0_i32 = arith.constant 0 : i32
    %c0_i32_0 = arith.constant 0 : i32
    %c0_i32_1 = arith.constant 0 : i32
    return %arg0, %c0_i32, %c0_i32_0 : i32, i32, i32
  }
  func.func @transform_8(%arg0: i32) -> (i32, i32, i32) {
    %c0_i32 = arith.constant 0 : i32
    %c0_i32_0 = arith.constant 0 : i32
    %c0_i32_1 = arith.constant 0 : i32
    return %arg0, %c0_i32, %c0_i32_0 : i32, i32, i32
  }
}

module attributes {stable_mosaic.version = 11 : i64} {
  func.func @_fc_bn_kernel(%arg0: memref<2x64xf32, #tpu.memory_space<vmem>>, %arg1: memref<64x6xf32, #tpu.memory_space<vmem>>, %arg2: memref<1x6xf32, #tpu.memory_space<vmem>>, %arg3: memref<1x6xf32, #tpu.memory_space<vmem>>, %arg4: memref<1x6xf32, #tpu.memory_space<vmem>>, %arg5: memref<2x6xf32, #tpu.memory_space<vmem>>) attributes {dimension_semantics = [], scalar_prefetch = 0 : i64, scratch_operands = 0 : i64, tpu.core_type = #tpu.core_type<tc>} {
    %c0 = arith.constant 0 : index
    %c0_0 = arith.constant 0 : index
    %0 = vector.load %arg0[%c0, %c0_0] : memref<2x64xf32, #tpu.memory_space<vmem>>, vector<2x64xf32>
    %c0_1 = arith.constant 0 : index
    %c0_2 = arith.constant 0 : index
    %1 = vector.load %arg1[%c0_1, %c0_2] : memref<64x6xf32, #tpu.memory_space<vmem>>, vector<64x6xf32>
    %cst = arith.constant dense<0.000000e+00> : vector<2x6xf32>
    %2 = tpu.matmul %0, %1, %cst {dimension_numbers = #tpu.dot_dimension_numbers<[1], [0], [0], [1], [0, 0, 1, 1], [], []>} : vector<2x64xf32>, vector<64x6xf32>, vector<2x6xf32> -> vector<2x6xf32>
    %c0_3 = arith.constant 0 : index
    %c0_4 = arith.constant 0 : index
    %3 = vector.load %arg2[%c0_3, %c0_4] : memref<1x6xf32, #tpu.memory_space<vmem>>, vector<1x6xf32>
    %4 = vector.broadcast %3 : vector<1x6xf32> to vector<2x6xf32>
    %5 = arith.addf %2, %4 : vector<2x6xf32>
    %cst_5 = arith.constant dense<0.000000e+00> : vector<6xf32>
    %6 = vector.multi_reduction <add>, %5, %cst_5 [0] : vector<2x6xf32> to vector<6xf32>
    %7 = vector.shape_cast %6 : vector<6xf32> to vector<1x6xf32>
    %cst_6 = arith.constant 2.000000e+00 : f32
    %8 = vector.broadcast %cst_6 : f32 to vector<1x6xf32>
    %9 = arith.divf %7, %8 : vector<1x6xf32>
    %10 = arith.mulf %5, %5 : vector<2x6xf32>
    %cst_7 = arith.constant dense<0.000000e+00> : vector<6xf32>
    %11 = vector.multi_reduction <add>, %10, %cst_7 [0] : vector<2x6xf32> to vector<6xf32>
    %12 = vector.shape_cast %11 : vector<6xf32> to vector<1x6xf32>
    %cst_8 = arith.constant 2.000000e+00 : f32
    %13 = vector.broadcast %cst_8 : f32 to vector<1x6xf32>
    %14 = arith.divf %12, %13 : vector<1x6xf32>
    %15 = arith.mulf %9, %9 : vector<1x6xf32>
    %16 = arith.subf %14, %15 : vector<1x6xf32>
    %cst_9 = arith.constant 0.000000e+00 : f32
    %17 = vector.broadcast %cst_9 : f32 to vector<1x6xf32>
    %18 = arith.maximumf %16, %17 : vector<1x6xf32>
    %19 = vector.broadcast %9 : vector<1x6xf32> to vector<2x6xf32>
    %20 = arith.subf %5, %19 : vector<2x6xf32>
    %cst_10 = arith.constant 9.99999974E-6 : f32
    %21 = vector.broadcast %cst_10 : f32 to vector<1x6xf32>
    %22 = arith.addf %18, %21 : vector<1x6xf32>
    %23 = math.rsqrt %22 : vector<1x6xf32>
    %24 = vector.broadcast %23 : vector<1x6xf32> to vector<2x6xf32>
    %25 = arith.mulf %20, %24 : vector<2x6xf32>
    %c0_11 = arith.constant 0 : index
    %c0_12 = arith.constant 0 : index
    %26 = vector.load %arg3[%c0_11, %c0_12] : memref<1x6xf32, #tpu.memory_space<vmem>>, vector<1x6xf32>
    %27 = vector.broadcast %26 : vector<1x6xf32> to vector<2x6xf32>
    %28 = arith.mulf %25, %27 : vector<2x6xf32>
    %c0_13 = arith.constant 0 : index
    %c0_14 = arith.constant 0 : index
    %29 = vector.load %arg4[%c0_13, %c0_14] : memref<1x6xf32, #tpu.memory_space<vmem>>, vector<1x6xf32>
    %30 = vector.broadcast %29 : vector<1x6xf32> to vector<2x6xf32>
    %31 = arith.addf %28, %30 : vector<2x6xf32>
    %c0_15 = arith.constant 0 : index
    %c0_16 = arith.constant 0 : index
    %32 = vector.load %arg5[%c0_15, %c0_16] : memref<2x6xf32, #tpu.memory_space<vmem>>, vector<2x6xf32>
    tpu.vector_store %arg5[%c0_15, %c0_16], %31 {strides = array<i32>} : memref<2x6xf32, #tpu.memory_space<vmem>>, vector<2x6xf32>,
    return
  }
}

</mosaic_0001>

<bundles_post_ra>
// kernel: localization3d_forward.6
= control target key start
LH: loop header
LB: loop body
LE: loop exit
PB: predicated region body
PF: predicated region fallthrough
CT: control target
= control target key end

     0   :  { %s1296_s24 = smov 0   ;;  %s1719_s0 = inlined_call_operand.vmem [shape: f32[2,10,8,100], index: 0, kind: input, shape index: {}]   ;;  %s1720_s1 = inlined_call_operand.vmem [shape: f32[10,1,100], index: 1, kind: input, shape index: {}]   ;;  %s1721_s2 = inlined_call_operand.vmem [shape: f32[8,1], index: 2, kind: input, shape index: {}]   ;;  %s1722_s3 = inlined_call_operand.vmem [shape: f32[8,1], index: 3, kind: input, shape index: {}]   ;;  %s1723_s4 = inlined_call_operand.vmem [shape: f32[78,36], index: 4, kind: input, shape index: {}]   ;;  %s1724_s5 = inlined_call_operand.vmem [shape: f32[8,216], index: 5, kind: input, shape index: {}]   ;;  %s1725_s6 = inlined_call_operand.vmem [shape: f32[15,4], index: 6, kind: input, shape index: {}]   ;;  %s1726_s7 = inlined_call_operand.vmem [shape: f32[2,2,8,4], index: 7, kind: output, shape index: {}]  }
   0x1 LB: > { %s1075_s25 = sadd.s32 4294967295, %s1239_s24   ;;  %p1079_p0 = scmp.ge.s32.totalorder %s1239_s24, 1  ;;  %s1239_s24 = sphi %s1296_s24, %s17_s24  }
   0x2   : > { %p237_p1 = scmp.lt.s32.totalorder %s1239_s24, 3 }
   0x4   : > { %p238_p2 = pnand %p1079_p0, %p237_p1 }
   0x5   : > { %p269_p3 = scmp.lt.s32.totalorder (!%p238_p2), %s1075_s25, 1  ;;  %s1242_s27 = smov (!%p238_p2), 126  }
   0x6   : > { %241 = sbr.rel (%p238_p2) target bundleno = 1037 (0x40d), region = 48  ;;  %s1243_s28 = smov (!%p238_p2), 127  }
   0x7   : > { %s1244_s29 = smov (!%p238_p2), 118   ;;  %s1246_s8 = smov (!%p238_p2), 116  }
   0x8   : > { %s1247_s9 = smov (!%p238_p2), 108   ;;  %s1248_s14 = smov (!%p238_p2), 107  }
   0x9   : > { %s1249_s15 = smov (!%p238_p2), 106   ;;  %s1250_s18 = smov (!%p238_p2), 114  }
   0xa   : > { %s1251_s19 = smov (!%p238_p2), 121   ;;  %s1252_s20 = smov (!%p238_p2), 120  }
   0xb   : > { %v280_v0 = vld [vmem:[%s1721_s2] sm:$0xff]  ;;  %v1241_v1 = vmov 0   ;;  %s1728_s25 = smov (!%p269_p3, %s1075_s25), 1  ;;  %v1232_v62 = vld [vmem:[%s1720_s1 + $0x8] ss:$0 sm:$0xff]  ;;  %vm371_vm0 = vcmask 1045504  }
   0xc   : > { %1143 = vset.pattern.permute.xlu0 %v1241_v1  ;;  %v287_v2 = vld [vmem:[%s1722_s3] sm:$0xff]  ;;  %s1119_s30 = smul.u32 80, %s1728_s25  ;;  %vm367_vm1 = vcmask 637952   ;;  %s1253_s21 = smov 115   ;;  %vm712_vm2 = vcmask 719872   ;;  %vm950_vm3 = vcmask 1046528  }
   0xd   : > { %283 = vperm.xlu0 %1143, %v280_v0   ;;  %v1224_v19 = vld [vmem:[%s1720_s1] ss:$0 sm:$0xff]  ;;  %v1225_v20 = vld [vmem:[%s1720_s1 + $0x1] ss:$0 sm:$0xff]  ;;  %v1228_v25 = vld [vmem:[%s1720_s1 + $0x4] ss:$0 sm:$0xff] }
   0xe   : > { %s1318_s10 = scalar_lea.vmem %s1719_s0, %s1119_s30  ;;  %v1229_v26 = vld [vmem:[%s1720_s1 + $0x5] ss:$0 sm:$0xff]  ;;  %v1226_v30 = vld [vmem:[%s1720_s1 + $0x2] ss:$0 sm:$0xff]  ;;  %v1230_v34 = vld [vmem:[%s1720_s1 + $0x6] ss:$0 sm:$0xff] }
   0xf   : > { %v279_v4 = vld [vmem:[%s1318_s10] sm:$0xff]  ;;  %v1083_v5 = vld [vmem:[%s1318_s10 + $0x8] sm:$0xff]  ;;  %v1085_v6 = vld [vmem:[%s1318_s10 + $0x10] sm:$0xff]  ;;  %s1245_s30 = smov 117   ;;  %s1254_s22 = smov 122   ;;  %vm946_vm4 = vcmask 121856  }
  0x10   : > { %v1089_v7 = vld [vmem:[%s1318_s10 + $0x18] sm:$0xff]  ;;  %v1091_v8 = vld [vmem:[%s1318_s10 + $0x20] sm:$0xff]  ;;  %v1095_v9 = vld [vmem:[%s1318_s10 + $0x28] sm:$0xff]  ;;  %vm974_vm5 = vcmask 31744  }
  0x11   : > { %v1097_v10 = vld [vmem:[%s1318_s10 + $0x30] sm:$0xff]  ;;  %v1227_v38 = vld [vmem:[%s1720_s1 + $0x3] ss:$0 sm:$0xff]  ;;  %v1101_v53 = vld [vmem:[%s1318_s10 + $0x38] sm:$0xff] }
  0x12   : > { %v1103_v56 = vld [vmem:[%s1318_s10 + $0x40] sm:$0xff] }
  0x13   : > { %v1231_v58 = vld [vmem:[%s1720_s1 + $0x7] ss:$0 sm:$0xff] }
  0x15   : > { %290 = vperm.xlu0 %1143, %v287_v2  }
  0x7f   : > { %v1313_v3 = vpop.permute.xlu0 %283 }
  0x80   : > { %v286_v11 = vmul.f32 %v1313_v3, %v279_v4  ;;  %v302_v12 = vmul.f32 %v1083_v5, %v1313_v3  ;;  %v314_v13 = vmul.f32 %v1085_v6, %v1313_v3  ;;  %v397_v14 = vmul.f32 %v1089_v7, %v1313_v3  ;;  %v366_v5 = vld [vmem:[%s1723_s4 + $0x48] sm:$0x3f] }
  0x81   : > { %v409_v15 = vmul.f32 %v1091_v8, %v1313_v3  ;;  %v477_v16 = vmul.f32 %v1095_v9, %v1313_v3  ;;  %v489_v17 = vmul.f32 %v1097_v10, %v1313_v3  ;;  %v557_v54 = vmul.f32 %v1101_v53, %v1313_v3  ;;  %1087 = vmatpush.msk.msra.mxu0 %vm371_vm0, %v366_v5  ;;  %v365_v9 = vld [vmem:[%s1723_s4 + $0x40] sm:$0xff]  ;;  %v364_v10 = vld [vmem:[%s1723_s4 + $0x38] sm:$0xff] }
  0x82   : > { %v569_v57 = vmul.f32 %v1103_v56, %v1313_v3  ;;  %1099 = vmatpush.msk.msra.mxu2 %vm371_vm0, %v366_v5  ;;  %1093 = vmatpush.msk.msra.mxu1 %vm371_vm0, %v366_v5 }
  0x83   : > { %1105 = vmatpush.msk.msra.mxu3 %vm371_vm0, %v366_v5  ;;  %382 = vmatpush.msra.mxu0 %v365_v9 }
  0x84   : > { %542 = vmatpush.msra.mxu2 %v365_v9  ;;  %462 = vmatpush.msra.mxu1 %v365_v9 }
  0x85   : > { %622 = vmatpush.msra.mxu3 %v365_v9  ;;  %383 = vmatpush.msra.mxu0 %v364_v10 }
  0x86   : > { %543 = vmatpush.msra.mxu2 %v364_v10  ;;  %463 = vmatpush.msra.mxu1 %v364_v10 }
  0x87   : > { %v1334_v18 = vpop.permute.xlu0 %290  ;;  %623 = vmatpush.msra.mxu3 %v364_v10 }
  0x88   : > { %v293_v21 = vadd.f32 %v1334_v18, %v286_v11  ;;  %v303_v22 = vadd.f32 %v302_v12, %v1334_v18  ;;  %v315_v23 = vadd.f32 %v314_v13, %v1334_v18  ;;  %v398_v24 = vadd.f32 %v397_v14, %v1334_v18  ;;  %v363_v11 = vld [vmem:[%s1723_s4 + $0x30] sm:$0xff]  ;;  %v362_v12 = vld [vmem:[%s1723_s4 + $0x28] sm:$0xff] }
  0x89   : > { %v410_v27 = vadd.f32 %v409_v15, %v1334_v18  ;;  %v478_v28 = vadd.f32 %v477_v16, %v1334_v18  ;;  %v490_v29 = vadd.f32 %v489_v17, %v1334_v18  ;;  %v558_v55 = vadd.f32 %v557_v54, %v1334_v18  ;;  %384 = vmatpush.msra.mxu0 %v363_v11  ;;  %v361_v16 = vld [vmem:[%s1723_s4 + $0x20] sm:$0xff]  ;;  %v360_v17 = vld [vmem:[%s1723_s4 + $0x18] sm:$0xff] }
  0x8a   : > { %v294_v31 = vmax.f32 %v293_v21, 0.0  ;;  %v304_v32 = vmax.f32 %v303_v22, 0.0  ;;  %v316_v33 = vmax.f32 %v315_v23, 0.0  ;;  %v399_v41 = vmax.f32 %v398_v24, 0.0  ;;  %544 = vmatpush.msra.mxu2 %v363_v11  ;;  %464 = vmatpush.msra.mxu1 %v363_v11  ;;  %v357_v22 = vld [vmem:[%s1723_s4] sm:$0xff] }
  0x8b   : > { %v411_v35 = vmax.f32 %v410_v27, 0.0  ;;  %v479_v36 = vmax.f32 %v478_v28, 0.0  ;;  %v491_v37 = vmax.f32 %v490_v29, 0.0  ;;  %v559_v59 = vmax.f32 %v558_v55, 0.0  ;;  %624 = vmatpush.msra.mxu3 %v363_v11  ;;  %385 = vmatpush.msra.mxu0 %v362_v12 }
  0x8c   : > { %v299_v39 = vmul.f32 %v1224_v19, %v294_v31  ;;  %v310_v40 = vmul.f32 %v1225_v20, %v304_v32  ;;  %v322_v45 = vmul.f32 %v1226_v30, %v316_v33  ;;  %v405_v49 = vmul.f32 %v1227_v38, %v399_v41  ;;  %545 = vmatpush.msra.mxu2 %v362_v12  ;;  %v358_v19 = vld [vmem:[%s1723_s4 + $0x8] sm:$0xff] }
  0x8d   : > { %v417_v42 = vmul.f32 %v1228_v25, %v411_v35  ;;  %v485_v43 = vmul.f32 %v1229_v26, %v479_v36  ;;  %v497_v47 = vmul.f32 %v1230_v34, %v491_v37  ;;  %v570_v60 = vadd.f32 %v569_v57, %v1334_v18  ;;  %465 = vmatpush.msra.mxu1 %v362_v12  ;;  %v359_v18 = vld [vmem:[%s1723_s4 + $0x10] sm:$0xff] }
  0x8e   : > { %v311_v44 = vmax.f32 %v299_v39, %v310_v40  ;;  %v406_v51 = vmax.f32 %v322_v45, %v405_v49  ;;  %v565_v61 = vmul.f32 %v1231_v58, %v559_v59  ;;  %625 = vmatpush.msra.mxu3 %v362_v12  ;;  %386 = vmatpush.msra.mxu0 %v361_v16 }
  0x8f   : > { %v486_v46 = vmax.f32 %v417_v42, %v485_v43  ;;  %v571_v63 = vmax.f32 %v570_v60, 0.0  ;;  %546 = vmatpush.msra.mxu2 %v361_v16  ;;  %466 = vmatpush.msra.mxu1 %v361_v16 }
  0x90   : > { %v1364_v48 = vmax.f32 %v311_v44, %v322_v45  ;;  %v1374_v52 = vmax.f32 %v406_v51, %v417_v42  ;;  %v566_v0 = vmax.f32 %v497_v47, %v565_v61  ;;  %626 = vmatpush.msra.mxu3 %v361_v16  ;;  %387 = vmatpush.msra.mxu0 %v360_v17 }
  0x91   : > { %v1366_v50 = vmax.f32 %v486_v46, %v497_v47  ;;  %v577_v1 = vmul.f32 %v1232_v62, %v571_v63  ;;  %547 = vmatpush.msra.mxu2 %v360_v17  ;;  %467 = vmatpush.msra.mxu1 %v360_v17 }
  0x92   : > { %329 = vrot.lane.b32.xlu0 %v1364_v48, %s1242_s27  ;;  %325 = vrot.lane.b32.xlu2 %v1364_v48, %s1243_s28 }
  0x93   : > { %500 = vrot.lane.b32.xlu1 %v1366_v50, %s1243_s28  ;;  %v1416_v2 = vmax.f32 %v566_v0, %v577_v1  ;;  %627 = vmatpush.msra.mxu3 %v360_v17 }
  0x94   : > { %388 = vmatpush.msra.mxu0 %v359_v18  ;;  %548 = vmatpush.msra.mxu2 %v359_v18 }
  0x95   : > { %468 = vmatpush.msra.mxu1 %v359_v18  ;;  %628 = vmatpush.msra.mxu3 %v359_v18 }
  0x96   : > { %389 = vmatpush.msra.mxu0 %v358_v19  ;;  %549 = vmatpush.msra.mxu2 %v358_v19 }
  0x97   : > { %469 = vmatpush.msra.mxu1 %v358_v19  ;;  %629 = vmatpush.msra.mxu3 %v358_v19 }
  0x98   : > { %390 = vmatpush.msra.mxu0 %v357_v22  ;;  %550 = vmatpush.msra.mxu2 %v357_v22 }
  0x99   : > { %470 = vmatpush.msra.mxu1 %v357_v22  ;;  %630 = vmatpush.msra.mxu3 %v357_v22 }
  0x9a   : > { %420 = vrot.lane.b32.xlu0 %v1374_v52, %s1243_s28  ;;  %508 = vrot.lane.b32.xlu2 %v1366_v50, %s1244_s29 }
  0x9b   : > { %504 = vrot.lane.b32.xlu1 %v1366_v50, %s1242_s27 }
  0xa2   : > { %424 = vrot.lane.b32.xlu0 %v1374_v52, %s1242_s27  ;;  %333 = vrot.lane.b32.xlu2 %v1364_v48, %s1244_s29 }
  0xa3   : > { %512 = vrot.lane.b32.xlu1 %v1366_v50, %s1245_s30 }
  0xaa   : > { %428 = vrot.lane.b32.xlu0 %v1374_v52, %s1244_s29  ;;  %337 = vrot.lane.b32.xlu2 %v1364_v48, %s1245_s30 }
  0xab   : > { %516 = vrot.lane.b32.xlu1 %v1366_v50, %s1246_s8 }
  0xb2   : > { %432 = vrot.lane.b32.xlu0 %v1374_v52, %s1245_s30  ;;  %341 = vrot.lane.b32.xlu2 %v1364_v48, %s1246_s8 }
  0xb3   : > { %520 = vrot.lane.b32.xlu1 %v1366_v50, %s1247_s9 }
  0xba   : > { %349 = vrot.lane.b32.xlu0 %v1364_v48, %s1248_s14  ;;  %345 = vrot.lane.b32.xlu2 %v1364_v48, %s1247_s9 }
  0xbb   : > { %524 = vrot.lane.b32.xlu1 %v1366_v50, %s1248_s14 }
  0xc2   : > { %353 = vrot.lane.b32.xlu0 %v1364_v48, %s1249_s15  ;;  %580 = vrot.lane.b32.xlu2 %v1416_v2, %s1243_s28 }
  0xc3   : > { %528 = vrot.lane.b32.xlu1 %v1366_v50, %s1249_s15 }
  0xca   : > { %444 = vrot.lane.b32.xlu0 %v1374_v52, %s1248_s14  ;;  %584 = vrot.lane.b32.xlu2 %v1416_v2, %s1242_s27 }
  0xcb   : > { %436 = vrot.lane.b32.xlu1 %v1374_v52, %s1246_s8 }
  0xd2   : > { %596 = vrot.lane.b32.xlu0 %v1416_v2, %s1246_s8  ;;  %588 = vrot.lane.b32.xlu2 %v1416_v2, %s1244_s29 }
  0xd3   : > { %440 = vrot.lane.b32.xlu1 %v1374_v52, %s1247_s9 }
  0xda   : > { %608 = vrot.lane.b32.xlu0 %v1416_v2, %s1249_s15  ;;  %448 = vrot.lane.b32.xlu2 %v1374_v52, %s1249_s15 }
  0xdb   : > { %592 = vrot.lane.b32.xlu1 %v1416_v2, %s1245_s30 }
  0xe2   : > { %604 = vrot.lane.b32.xlu2 %v1416_v2, %s1248_s14 }
  0xe3   : > { %600 = vrot.lane.b32.xlu1 %v1416_v2, %s1247_s9 }
  0xec   : > { %v1440_v3 = vpop.permute.xlu2 %325 }
  0xed   : > { %v328_v27 = vmax.f32 %v1364_v48, %v1440_v3 }
  0xf4   : > { %v1442_v4 = vpop.permute.xlu2 %508 }
  0xfc   : > { %v1447_v6 = vpop.permute.xlu2 %333 }
 0x104   : > { %v330_v7 = vpop.permute.xlu0 %329  ;;  %v338_v14 = vpop.permute.xlu2 %337 }
 0x105   : > { %v501_v8 = vpop.permute.xlu1 %500  ;;  %v332_v29 = vmax.f32 %v328_v27, %v330_v7 }
 0x106   : > { %v503_v31 = vmax.f32 %v1366_v50, %v501_v8 }
 0x107   : > { %v336_v33 = vmax.f32 %v332_v29, %v1447_v6 }
 0x109   : > { %v340_v37 = vmax.f32 %v336_v33, %v338_v14 }
 0x10c   : > { %v1461_v13 = vpop.permute.xlu0 %420  ;;  %v342_v23 = vpop.permute.xlu2 %341 }
 0x10d   : > { %v505_v15 = vpop.permute.xlu1 %504  ;;  %v344_v40 = vmax.f32 %v340_v37, %v342_v23  ;;  %v423_v51 = vmax.f32 %v1374_v52, %v1461_v13 }
 0x10e   : > { %v507_v32 = vmax.f32 %v503_v31, %v505_v15 }
 0x110   : > { %v511_v35 = vmax.f32 %v507_v32, %v1442_v4 }
 0x114   : > { %v425_v20 = vpop.permute.xlu0 %424  ;;  %v346_v26 = vpop.permute.xlu2 %345 }
 0x115   : > { %v513_v21 = vpop.permute.xlu1 %512  ;;  %v348_v42 = vmax.f32 %v344_v40, %v346_v26  ;;  %v427_v54 = vmax.f32 %v423_v51, %v425_v20 }
 0x116   : > { %v515_v39 = vmax.f32 %v511_v35, %v513_v21 }
 0x11c   : > { %v429_v24 = vpop.permute.xlu0 %428  ;;  %v581_v34 = vpop.permute.xlu2 %580 }
 0x11d   : > { %v517_v25 = vpop.permute.xlu1 %516  ;;  %v431_v56 = vmax.f32 %v427_v54, %v429_v24  ;;  %v583_v0 = vmax.f32 %v1416_v2, %v581_v34 }
 0x11e   : > { %v519_v41 = vmax.f32 %v515_v39, %v517_v25 }
 0x124   : > { %v433_v28 = vpop.permute.xlu0 %432  ;;  %v585_v47 = vpop.permute.xlu2 %584 }
 0x125   : > { %v521_v30 = vpop.permute.xlu1 %520  ;;  %v435_v57 = vmax.f32 %v431_v56, %v433_v28  ;;  %v587_v3 = vmax.f32 %v583_v0, %v585_v47 }
 0x126   : > { %v523_v43 = vmax.f32 %v519_v41, %v521_v30 }
 0x12c   : > { %v350_v36 = vpop.permute.xlu0 %349  ;;  %v589_v55 = vpop.permute.xlu2 %588 }
 0x12d   : > { %v525_v38 = vpop.permute.xlu1 %524  ;;  %v352_v44 = vmax.f32 %v348_v42, %v350_v36  ;;  %v591_v5 = vmax.f32 %v587_v3, %v589_v55 }
 0x12e   : > { %v527_v45 = vmax.f32 %v523_v43, %v525_v38 }
 0x134   : > { %v354_v46 = vpop.permute.xlu0 %353  ;;  %v449_v63 = vpop.permute.xlu2 %448 }
 0x135   : > { %v529_v48 = vpop.permute.xlu1 %528  ;;  %v356_v49 = vmax.f32 %v352_v44, %v354_v46 }
 0x136   : > { %v531_v50 = vmax.f32 %v527_v45, %v529_v48 }
 0x137   : > { %1088 = vmatmul.msk.f32.vlgmr.msra.gmra.mxu0 %vm367_vm1, %v356_v49 }
 0x138   : > { %1100 = vmatmul.msk.f32.vlgmr.msra.gmra.mxu2 %vm367_vm1, %v531_v50 }
 0x13c   : > { %v445_v59 = vpop.permute.xlu0 %444  ;;  %v605_v10 = vpop.permute.xlu2 %604 }
 0x13d   : > { %v437_v53 = vpop.permute.xlu1 %436 }
 0x13e   : > { %v439_v58 = vmax.f32 %v435_v57, %v437_v53 }
 0x144   : > { %v597_v52 = vpop.permute.xlu0 %596 }
 0x145   : > { %v441_v60 = vpop.permute.xlu1 %440 }
 0x146   : > { %v443_v61 = vmax.f32 %v439_v58, %v441_v60 }
 0x148   : > { %v447_v62 = vmax.f32 %v443_v61, %v445_v59 }
 0x14a   : > { %v451_v1 = vmax.f32 %v447_v62, %v449_v63 }
 0x14c   : > { %1094 = vmatmul.msk.f32.vlgmr.msra.gmra.mxu1 %vm367_vm1, %v451_v1  ;;  %v609_v12 = vpop.permute.xlu0 %608  ;;  %v1626_v1 = vld [vmem:[%s1724_s5] sm:$0xff] }
 0x14d   : > { %v593_v4 = vpop.permute.xlu1 %592 }
 0x14e   : > { %v595_v6 = vmax.f32 %v591_v5, %v593_v4  ;;  %v1255_v5 = vmov 0.0  }
 0x150   : > { %v599_v7 = vmax.f32 %v595_v6, %v597_v52 }
 0x155   : > { %v601_v8 = vpop.permute.xlu1 %600 }
 0x156   : > { %v603_v9 = vmax.f32 %v599_v7, %v601_v8 }
 0x158   : > { %v607_v11 = vmax.f32 %v603_v9, %v605_v10 }
 0x15a   : > { %v611_v13 = vmax.f32 %v607_v11, %v609_v12  ;;  %v711_v11 = vld [vmem:[%s1724_s5 + $0x8] sm:$0xff] }
 0x15c   : > { %1106 = vmatmul.msk.f32.vlgmr.msra.gmra.mxu3 %vm367_vm1, %v611_v13 }
 0x1b4   : > { %v1490_v14 = vpop.f32.mrf.mxu0 }
 0x1b5   : > { %v1159_v2 = vpack.i.bf16 0.0, %v1490_v14 }
 0x1b7   : > { %1160 = vrot.lane.b32.xlu2 %v1159_v2, %s1250_s18  ;;  %1150 = vrot.lane.b32.xlu0 %v1159_v2, %s1251_s19 }
 0x1b8   : > { %1145 = vrot.lane.b32.xlu1 %v1159_v2, %s1252_s20 }
 0x1bb   : > { %v1496_v15 = vpop.f32.mrf.mxu2 }
 0x1bf   : > { %1170 = vrot.lane.b32.xlu2 %v1159_v2, %s1253_s21  ;;  %1155 = vrot.lane.b32.xlu0 %v1159_v2, %s1254_s22 }
 0x1c7   : > { %1165 = vrot.lane.b32.xlu0 %v1159_v2, %s1242_s27 }
 0x1c9   : > { %v1498_v16 = vpop.f32.mrf.mxu1 }
 0x1ca   : > { %v1184_v17 = vpack.i.bf16 %v1498_v16, %v1496_v15  ;;  %v1194_v18 = vpack.i.bf16 %v1496_v15, %v1498_v16 }
 0x1cc   : > { %1185 = vrot.lane.b32.xlu1 %v1184_v17, %s1254_s22  ;;  %1180 = vrot.lane.b32.xlu2 %v1184_v17, %s1251_s19 }
 0x1cf   : > { %1175 = vrot.lane.b32.xlu0 %v1159_v2, %s1243_s28 }
 0x1d4   : > { %1195 = vrot.lane.b32.xlu1 %v1194_v18, %s1252_s20  ;;  %1190 = vrot.lane.b32.xlu2 %v1184_v17, %s1250_s18 }
 0x1d7   : > { %1200 = vrot.lane.b32.xlu0 %v1184_v17, %s1242_s27 }
 0x1dc   : > { %1205 = vrot.lane.b32.xlu1 %v1184_v17, %s1253_s21 }
 0x1df   : > { %v1508_v19 = vpop.f32.mrf.mxu3  ;;  %1210 = vrot.lane.b32.xlu0 %v1184_v17, %s1243_s28 }
 0x1e0   : > { %833 = vrot.lane.b32.xlu2 %v1508_v19, %s1251_s19 }
 0x1e4   : > { %845 = vrot.lane.b32.xlu1 %v1508_v19, %s1250_s18 }
 0x1e7   : > { %827 = vrot.lane.b32.xlu0 %v1508_v19, %s1242_s27 }
 0x1e8   : > { %830 = vrot.lane.b32.xlu2 %v1508_v19, %s1254_s22 }
 0x1ec   : > { %1215 = vrot.lane.b32.xlu1 %v1184_v17, %s1246_s8 }
 0x1ef   : > { %836 = vrot.lane.b32.xlu0 %v1508_v19, %s1252_s20 }
 0x1f0   : > { %1220 = vrot.lane.b32.xlu2 %v1159_v2, %s1246_s8 }
 0x1f4   : > { %842 = vrot.lane.b32.xlu1 %v1508_v19, %s1253_s21 }
 0x1f8   : > { %824 = vrot.lane.b32.xlu2 %v1508_v19, %s1243_s28 }
 0x1fc   : > { %839 = vrot.lane.b32.xlu1 %v1508_v19, %s1246_s8 }
 0x211   : > { %v1526_v20 = vpop.permute.xlu2 %1160 }
 0x212   : > { %v1162_v35 = vunpack.i.l.bf16 %v1526_v20  ;;  %v1163_v36 = vunpack.i.h.bf16 %v1526_v20 }
 0x219   : > { %v1528_v21 = vpop.permute.xlu2 %1170 }
 0x21a   : > { %v1172_v56 = vunpack.i.l.bf16 %v1528_v21  ;;  %v1173_v59 = vunpack.i.h.bf16 %v1528_v21 }
 0x226   : > { %v1181_v22 = vpop.permute.xlu2 %1180 }
 0x227   : > { %v1536_v27 = vunpack.i.h.bf16 %v1181_v22  ;;  %v1538_v28 = vunpack.i.l.bf16 %v1181_v22 }
 0x229   : > { %v1530_v23 = vpop.permute.xlu0 %1150 }
 0x22a   : > { %v1532_v24 = vpop.permute.xlu1 %1145  ;;  %v1152_v32 = vunpack.i.l.bf16 %v1530_v23  ;;  %v1153_v34 = vunpack.i.h.bf16 %v1530_v23 }
 0x22b   : > { %v1148_v25 = vunpack.i.h.bf16 %v1532_v24  ;;  %v1147_v26 = vunpack.i.l.bf16 %v1532_v24 }
 0x22d   : > { %716 = vmatpush.msrb.mxu0 %v1148_v25  ;;  %782 = vmatpush.msrb.mxu2 %v1147_v26 }
 0x22e   : > { %v1191_v29 = vpop.permute.xlu2 %1190 }
 0x22f   : > { %v1544_v30 = vunpack.i.h.bf16 %v1191_v29  ;;  %v1546_v31 = vunpack.i.l.bf16 %v1191_v29  ;;  %717 = vmatpush.msrb.mxu0 %v1536_v27  ;;  %783 = vmatpush.msrb.mxu2 %v1538_v28 }
 0x231   : > { %718 = vmatpush.msrb.mxu0 %v1152_v32  ;;  %741 = vmatpush.msrb.mxu1 %v1544_v30  ;;  %v1552_v33 = vpop.permute.xlu0 %1155 }
 0x232   : > { %784 = vmatpush.msrb.mxu2 %v1536_v27  ;;  %807 = vmatpush.msrb.mxu3 %v1546_v31  ;;  %v1157_v42 = vunpack.i.l.bf16 %v1552_v33  ;;  %v1158_v43 = vunpack.i.h.bf16 %v1552_v33  ;;  %v945_v33 = vld [vmem:[%s1725_s6 + $0x8] sm:$0x7f] }
 0x233   : > { %719 = vmatpush.msrb.mxu0 %v1153_v34  ;;  %742 = vmatpush.msrb.mxu1 %v1162_v35 }
 0x234   : > { %785 = vmatpush.msrb.mxu2 %v1152_v32  ;;  %808 = vmatpush.msrb.mxu3 %v1544_v30 }
 0x235   : > { %743 = vmatpush.msrb.mxu1 %v1163_v36 }
 0x236   : > { %809 = vmatpush.msrb.mxu3 %v1162_v35  ;;  %v991_v35 = vld [vmem:[%s1725_s6 + $0x8] sm:$0x7f] }
 0x239   : > { %v1564_v37 = vpop.permute.xlu0 %1165 }
 0x23a   : > { %v1581_v46 = vpop.permute.xlu2 %833  ;;  %v1167_v49 = vunpack.i.l.bf16 %v1564_v37  ;;  %v1168_v51 = vunpack.i.h.bf16 %v1564_v37 }
 0x23e   : > { %v1186_v38 = vpop.permute.xlu1 %1185 }
 0x23f   : > { %v1566_v39 = vunpack.i.h.bf16 %v1186_v38  ;;  %v1568_v40 = vunpack.i.l.bf16 %v1186_v38 }
 0x241   : > { %720 = vmatpush.msrb.mxu0 %v1566_v39  ;;  %786 = vmatpush.msrb.mxu2 %v1568_v40  ;;  %v1572_v41 = vpop.permute.xlu0 %1175 }
 0x242   : > { %v1607_v60 = vpop.permute.xlu2 %830  ;;  %v1177_v61 = vunpack.i.l.bf16 %v1572_v41  ;;  %v1178_v63 = vunpack.i.h.bf16 %v1572_v41 }
 0x243   : > { %721 = vmatpush.msrb.mxu0 %v1157_v42  ;;  %787 = vmatpush.msrb.mxu2 %v1566_v39 }
 0x245   : > { %722 = vmatpush.msrb.mxu0 %v1158_v43  ;;  %788 = vmatpush.msrb.mxu2 %v1157_v42 }
 0x246   : > { %v1579_v44 = vpop.permute.xlu1 %1195 }
 0x247   : > { %v1621_v0 = vunpack.i.h.bf16 %v1579_v44  ;;  %v1197_v9 = vunpack.i.l.bf16 %v1579_v44 }
 0x249   : > { %v1201_v45 = vpop.permute.xlu0 %1200 }
 0x24a   : > { %v1583_v47 = vunpack.i.h.bf16 %v1201_v45  ;;  %v1585_v48 = vunpack.i.l.bf16 %v1201_v45  ;;  %v1221_v3 = vpop.permute.xlu2 %1220 }
 0x24b   : > { %v1222_v7 = vunpack.i.l.bf16 %v1221_v3  ;;  %v1223_v8 = vunpack.i.h.bf16 %v1221_v3 }
 0x24c   : > { %723 = vmatpush.msrb.mxu0 %v1583_v47  ;;  %789 = vmatpush.msrb.mxu2 %v1585_v48 }
 0x24e   : > { %v1206_v50 = vpop.permute.xlu1 %1205  ;;  %724 = vmatpush.msrb.mxu0 %v1167_v49  ;;  %790 = vmatpush.msrb.mxu2 %v1583_v47 }
 0x24f   : > { %v1592_v53 = vunpack.i.h.bf16 %v1206_v50  ;;  %v1594_v54 = vunpack.i.l.bf16 %v1206_v50 }
 0x250   : > { %725 = vmatpush.msrb.mxu0 %v1168_v51  ;;  %791 = vmatpush.msrb.mxu2 %v1167_v49 }
 0x251   : > { %744 = vmatpush.msrb.mxu1 %v1592_v53  ;;  %810 = vmatpush.msrb.mxu3 %v1594_v54  ;;  %v1211_v55 = vpop.permute.xlu0 %1210 }
 0x252   : > { %v1601_v57 = vunpack.i.h.bf16 %v1211_v55  ;;  %v1603_v58 = vunpack.i.l.bf16 %v1211_v55  ;;  %v825_v2 = vpop.permute.xlu2 %824 }
 0x253   : > { %745 = vmatpush.msrb.mxu1 %v1172_v56  ;;  %811 = vmatpush.msrb.mxu3 %v1592_v53 }
 0x254   : > { %726 = vmatpush.msrb.mxu0 %v1601_v57  ;;  %792 = vmatpush.msrb.mxu2 %v1603_v58 }
 0x255   : > { %746 = vmatpush.msrb.mxu1 %v1173_v59  ;;  %812 = vmatpush.msrb.mxu3 %v1172_v56 }
 0x256   : > { %v846_v62 = vpop.permute.xlu1 %845  ;;  %727 = vmatpush.msrb.mxu0 %v1177_v61  ;;  %793 = vmatpush.msrb.mxu2 %v1601_v57 }
 0x258   : > { %728 = vmatpush.msrb.mxu0 %v1178_v63  ;;  %794 = vmatpush.msrb.mxu2 %v1177_v61 }
 0x259   : > { %v828_v12 = vpop.permute.xlu0 %827 }
 0x25a   : > { %729 = vmatpush.msrb.mxu0 %v1498_v16  ;;  %795 = vmatpush.msrb.mxu2 %v1496_v15 }
 0x25c   : > { %730 = vmatpush.msrb.mxu0 %v1490_v14  ;;  %796 = vmatpush.msrb.mxu2 %v1498_v16 }
 0x25e   : > { %v1216_v4 = vpop.permute.xlu1 %1215  ;;  %731 = vmatpush.msrb.mxu0 %v1255_v5  ;;  %797 = vmatpush.msrb.mxu2 %v1490_v14 }
 0x25f   : > { %v1630_v52 = vunpack.i.h.bf16 %v1216_v4  ;;  %v1632_v6 = vunpack.i.l.bf16 %v1216_v4  ;;  %798 = vmatmul.f32.vlgmr.msrb.gmra.mxu2 %v1626_v1  ;;  %732 = vmatmul.f32.vlgmr.msrb.gmra.mxu0 %v1626_v1 }
 0x260   : > { %889 = vmatpush.msra.mxu0 %v1621_v0  ;;  %914 = vmatpush.msra.mxu2 %v1163_v36 }
 0x261   : > { %747 = vmatpush.msrb.mxu1 %v1630_v52  ;;  %813 = vmatpush.msrb.mxu3 %v1632_v6  ;;  %v837_v14 = vpop.permute.xlu0 %836 }
 0x262   : > { %890 = vmatpush.msra.mxu0 %v1153_v34  ;;  %915 = vmatpush.msra.mxu2 %v846_v62  ;;  %v944_v34 = vld [vmem:[%s1725_s6] sm:$0xff] }
 0x263   : > { %748 = vmatpush.msrb.mxu1 %v1222_v7  ;;  %814 = vmatpush.msrb.mxu3 %v1630_v52 }
 0x264   : > { %891 = vmatpush.msra.mxu0 %v1581_v46  ;;  %916 = vmatpush.msra.mxu2 %v1546_v31 }
 0x265   : > { %749 = vmatpush.msrb.mxu1 %v1223_v8  ;;  %815 = vmatpush.msrb.mxu3 %v1222_v7 }
 0x266   : > { %v843_v10 = vpop.permute.xlu1 %842  ;;  %892 = vmatpush.msra.mxu0 %v1538_v28  ;;  %917 = vmatpush.msra.mxu2 %v1173_v59 }
 0x267   : > { %750 = vmatpush.msrb.mxu1 %v1197_v9  ;;  %816 = vmatpush.msrb.mxu3 %v1621_v0 }
 0x268   : > { %893 = vmatpush.msra.mxu0 %v1158_v43  ;;  %918 = vmatpush.msra.mxu2 %v843_v10 }
 0x269   : > { %751 = vmatpush.msrb.mxu1 %v1147_v26  ;;  %817 = vmatpush.msrb.mxu3 %v1197_v9 }
 0x26a   : > { %1108 = vmatmul.msk.f32.vlgmr.msrb.gmra.mxu3 %vm712_vm2, %v711_v11  ;;  %894 = vmatpush.msra.mxu0 %v1607_v60 }
 0x26b   : > { %848 = vmatpush.msra.mxu1 %v1197_v9  ;;  %873 = vmatpush.msra.mxu3 %v846_v62 }
 0x26c   : > { %919 = vmatpush.msra.mxu2 %v1594_v54  ;;  %895 = vmatpush.msra.mxu0 %v1568_v40 }
 0x26d   : > { %849 = vmatpush.msra.mxu1 %v1581_v46  ;;  %874 = vmatpush.msra.mxu3 %v1546_v31 }
 0x26e   : > { %920 = vmatpush.msra.mxu2 %v1223_v8  ;;  %v840_v13 = vpop.permute.xlu1 %839  ;;  %896 = vmatpush.msra.mxu0 %v1168_v51 }
 0x26f   : > { %850 = vmatpush.msra.mxu1 %v1538_v28  ;;  %875 = vmatpush.msra.mxu3 %v1544_v30 }
 0x270   : > { %921 = vmatpush.msra.mxu2 %v840_v13  ;;  %1107 = vmatmul.msk.f32.vlgmr.msrb.gmra.mxu1 %vm712_vm2, %v711_v11 }
 0x271   : > { %851 = vmatpush.msra.mxu1 %v1536_v27  ;;  %876 = vmatpush.msra.mxu3 %v843_v10 }
 0x272   : > { %897 = vmatpush.msra.mxu0 %v828_v12  ;;  %922 = vmatpush.msra.mxu2 %v1632_v6 }
 0x273   : > { %852 = vmatpush.msra.mxu1 %v1607_v60  ;;  %877 = vmatpush.msra.mxu3 %v1594_v54 }
 0x274   : > { %898 = vmatpush.msra.mxu0 %v1585_v48  ;;  %923 = vmatpush.msra.mxu2 %v1148_v25 }
 0x275   : > { %853 = vmatpush.msra.mxu1 %v1568_v40  ;;  %878 = vmatpush.msra.mxu3 %v1592_v53 }
 0x276   : > { %899 = vmatpush.msra.mxu0 %v1178_v63  ;;  %924 = vmatpush.msra.mxu2 %v837_v14 }
 0x277   : > { %854 = vmatpush.msra.mxu1 %v1566_v39  ;;  %879 = vmatpush.msra.mxu3 %v840_v13 }
 0x278   : > { %900 = vmatpush.msra.mxu0 %v825_v2  ;;  %1110 = vmatmul.msk.f32.vlgmr.msra.gmra.mxu2 %vm712_vm2, %v711_v11 }
 0x279   : > { %855 = vmatpush.msra.mxu1 %v828_v12  ;;  %880 = vmatpush.msra.mxu3 %v1632_v6 }
 0x27a   : > { %901 = vmatpush.msra.mxu0 %v1603_v58 }
 0x27b   : > { %856 = vmatpush.msra.mxu1 %v1585_v48  ;;  %881 = vmatpush.msra.mxu3 %v1630_v52 }
 0x27c   : > { %902 = vmatpush.msra.mxu0 %v1255_v5 }
 0x27d   : > { %857 = vmatpush.msra.mxu1 %v1583_v47  ;;  %882 = vmatpush.msra.mxu3 %v837_v14 }
 0x27e   : > { %903 = vmatpush.msra.mxu0 %v1508_v19 }
 0x27f   : > { %858 = vmatpush.msra.mxu1 %v825_v2  ;;  %883 = vmatpush.msra.mxu3 %v1621_v0 }
 0x280   : > { %904 = vmatpush.msra.mxu0 %v1496_v15  ;;  %1109 = vmatmul.msk.f32.vlgmr.msra.gmra.mxu3 %vm712_vm2, %v711_v11 }
 0x281   : > { %859 = vmatpush.msra.mxu1 %v1603_v58  ;;  %905 = vmatmul.f32.vlgmr.msra.gmra.mxu0 %v1626_v1 }
 0x282   : > { %1111 = vmatpush.msk.msrb.mxu3 %vm950_vm3, %v945_v33 }
 0x283   : > { %860 = vmatpush.msra.mxu1 %v1601_v57 }
 0x284   : > { %969 = vmatpush.msrb.mxu3 %v944_v34 }
 0x285   : > { %861 = vmatpush.msra.mxu1 %v1508_v19 }
 0x286   : > { %1113 = vmatpush.msk.msra.mxu3 %vm950_vm3, %v991_v35 }
 0x287   : > { %862 = vmatpush.msra.mxu1 %v1496_v15 }
 0x288   : > { %1013 = vmatpush.msra.mxu3 %v944_v34 }
 0x289   : > { %863 = vmatpush.msra.mxu1 %v1498_v16 }
 0x28a   : > { %864 = vmatmul.f32.vlgmr.msra.gmra.mxu1 %v1626_v1 }
 0x2dc   : > { %v733_v17 = vpop.f32.mrf.mxu0 }
 0x2e2   : > { %v799_v18 = vpop.f32.mrf.mxu2 }
 0x2ed   : > { %v753_v20 = vpop.f32.mrf.mxu1  ;;  %v819_v21 = vpop.f32.mrf.mxu3 }
 0x2ee   : > { %v754_v22 = vadd.f32 %v753_v20, %v733_v17  ;;  %v820_v23 = vadd.f32 %v819_v21, %v799_v18 }
 0x2f0   : > { %v756_v24 = vmax.f32 %v754_v22, 0.0  ;;  %v822_v25 = vmax.f32 %v820_v23, 0.0 }
 0x2f2   : > { %v930_v26 = vmax.f32 %v756_v24, %v822_v25 }
 0x2f4   : > { %932 = vrot.lane.b32.xlu1 %v930_v26, %s1243_s28  ;;  %940 = vrot.lane.b32.xlu0 %v930_v26, %s1251_s19 }
 0x2f5   : > { %936 = vrot.lane.b32.xlu2 %v930_v26, %s1254_s22 }
 0x2fb   : > { %v926_v19 = vpop.f32.mrf.mxu2 }
 0x2fe   : > { %v906_v15 = vpop.f32.mrf.mxu0 }
 0x2ff   : > { %v927_v16 = vadd.f32 %v926_v19, %v906_v15 }
 0x301   : > { %v929_v30 = vmax.f32 %v927_v16, 0.0 }
 0x303   : > { %v885_v27 = vpop.f32.mrf.mxu3 }
 0x307   : > { %v865_v28 = vpop.f32.mrf.mxu1 }
 0x308   : > { %v886_v29 = vadd.f32 %v885_v27, %v865_v28 }
 0x30a   : > { %v888_v31 = vmax.f32 %v886_v29, 0.0 }
 0x30c   : > { %v976_v32 = vmax.f32 %v888_v31, %v929_v30 }
 0x30e   : > { %986 = vrot.lane.b32.xlu0 %v976_v32, %s1251_s19  ;;  %982 = vrot.lane.b32.xlu2 %v976_v32, %s1254_s22 }
 0x30f   : > { %978 = vrot.lane.b32.xlu1 %v976_v32, %s1243_s28  ;;  %s1118_s28 = sshll.u32 %s1728_s25, 4 }
 0x310   : > { %s278_s15 = scalar_lea.vmem %s1726_s7, %s1118_s28 }
 0x34f   : > { %v937_v38 = vpop.permute.xlu2 %936 }
 0x366   : > { %v933_v36 = vpop.permute.xlu1 %932  ;;  %v941_v39 = vpop.permute.xlu0 %940 }
 0x367   : > { %v935_v37 = vmax.f32 %v930_v26, %v933_v36 }
 0x368   : > { %v983_v44 = vpop.permute.xlu2 %982 }
 0x369   : > { %v939_v40 = vmax.f32 %v935_v37, %v937_v38 }
 0x36b   : > { %v943_v41 = vmax.f32 %v939_v40, %v941_v39 }
 0x36d   : > { %1112 = vmatmul.msk.f32.vlgmr.msrb.gmra.mxu3 %vm946_vm4, %v943_v41 }
 0x380   : > { %v987_v46 = vpop.permute.xlu0 %986 }
 0x381   : > { %v979_v42 = vpop.permute.xlu1 %978 }
 0x382   : > { %v981_v43 = vmax.f32 %v976_v32, %v979_v42 }
 0x384   : > { %v985_v45 = vmax.f32 %v981_v43, %v983_v44 }
 0x386   : > { %v989_v47 = vmax.f32 %v985_v45, %v987_v46 }
 0x388   : > { %1114 = vmatmul.msk.f32.vlgmr.msra.gmra.mxu3 %vm946_vm4, %v989_v47 }
 0x3f0   : > { %v971_v48 = vpop.f32.mrf.mxu3 }
 0x3f1   : > { %975 = vst.msk [vmem:[%s278_s15] sm:$0xff] %vm974_vm5, %v971_v48 }
 0x40b   : > { %v1015_v49 = vpop.f32.mrf.mxu3 }
 0x40c   : > { %1115 = vst.msk [vmem:[%s278_s15 + $0x8] sm:$0xff] %vm974_vm5, %v1015_v49 }
 0x40d PF: > { %s17_s24 = sadd.s32 1, %s1239_s24  }
 0x40e   : > { %p14_p4 = scmp.ge.s32.totalorder %s17_s24, 4  }
 0x410   :  { %16 = sbr.rel (!%p14_p4) target bundleno = 1 (0x1), region = 95 }

// kernel: localization3d_forward.4
= control target key start
LH: loop header
LB: loop body
LE: loop exit
PB: predicated region body
PF: predicated region fallthrough
CT: control target
= control target key end

     0   :  { %s3327_s27 = smov 0   ;;  %s5127_s0 = inlined_call_operand.vmem [shape: f32[2,18,4,324], index: 0, kind: input, shape index: {}]   ;;  %s5128_s1 = inlined_call_operand.vmem [shape: f32[18,1,324], index: 1, kind: input, shape index: {}]   ;;  %s5129_s2 = inlined_call_operand.vmem [shape: f32[4,1], index: 2, kind: input, shape index: {}]   ;;  %s5130_s3 = inlined_call_operand.vmem [shape: f32[4,1], index: 3, kind: input, shape index: {}]   ;;  %s5131_s4 = inlined_call_operand.vmem [shape: f32[8,4], index: 4, kind: input, shape index: {}]   ;;  %s5132_s5 = inlined_call_operand.vmem [shape: f32[286,100], index: 5, kind: input, shape index: {}]   ;;  %s5133_s6 = inlined_call_operand.vmem [shape: f32[2,10,8,100], index: 6, kind: output, shape index: {0}]   ;;  %s5134_s7 = inlined_call_operand.vmem [shape: f32[2,8,1], index: 7, kind: output, shape index: {1}]   ;;  %s5135_s8 = inlined_call_operand.vmem [shape: f32[2,8,1], index: 8, kind: output, shape index: {2}]  }
   0x1 LB: > { %s3119_s28 = sadd.s32 4294967295, %s3269_s27   ;;  %p3123_p0 = scmp.ge.s32.totalorder %s3269_s27, 1  ;;  %s3269_s27 = sphi %s3327_s27, %s19_s27  }
   0x2   : > { %p267_p1 = scmp.lt.s32.totalorder %s3269_s27, 3 }
   0x4   : > { %p268_p2 = pnand %p3123_p0, %p267_p1 }
   0x6   : > { %271 = sbr.rel (%p268_p2) target bundleno = 1887 (0x75f), region = 44 }
   0xb   : > { %v333_v0 = vld [vmem:[%s5129_s2] sm:$0xf]  ;;  %v3271_v1 = vmov 0   ;;  %p309_p3 = scmp.lt.s32.totalorder %s3119_s28, 1  ;;  %v3272_v3 = vmov 839922192  }
   0xc   : > { %3261 = vset.pattern.permute.xlu0 %v3271_v1  ;;  %3262 = vset.pattern.permute.xlu1 %v3271_v1  ;;  %v345_v2 = vld [vmem:[%s5130_s3] sm:$0xf]  ;;  %v339_v4 = vunpack.c.l.s4 %v3272_v3  ;;  %v3134_v9 = vld [vmem:[%s5128_s1 + $0x6] sm:$0x7]  ;;  %vm366_vm0 = vcmask 1043456   ;;  %s3273_s21 = smov 110  }
   0xd   : > { %336 = vperm.xlu0 %3261, %v333_v0   ;;  %s5172_s28 = smov (!%p309_p3, %s3119_s28), 1  ;;  %v359_v7 = vld [vmem:[%s5128_s1] sm:$0x7]  ;;  %v3131_v8 = vld [vmem:[%s5128_s1 + $0x3] sm:$0x7]  ;;  %v407_v17 = vperm.slane %v3134_v9, 1 }
   0xe   : > { %s3240_s11 = smul.u32 216, %s5172_s28  ;;  %v3344_v5 = vunpack.c.0.s8 %v339_v4  ;;  %v362_v11 = vperm.slane %v359_v7, 1  ;;  %v384_v12 = vperm.slane %v3131_v8, 1  ;;  %v361_v19 = vperm.slane %v359_v7, 0  ;;  %s3274_s22 = smov 126   ;;  %v3421_v1 = vld [vmem:[%s5132_s5 + $0x78] sm:$0xff] }
   0xf   : > { %v383_v22 = vperm.slane %v3131_v8, 0  ;;  %v406_v30 = vperm.slane %v3134_v9, 0  ;;  %v410_v31 = vrot.slane %v407_v17, 4  ;;  %v363_v40 = vperm.slane %v359_v7, 2  ;;  %s3275_s23 = smov 127   ;;  %s3276_s24 = smov 109   ;;  %576 = vmatpush.msra.mxu0 %v3421_v1 }
  0x10   : > { %s3355_s18 = scalar_lea.vmem %s5127_s0, %s3240_s11  ;;  %v365_v21 = vrot.slane %v362_v11, 4  ;;  %v387_v23 = vrot.slane %v384_v12, 4  ;;  %v385_v44 = vperm.slane %v3131_v8, 2  ;;  %v408_v57 = vperm.slane %v3134_v9, 2  ;;  %s3277_s25 = smov 92   ;;  %v3433_v3 = vld [vmem:[%s5132_s5 + $0x70] sm:$0xff] }
  0x11   : > { %v331_v13 = vld [vmem:[%s3355_s18] sm:$0xff]  ;;  %v332_v14 = vld [vmem:[%s3355_s18 + $0x8] sm:$0xf]  ;;  %v3129_v15 = vld [vmem:[%s3355_s18 + $0xc] sm:$0xff]  ;;  %v411_v45 = vsel %vm366_vm0, %v406_v30, %v410_v31  ;;  %s3278_s26 = smov 91   ;;  %s3279_s29 = smov 108   ;;  %577 = vmatpush.msra.mxu0 %v3433_v3 }
  0x12   : > { %v3130_v16 = vld [vmem:[%s3355_s18 + $0x14] sm:$0xf]  ;;  %v3366_v18 = vld [vmem:[%s3355_s18 + $0x18] sm:$0xff]  ;;  %v3133_v32 = vld [vmem:[%s3355_s18 + $0x20] sm:$0xf]  ;;  %v367_v37 = vsel %vm366_vm0, %v361_v19, %v365_v21  ;;  %v388_v38 = vsel %vm366_vm0, %v383_v22, %v387_v23  ;;  %s3280_s10 = smov 90  }
  0x13   : > { %v677_v62 = vld [vmem:[%s5129_s2] sm:$0xf]  ;;  %v3438_v4 = vld [vmem:[%s5132_s5 + $0xf0] sm:$0xff]  ;;  %v3450_v7 = vld [vmem:[%s5132_s5 + $0xe8] sm:$0xff]  ;;  %vm572_vm1 = vcmask 1045504   ;;  %vm426_vm2 = vcmask 1039360  }
  0x14   : > { %v689_v63 = vld [vmem:[%s5130_s3] sm:$0xf]  ;;  %v3469_v11 = vld [vmem:[%s5132_s5 + $0x58] sm:$0xff]  ;;  %v3499_v17 = vld [vmem:[%s5132_s5 + $0x48] sm:$0xff]  ;;  %vm439_vm3 = vcmask 1031168   ;;  %vm452_vm4 = vcmask 900096  }
  0x15   : > { %348 = vperm.xlu0 %3261, %v345_v2   ;;  %v3426_v2 = vld [vmem:[%s5132_s5 + $0xf8] sm:$0xff]  ;;  %v3459_v9 = vld [vmem:[%s5132_s5 + $0x60] sm:$0xff]  ;;  %v3504_v19 = vld [vmem:[%s5132_s5 + $0xc8] sm:$0xff]  ;;  %vm465_vm5 = vcmask 891904   ;;  %vm478_vm6 = vcmask 883712   ;;  %vm491_vm7 = vcmask 752640  }
  0x16   : > { %596 = vmatpush.msra.mxu1 %v3426_v2  ;;  %v3476_v12 = vld [vmem:[%s5132_s5 + $0xd8] sm:$0xff]  ;;  %v3516_v21 = vld [vmem:[%s5132_s5 + $0xc0] sm:$0xff]  ;;  %v3561_v31 = vld [vmem:[%s5132_s5 + $0x28] sm:$0xff]  ;;  %vm504_vm8 = vcmask 744448   ;;  %vm517_vm9 = vcmask 736256   ;;  %vm569_vm10 = vcmask 244736  }
  0x17   : > { %v3525_v23 = vld [vmem:[%s5132_s5 + $0x38] sm:$0xff]  ;;  %vm637_vm11 = vcmask 31744   ;;  %s3241_s9 = smul.u32 80, %s5172_s28  ;;  %vm327_vm12 = vcmask 818176   ;;  %vm2999_vm13 = vcmask 7168  }
  0x18   : > { %597 = vmatpush.msra.mxu1 %v3438_v4 }
  0x19   : > { %s3933_s13 = scalar_lea.vmem %s5133_s6, %s3241_s9 }
  0x1a   : > { %598 = vmatpush.msra.mxu1 %v3450_v7 }
  0x7f   : > { %v337_v6 = vpop.permute.xlu0 %336 }
  0x80   : > { %v341_v10 = vperm.slane %v337_v6, %v3344_v5  ;;  %v3445_v6 = vld [vmem:[%s5132_s5 + $0x68] sm:$0xff] }
  0x81   : > { %578 = vmatpush.msra.mxu0 %v3445_v6 }
  0x82   : > { %v343_v20 = vmul.f32 %v341_v10, %v331_v13  ;;  %v344_v25 = vmul.f32 %v341_v10, %v332_v14  ;;  %v374_v26 = vmul.f32 %v3129_v15, %v341_v10  ;;  %v375_v27 = vmul.f32 %v3130_v16, %v341_v10  ;;  %v3487_v15 = vld [vmem:[%s5132_s5 + $0x50] sm:$0xff] }
  0x83   : > { %v397_v29 = vmul.f32 %v3366_v18, %v341_v10  ;;  %v398_v43 = vmul.f32 %v3133_v32, %v341_v10  ;;  %v3464_v10 = vld [vmem:[%s5132_s5 + $0xe0] sm:$0xff]  ;;  %579 = vmatpush.msra.mxu0 %v3459_v9  ;;  %v3492_v16 = vld [vmem:[%s5132_s5 + $0xd0] sm:$0xff]  ;;  %v3566_v32 = vld [vmem:[%s5132_s5 + $0xa8] sm:$0xff] }
  0x84   : > { %599 = vmatpush.msra.mxu1 %v3464_v10 }
  0x85   : > { %580 = vmatpush.msra.mxu0 %v3469_v11 }
  0x86   : > { %600 = vmatpush.msra.mxu1 %v3476_v12 }
  0x87   : > { %v349_v24 = vpop.permute.xlu0 %348  ;;  %581 = vmatpush.msra.mxu0 %v3487_v15 }
  0x88   : > { %v353_v28 = vperm.slane %v349_v24, %v3344_v5  ;;  %601 = vmatpush.msra.mxu1 %v3492_v16  ;;  %v3530_v24 = vld [vmem:[%s5132_s5 + $0xb8] sm:$0xff] }
  0x89   : > { %582 = vmatpush.msra.mxu0 %v3499_v17 }
  0x8a   : > { %v355_v33 = vadd.f32 %v353_v28, %v343_v20  ;;  %v356_v34 = vadd.f32 %v353_v28, %v344_v25  ;;  %v376_v35 = vadd.f32 %v374_v26, %v353_v28  ;;  %v377_v36 = vadd.f32 %v375_v27, %v353_v28  ;;  %602 = vmatpush.msra.mxu1 %v3504_v19  ;;  %v3511_v20 = vld [vmem:[%s5132_s5 + $0x40] sm:$0xff]  ;;  %v558_v25 = vld [vmem:[%s5132_s5 + $0x118] sm:$0x3f]  ;;  %v3541_v27 = vld [vmem:[%s5132_s5 + $0x30] sm:$0xff] }
  0x8b   : > { %v399_v39 = vadd.f32 %v397_v29, %v353_v28  ;;  %v400_v52 = vadd.f32 %v398_v43, %v353_v28  ;;  %583 = vmatpush.msra.mxu0 %v3511_v20  ;;  %3135 = vmatpush.msk.msra.mxu2 %vm572_vm1, %v558_v25  ;;  %v3546_v28 = vld [vmem:[%s5132_s5 + $0xb0] sm:$0xff] }
  0x8c   : > { %v357_v41 = vmax.f32 %v355_v33, 0.0  ;;  %v378_v42 = vmax.f32 %v376_v35, 0.0  ;;  %v358_v47 = vmax.f32 %v356_v34, 0.0  ;;  %v379_v49 = vmax.f32 %v377_v36, 0.0  ;;  %603 = vmatpush.msra.mxu1 %v3516_v21  ;;  %v3551_v29 = vld [vmem:[%s5132_s5 + $0x110] sm:$0xff]  ;;  %v3571_v33 = vld [vmem:[%s5132_s5 + $0x108] sm:$0xff] }
  0x8d   : > { %v401_v46 = vmax.f32 %v399_v39, 0.0  ;;  %v402_v58 = vmax.f32 %v400_v52, 0.0  ;;  %584 = vmatpush.msra.mxu0 %v3525_v23  ;;  %629 = vmatpush.msra.mxu2 %v3551_v29  ;;  %v3579_v34 = vld [vmem:[%s5132_s5 + $0x20] sm:$0xff]  ;;  %v3602_v39 = vld [vmem:[%s5132_s5 + $0x98] sm:$0xff] }
  0x8e   : > { %v369_v48 = vmul.f32 %v367_v37, %v357_v41  ;;  %v390_v50 = vmul.f32 %v388_v38, %v378_v42  ;;  %v370_v54 = vmul.f32 %v363_v40, %v358_v47  ;;  %v391_v55 = vmul.f32 %v385_v44, %v379_v49  ;;  %604 = vmatpush.msra.mxu1 %v3530_v24  ;;  %v3584_v35 = vld [vmem:[%s5132_s5 + $0xa0] sm:$0xff]  ;;  %v3597_v38 = vld [vmem:[%s5132_s5 + $0x18] sm:$0xff]  ;;  %v3612_v44 = vld [vmem:[%s5132_s5 + $0x10] sm:$0xff] }
  0x8f   : > { %v413_v53 = vmul.f32 %v411_v45, %v401_v46  ;;  %v414_v60 = vmul.f32 %v408_v57, %v402_v58  ;;  %585 = vmatpush.msra.mxu0 %v3541_v27  ;;  %630 = vmatpush.msra.mxu2 %v3571_v33  ;;  %v3589_v36 = vld [vmem:[%s5132_s5 + $0x100] sm:$0xff]  ;;  %5151 = vst [vmem:[#allocation2_spill] sm:$0xff] %v3602_v39  ;;  %v3617_v45 = vld [vmem:[%s5132_s5 + $0x90] sm:$0xff]  ;;  %v3625_v47 = vld [vmem:[%s5132_s5 + $0x8] sm:$0xff] }
  0x90   : > { %v392_v51 = vmax.f32 %v369_v48, %v390_v50  ;;  %v393_v59 = vmax.f32 %v370_v54, %v391_v55  ;;  %605 = vmatpush.msra.mxu1 %v3546_v28  ;;  %5152 = vst [vmem:[#allocation3_spill] sm:$0xff] %v3617_v45  ;;  %v3630_v48 = vld [vmem:[%s5132_s5 + $0x88] sm:$0xff]  ;;  %v3642_v54 = vld [vmem:[%s5132_s5] sm:$0xff] }
  0x91   : > { %586 = vmatpush.msra.mxu0 %v3561_v31  ;;  %631 = vmatpush.msra.mxu2 %v3589_v36  ;;  %5153 = vst [vmem:[#allocation4_spill] sm:$0xff] %v3625_v47  ;;  %v3647_v55 = vld [vmem:[%s5132_s5 + $0x80] sm:$0xff] }
  0x92   : > { %v3374_v56 = vmax.f32 %v392_v51, %v413_v53  ;;  %v3382_v61 = vmax.f32 %v393_v59, %v414_v60  ;;  %606 = vmatpush.msra.mxu1 %v3566_v32  ;;  %5154 = vst [vmem:[#allocation5_spill] sm:$0xff] %v3630_v48 }
  0x93   : > { %587 = vmatpush.msra.mxu0 %v3579_v34  ;;  %929 = vmatpush.msrb.mxu2 %v3426_v2  ;;  %5155 = vst [vmem:[#allocation6_spill] sm:$0xff] %v3642_v54 }
  0x94   : > { %445 = vrot.lane.b32.xlu0 %v3374_v56, %s3273_s21  ;;  %432 = vrot.lane.b32.xlu2 %v3374_v56, %s3274_s22  ;;  %5156 = vst [vmem:[#allocation7_spill] sm:$0xff] %v3647_v55 }
  0x95   : > { %419 = vrot.lane.b32.xlu1 %v3374_v56, %s3275_s23  ;;  %607 = vmatpush.msra.mxu1 %v3584_v35 }
  0x96   : > { %588 = vmatpush.msra.mxu0 %v3597_v38  ;;  %930 = vmatpush.msrb.mxu2 %v3438_v4 }
  0x97   : > { %608 = vmatpush.msra.mxu1 %v3602_v39 }
  0x98   : > { %589 = vmatpush.msra.mxu0 %v3612_v44  ;;  %931 = vmatpush.msrb.mxu2 %v3450_v7 }
  0x99   : > { %609 = vmatpush.msra.mxu1 %v3617_v45 }
  0x9a   : > { %590 = vmatpush.msra.mxu0 %v3625_v47  ;;  %932 = vmatpush.msrb.mxu2 %v3464_v10 }
  0x9b   : > { %610 = vmatpush.msra.mxu1 %v3630_v48 }
  0x9c   : > { %460 = vrot.lane.b32.xlu0 %v3382_v61, %s3276_s24  ;;  %434 = vrot.lane.b32.xlu2 %v3382_v61, %s3274_s22 }
  0x9d   : > { %421 = vrot.lane.b32.xlu1 %v3382_v61, %s3275_s23  ;;  %591 = vmatpush.msra.mxu0 %v3642_v54 }
  0x9e   : > { %611 = vmatpush.msra.mxu1 %v3647_v55  ;;  %933 = vmatpush.msrb.mxu2 %v3476_v12 }
  0xa0   : > { %934 = vmatpush.msrb.mxu2 %v3492_v16 }
  0xa2   : > { %935 = vmatpush.msrb.mxu2 %v3504_v19 }
  0xa4   : > { %484 = vrot.lane.b32.xlu0 %v3374_v56, %s3277_s25  ;;  %458 = vrot.lane.b32.xlu2 %v3374_v56, %s3276_s24 }
  0xa5   : > { %447 = vrot.lane.b32.xlu1 %v3382_v61, %s3273_s21  ;;  %936 = vmatpush.msrb.mxu2 %v3516_v21 }
  0xa7   : > { %937 = vmatpush.msrb.mxu2 %v3530_v24 }
  0xa9   : > { %938 = vmatpush.msrb.mxu2 %v3546_v28 }
  0xab   : > { %939 = vmatpush.msrb.mxu2 %v3566_v32 }
  0xac   : > { %499 = vrot.lane.b32.xlu0 %v3382_v61, %s3278_s26  ;;  %473 = vrot.lane.b32.xlu2 %v3382_v61, %s3279_s29 }
  0xad   : > { %471 = vrot.lane.b32.xlu1 %v3374_v56, %s3279_s29  ;;  %940 = vmatpush.msrb.mxu2 %v3584_v35 }
  0xaf   : > { %941 = vmatpush.msrb.mxu2 %v3602_v39 }
  0xb1   : > { %942 = vmatpush.msrb.mxu2 %v3617_v45 }
  0xb3   : > { %943 = vmatpush.msrb.mxu2 %v3630_v48 }
  0xb4   : > { %680 = vperm.xlu0 %3261, %v677_v62   ;;  %497 = vrot.lane.b32.xlu2 %v3374_v56, %s3278_s26 }
  0xb5   : > { %486 = vrot.lane.b32.xlu1 %v3382_v61, %s3277_s25  ;;  %944 = vmatpush.msrb.mxu2 %v3647_v55 }
  0xbc   : > { %512 = vrot.lane.b32.xlu2 %v3382_v61, %s3280_s10 }
  0xbd   : > { %510 = vrot.lane.b32.xlu1 %v3374_v56, %s3280_s10 }
  0xc5   : > { %692 = vperm.xlu1 %3262, %v689_v63  }
  0xee   : > { %v3416_v0 = vpop.permute.xlu2 %432 }
  0xef   : > { %v436_v57 = vrot.slane %v3416_v0, 4 }
  0xf6   : > { %v3452_v8 = vpop.permute.xlu2 %434 }
  0xf7   : > { %v437_v49 = vrot.slane %v3452_v8, 4 }
  0xfe   : > { %v3518_v22 = vpop.permute.xlu2 %458 }
 0x106   : > { %v3482_v14 = vpop.permute.xlu0 %445  ;;  %v474_v40 = vpop.permute.xlu2 %473 }
 0x107   : > { %v3478_v13 = vpop.permute.xlu1 %419  ;;  %v449_v58 = vrot.slane %v3482_v14, 4 }
 0x108   : > { %v423_v42 = vrot.slane %v3478_v13, 4 }
 0x10e   : > { %v3555_v30 = vpop.permute.xlu0 %460 }
 0x10f   : > { %v422_v26 = vpop.permute.xlu1 %421 }
 0x110   : > { %v424_v37 = vrot.slane %v422_v26, 4  ;;  %v431_v43 = vmax.f32 %v3382_v61, %v422_v26  ;;  %v438_v61 = vsel %vm366_vm0, %v436_v57, %v437_v49 }
 0x112   : > { %v425_v46 = vsel %vm366_vm0, %v423_v42, %v424_v37  ;;  %v444_v51 = vmax.f32 %v431_v43, %v3452_v8  ;;  %v498_v8 = vpop.permute.xlu2 %497  ;;  %v440_v37 = vsel %vm439_vm3, %v3416_v0, %v438_v61  ;;  %v476_v42 = vrot.slane %v474_v40, 4 }
 0x113   : > { %v427_v53 = vsel %vm426_vm2, %v3478_v13, %v425_v46  ;;  %v463_v13 = vrot.slane %v3555_v30, 4 }
 0x114   : > { %v430_v62 = vmax.f32 %v3374_v56, %v427_v53  ;;  %v462_v56 = vrot.slane %v3518_v22, 4 }
 0x116   : > { %v485_v50 = vpop.permute.xlu0 %484  ;;  %v443_v43 = vmax.f32 %v430_v62, %v440_v37  ;;  %v464_v46 = vsel %vm366_vm0, %v462_v56, %v463_v13 }
 0x117   : > { %v448_v41 = vpop.permute.xlu1 %447 }
 0x118   : > { %v450_v52 = vrot.slane %v448_v41, 4  ;;  %v457_v59 = vmax.f32 %v444_v51, %v448_v41 }
 0x11a   : > { %v451_v63 = vsel %vm366_vm0, %v449_v58, %v450_v52  ;;  %v470_v25 = vmax.f32 %v457_v59, %v3555_v30  ;;  %v466_v58 = vsel %vm465_vm5, %v3518_v22, %v464_v46 }
 0x11b   : > { %v453_v41 = vsel %vm452_vm4, %v3482_v14, %v451_v63  ;;  %v488_v14 = vrot.slane %v485_v50, 4 }
 0x11c   : > { %v456_v49 = vmax.f32 %v443_v43, %v453_v41  ;;  %v483_v0 = vmax.f32 %v470_v25, %v474_v40  ;;  %v513_v40 = vpop.permute.xlu2 %512 }
 0x11e   : > { %v500_v30 = vpop.permute.xlu0 %499  ;;  %v469_v62 = vmax.f32 %v456_v49, %v466_v58 }
 0x11f   : > { %v472_v60 = vpop.permute.xlu1 %471  ;;  %v502_v61 = vrot.slane %v500_v30, 4 }
 0x120   : > { %v475_v26 = vrot.slane %v472_v60, 4 }
 0x122   : > { %v477_v51 = vsel %vm366_vm0, %v475_v26, %v476_v42  ;;  %v501_v26 = vrot.slane %v498_v8, 4  ;;  %v3683_v42 = vld [vmem:[%s5128_s1 + $0x6] sm:$0x7] }
 0x123   : > { %v479_v59 = vsel %vm478_vm6, %v472_v60, %v477_v51 }
 0x124   : > { %v482_v37 = vmax.f32 %v469_v62, %v479_v59  ;;  %v503_v22 = vsel %vm366_vm0, %v501_v26, %v502_v61  ;;  %v3144_v61 = vld [vmem:[%s3355_s18 + $0x2c] sm:$0xf]  ;;  %v3703_v62 = vld [vmem:[%s3355_s18 + $0x30] sm:$0xff]  ;;  %v705_v26 = vperm.slane %v3683_v42, 0 }
 0x125   : > { %v505_v49 = vsel %vm504_vm8, %v498_v8, %v503_v22  ;;  %v3143_v8 = vld [vmem:[%s3355_s18 + $0x24] sm:$0xff]  ;;  %5157 = vst [vmem:[#allocation8_spill] sm:$0xff] %v3703_v62 }
 0x126   : > { %v681_v43 = vpop.permute.xlu0 %680 }
 0x127   : > { %v487_v52 = vpop.permute.xlu1 %486 }
 0x128   : > { %v489_v53 = vrot.slane %v487_v52, 4  ;;  %v496_v57 = vmax.f32 %v483_v0, %v487_v52  ;;  %v706_v52 = vperm.slane %v3683_v42, 1 }
 0x12a   : > { %v490_v63 = vsel %vm366_vm0, %v488_v14, %v489_v53  ;;  %v509_v13 = vmax.f32 %v496_v57, %v500_v30  ;;  %v3145_v30 = vld [vmem:[%s5128_s1 + $0x9] sm:$0x7]  ;;  %v3148_v14 = vld [vmem:[%s5128_s1 + $0xc] sm:$0x7]  ;;  %v3141_v53 = vld [vmem:[%s3355_s18 + $0x20] sm:$0xf]  ;;  %v685_v57 = vperm.slane %v681_v43, %v3344_v5 }
 0x12b   : > { %v492_v25 = vsel %vm491_vm7, %v485_v50, %v490_v63  ;;  %v515_v50 = vrot.slane %v513_v40, 4  ;;  %v727_v59 = vperm.slane %v3145_v30, 1  ;;  %v726_v22 = vperm.slane %v3145_v30, 0 }
 0x12c   : > { %v522_v41 = vmax.f32 %v509_v13, %v513_v40  ;;  %v495_v60 = vmax.f32 %v482_v37, %v492_v25  ;;  %v3147_v13 = vld [vmem:[%s3355_s18 + $0x38] sm:$0xf]  ;;  %v750_v25 = vperm.slane %v3148_v14, 1  ;;  %v707_v37 = vperm.slane %v3683_v42, 2 }
 0x12d   : > { %v749_v43 = vperm.slane %v3148_v14, 0  ;;  %v751_v48 = vperm.slane %v3148_v14, 2 }
 0x12e   : > { %563 = vst [vmem:[#allocation1 + $0x10] ss:$2 sm:$0xff] %v522_v41  ;;  %v508_v51 = vmax.f32 %v495_v60, %v505_v49  ;;  %v709_v41 = vrot.slane %v706_v52, 4  ;;  %v687_v60 = vmul.f32 %v3366_v18, %v685_v57  ;;  %v688_v49 = vmul.f32 %v3141_v53, %v685_v57 }
 0x12f   : > { %v511_v56 = vpop.permute.xlu1 %510  ;;  %v753_v42 = vrot.slane %v750_v25, 4 }
 0x130   : > { %v514_v46 = vrot.slane %v511_v56, 4 }
 0x132   : > { %v516_v0 = vsel %vm366_vm0, %v514_v46, %v515_v50  ;;  %v730_v50 = vrot.slane %v727_v59, 4 }
 0x133   : > { %v518_v58 = vsel %vm517_vm9, %v511_v56, %v516_v0  ;;  %v728_v56 = vperm.slane %v3145_v30, 2  ;;  %v718_v0 = vmul.f32 %v3144_v61, %v685_v57  ;;  %v710_v30 = vsel %vm366_vm0, %v705_v26, %v709_v41 }
 0x134   : > { %v521_v63 = vmax.f32 %v508_v51, %v518_v58  ;;  %v717_v51 = vmul.f32 %v3143_v8, %v685_v57  ;;  %v731_v59 = vsel %vm366_vm0, %v726_v22, %v730_v50 }
 0x135   : > { %v566_v40 = vld.sshfl [vmem:[#allocation1 + $0x10] sm:$0xff pattern:$0x75316420] }
 0x136   : > { %561 = vst [vmem:[#allocation1] ss:$2 sm:$0xff] %v521_v63  ;;  %3136 = vmatmul.msk.f32.vlgmr.msra.gmra.mxu2 %vm569_vm10, %v566_v40  ;;  %v740_v63 = vmul.f32 %v3703_v62, %v685_v57  ;;  %v741_v40 = vmul.f32 %v3147_v13, %v685_v57 }
 0x137   : > { %v693_v46 = vpop.permute.xlu1 %692 }
 0x138   : > { %v697_v58 = vperm.slane %v693_v46, %v3344_v5  ;;  %v754_v46 = vsel %vm366_vm0, %v749_v43, %v753_v42 }
 0x13a   : > { %v699_v52 = vadd.f32 %v697_v58, %v687_v60  ;;  %v700_v54 = vadd.f32 %v697_v58, %v688_v49  ;;  %v719_v45 = vadd.f32 %v717_v51, %v697_v58  ;;  %v720_v18 = vadd.f32 %v718_v0, %v697_v58 }
 0x13b   : > { %v742_v47 = vadd.f32 %v740_v63, %v697_v58  ;;  %v743_v55 = vadd.f32 %v741_v40, %v697_v58  ;;  %v893_v58 = vld [vmem:[%s5132_s5 + $0x118] sm:$0x3f] }
 0x13c   : > { %v701_v53 = vmax.f32 %v699_v52, 0.0  ;;  %v702_v8 = vmax.f32 %v700_v54, 0.0  ;;  %v721_v61 = vmax.f32 %v719_v45, 0.0  ;;  %v722_v39 = vmax.f32 %v720_v18, 0.0  ;;  %3149 = vmatpush.msk.msrb.mxu0 %vm572_vm1, %v893_v58 }
 0x13d   : > { %v744_v62 = vmax.f32 %v742_v47, 0.0  ;;  %v745_v57 = vmax.f32 %v743_v55, 0.0  ;;  %v564_v14 = vld.sshfl [vmem:[#allocation1] sm:$0xff pattern:$0x75316420] }
 0x13e   : > { %v712_v13 = vmul.f32 %v710_v30, %v701_v53  ;;  %v713_v25 = vmul.f32 %v707_v37, %v702_v8  ;;  %v733_v60 = vmul.f32 %v731_v59, %v721_v61  ;;  %v734_v49 = vmul.f32 %v728_v56, %v722_v39  ;;  %592 = vmatmul.f32.vlgmr.msra.gmra.mxu0 %v564_v14  ;;  %v565_v51 = vld.sshfl [vmem:[#allocation1 + $0x8] sm:$0xff pattern:$0x75316420]  ;;  %v1009_v39 = vld [vmem:[%s5129_s2] sm:$0xf] }
 0x13f   : > { %612 = vmatmul.f32.vlgmr.msra.gmra.mxu1 %v565_v51  ;;  %v756_v22 = vmul.f32 %v754_v46, %v744_v62  ;;  %v757_v50 = vmul.f32 %v751_v48, %v745_v57  ;;  %v1021_v47 = vld [vmem:[%s5130_s3] sm:$0xf]  ;;  %962 = vmatpush.msrb.mxu0 %v3551_v29 }
 0x140   : > { %v735_v26 = vmax.f32 %v712_v13, %v733_v60  ;;  %v736_v41 = vmax.f32 %v713_v25, %v734_v49  ;;  %v3771_v53 = vld [vmem:[%s5131_s4] sm:$0xff] }
 0x141   : > { %963 = vmatpush.msrb.mxu0 %v3571_v33 }
 0x142   : > { %v3717_v0 = vmax.f32 %v735_v26, %v756_v22  ;;  %v3719_v45 = vmax.f32 %v736_v41, %v757_v50 }
 0x143   : > { %964 = vmatpush.msrb.mxu0 %v3589_v36 }
 0x144   : > { %764 = vrot.lane.b32.xlu0 %v3719_v45, %s3275_s23  ;;  %774 = vrot.lane.b32.xlu1 %v3717_v0, %s3274_s22 }
 0x145   : > { %762 = vrot.lane.b32.xlu2 %v3717_v0, %s3275_s23  ;;  %1261 = vmatpush.msra.mxu0 %v3426_v2 }
 0x147   : > { %1262 = vmatpush.msra.mxu0 %v3438_v4 }
 0x149   : > { %1263 = vmatpush.msra.mxu0 %v3450_v7 }
 0x14b   : > { %1264 = vmatpush.msra.mxu0 %v3464_v10 }
 0x14c   : > { %786 = vrot.lane.b32.xlu0 %v3717_v0, %s3273_s21  ;;  %788 = vrot.lane.b32.xlu1 %v3719_v45, %s3273_s21 }
 0x14d   : > { %776 = vrot.lane.b32.xlu2 %v3719_v45, %s3274_s22  ;;  %1265 = vmatpush.msra.mxu0 %v3476_v12 }
 0x14f   : > { %1266 = vmatpush.msra.mxu0 %v3492_v16 }
 0x151   : > { %1267 = vmatpush.msra.mxu0 %v3504_v19 }
 0x153   : > { %1268 = vmatpush.msra.mxu0 %v3516_v21 }
 0x154   : > { %800 = vrot.lane.b32.xlu0 %v3719_v45, %s3276_s24  ;;  %810 = vrot.lane.b32.xlu1 %v3717_v0, %s3279_s29 }
 0x155   : > { %798 = vrot.lane.b32.xlu2 %v3717_v0, %s3276_s24  ;;  %1269 = vmatpush.msra.mxu0 %v3530_v24 }
 0x157   : > { %1270 = vmatpush.msra.mxu0 %v3546_v28  ;;  %v3824_v28 = vld [vmem:[%s5128_s1 + $0xc] sm:$0x7] }
 0x159   : > { %1271 = vmatpush.msra.mxu0 %v3566_v32 }
 0x15b   : > { %1272 = vmatpush.msra.mxu0 %v3584_v35  ;;  %v3155_v35 = vld [vmem:[%s3355_s18 + $0x38] sm:$0xf] }
 0x15c   : > { %822 = vrot.lane.b32.xlu0 %v3717_v0, %s3277_s25  ;;  %824 = vrot.lane.b32.xlu1 %v3719_v45, %s3277_s25 }
 0x15d   : > { %812 = vrot.lane.b32.xlu2 %v3719_v45, %s3279_s29 }
 0x164   : > { %836 = vrot.lane.b32.xlu0 %v3719_v45, %s3278_s26  ;;  %846 = vrot.lane.b32.xlu1 %v3717_v0, %s3280_s10 }
 0x165   : > { %834 = vrot.lane.b32.xlu2 %v3717_v0, %s3278_s26 }
 0x16c   : > { %1012 = vperm.xlu0 %3261, %v1009_v39   ;;  %1024 = vperm.xlu1 %3262, %v1021_v47  }
 0x16d   : > { %848 = vrot.lane.b32.xlu2 %v3719_v45, %s3280_s10 }
 0x19f   : > { %v763_v48 = vpop.permute.xlu2 %762 }
 0x1a0   : > { %v766_v8 = vrot.slane %v763_v48, 4 }
 0x1a7   : > { %v777_v54 = vpop.permute.xlu2 %776 }
 0x1a8   : > { %v779_v36 = vrot.slane %v777_v54, 4 }
 0x1af   : > { %v3759_v55 = vpop.permute.xlu2 %798 }
 0x1b0   : > { %v802_v4 = vrot.slane %v3759_v55, 4 }
 0x1b6   : > { %v765_v62 = vpop.permute.xlu0 %764  ;;  %v775_v37 = vpop.permute.xlu1 %774 }
 0x1b7   : > { %v3765_v18 = vpop.permute.xlu2 %812  ;;  %v767_v59 = vrot.slane %v765_v62, 4  ;;  %v778_v61 = vrot.slane %v775_v37, 4  ;;  %v773_v33 = vmax.f32 %v3719_v45, %v765_v62 }
 0x1b9   : > { %v633_v63 = vpop.f32.mrf.mxu2  ;;  %v768_v29 = vsel %vm366_vm0, %v766_v8, %v767_v59  ;;  %v780_v51 = vsel %vm366_vm0, %v778_v61, %v779_v36  ;;  %v785_v26 = vmax.f32 %v773_v33, %v777_v54 }
 0x1ba   : > { %v769_v14 = vsel %vm426_vm2, %v763_v48, %v768_v29  ;;  %v781_v7 = vsel %vm439_vm3, %v775_v37, %v780_v51  ;;  %v815_v37 = vrot.slane %v3765_v18, 4 }
 0x1bb   : > { %v593_v56 = vpop.f32.mrf.mxu0  ;;  %v772_v49 = vmax.f32 %v3717_v0, %v769_v14  ;;  %v3829_v14 = vld [vmem:[%s5128_s1 + $0xf] sm:$0x7] }
 0x1bc   : > { %v613_v43 = vpop.f32.mrf.mxu1 }
 0x1bd   : > { %v614_v40 = vadd.f32 %v613_v43, %v593_v56  ;;  %v784_v0 = vmax.f32 %v772_v49, %v781_v7  ;;  %v1059_v49 = vperm.slane %v3829_v14, 1 }
 0x1be   : > { %v787_v42 = vpop.permute.xlu0 %786  ;;  %v789_v52 = vpop.permute.xlu1 %788 }
 0x1bf   : > { %v634_v30 = vadd.f32 %v633_v63, %v614_v40  ;;  %v790_v13 = vrot.slane %v787_v42, 4  ;;  %v791_v25 = vrot.slane %v789_v52, 4  ;;  %v835_v60 = vpop.permute.xlu2 %834  ;;  %v797_v22 = vmax.f32 %v785_v26, %v789_v52  ;;  %v3158_v26 = vld [vmem:[%s3355_s18 + $0x44] sm:$0xf] }
 0x1c1   : > { %3137 = vmatpush.msk.msra.mxu3 %vm366_vm0, %v634_v30  ;;  %v792_v41 = vsel %vm366_vm0, %v790_v13, %v791_v25  ;;  %v3837_v25 = vld [vmem:[%s5128_s1 + $0x12] sm:$0x7] }
 0x1c2   : > { %3138 = vmatmul.msk.f32.vlgmr.msra.gmra.mxu3 %vm637_vm11, %v3771_v53  ;;  %v793_v45 = vsel %vm452_vm4, %v787_v42, %v792_v41  ;;  %v3161_v41 = vld [vmem:[%s3355_s18 + $0x50] sm:$0xf] }
 0x1c3   : > { %909 = vmatpush.msrb.mxu3 %v3421_v1  ;;  %v796_v56 = vmax.f32 %v784_v0, %v793_v45  ;;  %v5159_v45 = vld [vmem:[#allocation4_spill] sm:$0xff] }
 0x1c5   : > { %910 = vmatpush.msrb.mxu3 %v3433_v3 }
 0x1c6   : > { %v801_v46 = vpop.permute.xlu0 %800  ;;  %v811_v57 = vpop.permute.xlu1 %810 }
 0x1c7   : > { %911 = vmatpush.msrb.mxu3 %v3445_v6  ;;  %v803_v2 = vrot.slane %v801_v46, 4  ;;  %v809_v10 = vmax.f32 %v797_v22, %v801_v46  ;;  %v814_v48 = vrot.slane %v811_v57, 4  ;;  %v849_v58 = vpop.permute.xlu2 %848  ;;  %v1037_v22 = vperm.slane %v3824_v28, 0 }
 0x1c8   : > { %v851_v52 = vrot.slane %v849_v58, 4 }
 0x1c9   : > { %912 = vmatpush.msrb.mxu3 %v3459_v9  ;;  %v804_v50 = vsel %vm366_vm0, %v802_v4, %v803_v2  ;;  %v816_v16 = vsel %vm366_vm0, %v814_v48, %v815_v37  ;;  %v821_v63 = vmax.f32 %v809_v10, %v3765_v18  ;;  %v1038_v2 = vperm.slane %v3824_v28, 1  ;;  %v3157_v4 = vld [vmem:[%s3355_s18 + $0x3c] sm:$0xff] }
 0x1ca   : > { %v805_v12 = vsel %vm465_vm5, %v3759_v55, %v804_v50  ;;  %v838_v55 = vrot.slane %v835_v60, 4  ;;  %v817_v42 = vsel %vm478_vm6, %v811_v57, %v816_v16  ;;  %v1082_v50 = vperm.slane %v3837_v25, 1  ;;  %v5161_v16 = vld [vmem:[#allocation6_spill] sm:$0xff] }
 0x1cb   : > { %913 = vmatpush.msrb.mxu3 %v3469_v11  ;;  %v808_v43 = vmax.f32 %v796_v56, %v805_v12  ;;  %v1039_v48 = vperm.slane %v3824_v28, 2  ;;  %v1041_v12 = vrot.slane %v1038_v2, 4  ;;  %v1062_v37 = vrot.slane %v1059_v49, 4 }
 0x1cc   : > { %v1081_v56 = vperm.slane %v3837_v25, 0 }
 0x1cd   : > { %914 = vmatpush.msrb.mxu3 %v3487_v15  ;;  %v820_v18 = vmax.f32 %v808_v43, %v817_v42 }
 0x1ce   : > { %v823_v39 = vpop.permute.xlu0 %822  ;;  %v825_v47 = vpop.permute.xlu1 %824 }
 0x1cf   : > { %915 = vmatpush.msrb.mxu3 %v3499_v17  ;;  %v826_v54 = vrot.slane %v823_v39, 4  ;;  %v827_v62 = vrot.slane %v825_v47, 4  ;;  %v833_v19 = vmax.f32 %v821_v63, %v825_v47  ;;  %v3853_v47 = vld [vmem:[%s3355_s18 + $0x48] sm:$0xff]  ;;  %v5163_v63 = vld [vmem:[#allocation8_spill] sm:$0xff] }
 0x1d1   : > { %916 = vmatpush.msrb.mxu3 %v3511_v20  ;;  %v828_v40 = vsel %vm366_vm0, %v826_v54, %v827_v62  ;;  %v1058_v54 = vperm.slane %v3829_v14, 0  ;;  %v1060_v62 = vperm.slane %v3829_v14, 2 }
 0x1d2   : > { %v829_v21 = vsel %vm491_vm7, %v823_v39, %v828_v40  ;;  %v5160_v39 = vld [vmem:[#allocation3_spill] sm:$0xff] }
 0x1d3   : > { %917 = vmatpush.msrb.mxu3 %v3525_v23  ;;  %v832_v57 = vmax.f32 %v820_v18, %v829_v21  ;;  %v1083_v21 = vperm.slane %v3837_v25, 2 }
 0x1d5   : > { %918 = vmatpush.msrb.mxu3 %v3541_v27 }
 0x1d6   : > { %v837_v30 = vpop.permute.xlu0 %836  ;;  %v847_v59 = vpop.permute.xlu1 %846 }
 0x1d7   : > { %919 = vmatpush.msrb.mxu3 %v3561_v31  ;;  %v839_v8 = vrot.slane %v837_v30, 4  ;;  %v845_v29 = vmax.f32 %v833_v19, %v837_v30  ;;  %v850_v61 = vrot.slane %v847_v59, 4 }
 0x1d9   : > { %920 = vmatpush.msrb.mxu3 %v3579_v34  ;;  %v840_v24 = vsel %vm366_vm0, %v838_v55, %v839_v8  ;;  %v857_v46 = vmax.f32 %v845_v29, %v849_v58  ;;  %v852_v33 = vsel %vm366_vm0, %v850_v61, %v851_v52  ;;  %v5162_v58 = vld [vmem:[#allocation5_spill] sm:$0xff]  ;;  %v5164_v8 = vld [vmem:[#allocation7_spill] sm:$0xff] }
 0x1da   : > { %v841_v32 = vsel %vm504_vm8, %v835_v60, %v840_v24  ;;  %v853_v36 = vsel %vm517_vm9, %v847_v59, %v852_v33  ;;  %v5158_v60 = vld [vmem:[#allocation2_spill] sm:$0xff]  ;;  %v1085_v59 = vrot.slane %v1082_v50, 4  ;;  %v1063_v33 = vsel %vm366_vm0, %v1058_v54, %v1062_v37 }
 0x1db   : > { %921 = vmatpush.msrb.mxu3 %v3597_v38  ;;  %898 = vst [vmem:[#allocation1 + $0x10] ss:$2 sm:$0xff] %v857_v46  ;;  %v844_v13 = vmax.f32 %v832_v57, %v841_v32  ;;  %1273 = vmatpush.msra.mxu0 %v5158_v60  ;;  %v1042_v57 = vsel %vm366_vm0, %v1037_v22, %v1041_v12 }
 0x1dd   : > { %922 = vmatpush.msrb.mxu3 %v3612_v44  ;;  %v856_v51 = vmax.f32 %v844_v13, %v853_v36  ;;  %1274 = vmatpush.msra.mxu0 %v5160_v39  ;;  %v1086_v36 = vsel %vm366_vm0, %v1081_v56, %v1085_v59 }
 0x1de   : > { %v1013_v7 = vpop.permute.xlu0 %1012  ;;  %v1025_v0 = vpop.permute.xlu1 %1024 }
 0x1df   : > { %923 = vmatpush.msrb.mxu3 %v5159_v45  ;;  %896 = vst [vmem:[#allocation1] ss:$2 sm:$0xff] %v856_v51  ;;  %v1017_v10 = vperm.slane %v1013_v7, %v3344_v5  ;;  %v1029_v43 = vperm.slane %v1025_v0, %v3344_v5  ;;  %1275 = vmatpush.msra.mxu0 %v5162_v58 }
 0x1e1   : > { %924 = vmatpush.msrb.mxu3 %v5161_v16  ;;  %v1019_v40 = vmul.f32 %v5163_v63, %v1017_v10  ;;  %v1020_v19 = vmul.f32 %v3155_v35, %v1017_v10  ;;  %v1049_v55 = vmul.f32 %v3157_v4, %v1017_v10  ;;  %v1050_v42 = vmul.f32 %v3158_v26, %v1017_v10  ;;  %v1225_v63 = vld [vmem:[%s5132_s5 + $0x118] sm:$0x3f] }
 0x1e2   : > { %v1072_v52 = vmul.f32 %v3853_v47, %v1017_v10  ;;  %v1073_v30 = vmul.f32 %v3161_v41, %v1017_v10  ;;  %v901_v18 = vld.sshfl [vmem:[#allocation1 + $0x10] sm:$0xff pattern:$0x75316420]  ;;  %1276 = vmatpush.msra.mxu0 %v5164_v8 }
 0x1e3   : > { %1241 = vmatpush.msra.mxu3 %v3421_v1  ;;  %v1031_v29 = vadd.f32 %v1029_v43, %v1019_v40  ;;  %v1032_v61 = vadd.f32 %v1029_v43, %v1020_v19  ;;  %v1051_v24 = vadd.f32 %v1049_v55, %v1029_v43  ;;  %v1052_v46 = vadd.f32 %v1050_v42, %v1029_v43 }
 0x1e4   : > { %3150 = vmatmul.msk.f32.vlgmr.msrb.gmra.mxu0 %vm569_vm10, %v901_v18  ;;  %v1074_v1 = vadd.f32 %v1072_v52, %v1029_v43  ;;  %v1075_v28 = vadd.f32 %v1073_v30, %v1029_v43  ;;  %v3956_v30 = vld [vmem:[%s5132_s5 + $0x110] sm:$0xff] }
 0x1e5   : > { %1242 = vmatpush.msra.mxu3 %v3433_v3  ;;  %v1033_v14 = vmax.f32 %v1031_v29, 0.0  ;;  %v1034_v32 = vmax.f32 %v1032_v61, 0.0  ;;  %v1053_v13 = vmax.f32 %v1051_v24, 0.0  ;;  %v1054_v25 = vmax.f32 %v1052_v46, 0.0  ;;  %v3964_v29 = vld [vmem:[%s5132_s5 + $0x108] sm:$0xff] }
 0x1e6   : > { %v1076_v2 = vmax.f32 %v1074_v1, 0.0  ;;  %v1077_v49 = vmax.f32 %v1075_v28, 0.0  ;;  %v899_v60 = vld.sshfl [vmem:[#allocation1] sm:$0xff pattern:$0x75316420] }
 0x1e7   : > { %1243 = vmatpush.msra.mxu3 %v3445_v6  ;;  %v1044_v51 = vmul.f32 %v1042_v57, %v1033_v14  ;;  %v1045_v35 = vmul.f32 %v1039_v48, %v1034_v32  ;;  %v1065_v4 = vmul.f32 %v1063_v33, %v1053_v13  ;;  %v1066_v26 = vmul.f32 %v1060_v62, %v1054_v25  ;;  %v900_v41 = vld.sshfl [vmem:[#allocation1 + $0x8] sm:$0xff pattern:$0x75316420]  ;;  %v1341_v6 = vld [vmem:[%s5129_s2] sm:$0xf] }
 0x1e8   : > { %925 = vmatmul.f32.vlgmr.msrb.gmra.mxu3 %v899_v60  ;;  %945 = vmatmul.f32.vlgmr.msrb.gmra.mxu2 %v900_v41  ;;  %v1088_v22 = vmul.f32 %v1086_v36, %v1076_v2  ;;  %v1089_v50 = vmul.f32 %v1083_v21, %v1077_v49  ;;  %v3971_v57 = vld [vmem:[%s5132_s5 + $0x100] sm:$0xff] }
 0x1e9   : > { %1244 = vmatpush.msra.mxu3 %v3459_v9  ;;  %v1067_v3 = vmax.f32 %v1044_v51, %v1065_v4  ;;  %v1068_v7 = vmax.f32 %v1045_v35, %v1066_v26  ;;  %v1353_v9 = vld [vmem:[%s5130_s3] sm:$0xf] }
 0x1eb   : > { %1245 = vmatpush.msra.mxu3 %v3469_v11  ;;  %v3876_v0 = vmax.f32 %v1067_v3, %v1088_v22  ;;  %v3878_v39 = vmax.f32 %v1068_v7, %v1089_v50  ;;  %v3281_v11 = vmov 0.0  }
 0x1ec   : > { %328 = vst.msk [vmem:[%s3933_s13] sm:$0xff] %vm327_vm12, %v3281_v11 }
 0x1ed   : > { %1246 = vmatpush.msra.mxu3 %v3487_v15  ;;  %1096 = vrot.lane.b32.xlu0 %v3878_v39, %s3275_s23  ;;  %3128 = vst.msk [vmem:[%s3933_s13 + $0x48] sm:$0xff] %vm327_vm12, %v3281_v11 }
 0x1ee   : > { %1106 = vrot.lane.b32.xlu1 %v3876_v0, %s3274_s22  ;;  %1094 = vrot.lane.b32.xlu2 %v3876_v0, %s3275_s23 }
 0x1ef   : > { %1247 = vmatpush.msra.mxu3 %v3499_v17 }
 0x1f1   : > { %1248 = vmatpush.msra.mxu3 %v3511_v20 }
 0x1f3   : > { %1249 = vmatpush.msra.mxu3 %v3525_v23 }
 0x1f5   : > { %1250 = vmatpush.msra.mxu3 %v3541_v27  ;;  %1118 = vrot.lane.b32.xlu0 %v3876_v0, %s3273_s21 }
 0x1f6   : > { %1120 = vrot.lane.b32.xlu1 %v3878_v39, %s3273_s21  ;;  %1108 = vrot.lane.b32.xlu2 %v3878_v39, %s3274_s22 }
 0x1f7   : > { %1251 = vmatpush.msra.mxu3 %v3561_v31 }
 0x1f9   : > { %1252 = vmatpush.msra.mxu3 %v3579_v34 }
 0x1fb   : > { %1253 = vmatpush.msra.mxu3 %v3597_v38 }
 0x1fd   : > { %1254 = vmatpush.msra.mxu3 %v3612_v44  ;;  %1132 = vrot.lane.b32.xlu0 %v3878_v39, %s3276_s24 }
 0x1fe   : > { %1142 = vrot.lane.b32.xlu1 %v3876_v0, %s3279_s29  ;;  %1130 = vrot.lane.b32.xlu2 %v3876_v0, %s3276_s24 }
 0x1ff   : > { %1255 = vmatpush.msra.mxu3 %v5159_v45 }
 0x201   : > { %1256 = vmatpush.msra.mxu3 %v5161_v16 }
 0x205   : > { %1154 = vrot.lane.b32.xlu0 %v3876_v0, %s3277_s25 }
 0x206   : > { %1156 = vrot.lane.b32.xlu1 %v3878_v39, %s3277_s25  ;;  %1144 = vrot.lane.b32.xlu2 %v3878_v39, %s3279_s29 }
 0x20d   : > { %1168 = vrot.lane.b32.xlu0 %v3878_v39, %s3278_s26 }
 0x20e   : > { %1178 = vrot.lane.b32.xlu1 %v3876_v0, %s3280_s10  ;;  %1166 = vrot.lane.b32.xlu2 %v3876_v0, %s3278_s26 }
 0x215   : > { %1344 = vperm.xlu0 %3261, %v1341_v6  }
 0x216   : > { %1356 = vperm.xlu1 %3262, %v1353_v9   ;;  %1180 = vrot.lane.b32.xlu2 %v3878_v39, %s3280_s10 }
 0x245   : > { %v3939_v15 = vpop.f32.mrf.mxu3 }
 0x246   : > { %5165 = vst [vmem:[#allocation2_spill] sm:$0xff] %v3939_v15 }
 0x247   : > { %3139 = vst.msk [vmem:[%s3933_s13 + $0x8] sm:$0xff] %vm327_vm12, %v3939_v15 }
 0x248   : > { %v1095_v17 = vpop.permute.xlu2 %1094 }
 0x249   : > { %v1098_v48 = vrot.slane %v1095_v17, 4 }
 0x250   : > { %v1109_v20 = vpop.permute.xlu2 %1108 }
 0x251   : > { %v1111_v52 = vrot.slane %v1109_v20, 4 }
 0x258   : > { %v1131_v23 = vpop.permute.xlu2 %1130 }
 0x259   : > { %v1134_v61 = vrot.slane %v1131_v23, 4 }
 0x25f   : > { %v1097_v27 = vpop.permute.xlu0 %1096 }
 0x260   : > { %v1107_v31 = vpop.permute.xlu1 %1106  ;;  %v1145_v44 = vpop.permute.xlu2 %1144  ;;  %v1099_v45 = vrot.slane %v1097_v27, 4  ;;  %v1105_v40 = vmax.f32 %v3878_v39, %v1097_v27 }
 0x261   : > { %v966_v37 = vpop.f32.mrf.mxu0  ;;  %v1110_v43 = vrot.slane %v1107_v31, 4  ;;  %v1147_v35 = vrot.slane %v1145_v44, 4 }
 0x262   : > { %v1100_v12 = vsel %vm366_vm0, %v1098_v48, %v1099_v45  ;;  %v1117_v24 = vmax.f32 %v1105_v40, %v1109_v20  ;;  %v3173_v48 = vld [vmem:[%s5128_s1 + $0x15] sm:$0x7]  ;;  %v3172_v40 = vld [vmem:[%s3355_s18 + $0x5c] sm:$0xf] }
 0x263   : > { %v1101_v19 = vsel %vm426_vm2, %v1095_v17, %v1100_v12  ;;  %v1112_v8 = vsel %vm366_vm0, %v1110_v43, %v1111_v52  ;;  %v3176_v12 = vld [vmem:[%s5128_s1 + $0x18] sm:$0x7]  ;;  %v1391_v43 = vperm.slane %v3173_v48, 1 }
 0x264   : > { %v1104_v18 = vmax.f32 %v3876_v0, %v1101_v19  ;;  %v1113_v33 = vsel %vm439_vm3, %v1107_v31, %v1112_v8  ;;  %v3175_v19 = vld [vmem:[%s3355_s18 + $0x68] sm:$0xf]  ;;  %v1414_v52 = vperm.slane %v3176_v12, 1 }
 0x266   : > { %v1116_v14 = vmax.f32 %v1104_v18, %v1113_v33  ;;  %v1394_v33 = vrot.slane %v1391_v43, 4 }
 0x267   : > { %v1119_v34 = vpop.permute.xlu0 %1118 }
 0x268   : > { %v1121_v38 = vpop.permute.xlu1 %1120  ;;  %v1122_v55 = vrot.slane %v1119_v34, 4  ;;  %v1167_v21 = vpop.permute.xlu2 %1166 }
 0x269   : > { %v1123_v42 = vrot.slane %v1121_v38, 4  ;;  %v1129_v1 = vmax.f32 %v1117_v24, %v1121_v38  ;;  %v1170_v0 = vrot.slane %v1167_v21, 4  ;;  %v1392_v24 = vperm.slane %v3173_v48, 2 }
 0x26b   : > { %v926_v10 = vpop.f32.mrf.mxu3  ;;  %v946_v54 = vpop.f32.mrf.mxu2  ;;  %v1124_v46 = vsel %vm366_vm0, %v1122_v55, %v1123_v42 }
 0x26c   : > { %v947_v62 = vadd.f32 %v946_v54, %v926_v10  ;;  %v1125_v32 = vsel %vm452_vm4, %v1119_v34, %v1124_v46  ;;  %v3170_v10 = vld [vmem:[%s5128_s1 + $0x12] sm:$0x7] }
 0x26d   : > { %v1128_v4 = vmax.f32 %v1116_v14, %v1125_v32  ;;  %v1369_v42 = vperm.slane %v3170_v10, 0  ;;  %v1371_v8 = vperm.slane %v3170_v10, 2 }
 0x26e   : > { %v967_v56 = vadd.f32 %v966_v37, %v947_v62 }
 0x26f   : > { %v1133_v16 = vpop.permute.xlu0 %1132 }
 0x270   : > { %v1143_v58 = vpop.permute.xlu1 %1142  ;;  %3151 = vmatpush.msk.msrb.mxu1 %vm366_vm0, %v967_v56  ;;  %v1135_v59 = vrot.slane %v1133_v16, 4  ;;  %v1141_v36 = vmax.f32 %v1129_v1, %v1133_v16  ;;  %v1181_v3 = vpop.permute.xlu2 %1180  ;;  %v1370_v56 = vperm.slane %v3170_v10, 1  ;;  %v1413_v1 = vperm.slane %v3176_v12, 0 }
 0x271   : > { %3152 = vmatmul.msk.f32.vlgmr.msrb.gmra.mxu1 %vm637_vm11, %v3771_v53  ;;  %v1146_v2 = vrot.slane %v1143_v58, 4  ;;  %v1183_v6 = vrot.slane %v1181_v3, 4 }
 0x272   : > { %3163 = vmatpush.msk.msra.mxu1 %vm572_vm1, %v1225_v63  ;;  %v1136_v28 = vsel %vm366_vm0, %v1134_v61, %v1135_v59  ;;  %v1153_v7 = vmax.f32 %v1141_v36, %v1145_v44  ;;  %v3171_v63 = vld [vmem:[%s3355_s18 + $0x54] sm:$0xff]  ;;  %v4001_v59 = vld [vmem:[%s3355_s18 + $0x60] sm:$0xff]  ;;  %v1390_v61 = vperm.slane %v3173_v48, 0  ;;  %v1373_v46 = vrot.slane %v1370_v56, 4 }
 0x273   : > { %v1137_v51 = vsel %vm465_vm5, %v1131_v23, %v1136_v28  ;;  %v1148_v41 = vsel %vm366_vm0, %v1146_v2, %v1147_v35 }
 0x274   : > { %1294 = vmatpush.msra.mxu1 %v3956_v30  ;;  %v1140_v26 = vmax.f32 %v1128_v4, %v1137_v51  ;;  %v1149_v39 = vsel %vm478_vm6, %v1143_v58, %v1148_v41  ;;  %v3169_v58 = vld [vmem:[%s3355_s18 + $0x50] sm:$0xf] }
 0x276   : > { %1295 = vmatpush.msra.mxu1 %v3964_v29  ;;  %v1152_v20 = vmax.f32 %v1140_v26, %v1149_v39 }
 0x277   : > { %v1155_v13 = vpop.permute.xlu0 %1154 }
 0x278   : > { %v1157_v25 = vpop.permute.xlu1 %1156  ;;  %v1158_v49 = vrot.slane %v1155_v13, 4  ;;  %1296 = vmatpush.msra.mxu1 %v3971_v57 }
 0x279   : > { %v1159_v60 = vrot.slane %v1157_v25, 4  ;;  %v1165_v50 = vmax.f32 %v1153_v7, %v1157_v25  ;;  %v1395_v7 = vsel %vm366_vm0, %v1390_v61, %v1394_v33  ;;  %v4111_v61 = vld [vmem:[%s5132_s5 + $0x40] sm:$0xff]  ;;  %v4129_v33 = vld [vmem:[%s5132_s5 + $0x28] sm:$0xff] }
 0x27b   : > { %v1160_v22 = vsel %vm366_vm0, %v1158_v49, %v1159_v60  ;;  %v1415_v49 = vperm.slane %v3176_v12, 2  ;;  %v1417_v60 = vrot.slane %v1414_v52, 4  ;;  %v1673_v12 = vld [vmem:[%s5129_s2] sm:$0xf]  ;;  %v4100_v52 = vld [vmem:[%s5132_s5 + $0x48] sm:$0xff] }
 0x27c   : > { %v1161_v11 = vsel %vm491_vm7, %v1155_v13, %v1160_v22 }
 0x27d   : > { %v1164_v44 = vmax.f32 %v1152_v20, %v1161_v11 }
 0x27f   : > { %v1169_v9 = vpop.permute.xlu0 %1168 }
 0x280   : > { %v1179_v17 = vpop.permute.xlu1 %1178  ;;  %v1171_v23 = vrot.slane %v1169_v9, 4  ;;  %v1177_v27 = vmax.f32 %v1165_v50, %v1169_v9  ;;  %v1418_v9 = vsel %vm366_vm0, %v1413_v1, %v1417_v60  ;;  %v1557_v1 = vld [vmem:[%s5132_s5 + $0x118] sm:$0x3f] }
 0x281   : > { %v1182_v31 = vrot.slane %v1179_v17, 4  ;;  %3177 = vmatpush.msk.msrb.mxu3 %vm572_vm1, %v1557_v1 }
 0x282   : > { %v1172_v34 = vsel %vm366_vm0, %v1170_v0, %v1171_v23  ;;  %v1189_v38 = vmax.f32 %v1177_v27, %v1181_v3  ;;  %v1374_v3 = vsel %vm366_vm0, %v1369_v42, %v1373_v46  ;;  %v4095_v42 = vld [vmem:[%s5132_s5 + $0x50] sm:$0xff] }
 0x283   : > { %v1184_v45 = vsel %vm366_vm0, %v1182_v31, %v1183_v6  ;;  %v1173_v54 = vsel %vm504_vm8, %v1167_v21, %v1172_v34  ;;  %v4123_v46 = vld [vmem:[%s5132_s5 + $0x30] sm:$0xff]  ;;  %1626 = vmatpush.msrb.mxu3 %v3956_v30 }
 0x284   : > { %1230 = vst [vmem:[#allocation1 + $0x10] ss:$2 sm:$0xff] %v1189_v38  ;;  %v1176_v62 = vmax.f32 %v1164_v44, %v1173_v54  ;;  %v1185_v37 = vsel %vm517_vm9, %v1179_v17, %v1184_v45 }
 0x285   : > { %1627 = vmatpush.msrb.mxu3 %v3964_v29 }
 0x286   : > { %v1188_v16 = vmax.f32 %v1176_v62, %v1185_v37  ;;  %v1685_v37 = vld [vmem:[%s5130_s3] sm:$0xf] }
 0x287   : > { %v1345_v55 = vpop.permute.xlu0 %1344  ;;  %1628 = vmatpush.msrb.mxu3 %v3971_v57 }
 0x288   : > { %v1357_v21 = vpop.permute.xlu1 %1356  ;;  %1228 = vst [vmem:[#allocation1] ss:$2 sm:$0xff] %v1188_v16  ;;  %v1349_v18 = vperm.slane %v1345_v55, %v3344_v5  ;;  %v4063_v16 = vld [vmem:[%s5132_s5 + $0x78] sm:$0xff] }
 0x289   : > { %v1361_v28 = vperm.slane %v1357_v21, %v3344_v5  ;;  %1573 = vmatpush.msrb.mxu1 %v4063_v16  ;;  %v4089_v55 = vld [vmem:[%s5132_s5 + $0x58] sm:$0xff] }
 0x28a   : > { %v1351_v14 = vmul.f32 %v3853_v47, %v1349_v18  ;;  %v1352_v32 = vmul.f32 %v3169_v58, %v1349_v18  ;;  %v1381_v13 = vmul.f32 %v3171_v63, %v1349_v18  ;;  %v1382_v25 = vmul.f32 %v3172_v40, %v1349_v18  ;;  %v4069_v58 = vld [vmem:[%s5132_s5 + $0x70] sm:$0xff]  ;;  %v4077_v40 = vld [vmem:[%s5132_s5 + $0x68] sm:$0xff] }
 0x28b   : > { %v1404_v36 = vmul.f32 %v4001_v59, %v1349_v18  ;;  %v1405_v2 = vmul.f32 %v3175_v19, %v1349_v18  ;;  %v1233_v51 = vld.sshfl [vmem:[#allocation1 + $0x10] sm:$0xff pattern:$0x75316420]  ;;  %1574 = vmatpush.msrb.mxu1 %v4069_v58  ;;  %v4083_v19 = vld [vmem:[%s5132_s5 + $0x60] sm:$0xff] }
 0x28c   : > { %v1363_v35 = vadd.f32 %v1361_v28, %v1351_v14  ;;  %v1364_v4 = vadd.f32 %v1361_v28, %v1352_v32  ;;  %v1383_v26 = vadd.f32 %v1381_v13, %v1361_v28  ;;  %v1384_v41 = vadd.f32 %v1382_v25, %v1361_v28  ;;  %3164 = vmatmul.msk.f32.vlgmr.msra.gmra.mxu1 %vm569_vm10, %v1233_v51  ;;  %v4141_v32 = vld [vmem:[%s5132_s5 + $0x20] sm:$0xff] }
 0x28d   : > { %v1406_v47 = vadd.f32 %v1404_v36, %v1361_v28  ;;  %v1407_v22 = vadd.f32 %v1405_v2, %v1361_v28  ;;  %1575 = vmatpush.msrb.mxu1 %v4077_v40  ;;  %v4150_v36 = vld [vmem:[%s5132_s5 + $0x18] sm:$0xff] }
 0x28e   : > { %v1365_v50 = vmax.f32 %v1363_v35, 0.0  ;;  %v1366_v0 = vmax.f32 %v1364_v4, 0.0  ;;  %v1385_v39 = vmax.f32 %v1383_v26, 0.0  ;;  %v1386_v6 = vmax.f32 %v1384_v41, 0.0  ;;  %v4158_v4 = vld [vmem:[%s5132_s5 + $0x10] sm:$0xff] }
 0x28f   : > { %v1408_v11 = vmax.f32 %v1406_v47, 0.0  ;;  %v1409_v17 = vmax.f32 %v1407_v22, 0.0  ;;  %v1231_v20 = vld.sshfl [vmem:[#allocation1] sm:$0xff pattern:$0x75316420]  ;;  %1576 = vmatpush.msrb.mxu1 %v4083_v19 }
 0x290   : > { %v1376_v23 = vmul.f32 %v1374_v3, %v1365_v50  ;;  %v1377_v27 = vmul.f32 %v1371_v8, %v1366_v0  ;;  %v1397_v31 = vmul.f32 %v1395_v7, %v1385_v39  ;;  %v1398_v34 = vmul.f32 %v1392_v24, %v1386_v6  ;;  %1257 = vmatmul.f32.vlgmr.msra.gmra.mxu3 %v1231_v20  ;;  %v1232_v38 = vld.sshfl [vmem:[#allocation1 + $0x8] sm:$0xff pattern:$0x75316420]  ;;  %v4117_v24 = vld [vmem:[%s5132_s5 + $0x38] sm:$0xff]  ;;  %v4180_v6 = vld [vmem:[%s5132_s5 + $0xf0] sm:$0xff] }
 0x291   : > { %1277 = vmatmul.f32.vlgmr.msra.gmra.mxu0 %v1232_v38  ;;  %v1420_v10 = vmul.f32 %v1418_v9, %v1408_v11  ;;  %v1421_v48 = vmul.f32 %v1415_v49, %v1409_v17  ;;  %1577 = vmatpush.msrb.mxu1 %v4089_v55  ;;  %v4165_v3 = vld [vmem:[%s5132_s5 + $0xf8] sm:$0xff]  ;;  %v4171_v7 = vld [vmem:[%s5132_s5 + $0x8] sm:$0xff]  ;;  %v4186_v9 = vld [vmem:[%s5132_s5] sm:$0xff] }
 0x292   : > { %v1399_v44 = vmax.f32 %v1376_v23, %v1397_v31  ;;  %v1400_v45 = vmax.f32 %v1377_v27, %v1398_v34  ;;  %1905 = vmatpush.msra.mxu3 %v4063_v16  ;;  %v4197_v27 = vld [vmem:[%s5132_s5 + $0xe8] sm:$0xff] }
 0x293   : > { %1578 = vmatpush.msrb.mxu1 %v4095_v42 }
 0x294   : > { %v4011_v54 = vmax.f32 %v1399_v44, %v1420_v10  ;;  %v4013_v62 = vmax.f32 %v1400_v45, %v1421_v48  ;;  %1906 = vmatpush.msra.mxu3 %v4069_v58 }
 0x295   : > { %1579 = vmatpush.msrb.mxu1 %v4100_v52 }
 0x296   : > { %1428 = vrot.lane.b32.xlu0 %v4013_v62, %s3275_s23  ;;  %1438 = vrot.lane.b32.xlu1 %v4011_v54, %s3274_s22 }
 0x297   : > { %1426 = vrot.lane.b32.xlu2 %v4011_v54, %s3275_s23  ;;  %1580 = vmatpush.msrb.mxu1 %v4111_v61 }
 0x298   : > { %1907 = vmatpush.msra.mxu3 %v4077_v40 }
 0x299   : > { %1581 = vmatpush.msrb.mxu1 %v4117_v24 }
 0x29a   : > { %1908 = vmatpush.msra.mxu3 %v4083_v19 }
 0x29b   : > { %1582 = vmatpush.msrb.mxu1 %v4123_v46 }
 0x29c   : > { %1909 = vmatpush.msra.mxu3 %v4089_v55 }
 0x29d   : > { %1583 = vmatpush.msrb.mxu1 %v4129_v33 }
 0x29e   : > { %1450 = vrot.lane.b32.xlu0 %v4011_v54, %s3273_s21  ;;  %1452 = vrot.lane.b32.xlu1 %v4013_v62, %s3273_s21 }
 0x29f   : > { %1440 = vrot.lane.b32.xlu2 %v4013_v62, %s3274_s22  ;;  %1584 = vmatpush.msrb.mxu1 %v4141_v32 }
 0x2a0   : > { %1910 = vmatpush.msra.mxu3 %v4095_v42 }
 0x2a1   : > { %1585 = vmatpush.msrb.mxu1 %v4150_v36 }
 0x2a2   : > { %1911 = vmatpush.msra.mxu3 %v4100_v52 }
 0x2a3   : > { %1586 = vmatpush.msrb.mxu1 %v4158_v4 }
 0x2a4   : > { %1912 = vmatpush.msra.mxu3 %v4111_v61 }
 0x2a5   : > { %1587 = vmatpush.msrb.mxu1 %v4171_v7 }
 0x2a6   : > { %1464 = vrot.lane.b32.xlu0 %v4013_v62, %s3276_s24  ;;  %1474 = vrot.lane.b32.xlu1 %v4011_v54, %s3279_s29 }
 0x2a7   : > { %1462 = vrot.lane.b32.xlu2 %v4011_v54, %s3276_s24  ;;  %1588 = vmatpush.msrb.mxu1 %v4186_v9 }
 0x2a8   : > { %1913 = vmatpush.msra.mxu3 %v4117_v24 }
 0x2aa   : > { %1914 = vmatpush.msra.mxu3 %v4123_v46 }
 0x2ac   : > { %1915 = vmatpush.msra.mxu3 %v4129_v33 }
 0x2ae   : > { %1486 = vrot.lane.b32.xlu0 %v4011_v54, %s3277_s25  ;;  %1488 = vrot.lane.b32.xlu1 %v4013_v62, %s3277_s25 }
 0x2af   : > { %1476 = vrot.lane.b32.xlu2 %v4013_v62, %s3279_s29  ;;  %1916 = vmatpush.msra.mxu3 %v4141_v32 }
 0x2b1   : > { %1917 = vmatpush.msra.mxu3 %v4150_v36 }
 0x2b3   : > { %1918 = vmatpush.msra.mxu3 %v4158_v4 }
 0x2b5   : > { %1919 = vmatpush.msra.mxu3 %v4171_v7 }
 0x2b6   : > { %1500 = vrot.lane.b32.xlu0 %v4013_v62, %s3278_s26  ;;  %1510 = vrot.lane.b32.xlu1 %v4011_v54, %s3280_s10 }
 0x2b7   : > { %1498 = vrot.lane.b32.xlu2 %v4011_v54, %s3278_s26  ;;  %1920 = vmatpush.msra.mxu3 %v4186_v9 }
 0x2be   : > { %1676 = vperm.xlu0 %3261, %v1673_v12   ;;  %1688 = vperm.xlu1 %3262, %v1685_v37  }
 0x2bf   : > { %1512 = vrot.lane.b32.xlu2 %v4013_v62, %s3280_s10 }
 0x2ee   : > { %v4053_v56 = vpop.f32.mrf.mxu1 }
 0x2ef   : > { %5166 = vst [vmem:[#allocation4_spill] sm:$0xff] %v4053_v56 }
 0x2f0   : > { %3153 = vst.msk [vmem:[%s3933_s13 + $0x10] sm:$0xff] %vm327_vm12, %v4053_v56 }
 0x2f1   : > { %v4058_v43 = vpop.permute.xlu2 %1426 }
 0x2f2   : > { %v1430_v60 = vrot.slane %v4058_v43, 4 }
 0x2f9   : > { %v4071_v63 = vpop.permute.xlu2 %1440 }
 0x2fa   : > { %v1443_v20 = vrot.slane %v4071_v63, 4 }
 0x301   : > { %v4103_v21 = vpop.permute.xlu2 %1462 }
 0x302   : > { %v1466_v31 = vrot.slane %v4103_v21, 4 }
 0x308   : > { %v1429_v18 = vpop.permute.xlu0 %1428  ;;  %v4106_v8 = vpop.permute.xlu1 %1438 }
 0x309   : > { %v1431_v13 = vrot.slane %v1429_v18, 4  ;;  %v4145_v25 = vpop.permute.xlu2 %1476  ;;  %v1298_v35 = vpop.f32.mrf.mxu1  ;;  %v1442_v47 = vrot.slane %v4106_v8, 4  ;;  %v1437_v11 = vmax.f32 %v4013_v62, %v1429_v18 }
 0x30b   : > { %v1432_v26 = vsel %vm366_vm0, %v1430_v60, %v1431_v13  ;;  %v1444_v38 = vsel %vm366_vm0, %v1442_v47, %v1443_v20  ;;  %v1449_v10 = vmax.f32 %v1437_v11, %v4071_v63  ;;  %v4233_v13 = vld [vmem:[%s5132_s5 + $0xd0] sm:$0xff] }
 0x30c   : > { %v1433_v17 = vsel %vm426_vm2, %v4058_v43, %v1432_v26  ;;  %v1445_v62 = vsel %vm439_vm3, %v4106_v8, %v1444_v38 }
 0x30d   : > { %v1436_v34 = vmax.f32 %v4011_v54, %v1433_v17  ;;  %v4222_v54 = vld [vmem:[%s5132_s5 + $0xd8] sm:$0xff] }
 0x30e   : > { %v1278_v2 = vpop.f32.mrf.mxu0 }
 0x30f   : > { %v1448_v43 = vmax.f32 %v1436_v34, %v1445_v62  ;;  %v4270_v34 = vld [vmem:[%s5132_s5 + $0xb0] sm:$0xff] }
 0x310   : > { %v1451_v28 = vpop.permute.xlu0 %1450  ;;  %v4136_v14 = vpop.permute.xlu1 %1452 }
 0x311   : > { %v1454_v22 = vrot.slane %v1451_v28, 4  ;;  %v1455_v50 = vrot.slane %v4136_v14, 4  ;;  %v4208_v45 = vpop.permute.xlu2 %1498  ;;  %v1461_v12 = vmax.f32 %v1449_v10, %v4136_v14 }
 0x313   : > { %v1258_v49 = vpop.f32.mrf.mxu3  ;;  %v1456_v44 = vsel %vm366_vm0, %v1454_v22, %v1455_v50  ;;  %v4260_v50 = vld [vmem:[%s5132_s5 + $0xb8] sm:$0xff] }
 0x314   : > { %v1279_v51 = vadd.f32 %v1278_v2, %v1258_v49  ;;  %v1457_v37 = vsel %vm452_vm4, %v1451_v28, %v1456_v44  ;;  %v1479_v28 = vrot.slane %v4145_v25, 4 }
 0x315   : > { %v1460_v60 = vmax.f32 %v1448_v43, %v1457_v37 }
 0x316   : > { %v1299_v41 = vadd.f32 %v1298_v35, %v1279_v51  ;;  %v4243_v51 = vld [vmem:[%s5132_s5 + $0xc8] sm:$0xff] }
 0x318   : > { %v1465_v0 = vpop.permute.xlu0 %1464  ;;  %v1475_v39 = vpop.permute.xlu1 %1474  ;;  %3165 = vmatpush.msk.msra.mxu2 %vm366_vm0, %v1299_v41  ;;  %v4252_v41 = vld [vmem:[%s5132_s5 + $0xc0] sm:$0xff] }
 0x319   : > { %v1467_v23 = vrot.slane %v1465_v0, 4  ;;  %3166 = vmatmul.msk.f32.vlgmr.msra.gmra.mxu2 %vm637_vm11, %v3771_v53  ;;  %v4213_v53 = vld [vmem:[%s5132_s5 + $0xe0] sm:$0xff]  ;;  %v1478_v63 = vrot.slane %v1475_v39, 4  ;;  %v1473_v2 = vmax.f32 %v1461_v12, %v1465_v0  ;;  %v1513_v22 = vpop.permute.xlu2 %1512  ;;  %v4282_v12 = vld [vmem:[%s5132_s5 + $0xa8] sm:$0xff] }
 0x31a   : > { %1593 = vmatpush.msrb.mxu2 %v4165_v3  ;;  %v1515_v38 = vrot.slane %v1513_v22, 4 }
 0x31b   : > { %v1468_v48 = vsel %vm366_vm0, %v1466_v31, %v1467_v23  ;;  %v1485_v47 = vmax.f32 %v1473_v2, %v4145_v25  ;;  %v1502_v25 = vrot.slane %v4208_v45, 4 }
 0x31c   : > { %1594 = vmatpush.msrb.mxu2 %v4180_v6  ;;  %v1469_v8 = vsel %vm465_vm5, %v4103_v21, %v1468_v48  ;;  %v1480_v21 = vsel %vm366_vm0, %v1478_v63, %v1479_v28  ;;  %v4276_v48 = vld [vmem:[%s5128_s1 + $0x18] sm:$0x7] }
 0x31d   : > { %v1472_v35 = vmax.f32 %v1460_v60, %v1469_v8  ;;  %v1481_v0 = vsel %vm478_vm6, %v1475_v39, %v1480_v21  ;;  %v1702_v2 = vperm.slane %v4276_v48, 1  ;;  %v4299_v8 = vld [vmem:[%s5132_s5 + $0xa0] sm:$0xff]  ;;  %v4313_v60 = vld [vmem:[%s5132_s5 + $0x98] sm:$0xff]  ;;  %v3183_v21 = vld [vmem:[%s3355_s18 + $0x68] sm:$0xf] }
 0x31e   : > { %1595 = vmatpush.msrb.mxu2 %v4197_v27 }
 0x31f   : > { %v1484_v20 = vmax.f32 %v1472_v35, %v1481_v0 }
 0x320   : > { %1596 = vmatpush.msrb.mxu2 %v4213_v53  ;;  %v1487_v18 = vpop.permute.xlu0 %1486  ;;  %v1489_v1 = vpop.permute.xlu1 %1488 }
 0x321   : > { %v1490_v14 = vrot.slane %v1487_v18, 4  ;;  %v1491_v49 = vrot.slane %v1489_v1, 4  ;;  %v1497_v11 = vmax.f32 %v1485_v47, %v1489_v1  ;;  %v4318_v47 = vld [vmem:[%s3355_s18 + $0x78] sm:$0xff] }
 0x322   : > { %1597 = vmatpush.msrb.mxu2 %v4222_v54 }
 0x323   : > { %v1492_v26 = vsel %vm366_vm0, %v1490_v14, %v1491_v49  ;;  %v4305_v49 = vld [vmem:[%s5128_s1 + $0x1e] sm:$0x7] }
 0x324   : > { %1598 = vmatpush.msrb.mxu2 %v4233_v13  ;;  %v1493_v17 = vsel %vm491_vm7, %v1487_v18, %v1492_v26  ;;  %v4290_v18 = vld [vmem:[%s5128_s1 + $0x1b] sm:$0x7]  ;;  %v3185_v26 = vld [vmem:[%s3355_s18 + $0x6c] sm:$0xff] }
 0x325   : > { %v1496_v62 = vmax.f32 %v1484_v20, %v1493_v17  ;;  %v1723_v28 = vperm.slane %v4290_v18, 1  ;;  %v1705_v17 = vrot.slane %v1702_v2, 4 }
 0x326   : > { %1599 = vmatpush.msrb.mxu2 %v4243_v51 }
 0x328   : > { %1600 = vmatpush.msrb.mxu2 %v4252_v41  ;;  %v1501_v23 = vpop.permute.xlu0 %1500  ;;  %v1511_v31 = vpop.permute.xlu1 %1510 }
 0x329   : > { %v1503_v44 = vrot.slane %v1501_v23, 4  ;;  %v1509_v39 = vmax.f32 %v1497_v11, %v1501_v23  ;;  %v1514_v10 = vrot.slane %v1511_v31, 4  ;;  %v1701_v11 = vperm.slane %v4276_v48, 0  ;;  %v4328_v23 = vld [vmem:[%s5132_s5 + $0x90] sm:$0xff] }
 0x32a   : > { %1601 = vmatpush.msrb.mxu2 %v4260_v50 }
 0x32b   : > { %v1504_v37 = vsel %vm366_vm0, %v1502_v25, %v1503_v44  ;;  %v1521_v43 = vmax.f32 %v1509_v39, %v1513_v22  ;;  %v1516_v63 = vsel %vm366_vm0, %v1514_v10, %v1515_v38  ;;  %v3186_v22 = vld [vmem:[%s3355_s18 + $0x74] sm:$0xf]  ;;  %v1746_v25 = vperm.slane %v4305_v49, 1 }
 0x32c   : > { %1602 = vmatpush.msrb.mxu2 %v4270_v34  ;;  %v1505_v1 = vsel %vm504_vm8, %v4208_v45, %v1504_v37  ;;  %v1517_v45 = vsel %vm517_vm9, %v1511_v31, %v1516_v63  ;;  %v3189_v31 = vld [vmem:[%s3355_s18 + $0x80] sm:$0xf]  ;;  %v1703_v44 = vperm.slane %v4276_v48, 2  ;;  %v1722_v39 = vperm.slane %v4290_v18, 0  ;;  %v4344_v48 = vld [vmem:[%s5132_s5 + $0x88] sm:$0xff] }
 0x32d   : > { %1562 = vst [vmem:[#allocation1 + $0x10] ss:$2 sm:$0xff] %v1521_v43  ;;  %v1508_v14 = vmax.f32 %v1496_v62, %v1505_v1  ;;  %v1724_v10 = vperm.slane %v4290_v18, 2  ;;  %v1726_v62 = vrot.slane %v1723_v28, 4  ;;  %v1745_v37 = vperm.slane %v4305_v49, 0 }
 0x32e   : > { %1603 = vmatpush.msrb.mxu2 %v4282_v12  ;;  %5167 = vst [vmem:[#allocation3_spill] sm:$0xff] %v4344_v48  ;;  %v1706_v28 = vsel %vm366_vm0, %v1701_v11, %v1705_v17 }
 0x32f   : > { %v1520_v35 = vmax.f32 %v1508_v14, %v1517_v45  ;;  %v1727_v56 = vsel %vm366_vm0, %v1722_v39, %v1726_v62 }
 0x330   : > { %1604 = vmatpush.msrb.mxu2 %v4299_v8  ;;  %v1677_v0 = vpop.permute.xlu0 %1676  ;;  %v1689_v20 = vpop.permute.xlu1 %1688 }
 0x331   : > { %1560 = vst [vmem:[#allocation1] ss:$2 sm:$0xff] %v1520_v35  ;;  %v1681_v38 = vperm.slane %v1677_v0, %v3344_v5  ;;  %v1693_v43 = vperm.slane %v1689_v20, %v3344_v5  ;;  %v1749_v35 = vrot.slane %v1746_v25, 4  ;;  %v4353_v20 = vld [vmem:[%s5132_s5 + $0x80] sm:$0xff] }
 0x332   : > { %1605 = vmatpush.msrb.mxu2 %v4313_v60 }
 0x333   : > { %v1683_v63 = vmul.f32 %v4001_v59, %v1681_v38  ;;  %v1684_v1 = vmul.f32 %v3183_v21, %v1681_v38  ;;  %v1713_v2 = vmul.f32 %v3185_v26, %v1681_v38  ;;  %v1714_v14 = vmul.f32 %v3186_v22, %v1681_v38 }
 0x334   : > { %1606 = vmatpush.msrb.mxu2 %v4328_v23  ;;  %v1736_v45 = vmul.f32 %v4318_v47, %v1681_v38  ;;  %v1737_v18 = vmul.f32 %v3189_v31, %v1681_v38  ;;  %v1565_v0 = vld.sshfl [vmem:[#allocation1 + $0x10] sm:$0xff pattern:$0x75316420]  ;;  %v1747_v31 = vperm.slane %v4305_v49, 2 }
 0x335   : > { %v1695_v59 = vadd.f32 %v1693_v43, %v1683_v63  ;;  %v1696_v21 = vadd.f32 %v1693_v43, %v1684_v1  ;;  %v1715_v26 = vadd.f32 %v1713_v2, %v1693_v43  ;;  %v1716_v22 = vadd.f32 %v1714_v14, %v1693_v43  ;;  %3178 = vmatmul.msk.f32.vlgmr.msrb.gmra.mxu3 %vm569_vm10, %v1565_v0 }
 0x336   : > { %v1738_v11 = vadd.f32 %v1736_v45, %v1693_v43  ;;  %v1739_v17 = vadd.f32 %v1737_v18, %v1693_v43  ;;  %1607 = vmatpush.msrb.mxu2 %v4344_v48  ;;  %v1750_v2 = vsel %vm366_vm0, %v1745_v37, %v1749_v35 }
 0x337   : > { %v1697_v25 = vmax.f32 %v1695_v59, 0.0  ;;  %v1698_v38 = vmax.f32 %v1696_v21, 0.0  ;;  %v1717_v63 = vmax.f32 %v1715_v26, 0.0  ;;  %v1718_v1 = vmax.f32 %v1716_v22, 0.0 }
 0x338   : > { %v1740_v14 = vmax.f32 %v1738_v11, 0.0  ;;  %v1741_v0 = vmax.f32 %v1739_v17, 0.0  ;;  %1608 = vmatpush.msrb.mxu2 %v4353_v20  ;;  %v1563_v15 = vld.sshfl [vmem:[#allocation1] sm:$0xff pattern:$0x75316420] }
 0x339   : > { %v1708_v39 = vmul.f32 %v1706_v28, %v1697_v25  ;;  %v1709_v62 = vmul.f32 %v1703_v44, %v1698_v38  ;;  %v1729_v49 = vmul.f32 %v1727_v56, %v1717_v63  ;;  %v1730_v45 = vmul.f32 %v1724_v10, %v1718_v1  ;;  %1589 = vmatmul.f32.vlgmr.msrb.gmra.mxu1 %v1563_v15  ;;  %v1564_v43 = vld.sshfl [vmem:[#allocation1 + $0x8] sm:$0xff pattern:$0x75316420]  ;;  %v2005_v15 = vld [vmem:[%s5129_s2] sm:$0xf] }
 0x33a   : > { %1609 = vmatmul.f32.vlgmr.msrb.gmra.mxu2 %v1564_v43  ;;  %v1752_v59 = vmul.f32 %v1750_v2, %v1740_v14  ;;  %v1753_v21 = vmul.f32 %v1747_v31, %v1741_v0  ;;  %v2017_v56 = vld [vmem:[%s5130_s3] sm:$0xf]  ;;  %v1889_v31 = vld [vmem:[%s5132_s5 + $0x118] sm:$0x3f] }
 0x33b   : > { %v1731_v18 = vmax.f32 %v1708_v39, %v1729_v49  ;;  %v1732_v48 = vmax.f32 %v1709_v62, %v1730_v45  ;;  %3191 = vmatpush.msk.msra.mxu1 %vm572_vm1, %v1889_v31 }
 0x33d   : > { %v4361_v26 = vmax.f32 %v1731_v18, %v1752_v59  ;;  %v4363_v22 = vmax.f32 %v1732_v48, %v1753_v21  ;;  %1958 = vmatpush.msra.mxu1 %v3956_v30  ;;  %v4422_v30 = vld [vmem:[%s5131_s4] sm:$0xff] }
 0x33f   : > { %1760 = vrot.lane.b32.xlu0 %v4363_v22, %s3275_s23  ;;  %1770 = vrot.lane.b32.xlu1 %v4361_v26, %s3274_s22 }
 0x340   : > { %1758 = vrot.lane.b32.xlu2 %v4361_v26, %s3275_s23  ;;  %1959 = vmatpush.msra.mxu1 %v3964_v29 }
 0x342   : > { %1960 = vmatpush.msra.mxu1 %v3971_v57 }
 0x344   : > { %2237 = vmatpush.msrb.mxu1 %v4063_v16 }
 0x346   : > { %2238 = vmatpush.msrb.mxu1 %v4069_v58 }
 0x347   : > { %1782 = vrot.lane.b32.xlu0 %v4361_v26, %s3273_s21  ;;  %1784 = vrot.lane.b32.xlu1 %v4363_v22, %s3273_s21 }
 0x348   : > { %1772 = vrot.lane.b32.xlu2 %v4363_v22, %s3274_s22  ;;  %2239 = vmatpush.msrb.mxu1 %v4077_v40 }
 0x34a   : > { %2240 = vmatpush.msrb.mxu1 %v4083_v19 }
 0x34c   : > { %2241 = vmatpush.msrb.mxu1 %v4089_v55 }
 0x34e   : > { %2242 = vmatpush.msrb.mxu1 %v4095_v42 }
 0x34f   : > { %1796 = vrot.lane.b32.xlu0 %v4363_v22, %s3276_s24  ;;  %1806 = vrot.lane.b32.xlu1 %v4361_v26, %s3279_s29 }
 0x350   : > { %1794 = vrot.lane.b32.xlu2 %v4361_v26, %s3276_s24  ;;  %2243 = vmatpush.msrb.mxu1 %v4100_v52 }
 0x352   : > { %2244 = vmatpush.msrb.mxu1 %v4111_v61 }
 0x354   : > { %2245 = vmatpush.msrb.mxu1 %v4117_v24 }
 0x356   : > { %2246 = vmatpush.msrb.mxu1 %v4123_v46  ;;  %v4466_v46 = vld [vmem:[%s5128_s1 + $0x1e] sm:$0x7] }
 0x357   : > { %1818 = vrot.lane.b32.xlu0 %v4361_v26, %s3277_s25  ;;  %1820 = vrot.lane.b32.xlu1 %v4363_v22, %s3277_s25 }
 0x358   : > { %1808 = vrot.lane.b32.xlu2 %v4363_v22, %s3279_s29  ;;  %2247 = vmatpush.msrb.mxu1 %v4129_v33 }
 0x35a   : > { %2248 = vmatpush.msrb.mxu1 %v4141_v32  ;;  %v3197_v32 = vld [vmem:[%s3355_s18 + $0x80] sm:$0xf] }
 0x35c   : > { %2249 = vmatpush.msrb.mxu1 %v4150_v36 }
 0x35e   : > { %2250 = vmatpush.msrb.mxu1 %v4158_v4 }
 0x35f   : > { %1832 = vrot.lane.b32.xlu0 %v4363_v22, %s3278_s26  ;;  %1842 = vrot.lane.b32.xlu1 %v4361_v26, %s3280_s10 }
 0x360   : > { %1830 = vrot.lane.b32.xlu2 %v4361_v26, %s3278_s26  ;;  %2251 = vmatpush.msrb.mxu1 %v4171_v7 }
 0x362   : > { %2252 = vmatpush.msrb.mxu1 %v4186_v9 }
 0x367   : > { %2008 = vperm.xlu0 %3261, %v2005_v15   ;;  %2020 = vperm.xlu1 %3262, %v2017_v56  }
 0x368   : > { %1844 = vrot.lane.b32.xlu2 %v4363_v22, %s3280_s10 }
 0x39a   : > { %v1759_v44 = vpop.permute.xlu2 %1758 }
 0x39b   : > { %v1762_v63 = vrot.slane %v1759_v44, 4 }
 0x39c   : > { %v4403_v10 = vpop.f32.mrf.mxu2 }
 0x39d   : > { %3167 = vst.msk [vmem:[%s3933_s13 + $0x18] sm:$0xff] %vm327_vm12, %v4403_v10 }
 0x3a2   : > { %v1773_v37 = vpop.permute.xlu2 %1772 }
 0x3a3   : > { %v1775_v16 = vrot.slane %v1773_v37, 4 }
 0x3aa   : > { %v1795_v48 = vpop.permute.xlu2 %1794 }
 0x3ab   : > { %v1798_v56 = vrot.slane %v1795_v48, 4 }
 0x3b1   : > { %v1761_v28 = vpop.permute.xlu0 %1760  ;;  %v1771_v35 = vpop.permute.xlu1 %1770 }
 0x3b2   : > { %v4412_v25 = vpop.permute.xlu2 %1808  ;;  %v1763_v38 = vrot.slane %v1761_v28, 4  ;;  %v1774_v49 = vrot.slane %v1771_v35, 4  ;;  %v1769_v29 = vmax.f32 %v4363_v22, %v1761_v28 }
 0x3b4   : > { %v1764_v0 = vsel %vm366_vm0, %v1762_v63, %v1763_v38  ;;  %v1776_v22 = vsel %vm366_vm0, %v1774_v49, %v1775_v16 }
 0x3b5   : > { %v1765_v57 = vsel %vm426_vm2, %v1759_v44, %v1764_v0  ;;  %v1781_v44 = vmax.f32 %v1769_v29, %v1773_v37  ;;  %v1777_v40 = vsel %vm439_vm3, %v1771_v35, %v1776_v22  ;;  %v1811_v35 = vrot.slane %v4412_v25, 4 }
 0x3b6   : > { %v1590_v1 = vpop.f32.mrf.mxu1  ;;  %v1768_v58 = vmax.f32 %v4361_v26, %v1765_v57 }
 0x3b8   : > { %v1630_v39 = vpop.f32.mrf.mxu3  ;;  %v1780_v26 = vmax.f32 %v1768_v58, %v1777_v40 }
 0x3b9   : > { %v1783_v11 = vpop.permute.xlu0 %1782  ;;  %v1785_v17 = vpop.permute.xlu1 %1784 }
 0x3ba   : > { %v1786_v18 = vrot.slane %v1783_v11, 4  ;;  %v1787_v59 = vrot.slane %v1785_v17, 4  ;;  %v1831_v21 = vpop.permute.xlu2 %1830  ;;  %v1793_v31 = vmax.f32 %v1781_v44, %v1785_v17 }
 0x3bc   : > { %v1788_v28 = vsel %vm366_vm0, %v1786_v18, %v1787_v59 }
 0x3bd   : > { %v1610_v2 = vpop.f32.mrf.mxu2  ;;  %v1789_v63 = vsel %vm452_vm4, %v1783_v11, %v1788_v28  ;;  %v4479_v28 = vld [vmem:[%s5128_s1 + $0x24] sm:$0x7] }
 0x3be   : > { %v1611_v14 = vadd.f32 %v1610_v2, %v1590_v1  ;;  %v1792_v17 = vmax.f32 %v1780_v26, %v1789_v63  ;;  %v3199_v26 = vld [vmem:[%s3355_s18 + $0x84] sm:$0xff]  ;;  %v3200_v63 = vld [vmem:[%s3355_s18 + $0x8c] sm:$0xf] }
 0x3c0   : > { %v1631_v62 = vadd.f32 %v1630_v39, %v1611_v14 }
 0x3c1   : > { %v1797_v45 = vpop.permute.xlu0 %1796  ;;  %v1807_v43 = vpop.permute.xlu1 %1806 }
 0x3c2   : > { %3179 = vmatpush.msk.msrb.mxu0 %vm366_vm0, %v1631_v62  ;;  %v1799_v15 = vrot.slane %v1797_v45, 4  ;;  %v1805_v19 = vmax.f32 %v1793_v31, %v1797_v45  ;;  %v1810_v37 = vrot.slane %v1807_v43, 4  ;;  %v1845_v39 = vpop.permute.xlu2 %1844  ;;  %v2034_v31 = vperm.slane %v4466_v46, 1 }
 0x3c3   : > { %3180 = vmatmul.msk.f32.vlgmr.msrb.gmra.mxu0 %vm637_vm11, %v4422_v30  ;;  %v1847_v29 = vrot.slane %v1845_v39, 4 }
 0x3c4   : > { %1925 = vmatpush.msra.mxu0 %v4165_v3  ;;  %v1800_v38 = vsel %vm366_vm0, %v1798_v56, %v1799_v15  ;;  %v1812_v42 = vsel %vm366_vm0, %v1810_v37, %v1811_v35  ;;  %v1817_v62 = vmax.f32 %v1805_v19, %v4412_v25  ;;  %v4471_v56 = vld [vmem:[%s5128_s1 + $0x21] sm:$0x7]  ;;  %v2033_v19 = vperm.slane %v4466_v46, 0 }
 0x3c5   : > { %v1801_v55 = vsel %vm465_vm5, %v1795_v48, %v1800_v38  ;;  %v1834_v48 = vrot.slane %v1831_v21, 4  ;;  %v1813_v45 = vsel %vm478_vm6, %v1807_v43, %v1812_v42  ;;  %v2078_v37 = vperm.slane %v4479_v28, 1 }
 0x3c6   : > { %1926 = vmatpush.msra.mxu0 %v4180_v6  ;;  %v1804_v11 = vmax.f32 %v1792_v17, %v1801_v55  ;;  %v2035_v55 = vperm.slane %v4466_v46, 2  ;;  %v2054_v35 = vperm.slane %v4471_v56, 0  ;;  %v2056_v17 = vperm.slane %v4471_v56, 2 }
 0x3c8   : > { %1927 = vmatpush.msra.mxu0 %v4197_v27  ;;  %v1816_v25 = vmax.f32 %v1804_v11, %v1813_v45  ;;  %v2037_v11 = vrot.slane %v2034_v31, 4 }
 0x3c9   : > { %v1819_v1 = vpop.permute.xlu0 %1818  ;;  %v1821_v2 = vpop.permute.xlu1 %1820 }
 0x3ca   : > { %1928 = vmatpush.msra.mxu0 %v4213_v53  ;;  %v1822_v14 = vrot.slane %v1819_v1, 4  ;;  %v1823_v0 = vrot.slane %v1821_v2, 4  ;;  %v1829_v52 = vmax.f32 %v1817_v62, %v1821_v2 }
 0x3cc   : > { %1929 = vmatpush.msra.mxu0 %v4222_v54  ;;  %v1824_v49 = vsel %vm366_vm0, %v1822_v14, %v1823_v0  ;;  %v4495_v0 = vld [vmem:[%s3355_s18 + $0x90] sm:$0xff] }
 0x3cd   : > { %v1825_v61 = vsel %vm491_vm7, %v1819_v1, %v1824_v49  ;;  %v3203_v1 = vld [vmem:[%s3355_s18 + $0x98] sm:$0xf] }
 0x3ce   : > { %1930 = vmatpush.msra.mxu0 %v4233_v13  ;;  %v1828_v58 = vmax.f32 %v1816_v25, %v1825_v61  ;;  %v2081_v61 = vrot.slane %v2078_v37, 4 }
 0x3d0   : > { %1931 = vmatpush.msra.mxu0 %v4243_v51 }
 0x3d1   : > { %v1833_v57 = vpop.permute.xlu0 %1832  ;;  %v1843_v18 = vpop.permute.xlu1 %1842 }
 0x3d2   : > { %1932 = vmatpush.msra.mxu0 %v4252_v41  ;;  %v1835_v59 = vrot.slane %v1833_v57, 4  ;;  %v1841_v16 = vmax.f32 %v1829_v52, %v1833_v57  ;;  %v1846_v15 = vrot.slane %v1843_v18, 4  ;;  %v2079_v57 = vperm.slane %v4479_v28, 2 }
 0x3d4   : > { %1933 = vmatpush.msra.mxu0 %v4260_v50  ;;  %v1836_v24 = vsel %vm366_vm0, %v1834_v48, %v1835_v59  ;;  %v1853_v43 = vmax.f32 %v1841_v16, %v1845_v39  ;;  %v1848_v22 = vsel %vm366_vm0, %v1846_v15, %v1847_v29  ;;  %v2077_v39 = vperm.slane %v4479_v28, 0 }
 0x3d5   : > { %v1837_v33 = vsel %vm504_vm8, %v1831_v21, %v1836_v24  ;;  %v1849_v40 = vsel %vm517_vm9, %v1843_v18, %v1848_v22  ;;  %v2055_v21 = vperm.slane %v4471_v56, 1 }
 0x3d6   : > { %1934 = vmatpush.msra.mxu0 %v4270_v34  ;;  %1894 = vst [vmem:[#allocation1 + $0x10] ss:$2 sm:$0xff] %v1853_v43  ;;  %v1840_v44 = vmax.f32 %v1828_v58, %v1837_v33  ;;  %v5168_v58 = vld [vmem:[#allocation3_spill] sm:$0xff]  ;;  %v2082_v9 = vsel %vm366_vm0, %v2077_v39, %v2081_v61 }
 0x3d7   : > { %v2058_v42 = vrot.slane %v2055_v21, 4 }
 0x3d8   : > { %1935 = vmatpush.msra.mxu0 %v4282_v12  ;;  %v1852_v38 = vmax.f32 %v1840_v44, %v1849_v40 }
 0x3d9   : > { %v2009_v2 = vpop.permute.xlu0 %2008  ;;  %v2021_v14 = vpop.permute.xlu1 %2020  ;;  %v2059_v15 = vsel %vm366_vm0, %v2054_v35, %v2058_v42 }
 0x3da   : > { %1936 = vmatpush.msra.mxu0 %v4299_v8  ;;  %1892 = vst [vmem:[#allocation1] ss:$2 sm:$0xff] %v1852_v38  ;;  %v2013_v36 = vperm.slane %v2009_v2, %v3344_v5  ;;  %v2025_v62 = vperm.slane %v2021_v14, %v3344_v5 }
 0x3dc   : > { %1937 = vmatpush.msra.mxu0 %v4313_v60  ;;  %v2015_v4 = vmul.f32 %v4318_v47, %v2013_v36  ;;  %v2016_v49 = vmul.f32 %v3197_v32, %v2013_v36  ;;  %v2045_v52 = vmul.f32 %v3199_v26, %v2013_v36  ;;  %v2046_v48 = vmul.f32 %v3200_v63, %v2013_v36 }
 0x3dd   : > { %v2068_v45 = vmul.f32 %v4495_v0, %v2013_v36  ;;  %v2069_v29 = vmul.f32 %v3203_v1, %v2013_v36  ;;  %v1897_v18 = vld.sshfl [vmem:[#allocation1 + $0x10] sm:$0xff pattern:$0x75316420]  ;;  %v2038_v47 = vsel %vm366_vm0, %v2033_v19, %v2037_v11  ;;  %v2337_v36 = vld [vmem:[%s5129_s2] sm:$0xf] }
 0x3de   : > { %1938 = vmatpush.msra.mxu0 %v4328_v23  ;;  %v2027_v25 = vadd.f32 %v2025_v62, %v2015_v4  ;;  %v2028_v59 = vadd.f32 %v2025_v62, %v2016_v49  ;;  %v2047_v16 = vadd.f32 %v2045_v52, %v2025_v62  ;;  %v2048_v7 = vadd.f32 %v2046_v48, %v2025_v62  ;;  %v2221_v4 = vld [vmem:[%s5132_s5 + $0x118] sm:$0x3f]  ;;  %v4570_v48 = vld [vmem:[%s5132_s5 + $0x110] sm:$0xff] }
 0x3df   : > { %3192 = vmatmul.msk.f32.vlgmr.msra.gmra.mxu1 %vm569_vm10, %v1897_v18  ;;  %v2070_v24 = vadd.f32 %v2068_v45, %v2025_v62  ;;  %v2071_v43 = vadd.f32 %v2069_v29, %v2025_v62  ;;  %3205 = vmatpush.msk.msrb.mxu3 %vm572_vm1, %v2221_v4 }
 0x3e0   : > { %1939 = vmatpush.msra.mxu0 %v5168_v58  ;;  %v2029_v22 = vmax.f32 %v2027_v25, 0.0  ;;  %v2030_v46 = vmax.f32 %v2028_v59, 0.0  ;;  %v2049_v56 = vmax.f32 %v2047_v16, 0.0  ;;  %v2050_v33 = vmax.f32 %v2048_v7, 0.0  ;;  %v4582_v7 = vld [vmem:[%s5132_s5 + $0x100] sm:$0xff] }
 0x3e1   : > { %v2072_v44 = vmax.f32 %v2070_v24, 0.0  ;;  %v2073_v28 = vmax.f32 %v2071_v43, 0.0  ;;  %v1895_v40 = vld.sshfl [vmem:[#allocation1] sm:$0xff pattern:$0x75316420]  ;;  %2290 = vmatpush.msrb.mxu3 %v4570_v48 }
 0x3e2   : > { %1940 = vmatpush.msra.mxu0 %v4353_v20  ;;  %v2040_v31 = vmul.f32 %v2038_v47, %v2029_v22  ;;  %v2041_v21 = vmul.f32 %v2035_v55, %v2030_v46  ;;  %v2061_v38 = vmul.f32 %v2059_v15, %v2049_v56  ;;  %v2062_v32 = vmul.f32 %v2056_v17, %v2050_v33  ;;  %v1896_v26 = vld.sshfl [vmem:[#allocation1 + $0x8] sm:$0xff pattern:$0x75316420]  ;;  %v2349_v55 = vld [vmem:[%s5130_s3] sm:$0xf] }
 0x3e3   : > { %1921 = vmatmul.f32.vlgmr.msra.gmra.mxu3 %v1895_v40  ;;  %1941 = vmatmul.f32.vlgmr.msra.gmra.mxu0 %v1896_v26  ;;  %v2084_v2 = vmul.f32 %v2082_v9, %v2072_v44  ;;  %v2085_v19 = vmul.f32 %v2079_v57, %v2073_v28  ;;  %v4576_v57 = vld [vmem:[%s5132_s5 + $0x108] sm:$0xff] }
 0x3e4   : > { %v2063_v63 = vmax.f32 %v2040_v31, %v2061_v38  ;;  %v2064_v1 = vmax.f32 %v2041_v21, %v2062_v32  ;;  %2291 = vmatpush.msrb.mxu3 %v4576_v57 }
 0x3e6   : > { %v4516_v37 = vmax.f32 %v2063_v63, %v2084_v2  ;;  %v4518_v14 = vmax.f32 %v2064_v1, %v2085_v19  ;;  %2292 = vmatpush.msrb.mxu3 %v4582_v7 }
 0x3e8   : > { %2092 = vrot.lane.b32.xlu0 %v4518_v14, %s3275_s23  ;;  %2102 = vrot.lane.b32.xlu1 %v4516_v37, %s3274_s22 }
 0x3e9   : > { %2090 = vrot.lane.b32.xlu2 %v4516_v37, %s3275_s23 }
 0x3f0   : > { %2114 = vrot.lane.b32.xlu0 %v4516_v37, %s3273_s21  ;;  %2116 = vrot.lane.b32.xlu1 %v4518_v14, %s3273_s21 }
 0x3f1   : > { %2104 = vrot.lane.b32.xlu2 %v4518_v14, %s3274_s22 }
 0x3f8   : > { %2128 = vrot.lane.b32.xlu0 %v4518_v14, %s3276_s24  ;;  %2138 = vrot.lane.b32.xlu1 %v4516_v37, %s3279_s29 }
 0x3f9   : > { %2126 = vrot.lane.b32.xlu2 %v4516_v37, %s3276_s24 }
 0x400   : > { %2150 = vrot.lane.b32.xlu0 %v4516_v37, %s3277_s25  ;;  %2152 = vrot.lane.b32.xlu1 %v4518_v14, %s3277_s25 }
 0x401   : > { %2140 = vrot.lane.b32.xlu2 %v4518_v14, %s3279_s29 }
 0x408   : > { %2164 = vrot.lane.b32.xlu0 %v4518_v14, %s3278_s26  ;;  %2174 = vrot.lane.b32.xlu1 %v4516_v37, %s3280_s10 }
 0x409   : > { %2162 = vrot.lane.b32.xlu2 %v4516_v37, %s3278_s26 }
 0x410   : > { %2340 = vperm.xlu0 %3261, %v2337_v36   ;;  %2352 = vperm.xlu1 %3262, %v2349_v55  }
 0x411   : > { %2176 = vrot.lane.b32.xlu2 %v4518_v14, %s3280_s10 }
 0x440   : > { %v4558_v35 = vpop.f32.mrf.mxu0 }
 0x441   : > { %3181 = vst.msk [vmem:[%s3933_s13 + $0x20] sm:$0xff] %vm327_vm12, %v4558_v35 }
 0x443   : > { %v2091_v17 = vpop.permute.xlu2 %2090 }
 0x444   : > { %v2094_v25 = vrot.slane %v2091_v17, 4 }
 0x44b   : > { %v2105_v11 = vpop.permute.xlu2 %2104 }
 0x44c   : > { %v2107_v44 = vrot.slane %v2105_v11, 4 }
 0x453   : > { %v2127_v42 = vpop.permute.xlu2 %2126 }
 0x454   : > { %v2130_v38 = vrot.slane %v2127_v42, 4 }
 0x45a   : > { %v2093_v39 = vpop.permute.xlu0 %2092  ;;  %v2103_v62 = vpop.permute.xlu1 %2102 }
 0x45b   : > { %v2141_v45 = vpop.permute.xlu2 %2140  ;;  %v2095_v29 = vrot.slane %v2093_v39, 4  ;;  %v2106_v24 = vrot.slane %v2103_v62, 4  ;;  %v2101_v46 = vmax.f32 %v4518_v14, %v2093_v39 }
 0x45c   : > { %v1962_v16 = vpop.f32.mrf.mxu1 }
 0x45d   : > { %v2096_v47 = vsel %vm366_vm0, %v2094_v25, %v2095_v29  ;;  %v2108_v21 = vsel %vm366_vm0, %v2106_v24, %v2107_v44  ;;  %v2113_v32 = vmax.f32 %v2101_v46, %v2105_v11  ;;  %v2143_v11 = vrot.slane %v2141_v45, 4 }
 0x45e   : > { %v2097_v56 = vsel %vm426_vm2, %v2091_v17, %v2096_v47 }
 0x45f   : > { %v2100_v31 = vmax.f32 %v4516_v37, %v2097_v56 }
 0x460   : > { %v1942_v61 = vpop.f32.mrf.mxu0 }
 0x462   : > { %v2115_v49 = vpop.permute.xlu0 %2114  ;;  %v2117_v52 = vpop.permute.xlu1 %2116 }
 0x463   : > { %v2118_v33 = vrot.slane %v2115_v49, 4  ;;  %v2119_v9 = vrot.slane %v2117_v52, 4  ;;  %v2163_v28 = vpop.permute.xlu2 %2162  ;;  %v2125_v63 = vmax.f32 %v2113_v32, %v2117_v52 }
 0x465   : > { %v2120_v26 = vsel %vm366_vm0, %v2118_v33, %v2119_v9 }
 0x466   : > { %v1922_v18 = vpop.f32.mrf.mxu3 }
 0x467   : > { %v1943_v59 = vadd.f32 %v1942_v61, %v1922_v18  ;;  %v2166_v61 = vrot.slane %v2163_v28, 4 }
 0x469   : > { %v1963_v15 = vadd.f32 %v1962_v16, %v1943_v59 }
 0x46a   : > { %v2129_v43 = vpop.permute.xlu0 %2128  ;;  %v2139_v22 = vpop.permute.xlu1 %2138 }
 0x46b   : > { %3193 = vmatpush.msk.msra.mxu2 %vm366_vm0, %v1963_v15  ;;  %v2131_v40 = vrot.slane %v2129_v43, 4  ;;  %v2137_v14 = vmax.f32 %v2125_v63, %v2129_v43  ;;  %v2142_v36 = vrot.slane %v2139_v22, 4  ;;  %v2177_v4 = vpop.permute.xlu2 %2176  ;;  %v3212_v43 = vld [vmem:[%s5128_s1 + $0x24] sm:$0x7] }
 0x46c   : > { %3194 = vmatmul.msk.f32.vlgmr.msra.gmra.mxu2 %vm637_vm11, %v4422_v30  ;;  %v2366_v33 = vperm.slane %v3212_v43, 1 }
 0x46d   : > { %2257 = vmatpush.msrb.mxu2 %v4165_v3  ;;  %v2109_v3 = vsel %vm439_vm3, %v2103_v62, %v2108_v21  ;;  %v2132_v1 = vsel %vm366_vm0, %v2130_v38, %v2131_v40  ;;  %v2149_v52 = vmax.f32 %v2137_v14, %v2141_v45  ;;  %v3211_v40 = vld [vmem:[%s3355_s18 + $0x98] sm:$0xf]  ;;  %v3217_v21 = vld [vmem:[%s3355_s18 + $0xb0] sm:$0xf] }
 0x46e   : > { %v2112_v2 = vmax.f32 %v2100_v31, %v2109_v3  ;;  %v3213_v31 = vld [vmem:[%s3355_s18 + $0x9c] sm:$0xff]  ;;  %v4638_v3 = vld [vmem:[%s3355_s18 + $0xa8] sm:$0xff] }
 0x46f   : > { %2258 = vmatpush.msrb.mxu2 %v4180_v6  ;;  %v2121_v6 = vsel %vm452_vm4, %v2115_v49, %v2120_v26 }
 0x470   : > { %v2124_v39 = vmax.f32 %v2112_v2, %v2121_v6 }
 0x471   : > { %2259 = vmatpush.msrb.mxu2 %v4197_v27  ;;  %v2133_v27 = vsel %vm465_vm5, %v2127_v42, %v2132_v1  ;;  %v2179_v42 = vrot.slane %v2177_v4, 4  ;;  %v2367_v1 = vperm.slane %v3212_v43, 2 }
 0x472   : > { %v2151_v19 = vpop.permute.xlu0 %2150  ;;  %v2153_v37 = vpop.permute.xlu1 %2152  ;;  %v2136_v62 = vmax.f32 %v2124_v39, %v2133_v27 }
 0x473   : > { %2260 = vmatpush.msrb.mxu2 %v4213_v53  ;;  %v2154_v55 = vrot.slane %v2151_v19, 4  ;;  %v2155_v17 = vrot.slane %v2153_v37, 4  ;;  %v2144_v53 = vsel %vm366_vm0, %v2142_v36, %v2143_v11  ;;  %v2161_v29 = vmax.f32 %v2149_v52, %v2153_v37 }
 0x475   : > { %2261 = vmatpush.msrb.mxu2 %v4222_v54  ;;  %v2156_v49 = vsel %vm366_vm0, %v2154_v55, %v2155_v17  ;;  %v2145_v54 = vsel %vm478_vm6, %v2139_v22, %v2144_v53 }
 0x476   : > { %v2157_v25 = vsel %vm491_vm7, %v2151_v19, %v2156_v49  ;;  %v2148_v59 = vmax.f32 %v2136_v62, %v2145_v54 }
 0x477   : > { %2262 = vmatpush.msrb.mxu2 %v4233_v13 }
 0x479   : > { %2263 = vmatpush.msrb.mxu2 %v4243_v51 }
 0x47a   : > { %v2165_v18 = vpop.permute.xlu0 %2164  ;;  %v2175_v13 = vpop.permute.xlu1 %2174 }
 0x47b   : > { %2264 = vmatpush.msrb.mxu2 %v4252_v41  ;;  %v2167_v16 = vrot.slane %v2165_v18, 4  ;;  %v2173_v47 = vmax.f32 %v2161_v29, %v2165_v18  ;;  %v2178_v15 = vrot.slane %v2175_v13, 4  ;;  %v2160_v41 = vmax.f32 %v2148_v59, %v2157_v25 }
 0x47d   : > { %2265 = vmatpush.msrb.mxu2 %v4260_v50  ;;  %v2168_v45 = vsel %vm366_vm0, %v2166_v61, %v2167_v16  ;;  %v2185_v51 = vmax.f32 %v2173_v47, %v2177_v4  ;;  %v2180_v24 = vsel %vm366_vm0, %v2178_v15, %v2179_v42  ;;  %v4620_v50 = vld [vmem:[%s5128_s1 + $0x27] sm:$0x7] }
 0x47e   : > { %v2169_v22 = vsel %vm504_vm8, %v2163_v28, %v2168_v45  ;;  %v2181_v56 = vsel %vm517_vm9, %v2175_v13, %v2180_v24  ;;  %v2387_v9 = vperm.slane %v4620_v50, 1  ;;  %v3214_v28 = vld [vmem:[%s3355_s18 + $0xa4] sm:$0xf]  ;;  %v2386_v2 = vperm.slane %v4620_v50, 0 }
 0x47f   : > { %2266 = vmatpush.msrb.mxu2 %v4270_v34  ;;  %2226 = vst [vmem:[#allocation1 + $0x10] ss:$2 sm:$0xff] %v2185_v51  ;;  %v2172_v46 = vmax.f32 %v2160_v41, %v2169_v22  ;;  %v4627_v34 = vld [vmem:[%s5128_s1 + $0x2a] sm:$0x7]  ;;  %v2388_v6 = vperm.slane %v4620_v50, 2 }
 0x480   : > { %v2410_v32 = vperm.slane %v4627_v34, 1  ;;  %v2390_v19 = vrot.slane %v2387_v9, 4  ;;  %v2409_v37 = vperm.slane %v4627_v34, 0  ;;  %v2411_v62 = vperm.slane %v4627_v34, 2 }
 0x481   : > { %2267 = vmatpush.msrb.mxu2 %v4282_v12  ;;  %v2184_v44 = vmax.f32 %v2172_v46, %v2181_v56  ;;  %v2365_v12 = vperm.slane %v3212_v43, 0 }
 0x482   : > { %v2341_v38 = vpop.permute.xlu0 %2340  ;;  %v2353_v26 = vpop.permute.xlu1 %2352  ;;  %v2413_v53 = vrot.slane %v2410_v32, 4  ;;  %v2391_v61 = vsel %vm366_vm0, %v2386_v2, %v2390_v19  ;;  %v4732_v32 = vld [vmem:[%s5132_s5 + $0x50] sm:$0xff] }
 0x483   : > { %2268 = vmatpush.msrb.mxu2 %v4299_v8  ;;  %2224 = vst [vmem:[#allocation1] ss:$2 sm:$0xff] %v2184_v44  ;;  %v2345_v63 = vperm.slane %v2341_v38, %v3344_v5  ;;  %v2369_v8 = vrot.slane %v2366_v33, 4  ;;  %v2357_v14 = vperm.slane %v2353_v26, %v3344_v5  ;;  %v2681_v33 = vld [vmem:[%s5130_s3] sm:$0xf]  ;;  %v4737_v26 = vld [vmem:[%s5132_s5 + $0x48] sm:$0xff] }
 0x484   : > { %v2414_v59 = vsel %vm366_vm0, %v2409_v37, %v2413_v53  ;;  %v4720_v38 = vld [vmem:[%s5132_s5 + $0x60] sm:$0xff]  ;;  %v4760_v19 = vld [vmem:[%s5132_s5 + $0x30] sm:$0xff]  ;;  %v4766_v37 = vld [vmem:[%s5132_s5 + $0x28] sm:$0xff] }
 0x485   : > { %2269 = vmatpush.msrb.mxu2 %v4313_v60  ;;  %v2347_v36 = vmul.f32 %v4495_v0, %v2345_v63  ;;  %v2348_v55 = vmul.f32 %v3211_v40, %v2345_v63  ;;  %v2377_v17 = vmul.f32 %v3213_v31, %v2345_v63  ;;  %v2378_v27 = vmul.f32 %v3214_v28, %v2345_v63  ;;  %v2533_v40 = vld [vmem:[%s5132_s5 + $0x78] sm:$0xff]  ;;  %v2532_v31 = vld [vmem:[%s5132_s5 + $0x70] sm:$0xff] }
 0x486   : > { %v2400_v11 = vmul.f32 %v4638_v3, %v2345_v63  ;;  %v2401_v39 = vmul.f32 %v3217_v21, %v2345_v63  ;;  %v2229_v60 = vld.sshfl [vmem:[#allocation1 + $0x10] sm:$0xff pattern:$0x75316420]  ;;  %v2370_v0 = vsel %vm366_vm0, %v2365_v12, %v2369_v8  ;;  %2569 = vmatpush.msra.mxu3 %v2533_v40  ;;  %v4714_v21 = vld [vmem:[%s5132_s5 + $0x68] sm:$0xff]  ;;  %v4726_v12 = vld [vmem:[%s5132_s5 + $0x58] sm:$0xff] }
 0x487   : > { %2270 = vmatpush.msrb.mxu2 %v4328_v23  ;;  %v2359_v4 = vadd.f32 %v2357_v14, %v2347_v36  ;;  %v2360_v52 = vadd.f32 %v2357_v14, %v2348_v55  ;;  %v2379_v49 = vadd.f32 %v2377_v17, %v2357_v14  ;;  %v2380_v29 = vadd.f32 %v2378_v27, %v2357_v14  ;;  %v4754_v8 = vld [vmem:[%s5132_s5 + $0x38] sm:$0xff]  ;;  %v4776_v17 = vld [vmem:[%s5132_s5 + $0x20] sm:$0xff] }
 0x488   : > { %3206 = vmatmul.msk.f32.vlgmr.msrb.gmra.mxu3 %vm569_vm10, %v2229_v60  ;;  %v2402_v54 = vadd.f32 %v2400_v11, %v2357_v14  ;;  %v2403_v42 = vadd.f32 %v2401_v39, %v2357_v14  ;;  %v2553_v14 = vld [vmem:[%s5132_s5 + $0x118] sm:$0x3f] }
 0x489   : > { %2271 = vmatpush.msrb.mxu2 %v5168_v58  ;;  %v2361_v23 = vmax.f32 %v2359_v4, 0.0  ;;  %v2362_v18 = vmax.f32 %v2360_v52, 0.0  ;;  %v2381_v25 = vmax.f32 %v2379_v49, 0.0  ;;  %v2382_v13 = vmax.f32 %v2380_v29, 0.0  ;;  %2570 = vmatpush.msra.mxu3 %v2532_v31  ;;  %v4785_v39 = vld [vmem:[%s5132_s5 + $0x18] sm:$0xff]  ;;  %v4792_v52 = vld [vmem:[%s5132_s5 + $0x10] sm:$0xff] }
 0x48a   : > { %v2404_v16 = vmax.f32 %v2402_v54, 0.0  ;;  %v2405_v47 = vmax.f32 %v2403_v42, 0.0  ;;  %v2227_v15 = vld.sshfl [vmem:[#allocation1] sm:$0xff pattern:$0x75316420]  ;;  %3219 = vmatpush.msk.msra.mxu1 %vm572_vm1, %v2553_v14  ;;  %v4805_v54 = vld [vmem:[%s5132_s5 + $0xf8] sm:$0xff] }
 0x48b   : > { %2272 = vmatpush.msrb.mxu2 %v4353_v20  ;;  %v2372_v45 = vmul.f32 %v2370_v0, %v2361_v23  ;;  %v2373_v51 = vmul.f32 %v2367_v1, %v2362_v18  ;;  %v2393_v41 = vmul.f32 %v2391_v61, %v2381_v25  ;;  %v2394_v24 = vmul.f32 %v2388_v6, %v2382_v13  ;;  %v2228_v43 = vld.sshfl [vmem:[#allocation1 + $0x8] sm:$0xff pattern:$0x75316420]  ;;  %v2669_v20 = vld [vmem:[%s5129_s2] sm:$0xf]  ;;  %v4865_v14 = vld [vmem:[%s5132_s5 + $0xd0] sm:$0xff] }
 0x48c   : > { %2253 = vmatmul.f32.vlgmr.msrb.gmra.mxu1 %v2227_v15  ;;  %2273 = vmatmul.f32.vlgmr.msrb.gmra.mxu2 %v2228_v43  ;;  %v2416_v22 = vmul.f32 %v2414_v59, %v2404_v16  ;;  %v2417_v46 = vmul.f32 %v2411_v62, %v2405_v47  ;;  %v4748_v6 = vld [vmem:[%s5132_s5 + $0x40] sm:$0xff]  ;;  %v4800_v0 = vld [vmem:[%s5132_s5 + $0x8] sm:$0xff]  ;;  %v4822_v15 = vld [vmem:[%s5132_s5 + $0xf0] sm:$0xff] }
 0x48d   : > { %v2395_v50 = vmax.f32 %v2372_v45, %v2393_v41  ;;  %v2396_v58 = vmax.f32 %v2373_v51, %v2394_v24  ;;  %2571 = vmatpush.msra.mxu3 %v4714_v21  ;;  %2622 = vmatpush.msra.mxu1 %v4570_v48  ;;  %v4814_v25 = vld [vmem:[%s5132_s5] sm:$0xff]  ;;  %v4832_v24 = vld [vmem:[%s5132_s5 + $0xe8] sm:$0xff] }
 0x48f   : > { %v4656_v34 = vmax.f32 %v2395_v50, %v2416_v22  ;;  %v4658_v56 = vmax.f32 %v2396_v58, %v2417_v46  ;;  %2572 = vmatpush.msra.mxu3 %v4720_v38  ;;  %2623 = vmatpush.msra.mxu1 %v4576_v57 }
 0x491   : > { %2424 = vrot.lane.b32.xlu0 %v4658_v56, %s3275_s23  ;;  %2434 = vrot.lane.b32.xlu1 %v4656_v34, %s3274_s22 }
 0x492   : > { %2422 = vrot.lane.b32.xlu2 %v4656_v34, %s3275_s23  ;;  %2573 = vmatpush.msra.mxu3 %v4726_v12 }
 0x493   : > { %2624 = vmatpush.msra.mxu1 %v4582_v7 }
 0x494   : > { %2574 = vmatpush.msra.mxu3 %v4732_v32 }
 0x495   : > { %2901 = vmatpush.msrb.mxu1 %v2533_v40 }
 0x496   : > { %2575 = vmatpush.msra.mxu3 %v4737_v26 }
 0x497   : > { %2902 = vmatpush.msrb.mxu1 %v2532_v31 }
 0x498   : > { %2576 = vmatpush.msra.mxu3 %v4748_v6 }
 0x499   : > { %2446 = vrot.lane.b32.xlu0 %v4656_v34, %s3273_s21  ;;  %2448 = vrot.lane.b32.xlu1 %v4658_v56, %s3273_s21 }
 0x49a   : > { %2436 = vrot.lane.b32.xlu2 %v4658_v56, %s3274_s22  ;;  %2577 = vmatpush.msra.mxu3 %v4754_v8 }
 0x49b   : > { %2903 = vmatpush.msrb.mxu1 %v4714_v21 }
 0x49c   : > { %2578 = vmatpush.msra.mxu3 %v4760_v19 }
 0x49d   : > { %2904 = vmatpush.msrb.mxu1 %v4720_v38 }
 0x49e   : > { %2579 = vmatpush.msra.mxu3 %v4766_v37 }
 0x49f   : > { %2905 = vmatpush.msrb.mxu1 %v4726_v12 }
 0x4a0   : > { %2580 = vmatpush.msra.mxu3 %v4776_v17 }
 0x4a1   : > { %2460 = vrot.lane.b32.xlu0 %v4658_v56, %s3276_s24  ;;  %2470 = vrot.lane.b32.xlu1 %v4656_v34, %s3279_s29 }
 0x4a2   : > { %2458 = vrot.lane.b32.xlu2 %v4656_v34, %s3276_s24  ;;  %2581 = vmatpush.msra.mxu3 %v4785_v39 }
 0x4a3   : > { %2906 = vmatpush.msrb.mxu1 %v4732_v32 }
 0x4a4   : > { %2582 = vmatpush.msra.mxu3 %v4792_v52 }
 0x4a5   : > { %2907 = vmatpush.msrb.mxu1 %v4737_v26 }
 0x4a6   : > { %2583 = vmatpush.msra.mxu3 %v4800_v0 }
 0x4a7   : > { %2908 = vmatpush.msrb.mxu1 %v4748_v6 }
 0x4a8   : > { %2584 = vmatpush.msra.mxu3 %v4814_v25 }
 0x4a9   : > { %2482 = vrot.lane.b32.xlu0 %v4656_v34, %s3277_s25  ;;  %2484 = vrot.lane.b32.xlu1 %v4658_v56, %s3277_s25 }
 0x4aa   : > { %2472 = vrot.lane.b32.xlu2 %v4658_v56, %s3279_s29  ;;  %2909 = vmatpush.msrb.mxu1 %v4754_v8  ;;  %v4903_v8 = vld [vmem:[%s5132_s5 + $0xb0] sm:$0xff] }
 0x4ac   : > { %2910 = vmatpush.msrb.mxu1 %v4760_v19 }
 0x4ae   : > { %2911 = vmatpush.msrb.mxu1 %v4766_v37  ;;  %v4937_v37 = vld [vmem:[%s5132_s5 + $0xa0] sm:$0xff] }
 0x4b0   : > { %2912 = vmatpush.msrb.mxu1 %v4776_v17 }
 0x4b1   : > { %2496 = vrot.lane.b32.xlu0 %v4658_v56, %s3278_s26  ;;  %2506 = vrot.lane.b32.xlu1 %v4656_v34, %s3280_s10 }
 0x4b2   : > { %2494 = vrot.lane.b32.xlu2 %v4656_v34, %s3278_s26  ;;  %2913 = vmatpush.msrb.mxu1 %v4785_v39  ;;  %v4963_v39 = vld [vmem:[%s5132_s5 + $0x90] sm:$0xff] }
 0x4b4   : > { %2914 = vmatpush.msrb.mxu1 %v4792_v52 }
 0x4b6   : > { %2915 = vmatpush.msrb.mxu1 %v4800_v0 }
 0x4b8   : > { %2916 = vmatpush.msrb.mxu1 %v4814_v25 }
 0x4b9   : > { %2672 = vperm.xlu0 %3261, %v2669_v20   ;;  %2684 = vperm.xlu1 %3262, %v2681_v33   ;;  %v4856_v33 = vld [vmem:[%s5132_s5 + $0xd8] sm:$0xff] }
 0x4ba   : > { %2508 = vrot.lane.b32.xlu2 %v4658_v56, %s3280_s10 }
 0x4ec   : > { %v2423_v9 = vpop.permute.xlu2 %2422 }
 0x4ed   : > { %v2426_v62 = vrot.slane %v2423_v9, 4 }
 0x4ef   : > { %v4698_v44 = vpop.f32.mrf.mxu2 }
 0x4f0   : > { %3195 = vst.msk [vmem:[%s3933_s13 + $0x28] sm:$0xff] %vm327_vm12, %v4698_v44 }
 0x4f4   : > { %v4709_v28 = vpop.permute.xlu2 %2436 }
 0x4f5   : > { %v2439_v45 = vrot.slane %v4709_v28, 4 }
 0x4fc   : > { %v4740_v63 = vpop.permute.xlu2 %2458 }
 0x4fd   : > { %v2462_v58 = vrot.slane %v4740_v63, 4 }
 0x503   : > { %v2425_v1 = vpop.permute.xlu0 %2424  ;;  %v4743_v2 = vpop.permute.xlu1 %2434 }
 0x504   : > { %v4778_v27 = vpop.permute.xlu2 %2472  ;;  %v2427_v11 = vrot.slane %v2425_v1, 4  ;;  %v2438_v42 = vrot.slane %v4743_v2, 4  ;;  %v2433_v13 = vmax.f32 %v4658_v56, %v2425_v1  ;;  %v4846_v56 = vld [vmem:[%s5132_s5 + $0xe0] sm:$0xff] }
 0x506   : > { %v2428_v49 = vsel %vm366_vm0, %v2426_v62, %v2427_v11  ;;  %v2440_v50 = vsel %vm366_vm0, %v2438_v42, %v2439_v45  ;;  %v2445_v22 = vmax.f32 %v2433_v13, %v4709_v28  ;;  %v4875_v11 = vld [vmem:[%s5132_s5 + $0xc8] sm:$0xff] }
 0x507   : > { %v2429_v59 = vsel %vm426_vm2, %v2423_v9, %v2428_v49  ;;  %v4892_v49 = vld [vmem:[%s5132_s5 + $0xb8] sm:$0xff] }
 0x508   : > { %v2432_v43 = vmax.f32 %v4656_v34, %v2429_v59 }
 0x509   : > { %v2254_v53 = vpop.f32.mrf.mxu1 }
 0x50b   : > { %v2447_v36 = vpop.permute.xlu0 %2446  ;;  %v2449_v55 = vpop.permute.xlu1 %2448 }
 0x50c   : > { %v2294_v29 = vpop.f32.mrf.mxu3  ;;  %v2450_v16 = vrot.slane %v2447_v36, 4  ;;  %v2451_v47 = vrot.slane %v2449_v55, 4  ;;  %v4827_v51 = vpop.permute.xlu2 %2494  ;;  %v2457_v34 = vmax.f32 %v2445_v22, %v2449_v55  ;;  %v4922_v22 = vld [vmem:[%s5128_s1 + $0x2d] sm:$0x7] }
 0x50e   : > { %v2452_v46 = vsel %vm366_vm0, %v2450_v16, %v2451_v47 }
 0x50f   : > { %v2274_v60 = vpop.f32.mrf.mxu2  ;;  %v2453_v40 = vsel %vm452_vm4, %v2447_v36, %v2452_v46  ;;  %v2475_v36 = vrot.slane %v4778_v27, 4 }
 0x510   : > { %v2275_v4 = vadd.f32 %v2274_v60, %v2254_v53 }
 0x512   : > { %v2295_v61 = vadd.f32 %v2294_v29, %v2275_v4  ;;  %v4885_v4 = vld [vmem:[%s5132_s5 + $0xc0] sm:$0xff] }
 0x513   : > { %v2461_v23 = vpop.permute.xlu0 %2460  ;;  %v4808_v18 = vpop.permute.xlu1 %2470 }
 0x514   : > { %3207 = vmatpush.msk.msrb.mxu0 %vm366_vm0, %v2295_v61  ;;  %v2463_v41 = vrot.slane %v2461_v23, 4  ;;  %v2469_v21 = vmax.f32 %v2457_v34, %v2461_v23  ;;  %v2474_v38 = vrot.slane %v4808_v18, 4  ;;  %v2509_v53 = vpop.permute.xlu2 %2508  ;;  %v4932_v34 = vld [vmem:[%s5128_s1 + $0x30] sm:$0x7] }
 0x515   : > { %3208 = vmatmul.msk.f32.vlgmr.msrb.gmra.mxu0 %vm637_vm11, %v4422_v30  ;;  %v2441_v30 = vsel %vm439_vm3, %v4743_v2, %v2440_v50  ;;  %v2511_v61 = vrot.slane %v2509_v53, 4 }
 0x516   : > { %2589 = vmatpush.msra.mxu0 %v4805_v54  ;;  %v2464_v20 = vsel %vm366_vm0, %v2462_v58, %v2463_v41  ;;  %v2444_v9 = vmax.f32 %v2432_v43, %v2441_v30  ;;  %v2476_v32 = vsel %vm366_vm0, %v2474_v38, %v2475_v36  ;;  %v4917_v58 = vld [vmem:[%s5132_s5 + $0xa8] sm:$0xff] }
 0x517   : > { %v2465_v12 = vsel %vm465_vm5, %v4740_v63, %v2464_v20  ;;  %v2481_v63 = vmax.f32 %v2469_v21, %v4778_v27  ;;  %v2498_v27 = vrot.slane %v4827_v51, 4  ;;  %v2477_v29 = vsel %vm478_vm6, %v4808_v18, %v2476_v32  ;;  %v4908_v18 = vld [vmem:[%s5128_s1 + $0x2a] sm:$0x7]  ;;  %v3227_v21 = vld [vmem:[%s3355_s18 + $0xb4] sm:$0xff] }
 0x518   : > { %2590 = vmatpush.msra.mxu0 %v4822_v15  ;;  %v2456_v55 = vmax.f32 %v2444_v9, %v2453_v40  ;;  %v2698_v46 = vperm.slane %v4908_v18, 1  ;;  %v2719_v20 = vperm.slane %v4922_v22, 1  ;;  %v3225_v40 = vld [vmem:[%s3355_s18 + $0xb0] sm:$0xf]  ;;  %v3231_v38 = vld [vmem:[%s3355_s18 + $0xc8] sm:$0xf] }
 0x519   : > { %v2699_v32 = vperm.slane %v4908_v18, 2 }
 0x51a   : > { %2591 = vmatpush.msra.mxu0 %v4832_v24  ;;  %v2468_v62 = vmax.f32 %v2456_v55, %v2465_v12  ;;  %v2742_v12 = vperm.slane %v4932_v34, 1  ;;  %v3230_v55 = vld [vmem:[%s3355_s18 + $0xc0] sm:$0xff] }
 0x51b   : > { %v2483_v31 = vpop.permute.xlu0 %2482  ;;  %v2485_v28 = vpop.permute.xlu1 %2484 }
 0x51c   : > { %2592 = vmatpush.msra.mxu0 %v4846_v56  ;;  %v2486_v1 = vrot.slane %v2483_v31, 4  ;;  %v2487_v2 = vrot.slane %v2485_v28, 4  ;;  %v2493_v26 = vmax.f32 %v2481_v63, %v2485_v28  ;;  %v2480_v13 = vmax.f32 %v2468_v62, %v2477_v29  ;;  %v4948_v28 = vld [vmem:[%s5132_s5 + $0x98] sm:$0xff] }
 0x51d   : > { %v2720_v63 = vperm.slane %v4922_v22, 2 }
 0x51e   : > { %2593 = vmatpush.msra.mxu0 %v4856_v33  ;;  %v2488_v60 = vsel %vm366_vm0, %v2486_v1, %v2487_v2  ;;  %v2697_v1 = vperm.slane %v4908_v18, 0  ;;  %v2701_v2 = vrot.slane %v2698_v46, 4 }
 0x51f   : > { %v2489_v23 = vsel %vm491_vm7, %v2483_v31, %v2488_v60  ;;  %v3228_v31 = vld [vmem:[%s3355_s18 + $0xbc] sm:$0xf]  ;;  %v2722_v60 = vrot.slane %v2719_v20, 4 }
 0x520   : > { %2594 = vmatpush.msra.mxu0 %v4865_v14  ;;  %v2492_v43 = vmax.f32 %v2480_v13, %v2489_v23 }
 0x522   : > { %2595 = vmatpush.msra.mxu0 %v4875_v11 }
 0x523   : > { %v2497_v42 = vpop.permute.xlu0 %2496  ;;  %v2507_v6 = vpop.permute.xlu1 %2506 }
 0x524   : > { %2596 = vmatpush.msra.mxu0 %v4885_v4  ;;  %v2499_v59 = vrot.slane %v2497_v42, 4  ;;  %v2505_v16 = vmax.f32 %v2493_v26, %v2497_v42  ;;  %v2510_v47 = vrot.slane %v2507_v6, 4  ;;  %v2741_v26 = vperm.slane %v4932_v34, 0 }
 0x526   : > { %2597 = vmatpush.msra.mxu0 %v4892_v49  ;;  %v2500_v45 = vsel %vm366_vm0, %v2498_v27, %v2499_v59  ;;  %v2517_v41 = vmax.f32 %v2505_v16, %v2509_v53  ;;  %v2512_v50 = vsel %vm366_vm0, %v2510_v47, %v2511_v61  ;;  %v2718_v53 = vperm.slane %v4922_v22, 0 }
 0x527   : > { %v2501_v19 = vsel %vm504_vm8, %v4827_v51, %v2500_v45  ;;  %v2513_v51 = vsel %vm517_vm9, %v2507_v6, %v2512_v50  ;;  %v4974_v6 = vld [vmem:[%s5132_s5 + $0x88] sm:$0xff]  ;;  %v2702_v59 = vsel %vm366_vm0, %v2697_v1, %v2701_v2  ;;  %v2745_v16 = vrot.slane %v2742_v12, 4 }
 0x528   : > { %2598 = vmatpush.msra.mxu0 %v4903_v8  ;;  %2558 = vst [vmem:[#allocation1 + $0x10] ss:$2 sm:$0xff] %v2517_v41  ;;  %v2504_v30 = vmax.f32 %v2492_v43, %v2501_v19  ;;  %v4983_v41 = vld [vmem:[%s5132_s5 + $0x80] sm:$0xff]  ;;  %v2723_v0 = vsel %vm366_vm0, %v2718_v53, %v2722_v60  ;;  %v2743_v43 = vperm.slane %v4932_v34, 2 }
 0x529   : > { %v2746_v20 = vsel %vm366_vm0, %v2741_v26, %v2745_v16  ;;  %v1334_v26 = vmul.f32 %v4403_v10, %v4403_v10 }
 0x52a   : > { %2599 = vmatpush.msra.mxu0 %v4917_v58  ;;  %v2516_v9 = vmax.f32 %v2504_v30, %v2513_v51 }
 0x52b   : > { %v2673_v17 = vpop.permute.xlu0 %2672  ;;  %v2685_v36 = vpop.permute.xlu1 %2684 }
 0x52c   : > { %2600 = vmatpush.msra.mxu0 %v4937_v37  ;;  %2556 = vst [vmem:[#allocation1] ss:$2 sm:$0xff] %v2516_v9  ;;  %v2677_v62 = vperm.slane %v2673_v17, %v3344_v5  ;;  %v2689_v27 = vperm.slane %v2685_v36, %v3344_v5 }
 0x52e   : > { %2601 = vmatpush.msra.mxu0 %v4948_v28  ;;  %v2679_v29 = vmul.f32 %v4638_v3, %v2677_v62  ;;  %v2680_v61 = vmul.f32 %v3225_v40, %v2677_v62  ;;  %v2709_v42 = vmul.f32 %v3227_v21, %v2677_v62  ;;  %v2710_v23 = vmul.f32 %v3228_v31, %v2677_v62 }
 0x52f   : > { %v2732_v52 = vmul.f32 %v3230_v55, %v2677_v62  ;;  %v2733_v13 = vmul.f32 %v3231_v38, %v2677_v62  ;;  %v2561_v5 = vld.sshfl [vmem:[#allocation1 + $0x10] sm:$0xff pattern:$0x75316420] }
 0x530   : > { %2602 = vmatpush.msra.mxu0 %v4963_v39  ;;  %v2691_v47 = vadd.f32 %v2689_v27, %v2679_v29  ;;  %v2692_v3 = vadd.f32 %v2689_v27, %v2680_v61  ;;  %v2711_v18 = vadd.f32 %v2709_v42, %v2689_v27  ;;  %v2712_v45 = vadd.f32 %v2710_v23, %v2689_v27 }
 0x531   : > { %3220 = vmatmul.msk.f32.vlgmr.msra.gmra.mxu1 %vm569_vm10, %v2561_v5  ;;  %v2734_v50 = vadd.f32 %v2732_v52, %v2689_v27  ;;  %v2735_v22 = vadd.f32 %v2733_v13, %v2689_v27  ;;  %v5170_v27 = vld [vmem:[#allocation4_spill] sm:$0xff]  ;;  %v1335_v61 = vsel %vm327_vm12, %v1334_v26, 0.0  ;;  %v1330_v42 = vsel %vm327_vm12, %v4403_v10, 0.0 }
 0x532   : > { %2603 = vmatpush.msra.mxu0 %v4974_v6  ;;  %v2693_v19 = vmax.f32 %v2691_v47, 0.0  ;;  %v2694_v46 = vmax.f32 %v2692_v3, 0.0  ;;  %v2713_v30 = vmax.f32 %v2711_v18, 0.0  ;;  %v2714_v51 = vmax.f32 %v2712_v45, 0.0 }
 0x533   : > { %v2736_v9 = vmax.f32 %v2734_v50, 0.0  ;;  %v2737_v40 = vmax.f32 %v2735_v22, 0.0  ;;  %v2559_v31 = vld.sshfl [vmem:[#allocation1] sm:$0xff pattern:$0x75316420]  ;;  %v998_v29 = vsel %vm327_vm12, %v5170_v27, 0.0  ;;  %v1002_v23 = vmul.f32 %v5170_v27, %v5170_v27 }
 0x534   : > { %2604 = vmatpush.msra.mxu0 %v4983_v41  ;;  %v2704_v21 = vmul.f32 %v2702_v59, %v2693_v19  ;;  %v2705_v38 = vmul.f32 %v2699_v32, %v2694_v46  ;;  %v2725_v34 = vmul.f32 %v2723_v0, %v2713_v30  ;;  %v2726_v17 = vmul.f32 %v2720_v63, %v2714_v51  ;;  %v2560_v1 = vld.sshfl [vmem:[#allocation1 + $0x8] sm:$0xff pattern:$0x75316420]  ;;  %v2885_v30 = vld [vmem:[%s5132_s5 + $0x118] sm:$0x3f] }
 0x535   : > { %2585 = vmatmul.f32.vlgmr.msra.gmra.mxu3 %v2559_v31  ;;  %2605 = vmatmul.f32.vlgmr.msra.gmra.mxu0 %v2560_v1  ;;  %v2748_v12 = vmul.f32 %v2746_v20, %v2736_v9  ;;  %v2749_v36 = vmul.f32 %v2743_v43, %v2737_v40  ;;  %v5169_v32 = vld [vmem:[#allocation2_spill] sm:$0xff]  ;;  %v1666_v52 = vmul.f32 %v4558_v35, %v4558_v35  ;;  %v1003_v13 = vsel %vm327_vm12, %v1002_v23, 0.0  ;;  %v5067_v1 = vld [vmem:[%s5131_s4] sm:$0xff] }
 0x536   : > { %v2727_v2 = vmax.f32 %v2704_v21, %v2725_v34  ;;  %v2728_v25 = vmax.f32 %v2705_v38, %v2726_v17  ;;  %v670_v53 = vmul.f32 %v5169_v32, %v5169_v32  ;;  %v666_v63 = vsel %vm327_vm12, %v5169_v32, 0.0  ;;  %3233 = vmatpush.msk.msrb.mxu3 %vm572_vm1, %v2885_v30 }
 0x537   : > { %v1994_v59 = vsel %vm327_vm12, %v4698_v44, 0.0  ;;  %v1667_v5 = vsel %vm327_vm12, %v1666_v52, 0.0  ;;  %v1662_v45 = vsel %vm327_vm12, %v4558_v35, 0.0  ;;  %v1998_v0 = vmul.f32 %v4698_v44, %v4698_v44 }
 0x538   : > { %v4991_v55 = vmax.f32 %v2727_v2, %v2748_v12  ;;  %v4993_v62 = vmax.f32 %v2728_v25, %v2749_v36  ;;  %v671_v60 = vsel %vm327_vm12, %v670_v53, 0.0  ;;  %2954 = vmatpush.msrb.mxu3 %v4570_v48 }
 0x539   : > { %v1999_v50 = vsel %vm327_vm12, %v1998_v0, 0.0 }
 0x53a   : > { %2756 = vrot.lane.b32.xlu0 %v4993_v62, %s3275_s23  ;;  %2766 = vrot.lane.b32.xlu1 %v4991_v55, %s3274_s22 }
 0x53b   : > { %2754 = vrot.lane.b32.xlu2 %v4991_v55, %s3275_s23  ;;  %2955 = vmatpush.msrb.mxu3 %v4576_v57 }
 0x53d   : > { %2956 = vmatpush.msrb.mxu3 %v4582_v7 }
 0x542   : > { %2778 = vrot.lane.b32.xlu0 %v4991_v55, %s3273_s21  ;;  %2780 = vrot.lane.b32.xlu1 %v4993_v62, %s3273_s21 }
 0x543   : > { %2768 = vrot.lane.b32.xlu2 %v4993_v62, %s3274_s22 }
 0x54a   : > { %2792 = vrot.lane.b32.xlu0 %v4993_v62, %s3276_s24  ;;  %2802 = vrot.lane.b32.xlu1 %v4991_v55, %s3279_s29 }
 0x54b   : > { %2790 = vrot.lane.b32.xlu2 %v4991_v55, %s3276_s24 }
 0x552   : > { %2814 = vrot.lane.b32.xlu0 %v4991_v55, %s3277_s25  ;;  %2816 = vrot.lane.b32.xlu1 %v4993_v62, %s3277_s25  ;;  %s3126_s25 = sshll.u32 %s5172_s28, 3 }
 0x553   : > { %2804 = vrot.lane.b32.xlu2 %v4993_v62, %s3279_s29  ;;  %s326_s11 = scalar_lea.vmem %s5135_s8, %s3126_s25 }
 0x55a   : > { %2828 = vrot.lane.b32.xlu0 %v4993_v62, %s3278_s26  ;;  %2838 = vrot.lane.b32.xlu1 %v4991_v55, %s3280_s10 }
 0x55b   : > { %2826 = vrot.lane.b32.xlu2 %v4991_v55, %s3278_s26 }
 0x563   : > { %2840 = vrot.lane.b32.xlu2 %v4993_v62, %s3280_s10  ;;  %s322_s10 = scalar_lea.vmem %s5134_s7, %s3126_s25 }
 0x584   : > { %667 = vadd.xlane.f32.xlu0 %v666_v63  ;;  %672 = vadd.xlane.f32.xlu1 %v671_v60 }
 0x58c   : > { %999 = vadd.xlane.f32.xlu2 %v998_v29  ;;  %1336 = vadd.xlane.f32.xlu1 %v1335_v61 }
 0x58d   : > { %1331 = vadd.xlane.f32.xlu0 %v1330_v42 }
 0x592   : > { %v2321_v16 = vpop.f32.mrf.mxu0 }
 0x593   : > { %3209 = vst.msk [vmem:[%s3933_s13 + $0x30] sm:$0xff] %vm327_vm12, %v2321_v16  ;;  %v2330_v10 = vmul.f32 %v2321_v16, %v2321_v16  ;;  %v2326_v18 = vsel %vm327_vm12, %v2321_v16, 0.0 }
 0x594   : > { %1004 = vadd.xlane.f32.xlu2 %v1003_v13  ;;  %1995 = vadd.xlane.f32.xlu1 %v1994_v59 }
 0x595   : > { %1668 = vadd.xlane.f32.xlu0 %v1667_v5  ;;  %v2755_v47 = vpop.permute.xlu2 %2754  ;;  %v2331_v3 = vsel %vm327_vm12, %v2330_v10, 0.0 }
 0x596   : > { %v2758_v31 = vrot.slane %v2755_v47, 4 }
 0x59c   : > { %1663 = vadd.xlane.f32.xlu2 %v1662_v45  ;;  %2332 = vadd.xlane.f32.xlu1 %v2331_v3 }
 0x59d   : > { %2327 = vadd.xlane.f32.xlu0 %v2326_v18  ;;  %v2769_v43 = vpop.permute.xlu2 %2768 }
 0x59e   : > { %v2771_v7 = vrot.slane %v2769_v43, 4 }
 0x5a4   : > { %2000 = vadd.xlane.f32.xlu2 %v1999_v50 }
 0x5a5   : > { %v2791_v22 = vpop.permute.xlu2 %2790 }
 0x5a6   : > { %v2794_v27 = vrot.slane %v2791_v22, 4 }
 0x5ac   : > { %v2757_v19 = vpop.permute.xlu0 %2756  ;;  %v2767_v46 = vpop.permute.xlu1 %2766 }
 0x5ad   : > { %v2805_v20 = vpop.permute.xlu2 %2804  ;;  %v2759_v9 = vrot.slane %v2757_v19, 4  ;;  %v2770_v2 = vrot.slane %v2767_v46, 4  ;;  %v2765_v57 = vmax.f32 %v4993_v62, %v2757_v19 }
 0x5ae   : > { %v2626_v38 = vpop.f32.mrf.mxu1 }
 0x5af   : > { %v2760_v34 = vsel %vm366_vm0, %v2758_v31, %v2759_v9  ;;  %v2772_v26 = vsel %vm366_vm0, %v2770_v2, %v2771_v7  ;;  %v2777_v62 = vmax.f32 %v2765_v57, %v2769_v43 }
 0x5b0   : > { %v2761_v12 = vsel %vm426_vm2, %v2755_v47, %v2760_v34  ;;  %v2773_v61 = vsel %vm439_vm3, %v2767_v46, %v2772_v26 }
 0x5b1   : > { %v2764_v60 = vmax.f32 %v4991_v55, %v2761_v12 }
 0x5b2   : > { %v2606_v44 = vpop.f32.mrf.mxu0 }
 0x5b4   : > { %v2779_v35 = vpop.permute.xlu0 %2778  ;;  %v2781_v51 = vpop.permute.xlu1 %2780 }
 0x5b5   : > { %v2782_v36 = vrot.slane %v2779_v35, 4  ;;  %v2783_v32 = vrot.slane %v2781_v51, 4  ;;  %v2827_v53 = vpop.permute.xlu2 %2826  ;;  %v2789_v42 = vmax.f32 %v2777_v62, %v2781_v51 }
 0x5b6   : > { %v2830_v50 = vrot.slane %v2827_v53, 4 }
 0x5b7   : > { %v2784_v29 = vsel %vm366_vm0, %v2782_v36, %v2783_v32 }
 0x5b8   : > { %v2586_v40 = vpop.f32.mrf.mxu3  ;;  %v2785_v52 = vsel %vm452_vm4, %v2779_v35, %v2784_v29 }
 0x5b9   : > { %v2607_v21 = vadd.f32 %v2606_v44, %v2586_v40 }
 0x5bb   : > { %v2627_v17 = vadd.f32 %v2626_v38, %v2607_v21 }
 0x5bc   : > { %v2793_v48 = vpop.permute.xlu0 %2792  ;;  %v2803_v25 = vpop.permute.xlu1 %2802 }
 0x5bd   : > { %3221 = vmatpush.msk.msra.mxu2 %vm366_vm0, %v2627_v17  ;;  %v2795_v63 = vrot.slane %v2793_v48, 4  ;;  %v2801_v59 = vmax.f32 %v2789_v42, %v2793_v48  ;;  %v2841_v45 = vpop.permute.xlu2 %2840 }
 0x5be   : > { %3222 = vmatmul.msk.f32.vlgmr.msra.gmra.mxu2 %vm637_vm11, %v5067_v1 }
 0x5bf   : > { %2921 = vmatpush.msrb.mxu2 %v4805_v54  ;;  %v2796_v23 = vsel %vm366_vm0, %v2794_v27, %v2795_v63  ;;  %v2776_v54 = vmax.f32 %v2764_v60, %v2773_v61  ;;  %v2813_v0 = vmax.f32 %v2801_v59, %v2805_v20 }
 0x5c0   : > { %v2797_v10 = vsel %vm465_vm5, %v2791_v22, %v2796_v23  ;;  %v2843_v22 = vrot.slane %v2841_v45, 4 }
 0x5c1   : > { %2922 = vmatpush.msrb.mxu2 %v4822_v15  ;;  %v2806_v15 = vrot.slane %v2803_v25, 4  ;;  %v2788_v47 = vmax.f32 %v2776_v54, %v2785_v52 }
 0x5c3   : > { %2923 = vmatpush.msrb.mxu2 %v4832_v24  ;;  %v2807_v24 = vrot.slane %v2805_v20, 4  ;;  %v2800_v3 = vmax.f32 %v2788_v47, %v2797_v10 }
 0x5c4   : > { %v2815_v13 = vpop.permute.xlu0 %2814  ;;  %v2817_v55 = vpop.permute.xlu1 %2816 }
 0x5c5   : > { %2924 = vmatpush.msrb.mxu2 %v4846_v56  ;;  %v2818_v16 = vrot.slane %v2815_v13, 4  ;;  %v2819_v5 = vrot.slane %v2817_v55, 4  ;;  %v2808_v18 = vsel %vm366_vm0, %v2806_v15, %v2807_v24  ;;  %v2825_v56 = vmax.f32 %v2813_v0, %v2817_v55 }
 0x5c6   : > { %v2809_v19 = vsel %vm478_vm6, %v2803_v25, %v2808_v18 }
 0x5c7   : > { %2925 = vmatpush.msrb.mxu2 %v4856_v33  ;;  %v2820_v43 = vsel %vm366_vm0, %v2818_v16, %v2819_v5 }
 0x5c8   : > { %v2821_v33 = vsel %vm491_vm7, %v2815_v13, %v2820_v43 }
 0x5c9   : > { %2926 = vmatpush.msrb.mxu2 %v4865_v14  ;;  %v2812_v14 = vmax.f32 %v2800_v3, %v2809_v19 }
 0x5cb   : > { %2927 = vmatpush.msrb.mxu2 %v4875_v11  ;;  %v2824_v44 = vmax.f32 %v2812_v14, %v2821_v33 }
 0x5cc   : > { %v2829_v46 = vpop.permute.xlu0 %2828  ;;  %v2839_v30 = vpop.permute.xlu1 %2838 }
 0x5cd   : > { %2928 = vmatpush.msrb.mxu2 %v4885_v4  ;;  %v2831_v35 = vrot.slane %v2829_v46, 4  ;;  %v2837_v51 = vmax.f32 %v2825_v56, %v2829_v46  ;;  %v2842_v9 = vrot.slane %v2839_v30, 4 }
 0x5cf   : > { %2929 = vmatpush.msrb.mxu2 %v4892_v49  ;;  %v2832_v20 = vsel %vm366_vm0, %v2830_v50, %v2831_v35  ;;  %v2849_v11 = vmax.f32 %v2837_v51, %v2841_v45  ;;  %v2844_v40 = vsel %vm366_vm0, %v2842_v9, %v2843_v22 }
 0x5d0   : > { %v2833_v31 = vsel %vm504_vm8, %v2827_v53, %v2832_v20  ;;  %v2845_v4 = vsel %vm517_vm9, %v2839_v30, %v2844_v40 }
 0x5d1   : > { %2930 = vmatpush.msrb.mxu2 %v4903_v8  ;;  %2890 = vst [vmem:[#allocation1 + $0x10] ss:$2 sm:$0xff] %v2849_v11  ;;  %v2836_v21 = vmax.f32 %v2824_v44, %v2833_v31 }
 0x5d3   : > { %2931 = vmatpush.msrb.mxu2 %v4917_v58  ;;  %v2848_v38 = vmax.f32 %v2836_v21, %v2845_v4 }
 0x5d5   : > { %2932 = vmatpush.msrb.mxu2 %v4937_v37  ;;  %2888 = vst [vmem:[#allocation1] ss:$2 sm:$0xff] %v2848_v38 }
 0x5d7   : > { %2933 = vmatpush.msrb.mxu2 %v4948_v28 }
 0x5d8   : > { %v2893_v49 = vld.sshfl [vmem:[#allocation1 + $0x10] sm:$0xff pattern:$0x75316420] }
 0x5d9   : > { %2934 = vmatpush.msrb.mxu2 %v4963_v39  ;;  %3234 = vmatmul.msk.f32.vlgmr.msrb.gmra.mxu3 %vm569_vm10, %v2893_v49 }
 0x5db   : > { %2935 = vmatpush.msrb.mxu2 %v4974_v6 }
 0x5dc   : > { %v2891_v8 = vld.sshfl [vmem:[#allocation1] sm:$0xff pattern:$0x75316420]  ;;  %v2892_v34 = vld.sshfl [vmem:[#allocation1 + $0x8] sm:$0xff pattern:$0x75316420] }
 0x5dd   : > { %2936 = vmatpush.msrb.mxu2 %v4983_v41  ;;  %2917 = vmatmul.f32.vlgmr.msrb.gmra.mxu1 %v2891_v8 }
 0x5de   : > { %2937 = vmatmul.f32.vlgmr.msrb.gmra.mxu2 %v2892_v34 }
 0x5f7   : > { %v668_v7 = vpop.xlane.xlu0 %667  ;;  %v673_v53 = vpop.xlane.xlu1 %672 }
 0x5ff   : > { %v1000_v32 = vpop.xlane.xlu2 %999  ;;  %v1337_v26 = vpop.xlane.xlu1 %1336 }
 0x600   : > { %v1332_v60 = vpop.xlane.xlu0 %1331 }
 0x607   : > { %v1005_v63 = vpop.xlane.xlu2 %1004  ;;  %v1996_v29 = vpop.xlane.xlu1 %1995 }
 0x608   : > { %v1669_v62 = vpop.xlane.xlu0 %1668  ;;  %v1006_v61 = vadd.f32 %v1005_v63, %v673_v53 }
 0x60a   : > { %v1338_v54 = vadd.f32 %v1337_v26, %v1006_v61 }
 0x60c   : > { %v1670_v59 = vadd.f32 %v1669_v62, %v1338_v54 }
 0x60f   : > { %v1664_v27 = vpop.xlane.xlu2 %1663  ;;  %v2333_v55 = vpop.xlane.xlu1 %2332 }
 0x610   : > { %v2328_v13 = vpop.xlane.xlu0 %2327 }
 0x617   : > { %v2001_v42 = vpop.xlane.xlu2 %2000 }
 0x618   : > { %v2002_v5 = vadd.f32 %v2001_v42, %v1670_v59 }
 0x61a   : > { %v2334_v47 = vadd.f32 %v2333_v55, %v2002_v5 }
 0x641   : > { %v2653_v58 = vpop.f32.mrf.mxu2 }
 0x642   : > { %3223 = vst.msk [vmem:[%s3933_s13 + $0x38] sm:$0xff] %vm327_vm12, %v2653_v58  ;;  %v2662_v37 = vmul.f32 %v2653_v58, %v2653_v58  ;;  %v2658_v28 = vsel %vm327_vm12, %v2653_v58, 0.0 }
 0x643   : > { %2659 = vadd.xlane.f32.xlu2 %v2658_v28 }
 0x644   : > { %v2663_v39 = vsel %vm327_vm12, %v2662_v37, 0.0 }
 0x645   : > { %2664 = vadd.xlane.f32.xlu0 %v2663_v39 }
 0x65a   : > { %v2918_v17 = vpop.f32.mrf.mxu1 }
 0x65c   : > { %v2958_v48 = vpop.f32.mrf.mxu3 }
 0x661   : > { %v2938_v2 = vpop.f32.mrf.mxu2 }
 0x662   : > { %v2939_v6 = vadd.f32 %v2938_v2, %v2918_v17 }
 0x664   : > { %v2959_v41 = vadd.f32 %v2958_v48, %v2939_v6 }
 0x666   : > { %3235 = vmatpush.msk.msrb.mxu0 %vm366_vm0, %v2959_v41 }
 0x667   : > { %3236 = vmatmul.msk.f32.vlgmr.msrb.gmra.mxu0 %vm637_vm11, %v5067_v1  ;;  %v1001_v1 = vadd.f32 %v1000_v32, %v668_v7 }
 0x669   : > { %v1333_v23 = vadd.f32 %v1332_v60, %v1001_v1 }
 0x66b   : > { %v1665_v52 = vadd.f32 %v1664_v27, %v1333_v23 }
 0x66d   : > { %v1997_v15 = vadd.f32 %v1996_v29, %v1665_v52 }
 0x66f   : > { %v2329_v10 = vadd.f32 %v2328_v13, %v1997_v15 }
 0x6b6   : > { %v2660_v16 = vpop.xlane.xlu2 %2659 }
 0x6b7   : > { %v2661_v3 = vadd.f32 %v2660_v16, %v2329_v10 }
 0x6b8   : > { %v2665_v24 = vpop.xlane.xlu0 %2664 }
 0x6b9   : > { %v2666_v45 = vadd.f32 %v2665_v24, %v2334_v47 }
 0x6e4   : > { %v2985_v25 = vpop.f32.mrf.mxu0 }
 0x6e5   : > { %3237 = vst.msk [vmem:[%s3933_s13 + $0x40] sm:$0xff] %vm327_vm12, %v2985_v25  ;;  %v2994_v57 = vmul.f32 %v2985_v25, %v2985_v25  ;;  %v2990_v12 = vsel %vm327_vm12, %v2985_v25, 0.0 }
 0x6e6   : > { %2991 = vadd.xlane.f32.xlu1 %v2990_v12 }
 0x6e7   : > { %v2995_v36 = vsel %vm327_vm12, %v2994_v57, 0.0 }
 0x6e8   : > { %2996 = vadd.xlane.f32.xlu2 %v2995_v36 }
 0x759   : > { %v2992_v18 = vpop.xlane.xlu1 %2991 }
 0x75a   : > { %v2993_v0 = vadd.f32 %v2992_v18, %v2661_v3 }
 0x75b   : > { %v2997_v43 = vpop.xlane.xlu2 %2996 }
 0x75c   : > { %3000 = vst.msk [vmem:[%s322_s10] sm:$0xff] %vm2999_vm13, %v2993_v0  ;;  %v2998_v56 = vadd.f32 %v2997_v43, %v2666_v45 }
 0x75e   : > { %3001 = vst.msk [vmem:[%s326_s11] sm:$0xff] %vm2999_vm13, %v2998_v56 }
 0x75f PF: > { %s19_s27 = sadd.s32 1, %s3269_s27  }
 0x760   : > { %p16_p4 = scmp.ge.s32.totalorder %s19_s27, 4  }
 0x762   :  { %18 = sbr.rel (!%p16_p4) target bundleno = 1 (0x1), region = 147 }

// kernel: localization3d_forward.7
= control target key start
LH: loop header
LB: loop body
LE: loop exit
PB: predicated region body
PF: predicated region fallthrough
CT: control target
= control target key end

     0   :  { %vm33_vm0 = vcmask 523264   ;;  %v122_v9 = vmov 2.0   ;;  %vm57_vm1 = vcmask 41984   ;;  %s195_s1 = inlined_call_operand.vmem [shape: f32[64,6], index: 1, kind: input, shape index: {}]   ;;  %s196_s2 = inlined_call_operand.vmem [shape: f32[1,6], index: 2, kind: input, shape index: {}]   ;;  %s197_s3 = inlined_call_operand.vmem [shape: f32[1,6], index: 3, kind: input, shape index: {}]   ;;  %s198_s4 = inlined_call_operand.vmem [shape: f32[1,6], index: 4, kind: input, shape index: {}]   ;;  %s199_s0 = inlined_call_operand.vmem [shape: f32[2,64], index: 0, kind: input, shape index: {}]   ;;  %s200_s5 = inlined_call_operand.vmem [shape: f32[2,6], index: 5, kind: output, shape index: {}]  }
   0x1   :  { %v28_v0 = vld [vmem:[%s195_s1 + $0x38] sm:$0xff]  ;;  %v27_v1 = vld [vmem:[%s195_s1 + $0x30] sm:$0xff]  ;;  %v26_v2 = vld [vmem:[%s195_s1 + $0x28] sm:$0xff]  ;;  %118 = vrcp.f32 %v122_v9 }
   0x2   :  { %45 = vmatpush.msra.mxu0 %v28_v0  ;;  %v25_v3 = vld [vmem:[%s195_s1 + $0x20] sm:$0xff]  ;;  %v24_v4 = vld [vmem:[%s195_s1 + $0x18] sm:$0xff]  ;;  %v23_v5 = vld [vmem:[%s195_s1 + $0x10] sm:$0xff] }
   0x3   :  { %v22_v6 = vld [vmem:[%s195_s1 + $0x8] sm:$0xff]  ;;  %v21_v7 = vld [vmem:[%s195_s1] sm:$0xff] }
   0x4   :  { %46 = vmatpush.msra.mxu0 %v27_v1  ;;  %v20_v8 = vld [vmem:[%s199_s0] sm:$0x3] }
   0x5   :  { %v115_v11 = vld [vmem:[%s196_s2] ss:$0 sm:$0xff] }
   0x6   :  { %47 = vmatpush.msra.mxu0 %v26_v2  ;;  %v116_v47 = vld [vmem:[%s197_s3] ss:$0 sm:$0xff] }
   0x7   :  { %v119_v10 = vpop.eup %118  ;;  %v117_v50 = vld [vmem:[%s198_s4] ss:$0 sm:$0xff] }
   0x8   :  { %48 = vmatpush.msra.mxu0 %v25_v3  ;;  %v66_v12 = vmul.f32 2.0, %v119_v10  ;;  %vm70_vm2 = vweird.f32 %v119_v10 }
   0xa   :  { %49 = vmatpush.msra.mxu0 %v24_v4  ;;  %v67_v15 = vsub.f32 1.0, %v66_v12 }
   0xc   :  { %50 = vmatpush.msra.mxu0 %v23_v5  ;;  %v68_v19 = vmul.f32 %v119_v10, %v67_v15 }
   0xe   :  { %51 = vmatpush.msra.mxu0 %v22_v6  ;;  %v69_v25 = vadd.f32 %v119_v10, %v68_v19 }
  0x10   :  { %52 = vmatpush.msra.mxu0 %v21_v7  ;;  %v71_v30 = vsel %vm70_vm2, %v119_v10, %v69_v25 }
  0x11   :  { %113 = vmatmul.msk.f32.vlgmr.msra.gmra.mxu0 %vm33_vm0, %v20_v8 }
  0x8e   :  { %v54_v13 = vpop.f32.mrf.mxu0 }
  0x8f   :  { %v55_v14 = vadd.f32 %v115_v11, %v54_v13 }
  0x91   :  { %v58_v16 = vsel %vm57_vm1, %v55_v14, 0.0  ;;  %v73_v17 = vmul.f32 %v55_v14, %v55_v14 }
  0x92   :  { %v59_v18 = vrot.slane %v58_v16, 4 }
  0x93   :  { %v74_v20 = vsel %vm57_vm1, %v73_v17, 0.0 }
  0x94   :  { %v60_v21 = vadd.f32 %v59_v18, %v58_v16  ;;  %v75_v22 = vrot.slane %v74_v20, 4 }
  0x96   :  { %v61_v23 = vrot.slane %v60_v21, 2  ;;  %v76_v24 = vadd.f32 %v75_v22, %v74_v20 }
  0x98   :  { %v62_v26 = vadd.f32 %v61_v23, %v60_v21  ;;  %v77_v27 = vrot.slane %v76_v24, 2 }
  0x9a   :  { %v63_v28 = vrot.slane %v62_v26, 1  ;;  %v78_v29 = vadd.f32 %v77_v27, %v76_v24 }
  0x9c   :  { %v64_v31 = vadd.f32 %v63_v28, %v62_v26  ;;  %v79_v32 = vrot.slane %v78_v29, 1 }
  0x9e   :  { %v72_v33 = vmul.f32 %v71_v30, %v64_v31  ;;  %v80_v34 = vadd.f32 %v79_v32, %v78_v29 }
  0xa0   :  { %v81_v35 = vmul.f32 %v80_v34, %v71_v30  ;;  %v82_v36 = vmul.f32 %v72_v33, %v72_v33  ;;  %v85_v46 = vsub.f32 %v55_v14, %v72_v33 }
  0xa2   :  { %v83_v37 = vsub.f32 %v81_v35, %v82_v36 }
  0xa4   :  { %v84_v38 = vmax.f32 %v83_v37, 0.0 }
  0xa6   :  { %v86_v39 = vadd.f32 1e-05, %v84_v38 }
  0xa8   :  { %120 = vrsqrt.f32 %v86_v39  ;;  %vm93_vm4 = vweird.f32 %v86_v39 }
  0xae   :  { %v121_v40 = vpop.eup %120 }
  0xaf   :  { %v88_v41 = vmul.f32 %v121_v40, %v86_v39  ;;  %vm94_vm3 = vweird.f32 %v121_v40 }
  0xb0   :  { %vm95_vm5 = vmor %vm93_vm4, %vm94_vm3 }
  0xb1   :  { %v89_v42 = vmul.f32 %v121_v40, %v88_v41 }
  0xb3   :  { %v90_v43 = vmul.f32 0.5, %v89_v42 }
  0xb5   :  { %v91_v44 = vsub.f32 1.5, %v90_v43 }
  0xb7   :  { %v92_v45 = vmul.f32 %v121_v40, %v91_v44 }
  0xb9   :  { %v96_v48 = vsel %vm95_vm5, %v121_v40, %v92_v45 }
  0xba   :  { %v97_v49 = vmul.f32 %v96_v48, %v85_v46 }
  0xbc   :  { %v102_v51 = vmul.f32 %v116_v47, %v97_v49 }
  0xbe   :  { %v107_v52 = vadd.f32 %v117_v50, %v102_v51 }
  0xc0   :  { %108 = vst.msk [vmem:[%s200_s5] sm:$0x3] %vm57_vm1, %v107_v52 }

// kernel: localization3d_forward.5
= control target key start
LH: loop header
LB: loop body
LE: loop exit
PB: predicated region body
PF: predicated region fallthrough
CT: control target
= control target key end

     0   :  { %s2719_s27 = smov 0   ;;  %s3523_s0 = inlined_call_operand.vmem [shape: f32[2,10,8,100], index: 0, kind: input, shape index: {}]   ;;  %s3524_s1 = inlined_call_operand.vmem [shape: f32[10,1,100], index: 1, kind: input, shape index: {}]   ;;  %s3525_s2 = inlined_call_operand.vmem [shape: f32[8,1], index: 2, kind: input, shape index: {}]   ;;  %s3526_s3 = inlined_call_operand.vmem [shape: f32[8,1], index: 3, kind: input, shape index: {}]   ;;  %s3527_s4 = inlined_call_operand.vmem [shape: f32[8,216], index: 4, kind: input, shape index: {}]   ;;  %s3528_s5 = inlined_call_operand.vmem [shape: f32[78,100], index: 5, kind: input, shape index: {}]   ;;  %s3529_s6 = inlined_call_operand.vmem [shape: f32[2,10,8,100], index: 6, kind: output, shape index: {0}]   ;;  %s3530_s7 = inlined_call_operand.vmem [shape: f32[2,8,1], index: 7, kind: output, shape index: {1}]   ;;  %s3531_s8 = inlined_call_operand.vmem [shape: f32[2,8,1], index: 8, kind: output, shape index: {2}]  }
   0x1 LB: > { %s2120_s28 = sadd.s32 4294967295, %s2662_s27   ;;  %p2124_p0 = scmp.ge.s32.totalorder %s2662_s27, 1  ;;  %s2662_s27 = sphi %s2719_s27, %s19_s27  }
   0x2   : > { %p267_p1 = scmp.lt.s32.totalorder %s2662_s27, 3 }
   0x4   : > { %p268_p2 = pnand %p2124_p0, %p267_p1 }
   0x5   : > { %p309_p3 = scmp.lt.s32.totalorder (!%p268_p2), %s2120_s28, 1  ;;  %s2665_s19 = smov (!%p268_p2), 118  }
   0x6   : > { %271 = sbr.rel (%p268_p2) target bundleno = 1424 (0x590), region = 44  ;;  %s2666_s20 = smov (!%p268_p2), 126  }
   0x7   : > { %s2667_s21 = smov (!%p268_p2), 127   ;;  %s2668_s24 = smov (!%p268_p2), 117  }
   0x8   : > { %s2669_s25 = smov (!%p268_p2), 108   ;;  %s2670_s26 = smov (!%p268_p2), 107  }
   0x9   : > { %s2671_s29 = smov (!%p268_p2), 116   ;;  %s2672_s30 = smov (!%p268_p2), 106  }
   0xb   : > { %v2730_v0 = vld [vmem:[%s3525_s2] sm:$0xff]  ;;  %v2664_v1 = vmov 0   ;;  %s3533_s28 = smov (!%p309_p3, %s2120_s28), 1  ;;  %vm509_vm0 = vcmask 1045504   ;;  %vm451_vm1 = vcmask 719872   ;;  %vm505_vm2 = vcmask 637952  }
   0xc   : > { %2229 = vset.pattern.permute.xlu0 %v2664_v1  ;;  %2270 = vset.pattern.permute.xlu2 %v2664_v1  ;;  %v2736_v2 = vld [vmem:[%s3526_s3] sm:$0xff]  ;;  %s2210_s11 = smul.u32 80, %s3533_s28  ;;  %vm327_vm3 = vcmask 818176   ;;  %vm2000_vm4 = vcmask 7168  }
   0xd   : > { %335 = vperm.xlu0 %2229, %v2730_v0   ;;  %2341 = vset.pattern.permute.xlu1 %v2664_v1  ;;  %v2632_v9 = vld [vmem:[%s3524_s1] ss:$0 sm:$0xff]  ;;  %v2633_v10 = vld [vmem:[%s3524_s1 + $0x1] ss:$0 sm:$0xff]  ;;  %v2634_v21 = vld [vmem:[%s3524_s1 + $0x2] ss:$0 sm:$0xff] }
   0xe   : > { %s2747_s14 = scalar_lea.vmem %s3523_s0, %s2210_s11  ;;  %v2635_v39 = vld [vmem:[%s3524_s1 + $0x1] ss:$0 sm:$0xff]  ;;  %v2636_v40 = vld [vmem:[%s3524_s1 + $0x2] ss:$0 sm:$0xff]  ;;  %v2637_v41 = vld [vmem:[%s3524_s1 + $0x3] ss:$0 sm:$0xff]  ;;  %s3141_s12 = scalar_lea.vmem %s3529_s6, %s2210_s11 }
   0xf   : > { %v331_v4 = vld [vmem:[%s2747_s14] sm:$0xff]  ;;  %v2130_v5 = vld [vmem:[%s2747_s14 + $0x8] sm:$0xff]  ;;  %v2758_v13 = vld [vmem:[%s2747_s14 + $0x10] sm:$0xff] }
  0x10   : > { %v2805_v34 = vld [vmem:[%s2747_s14 + $0x18] sm:$0xff] }
  0x15   : > { %342 = vperm.xlu0 %2229, %v2736_v2  }
  0x7f   : > { %v336_v3 = vpop.permute.xlu0 %335 }
  0x80   : > { %v338_v6 = vmul.f32 %v336_v3, %v331_v4  ;;  %v354_v7 = vmul.f32 %v2130_v5, %v336_v3  ;;  %v365_v16 = vmul.f32 %v2758_v13, %v336_v3 }
  0x87   : > { %v343_v8 = vpop.permute.xlu0 %342 }
  0x88   : > { %v345_v11 = vadd.f32 %v343_v8, %v338_v6  ;;  %v355_v12 = vadd.f32 %v354_v7, %v343_v8  ;;  %v366_v19 = vadd.f32 %v365_v16, %v343_v8  ;;  %v504_v16 = vld [vmem:[%s3528_s5 + $0x48] sm:$0x3f] }
  0x89   : > { %2135 = vmatpush.msk.msra.mxu2 %vm509_vm0, %v504_v16 }
  0x8a   : > { %v346_v14 = vmax.f32 %v345_v11, 0.0  ;;  %v356_v15 = vmax.f32 %v355_v12, 0.0  ;;  %v367_v22 = vmax.f32 %v366_v19, 0.0  ;;  %v2877_v19 = vld [vmem:[%s3528_s5 + $0x38] sm:$0xff] }
  0x8c   : > { %v2761_v17 = vmul.f32 %v2632_v9, %v346_v14  ;;  %v2763_v18 = vmul.f32 %v2633_v10, %v356_v15  ;;  %v2773_v23 = vmul.f32 %v2634_v21, %v367_v22  ;;  %v500_v21 = vld [vmem:[%s3528_s5 + $0x28] sm:$0xff]  ;;  %v499_v22 = vld [vmem:[%s3528_s5 + $0x20] sm:$0xff] }
  0x8e   : > { %v2240_v20 = vpack.i.bf16 %v2763_v18, %v2761_v17 }
  0x90   : > { %2241 = vrot.lane.b32.xlu0 %v2240_v20, %s2665_s19  ;;  %2236 = vrot.lane.b32.xlu2 %v2240_v20, %s2666_s20 }
  0x91   : > { %2231 = vrot.lane.b32.xlu1 %v2240_v20, %s2667_s21 }
  0x98   : > { %408 = vrot.lane.b32.xlu0 %v2773_v23, %s2668_s24  ;;  %390 = vrot.lane.b32.xlu2 %v2773_v23, %s2666_s20 }
  0x99   : > { %381 = vrot.lane.b32.xlu1 %v2773_v23, %s2667_s21 }
  0xa0   : > { %2256 = vrot.lane.b32.xlu0 %v2240_v20, %s2669_s25  ;;  %2246 = vrot.lane.b32.xlu2 %v2240_v20, %s2668_s24 }
  0xa1   : > { %399 = vrot.lane.b32.xlu1 %v2773_v23, %s2665_s19 }
  0xa8   : > { %435 = vrot.lane.b32.xlu0 %v2773_v23, %s2670_s26  ;;  %417 = vrot.lane.b32.xlu2 %v2773_v23, %s2671_s29 }
  0xa9   : > { %2251 = vrot.lane.b32.xlu1 %v2240_v20, %s2671_s29 }
  0xb0   : > { %2261 = vrot.lane.b32.xlu2 %v2240_v20, %s2670_s26 }
  0xb1   : > { %426 = vrot.lane.b32.xlu1 %v2773_v23, %s2669_s25 }
  0xb8   : > { %548 = vperm.xlu2 %2270, %v2730_v0  }
  0xb9   : > { %2266 = vrot.lane.b32.xlu1 %v2240_v20, %s2672_s30  ;;  %v2883_v20 = vld [vmem:[%s3528_s5 + $0x30] sm:$0xff] }
  0xc0   : > { %555 = vperm.xlu2 %2270, %v2736_v2  }
  0xc8   : > { %444 = vrot.lane.b32.xlu2 %v2773_v23, %s2672_s30 }
  0xea   : > { %v2237_v24 = vpop.permute.xlu2 %2236 }
  0xeb   : > { %v2239_v63 = vunpack.i.h.bf16 %v2237_v24  ;;  %v2238_v3 = vunpack.i.l.bf16 %v2237_v24 }
  0xf2   : > { %v391_v25 = vpop.permute.xlu2 %390 }
  0xfa   : > { %v2247_v26 = vpop.permute.xlu2 %2246 }
  0xfb   : > { %v2249_v54 = vunpack.i.h.bf16 %v2247_v26  ;;  %v2248_v57 = vunpack.i.l.bf16 %v2247_v26  ;;  %v2901_v26 = vld [vmem:[%s3528_s5 + $0x10] sm:$0xff] }
 0x102   : > { %v2798_v27 = vpop.permute.xlu2 %417  ;;  %v2242_v32 = vpop.permute.xlu0 %2241 }
 0x103   : > { %v2800_v28 = vpop.permute.xlu1 %2231  ;;  %v2244_v59 = vunpack.i.h.bf16 %v2242_v32  ;;  %v2243_v61 = vunpack.i.l.bf16 %v2242_v32 }
 0x104   : > { %v2234_v6 = vunpack.i.h.bf16 %v2800_v28  ;;  %v2233_v8 = vunpack.i.l.bf16 %v2800_v28  ;;  %v495_v28 = vld [vmem:[%s3528_s5] sm:$0xff] }
 0x10a   : > { %v2802_v29 = vpop.permute.xlu2 %2261  ;;  %v409_v47 = vpop.permute.xlu0 %408 }
 0x10b   : > { %v382_v30 = vpop.permute.xlu1 %381  ;;  %v2264_v7 = vunpack.i.h.bf16 %v2802_v29  ;;  %v2263_v9 = vunpack.i.l.bf16 %v2802_v29 }
 0x112   : > { %v549_v31 = vpop.permute.xlu2 %548  ;;  %v2257_v60 = vpop.permute.xlu0 %2256 }
 0x113   : > { %v400_v33 = vpop.permute.xlu1 %399  ;;  %v551_v35 = vmul.f32 %v2130_v5, %v549_v31  ;;  %v566_v36 = vmul.f32 %v2758_v13, %v549_v31  ;;  %v576_v37 = vmul.f32 %v2805_v34, %v549_v31  ;;  %v2259_v10 = vunpack.i.h.bf16 %v2257_v60 }
 0x114   : > { %v2258_v11 = vunpack.i.l.bf16 %v2257_v60 }
 0x11a   : > { %v556_v38 = vpop.permute.xlu2 %555  ;;  %v436_v5 = vpop.permute.xlu0 %435 }
 0x11b   : > { %v558_v42 = vadd.f32 %v556_v38, %v551_v35  ;;  %v567_v43 = vadd.f32 %v566_v36, %v556_v38  ;;  %v577_v44 = vadd.f32 %v576_v37, %v556_v38  ;;  %v2818_v45 = vpop.permute.xlu1 %2251 }
 0x11c   : > { %v2253_v46 = vunpack.i.l.bf16 %v2818_v45  ;;  %v2254_v12 = vunpack.i.h.bf16 %v2818_v45 }
 0x11d   : > { %v559_v48 = vmax.f32 %v558_v42, 0.0  ;;  %v568_v49 = vmax.f32 %v567_v43, 0.0  ;;  %v578_v50 = vmax.f32 %v577_v44, 0.0 }
 0x11e   : > { %455 = vmatpush.msra.mxu0 %v2253_v46 }
 0x11f   : > { %v2821_v51 = vmul.f32 %v2635_v39, %v559_v48  ;;  %v2823_v52 = vmul.f32 %v2636_v40, %v568_v49  ;;  %v2825_v53 = vmul.f32 %v2637_v41, %v578_v50 }
 0x120   : > { %456 = vmatpush.msra.mxu0 %v409_v47 }
 0x121   : > { %610 = vrot.lane.b32.xlu1 %v2825_v53, %s2665_s19  ;;  %v2281_v55 = vpack.i.bf16 %v2823_v52, %v2821_v51 }
 0x122   : > { %457 = vmatpush.msra.mxu0 %v2249_v54  ;;  %v445_v56 = vpop.permute.xlu2 %444 }
 0x123   : > { %v427_v58 = vpop.permute.xlu1 %426  ;;  %2282 = vrot.lane.b32.xlu0 %v2281_v55, %s2665_s19  ;;  %2272 = vrot.lane.b32.xlu2 %v2281_v55, %s2667_s21 }
 0x124   : > { %458 = vmatpush.msra.mxu0 %v2248_v57  ;;  %480 = vmatpush.msra.mxu1 %v445_v56 }
 0x126   : > { %459 = vmatpush.msra.mxu0 %v400_v33 }
 0x128   : > { %460 = vmatpush.msra.mxu0 %v2244_v59 }
 0x129   : > { %2297 = vrot.lane.b32.xlu1 %v2281_v55, %s2669_s25 }
 0x12a   : > { %461 = vmatpush.msra.mxu0 %v2243_v61 }
 0x12b   : > { %v2267_v62 = vpop.permute.xlu1 %2266  ;;  %2292 = vrot.lane.b32.xlu0 %v2281_v55, %s2671_s29  ;;  %592 = vrot.lane.b32.xlu2 %v2825_v53, %s2667_s21 }
 0x12c   : > { %462 = vmatpush.msra.mxu0 %v391_v25  ;;  %v2269_v1 = vunpack.i.h.bf16 %v2267_v62  ;;  %v2268_v4 = vunpack.i.l.bf16 %v2267_v62  ;;  %v2895_v25 = vld [vmem:[%s3528_s5 + $0x18] sm:$0xff]  ;;  %v2638_v62 = vld [vmem:[%s3524_s1 + $0x2] ss:$0 sm:$0xff] }
 0x12e   : > { %463 = vmatpush.msra.mxu0 %v2239_v63  ;;  %481 = vmatpush.msra.mxu1 %v2269_v1  ;;  %v2639_v63 = vld [vmem:[%s3524_s1 + $0x3] ss:$0 sm:$0xff]  ;;  %v2640_v1 = vld [vmem:[%s3524_s1 + $0x4] ss:$0 sm:$0xff] }
 0x130   : > { %464 = vmatpush.msra.mxu0 %v2238_v3  ;;  %482 = vmatpush.msra.mxu1 %v2268_v4 }
 0x131   : > { %646 = vrot.lane.b32.xlu1 %v2825_v53, %s2670_s26 }
 0x132   : > { %465 = vmatpush.msra.mxu0 %v382_v30  ;;  %483 = vmatpush.msra.mxu1 %v436_v5 }
 0x133   : > { %637 = vrot.lane.b32.xlu0 %v2825_v53, %s2669_s25  ;;  %2277 = vrot.lane.b32.xlu2 %v2281_v55, %s2666_s20 }
 0x134   : > { %466 = vmatpush.msra.mxu0 %v2234_v6  ;;  %484 = vmatpush.msra.mxu1 %v2264_v7 }
 0x136   : > { %467 = vmatpush.msra.mxu0 %v2233_v8  ;;  %485 = vmatpush.msra.mxu1 %v2263_v9 }
 0x138   : > { %468 = vmatpush.msra.mxu0 %v2773_v23  ;;  %486 = vmatpush.msra.mxu1 %v427_v58  ;;  %v2917_v58 = vld [vmem:[%s2747_s14 + $0x20] sm:$0xff] }
 0x13a   : > { %469 = vmatpush.msra.mxu0 %v2763_v18  ;;  %487 = vmatpush.msra.mxu1 %v2259_v10 }
 0x13b   : > { %2307 = vrot.lane.b32.xlu0 %v2281_v55, %s2672_s30  ;;  %601 = vrot.lane.b32.xlu2 %v2825_v53, %s2666_s20 }
 0x13c   : > { %470 = vmatpush.msra.mxu0 %v2761_v17  ;;  %488 = vmatpush.msra.mxu1 %v2258_v11  ;;  %v2871_v17 = vld [vmem:[%s3528_s5 + $0x40] sm:$0xff] }
 0x13d   : > { %520 = vmatpush.msra.mxu2 %v2871_v17 }
 0x13e   : > { %489 = vmatpush.msra.mxu1 %v2798_v27  ;;  %v496_v27 = vld [vmem:[%s3528_s5 + $0x8] sm:$0xff] }
 0x13f   : > { %521 = vmatpush.msra.mxu2 %v2877_v19 }
 0x140   : > { %490 = vmatpush.msra.mxu1 %v2254_v12 }
 0x141   : > { %522 = vmatpush.msra.mxu2 %v2883_v20 }
 0x143   : > { %2287 = vrot.lane.b32.xlu2 %v2281_v55, %s2668_s24  ;;  %523 = vmatpush.msra.mxu2 %v500_v21 }
 0x145   : > { %524 = vmatpush.msra.mxu2 %v499_v22 }
 0x147   : > { %525 = vmatpush.msra.mxu2 %v2895_v25 }
 0x149   : > { %526 = vmatpush.msra.mxu2 %v2901_v26 }
 0x14b   : > { %619 = vrot.lane.b32.xlu2 %v2825_v53, %s2668_s24  ;;  %527 = vmatpush.msra.mxu2 %v496_v27 }
 0x14d   : > { %528 = vmatpush.msra.mxu2 %v495_v28 }
 0x153   : > { %628 = vrot.lane.b32.xlu2 %v2825_v53, %s2671_s29 }
 0x15b   : > { %2302 = vrot.lane.b32.xlu2 %v2281_v55, %s2670_s26 }
 0x163   : > { %655 = vrot.lane.b32.xlu2 %v2825_v53, %s2672_s30 }
 0x16b   : > { %756 = vperm.xlu2 %2270, %v2730_v0  }
 0x173   : > { %763 = vperm.xlu2 %2270, %v2736_v2  }
 0x17d   : > { %v2273_v14 = vpop.permute.xlu2 %2272 }
 0x17e   : > { %v2275_v44 = vunpack.i.h.bf16 %v2273_v14  ;;  %v2274_v46 = vunpack.i.l.bf16 %v2273_v14  ;;  %v2973_v14 = vld [vmem:[%s3527_s4] sm:$0xff] }
 0x17f   : > { %471 = vmatmul.f32.vlgmr.msra.gmra.mxu0 %v2973_v14 }
 0x185   : > { %v593_v15 = vpop.permute.xlu2 %592 }
 0x18d   : > { %v2278_v18 = vpop.permute.xlu2 %2277 }
 0x18e   : > { %v2280_v41 = vunpack.i.h.bf16 %v2278_v18  ;;  %v2279_v42 = vunpack.i.l.bf16 %v2278_v18 }
 0x193   : > { %v611_v36 = vpop.permute.xlu1 %610 }
 0x195   : > { %v2283_v23 = vpop.permute.xlu0 %2282  ;;  %v602_v24 = vpop.permute.xlu2 %601 }
 0x196   : > { %v2285_v37 = vunpack.i.h.bf16 %v2283_v23  ;;  %v2284_v39 = vunpack.i.l.bf16 %v2283_v23 }
 0x19b   : > { %v2298_v45 = vpop.permute.xlu1 %2297 }
 0x19d   : > { %v2910_v29 = vpop.permute.xlu0 %2292  ;;  %v2288_v30 = vpop.permute.xlu2 %2287 }
 0x19e   : > { %v2294_v31 = vunpack.i.l.bf16 %v2910_v29  ;;  %v2290_v33 = vunpack.i.h.bf16 %v2288_v30  ;;  %v2289_v35 = vunpack.i.l.bf16 %v2288_v30  ;;  %v2295_v8 = vunpack.i.h.bf16 %v2910_v29 }
 0x1a0   : > { %665 = vmatpush.msra.mxu3 %v2294_v31  ;;  %v2992_v31 = vld [vmem:[%s2747_s14 + $0x28] sm:$0xff] }
 0x1a3   : > { %v647_v54 = vpop.permute.xlu1 %646 }
 0x1a5   : > { %v620_v32 = vpop.permute.xlu2 %619  ;;  %v638_v40 = vpop.permute.xlu0 %637 }
 0x1a6   : > { %666 = vmatpush.msra.mxu3 %v620_v32 }
 0x1a8   : > { %667 = vmatpush.msra.mxu3 %v2290_v33 }
 0x1aa   : > { %668 = vmatpush.msra.mxu3 %v2289_v35 }
 0x1ac   : > { %669 = vmatpush.msra.mxu3 %v611_v36 }
 0x1ad   : > { %v629_v38 = vpop.permute.xlu2 %628  ;;  %v2308_v47 = vpop.permute.xlu0 %2307 }
 0x1ae   : > { %670 = vmatpush.msra.mxu3 %v2285_v37  ;;  %v2310_v49 = vunpack.i.h.bf16 %v2308_v47  ;;  %v2309_v50 = vunpack.i.l.bf16 %v2308_v47 }
 0x1b0   : > { %671 = vmatpush.msra.mxu3 %v2284_v39 }
 0x1b2   : > { %672 = vmatpush.msra.mxu3 %v602_v24 }
 0x1b4   : > { %673 = vmatpush.msra.mxu3 %v2280_v41 }
 0x1b5   : > { %v2303_v43 = vpop.permute.xlu2 %2302 }
 0x1b6   : > { %674 = vmatpush.msra.mxu3 %v2279_v42  ;;  %v2305_v55 = vunpack.i.h.bf16 %v2303_v43  ;;  %v2304_v57 = vunpack.i.l.bf16 %v2303_v43 }
 0x1b8   : > { %675 = vmatpush.msra.mxu3 %v593_v15  ;;  %v2978_v15 = vld [vmem:[%s3527_s4 + $0x8] sm:$0xff] }
 0x1b9   : > { %2134 = vmatmul.msk.f32.vlgmr.msra.gmra.mxu1 %vm451_vm1, %v2978_v15 }
 0x1ba   : > { %676 = vmatpush.msra.mxu3 %v2275_v44 }
 0x1bc   : > { %677 = vmatpush.msra.mxu3 %v2274_v46 }
 0x1bd   : > { %v656_v48 = vpop.permute.xlu2 %655 }
 0x1be   : > { %678 = vmatpush.msra.mxu3 %v2825_v53  ;;  %690 = vmatpush.msrb.mxu2 %v656_v48  ;;  %v2300_v53 = vunpack.i.h.bf16 %v2298_v45 }
 0x1c0   : > { %679 = vmatpush.msra.mxu3 %v2823_v52  ;;  %691 = vmatpush.msrb.mxu2 %v2310_v49 }
 0x1c2   : > { %680 = vmatpush.msra.mxu3 %v2821_v51  ;;  %692 = vmatpush.msrb.mxu2 %v2309_v50  ;;  %v2299_v51 = vunpack.i.l.bf16 %v2298_v45 }
 0x1c3   : > { %681 = vmatmul.f32.vlgmr.msra.gmra.mxu3 %v2973_v14 }
 0x1c4   : > { %693 = vmatpush.msrb.mxu2 %v647_v54  ;;  %v3010_v54 = vld [vmem:[%s2747_s14 + $0x30] sm:$0xff] }
 0x1c5   : > { %v757_v56 = vpop.permute.xlu2 %756 }
 0x1c6   : > { %694 = vmatpush.msrb.mxu2 %v2305_v55  ;;  %v759_v59 = vmul.f32 %v2758_v13, %v757_v56  ;;  %v774_v52 = vmul.f32 %v2805_v34, %v757_v56  ;;  %v784_v60 = vmul.f32 %v2917_v58, %v757_v56 }
 0x1c8   : > { %695 = vmatpush.msrb.mxu2 %v2304_v57 }
 0x1ca   : > { %696 = vmatpush.msrb.mxu2 %v638_v40 }
 0x1cc   : > { %697 = vmatpush.msrb.mxu2 %v2300_v53 }
 0x1cd   : > { %v764_v61 = vpop.permute.xlu2 %763 }
 0x1ce   : > { %v766_v13 = vadd.f32 %v764_v61, %v759_v59  ;;  %v775_v3 = vadd.f32 %v774_v52, %v764_v61  ;;  %v785_v4 = vadd.f32 %v784_v60, %v764_v61  ;;  %698 = vmatpush.msrb.mxu2 %v2299_v51  ;;  %v2641_v59 = vld [vmem:[%s3524_s1 + $0x3] ss:$0 sm:$0xff]  ;;  %v2642_v52 = vld [vmem:[%s3524_s1 + $0x4] ss:$0 sm:$0xff] }
 0x1d0   : > { %v767_v5 = vmax.f32 %v766_v13, 0.0  ;;  %v776_v6 = vmax.f32 %v775_v3, 0.0  ;;  %v786_v7 = vmax.f32 %v785_v4, 0.0  ;;  %699 = vmatpush.msrb.mxu2 %v629_v38  ;;  %v2643_v38 = vld [vmem:[%s3524_s1 + $0x5] ss:$0 sm:$0xff] }
 0x1d2   : > { %v2932_v9 = vmul.f32 %v2638_v62, %v767_v5  ;;  %v2934_v10 = vmul.f32 %v2639_v63, %v776_v6  ;;  %v2936_v11 = vmul.f32 %v2640_v1, %v786_v7  ;;  %700 = vmatpush.msrb.mxu2 %v2295_v8  ;;  %v2644_v62 = vld [vmem:[%s3524_s1 + $0x4] ss:$0 sm:$0xff] }
 0x1d4   : > { %809 = vrot.lane.b32.xlu1 %v2936_v11, %s2666_s20  ;;  %v2942_v12 = vpack.i.bf16 %v2934_v10, %v2932_v9 }
 0x1d6   : > { %2322 = vrot.lane.b32.xlu0 %v2942_v12, %s2665_s19  ;;  %2312 = vrot.lane.b32.xlu2 %v2942_v12, %s2667_s21 }
 0x1dc   : > { %836 = vrot.lane.b32.xlu1 %v2936_v11, %s2671_s29 }
 0x1de   : > { %2332 = vrot.lane.b32.xlu0 %v2942_v12, %s2671_s29  ;;  %800 = vrot.lane.b32.xlu2 %v2936_v11, %s2667_s21 }
 0x1e4   : > { %971 = vperm.xlu1 %2341, %v2736_v2  }
 0x1e6   : > { %964 = vperm.xlu0 %2229, %v2730_v0   ;;  %2317 = vrot.lane.b32.xlu2 %v2942_v12, %s2666_s20 }
 0x1ee   : > { %1179 = vperm.xlu0 %2229, %v2736_v2   ;;  %818 = vrot.lane.b32.xlu2 %v2936_v11, %s2665_s19 }
 0x1f6   : > { %2327 = vrot.lane.b32.xlu2 %v2942_v12, %s2668_s24 }
 0x1fe   : > { %827 = vrot.lane.b32.xlu2 %v2936_v11, %s2668_s24 }
 0x206   : > { %2337 = vrot.lane.b32.xlu2 %v2942_v12, %s2669_s25 }
 0x20e   : > { %1172 = vperm.xlu2 %2270, %v2730_v0  }
 0x216   : > { %2348 = vrot.lane.b32.xlu2 %v2942_v12, %s2670_s26 }
 0x230   : > { %v2984_v16 = vpop.permute.xlu2 %2312 }
 0x231   : > { %v2315_v13 = vunpack.i.h.bf16 %v2984_v16  ;;  %v2314_v6 = vunpack.i.l.bf16 %v2984_v16 }
 0x238   : > { %v801_v18 = vpop.permute.xlu2 %800 }
 0x240   : > { %v2318_v21 = vpop.permute.xlu2 %2317 }
 0x241   : > { %v2320_v50 = vunpack.i.h.bf16 %v2318_v21  ;;  %v2319_v57 = vunpack.i.l.bf16 %v2318_v21 }
 0x246   : > { %v810_v22 = vpop.permute.xlu1 %809 }
 0x248   : > { %v2323_v23 = vpop.permute.xlu0 %2322  ;;  %v819_v24 = vpop.permute.xlu2 %818 }
 0x249   : > { %v2325_v43 = vunpack.i.h.bf16 %v2323_v23  ;;  %v2324_v47 = vunpack.i.l.bf16 %v2323_v23 }
 0x24e   : > { %v2986_v27 = vpop.permute.xlu1 %836 }
 0x250   : > { %v2988_v28 = vpop.permute.xlu0 %2332  ;;  %v2328_v29 = vpop.permute.xlu2 %2327 }
 0x251   : > { %v2334_v30 = vunpack.i.l.bf16 %v2988_v28  ;;  %v2330_v37 = vunpack.i.h.bf16 %v2328_v29  ;;  %v2329_v40 = vunpack.i.l.bf16 %v2328_v29 }
 0x253   : > { %873 = vmatpush.msrb.mxu0 %v2334_v30 }
 0x256   : > { %v972_v32 = vpop.permute.xlu1 %971 }
 0x258   : > { %v965_v33 = vpop.permute.xlu0 %964  ;;  %v828_v35 = vpop.permute.xlu2 %827 }
 0x259   : > { %v992_v36 = vmul.f32 %v2992_v31, %v965_v33  ;;  %874 = vmatpush.msrb.mxu0 %v828_v35  ;;  %v982_v46 = vmul.f32 %v2917_v58, %v965_v33  ;;  %v967_v48 = vmul.f32 %v2805_v34, %v965_v33  ;;  %v492_v33 = vpop.f32.mrf.mxu1 }
 0x25b   : > { %v993_v39 = vadd.f32 %v992_v36, %v972_v32  ;;  %875 = vmatpush.msrb.mxu0 %v2330_v37  ;;  %v983_v49 = vadd.f32 %v982_v46, %v972_v32  ;;  %v974_v55 = vadd.f32 %v972_v32, %v967_v48  ;;  %v472_v32 = vpop.f32.mrf.mxu0 }
 0x25c   : > { %v493_v35 = vadd.f32 %v492_v33, %v472_v32 }
 0x25d   : > { %v994_v41 = vmax.f32 %v993_v39, 0.0  ;;  %876 = vmatpush.msrb.mxu0 %v2329_v40  ;;  %v984_v60 = vmax.f32 %v983_v49, 0.0  ;;  %v975_v61 = vmax.f32 %v974_v55, 0.0 }
 0x25e   : > { %2136 = vmatmul.msk.f32.vlgmr.msra.gmra.mxu2 %vm505_vm2, %v493_v35 }
 0x25f   : > { %v2998_v42 = vmul.f32 %v2643_v38, %v994_v41  ;;  %877 = vmatpush.msrb.mxu0 %v819_v24  ;;  %v3029_v5 = vmul.f32 %v2642_v52, %v984_v60  ;;  %v3032_v7 = vmul.f32 %v2641_v59, %v975_v61 }
 0x260   : > { %v3000_v44 = vpop.permute.xlu2 %2337  ;;  %v1180_v51 = vpop.permute.xlu0 %1179 }
 0x261   : > { %878 = vmatpush.msrb.mxu0 %v2325_v43  ;;  %v2362_v45 = vpack.i.bf16 %v2998_v42, %v2936_v11  ;;  %v2372_v16 = vpack.i.bf16 %v3029_v5, %v2998_v42 }
 0x263   : > { %2363 = vrot.lane.b32.xlu2 %v2362_v45, %s2672_s30  ;;  %2353 = vrot.lane.b32.xlu0 %v2362_v45, %s2670_s26 }
 0x264   : > { %2343 = vrot.lane.b32.xlu1 %v2362_v45, %s2669_s25  ;;  %879 = vmatpush.msrb.mxu0 %v2324_v47 }
 0x266   : > { %880 = vmatpush.msrb.mxu0 %v810_v22  ;;  %2144 = vmatmul.msk.f32.vlgmr.msrb.gmra.mxu2 %vm451_vm1, %v2978_v15 }
 0x268   : > { %881 = vmatpush.msrb.mxu0 %v2320_v50  ;;  %v1173_v56 = vpop.permute.xlu2 %1172 }
 0x269   : > { %v1175_v53 = vmul.f32 %v2917_v58, %v1173_v56  ;;  %v1200_v34 = vmul.f32 %v3010_v54, %v1173_v56  ;;  %v2646_v58 = vld [vmem:[%s3524_s1 + $0x6] ss:$0 sm:$0xff]  ;;  %v1190_v22 = vmul.f32 %v2992_v31, %v1173_v56 }
 0x26a   : > { %882 = vmatpush.msrb.mxu0 %v2319_v57 }
 0x26b   : > { %v1182_v63 = vadd.f32 %v1180_v51, %v1175_v53  ;;  %v1201_v1 = vadd.f32 %v1200_v34, %v1180_v51  ;;  %v1191_v23 = vadd.f32 %v1190_v22, %v1180_v51 }
 0x26c   : > { %2358 = vrot.lane.b32.xlu1 %v2942_v12, %s2672_s30  ;;  %883 = vmatpush.msrb.mxu0 %v801_v18 }
 0x26d   : > { %v1183_v3 = vmax.f32 %v1182_v63, 0.0  ;;  %v1202_v4 = vmax.f32 %v1201_v1, 0.0  ;;  %v1192_v24 = vmax.f32 %v1191_v23, 0.0 }
 0x26e   : > { %884 = vmatpush.msrb.mxu0 %v2315_v13  ;;  %v2339_v13 = vunpack.i.l.bf16 %v3000_v44 }
 0x26f   : > { %v3034_v8 = vmul.f32 %v2644_v62, %v1183_v3  ;;  %v3036_v21 = vmul.f32 %v2646_v58, %v1202_v4  ;;  %v2340_v62 = vunpack.i.h.bf16 %v3000_v44 }
 0x270   : > { %885 = vmatpush.msrb.mxu0 %v2314_v6  ;;  %v2349_v37 = vpop.permute.xlu2 %2348 }
 0x271   : > { %v2377_v12 = vpack.i.bf16 %v3036_v21, %v3032_v7  ;;  %v2367_v18 = vpack.i.bf16 %v3034_v8, %v3032_v7  ;;  %v2351_v55 = vunpack.i.h.bf16 %v2349_v37  ;;  %v2350_v34 = vunpack.i.l.bf16 %v2349_v37 }
 0x272   : > { %886 = vmatpush.msrb.mxu0 %v2936_v11  ;;  %v2645_v11 = vld [vmem:[%s3524_s1 + $0x5] ss:$0 sm:$0xff] }
 0x273   : > { %2378 = vrot.lane.b32.xlu2 %v2377_v12, %s2668_s24  ;;  %2368 = vrot.lane.b32.xlu0 %v2367_v18, %s2671_s29  ;;  %v3058_v29 = vmul.f32 %v2645_v11, %v1192_v24 }
 0x274   : > { %2373 = vrot.lane.b32.xlu1 %v2372_v16, %s2668_s24  ;;  %887 = vmatpush.msrb.mxu0 %v2934_v10 }
 0x275   : > { %v2407_v10 = vpack.i.bf16 %v3034_v8, %v3058_v29  ;;  %v2417_v30 = vpack.i.bf16 %v3058_v29, %v3032_v7  ;;  %v2467_v36 = vpack.i.bf16 %v3058_v29, %v3036_v21 }
 0x276   : > { %888 = vmatpush.msrb.mxu0 %v2932_v9  ;;  %v2402_v9 = vpack.i.bf16 %v3036_v21, %v3029_v5 }
 0x277   : > { %889 = vmatmul.f32.vlgmr.msrb.gmra.mxu0 %v2973_v14 }
 0x27b   : > { %2393 = vrot.lane.b32.xlu2 %v2372_v16, %s2666_s20  ;;  %2383 = vrot.lane.b32.xlu0 %v2372_v16, %s2665_s19 }
 0x27c   : > { %2388 = vrot.lane.b32.xlu1 %v2377_v12, %s2665_s19 }
 0x283   : > { %2408 = vrot.lane.b32.xlu2 %v2407_v10, %s2668_s24  ;;  %2398 = vrot.lane.b32.xlu0 %v2377_v12, %s2666_s20 }
 0x284   : > { %2403 = vrot.lane.b32.xlu1 %v2402_v9, %s2672_s30 }
 0x28b   : > { %1275 = vrot.lane.b32.xlu2 %v3034_v8, %s2672_s30  ;;  %2413 = vrot.lane.b32.xlu0 %v2372_v16, %s2667_s21 }
 0x28c   : > { %2418 = vrot.lane.b32.xlu1 %v2417_v30, %s2672_s30 }
 0x293   : > { %2433 = vrot.lane.b32.xlu2 %v2407_v10, %s2665_s19  ;;  %2423 = vrot.lane.b32.xlu0 %v2377_v12, %s2667_s21 }
 0x294   : > { %2428 = vrot.lane.b32.xlu1 %v2402_v9, %s2670_s26 }
 0x29b   : > { %2443 = vrot.lane.b32.xlu2 %v2402_v9, %s2669_s25  ;;  %2438 = vrot.lane.b32.xlu0 %v2417_v30, %s2670_s26 }
 0x29c   : > { %1266 = vrot.lane.b32.xlu1 %v3034_v8, %s2670_s26 }
 0x2a3   : > { %2458 = vrot.lane.b32.xlu2 %v2372_v16, %s2671_s29  ;;  %2448 = vrot.lane.b32.xlu0 %v2407_v10, %s2666_s20  ;;  %v2335_v16 = vunpack.i.h.bf16 %v2988_v28 }
 0x2a4   : > { %2453 = vrot.lane.b32.xlu1 %v2417_v30, %s2669_s25 }
 0x2ab   : > { %2468 = vrot.lane.b32.xlu2 %v2467_v36, %s2671_s29  ;;  %1257 = vrot.lane.b32.xlu0 %v3034_v8, %s2669_s25 }
 0x2ac   : > { %2463 = vrot.lane.b32.xlu1 %v2407_v10, %s2667_s21 }
 0x2b3   : > { %1588 = vperm.xlu2 %2270, %v2730_v0   ;;  %1380 = vperm.xlu0 %2229, %v2730_v0  }
 0x2b4   : > { %1387 = vperm.xlu1 %2341, %v2736_v2  }
 0x2bb   : > { %1803 = vperm.xlu2 %2270, %v2736_v2   ;;  %1595 = vperm.xlu0 %2229, %v2736_v2  }
 0x2bc   : > { %1796 = vperm.xlu1 %2341, %v2730_v0  }
 0x2bd   : > { %v3098_v38 = vpop.permute.xlu2 %2363 }
 0x2be   : > { %v2365_v39 = vunpack.i.l.bf16 %v3098_v38  ;;  %v2366_v11 = vunpack.i.h.bf16 %v3098_v38 }
 0x2c0   : > { %898 = vmatpush.msrb.mxu3 %v2365_v39 }
 0x2cd   : > { %v2379_v40 = vpop.permute.xlu2 %2378 }
 0x2ce   : > { %v2381_v59 = vunpack.i.h.bf16 %v2379_v40  ;;  %v2380_v58 = vunpack.i.l.bf16 %v2379_v40 }
 0x2d5   : > { %v3101_v41 = vpop.permute.xlu2 %2393  ;;  %v3105_v45 = vpop.permute.xlu0 %2353 }
 0x2d6   : > { %v3103_v43 = vpop.permute.xlu1 %2343  ;;  %v2355_v0 = vunpack.i.l.bf16 %v3105_v45  ;;  %v2395_v24 = vunpack.i.l.bf16 %v3101_v41  ;;  %v2356_v39 = vunpack.i.h.bf16 %v3105_v45 }
 0x2d7   : > { %v2345_v60 = vunpack.i.l.bf16 %v3103_v43 }
 0x2dd   : > { %v2409_v46 = vpop.permute.xlu2 %2408 }
 0x2de   : > { %v2359_v47 = vpop.permute.xlu1 %2358  ;;  %v2410_v51 = vunpack.i.l.bf16 %v2409_v46  ;;  %v2411_v63 = vunpack.i.h.bf16 %v2409_v46 }
 0x2df   : > { %v2361_v48 = vunpack.i.h.bf16 %v2359_v47  ;;  %v2360_v49 = vunpack.i.l.bf16 %v2359_v47 }
 0x2e1   : > { %899 = vmatpush.msrb.mxu3 %v2361_v48 }
 0x2e3   : > { %900 = vmatpush.msrb.mxu3 %v2360_v49 }
 0x2e5   : > { %901 = vmatpush.msrb.mxu3 %v2355_v0  ;;  %v2369_v2 = vpop.permute.xlu0 %2368  ;;  %v3108_v50 = vpop.permute.xlu2 %1275 }
 0x2e6   : > { %v2371_v56 = vunpack.i.h.bf16 %v2369_v2  ;;  %v2370_v57 = vunpack.i.l.bf16 %v2369_v2  ;;  %v2374_v53 = vpop.permute.xlu1 %2373 }
 0x2e7   : > { %902 = vmatpush.msrb.mxu3 %v2351_v55  ;;  %v2375_v52 = vunpack.i.l.bf16 %v2374_v53  ;;  %v2376_v61 = vunpack.i.h.bf16 %v2374_v53 }
 0x2e8   : > { %1081 = vmatpush.msra.mxu2 %v2370_v57  ;;  %1289 = vmatpush.msra.mxu0 %v2371_v56  ;;  %v2346_v56 = vunpack.i.h.bf16 %v3103_v43 }
 0x2e9   : > { %903 = vmatpush.msrb.mxu3 %v2350_v34 }
 0x2ea   : > { %1082 = vmatpush.msra.mxu2 %v2375_v52  ;;  %1290 = vmatpush.msra.mxu0 %v2381_v59  ;;  %v714_v52 = vld [vmem:[%s3528_s5 + $0x48] sm:$0x3f] }
 0x2eb   : > { %904 = vmatpush.msrb.mxu3 %v2345_v60  ;;  %2145 = vmatpush.msk.msrb.mxu1 %vm509_vm0, %v714_v52  ;;  %v2202_v52 = vld [vmem:[%s2747_s14 + $0x48] sm:$0xff] }
 0x2ec   : > { %1083 = vmatpush.msra.mxu2 %v2376_v61  ;;  %1291 = vmatpush.msra.mxu0 %v2410_v51 }
 0x2ed   : > { %905 = vmatpush.msrb.mxu3 %v2340_v62  ;;  %v2384_v1 = vpop.permute.xlu0 %2383  ;;  %v2434_v3 = vpop.permute.xlu2 %2433  ;;  %728 = vmatpush.msrb.mxu1 %v2871_v17  ;;  %v3146_v17 = vld [vmem:[%s3528_s5 + $0x28] sm:$0xff] }
 0x2ee   : > { %v2385_v4 = vunpack.i.l.bf16 %v2384_v1  ;;  %v2389_v6 = vpop.permute.xlu1 %2388  ;;  %1084 = vmatpush.msra.mxu2 %v2380_v58  ;;  %1292 = vmatpush.msra.mxu0 %v2411_v63  ;;  %v2386_v12 = vunpack.i.h.bf16 %v2384_v1  ;;  %v2435_v18 = vunpack.i.l.bf16 %v2434_v3  ;;  %v2436_v44 = vunpack.i.h.bf16 %v2434_v3 }
 0x2ef   : > { %v2391_v22 = vunpack.i.h.bf16 %v2389_v6  ;;  %906 = vmatpush.msrb.mxu3 %v2339_v13  ;;  %v2390_v23 = vunpack.i.l.bf16 %v2389_v6  ;;  %729 = vmatpush.msrb.mxu1 %v2877_v19  ;;  %v3158_v6 = vld [vmem:[%s3528_s5 + $0x20] sm:$0xff] }
 0x2f0   : > { %1085 = vmatpush.msra.mxu2 %v2385_v4  ;;  %v2673_v4 = vmov 0.0  }
 0x2f1   : > { %907 = vmatpush.msrb.mxu3 %v2986_v27  ;;  %1293 = vmatpush.msra.mxu0 %v2391_v22  ;;  %v2396_v27 = vunpack.i.h.bf16 %v3101_v41  ;;  %328 = vst.msk [vmem:[%s3141_s12] sm:$0xff] %vm327_vm3, %v2673_v4 }
 0x2f2   : > { %1086 = vmatpush.msra.mxu2 %v2386_v12  ;;  %730 = vmatpush.msrb.mxu1 %v2883_v20  ;;  %v3150_v20 = vpop.f32.mrf.mxu2  ;;  %2129 = vst.msk [vmem:[%s3141_s12 + $0x48] sm:$0xff] %vm327_vm3, %v2673_v4  ;;  %v2653_v4 = vld [vmem:[%s3524_s1 + $0x7] ss:$0 sm:$0xff] }
 0x2f3   : > { %908 = vmatpush.msrb.mxu3 %v2335_v16  ;;  %1294 = vmatpush.msra.mxu0 %v2435_v18  ;;  %2137 = vst.msk [vmem:[%s3141_s12 + $0x8] sm:$0xff] %vm327_vm3, %v3150_v20  ;;  %v2190_v18 = vld [vmem:[%s2747_s14 + $0x38] sm:$0xff] }
 0x2f4   : > { %2154 = vmatmul.msk.f32.vlgmr.msrb.gmra.mxu3 %vm451_vm1, %v2978_v15  ;;  %1087 = vmatpush.msra.mxu2 %v2390_v23  ;;  %v682_v23 = vpop.f32.mrf.mxu3 }
 0x2f5   : > { %1106 = vmatpush.msra.mxu3 %v2366_v11  ;;  %1295 = vmatpush.msra.mxu0 %v2436_v44  ;;  %v2399_v10 = vpop.permute.xlu0 %2398  ;;  %v2444_v48 = vpop.permute.xlu2 %2443 }
 0x2f6   : > { %v2401_v9 = vunpack.i.h.bf16 %v2399_v10  ;;  %v2404_v28 = vpop.permute.xlu1 %2403  ;;  %1088 = vmatpush.msra.mxu2 %v2395_v24  ;;  %v2400_v32 = vunpack.i.l.bf16 %v2399_v10  ;;  %v2445_v53 = vunpack.i.l.bf16 %v2444_v48  ;;  %v2446_v51 = vunpack.i.h.bf16 %v2444_v48  ;;  %731 = vmatpush.msrb.mxu1 %v3146_v17  ;;  %v3175_v10 = vld [vmem:[%s3528_s5 + $0x8] sm:$0xff] }
 0x2f7   : > { %v2405_v30 = vunpack.i.l.bf16 %v2404_v28  ;;  %v2406_v49 = vunpack.i.h.bf16 %v2404_v28  ;;  %v3188_v28 = vld [vmem:[%s3528_s5] sm:$0xff] }
 0x2f8   : > { %1089 = vmatpush.msra.mxu2 %v2396_v27  ;;  %1296 = vmatpush.msra.mxu0 %v2401_v9 }
 0x2f9   : > { %1107 = vmatpush.msra.mxu3 %v2405_v30  ;;  %732 = vmatpush.msrb.mxu1 %v3158_v6 }
 0x2fa   : > { %1090 = vmatpush.msra.mxu2 %v2400_v32 }
 0x2fb   : > { %733 = vmatpush.msrb.mxu1 %v2895_v25  ;;  %v702_v25 = vpop.f32.mrf.mxu2 }
 0x2fd   : > { %v2414_v33 = vpop.permute.xlu0 %2413  ;;  %v2459_v57 = vpop.permute.xlu2 %2458  ;;  %734 = vmatpush.msrb.mxu1 %v2901_v26  ;;  %v703_v26 = vadd.f32 %v702_v25, %v682_v23  ;;  %v3292_v25 = vld [vmem:[%s3528_s5 + $0x18] sm:$0xff] }
 0x2fe   : > { %v2415_v35 = vunpack.i.l.bf16 %v2414_v33  ;;  %v2419_v36 = vpop.permute.xlu1 %2418  ;;  %v2416_v38 = vunpack.i.h.bf16 %v2414_v33  ;;  %v2460_v61 = vunpack.i.l.bf16 %v2459_v57  ;;  %v2461_v62 = vunpack.i.h.bf16 %v2459_v57 }
 0x2ff   : > { %v2420_v37 = vunpack.i.l.bf16 %v2419_v36  ;;  %v2421_v45 = vunpack.i.h.bf16 %v2419_v36  ;;  %735 = vmatpush.msrb.mxu1 %v3175_v10 }
 0x300   : > { %1091 = vmatpush.msra.mxu2 %v2415_v35 }
 0x301   : > { %1108 = vmatpush.msra.mxu3 %v2420_v37  ;;  %736 = vmatpush.msrb.mxu1 %v3188_v28 }
 0x302   : > { %1092 = vmatpush.msra.mxu2 %v2416_v38  ;;  %2146 = vmatmul.msk.f32.vlgmr.msrb.gmra.mxu1 %vm505_vm2, %v703_v26 }
 0x303   : > { %1109 = vmatpush.msra.mxu3 %v2356_v39 }
 0x305   : > { %v2424_v40 = vpop.permute.xlu0 %2423  ;;  %v2469_v63 = vpop.permute.xlu2 %2468 }
 0x306   : > { %v2425_v41 = vunpack.i.l.bf16 %v2424_v40  ;;  %v2429_v46 = vpop.permute.xlu1 %2428  ;;  %v2470_v19 = vunpack.i.l.bf16 %v2469_v63  ;;  %v2471_v22 = vunpack.i.h.bf16 %v2469_v63 }
 0x307   : > { %v2430_v47 = vunpack.i.l.bf16 %v2429_v46  ;;  %v2431_v34 = vunpack.i.h.bf16 %v2429_v46 }
 0x308   : > { %1093 = vmatpush.msra.mxu2 %v2425_v41 }
 0x309   : > { %1110 = vmatpush.msra.mxu3 %v2430_v47 }
 0x30a   : > { %1094 = vmatpush.msra.mxu2 %v2998_v42 }
 0x30c   : > { %1095 = vmatpush.msra.mxu2 %v3029_v5 }
 0x30d   : > { %v2439_v0 = vpop.permute.xlu0 %2438  ;;  %v1589_v30 = vpop.permute.xlu2 %1588 }
 0x30e   : > { %v1267_v2 = vpop.permute.xlu1 %1266  ;;  %1096 = vmatpush.msra.mxu2 %v3032_v7  ;;  %v2440_v55 = vunpack.i.l.bf16 %v2439_v0  ;;  %v2441_v42 = vunpack.i.h.bf16 %v2439_v0  ;;  %v1591_v36 = vmul.f32 %v3010_v54, %v1589_v30 }
 0x30f   : > { %1097 = vmatmul.f32.vlgmr.msra.gmra.mxu2 %v2973_v14 }
 0x310   : > { %1314 = vmatpush.msrb.mxu2 %v2406_v49  ;;  %1111 = vmatpush.msra.mxu3 %v2440_v55 }
 0x312   : > { %1315 = vmatpush.msrb.mxu2 %v2421_v45  ;;  %1112 = vmatpush.msra.mxu3 %v2346_v56 }
 0x314   : > { %1316 = vmatpush.msrb.mxu2 %v3108_v50  ;;  %1113 = vmatpush.msra.mxu3 %v2445_v53  ;;  %v2426_v50 = vunpack.i.h.bf16 %v2424_v40  ;;  %v1606_v40 = vmul.f32 %v2190_v18, %v1589_v30  ;;  %v2651_v53 = vld [vmem:[%s3524_s1 + $0x7] ss:$0 sm:$0xff] }
 0x315   : > { %v2449_v5 = vpop.permute.xlu0 %2448 }
 0x316   : > { %1317 = vmatpush.msrb.mxu2 %v2431_v34  ;;  %v2450_v7 = vunpack.i.l.bf16 %v2449_v5  ;;  %v2454_v59 = vpop.permute.xlu1 %2453  ;;  %v2451_v43 = vunpack.i.h.bf16 %v2449_v5 }
 0x317   : > { %v2455_v60 = vunpack.i.l.bf16 %v2454_v59  ;;  %v2456_v58 = vunpack.i.h.bf16 %v2454_v59 }
 0x318   : > { %1318 = vmatpush.msrb.mxu2 %v2441_v42  ;;  %1297 = vmatpush.msra.mxu0 %v2450_v7 }
 0x319   : > { %1114 = vmatpush.msra.mxu3 %v2455_v60 }
 0x31a   : > { %1319 = vmatpush.msrb.mxu2 %v1267_v2  ;;  %1298 = vmatpush.msra.mxu0 %v2451_v43 }
 0x31b   : > { %1115 = vmatpush.msra.mxu3 %v2460_v61 }
 0x31c   : > { %1320 = vmatpush.msrb.mxu2 %v2446_v51  ;;  %1299 = vmatpush.msra.mxu0 %v2426_v50  ;;  %v922_v50 = vld [vmem:[%s3528_s5 + $0x48] sm:$0x3f] }
 0x31d   : > { %1116 = vmatpush.msra.mxu3 %v2461_v62  ;;  %v1258_v1 = vpop.permute.xlu0 %1257  ;;  %v1804_v62 = vpop.permute.xlu2 %1803  ;;  %2155 = vmatpush.msk.msra.mxu1 %vm509_vm0, %v922_v50 }
 0x31e   : > { %1321 = vmatpush.msrb.mxu2 %v2456_v58  ;;  %v2464_v13 = vpop.permute.xlu1 %2463  ;;  %2164 = vmatmul.msk.f32.vlgmr.msra.gmra.mxu3 %vm451_vm1, %v2978_v15 }
 0x31f   : > { %v2465_v3 = vunpack.i.l.bf16 %v2464_v13  ;;  %v2466_v12 = vunpack.i.h.bf16 %v2464_v13  ;;  %v3253_v13 = vld [vmem:[%s3528_s5 + $0x40] sm:$0xff] }
 0x320   : > { %1322 = vmatpush.msrb.mxu2 %v1258_v1  ;;  %936 = vmatpush.msra.mxu1 %v3253_v13 }
 0x321   : > { %1300 = vmatpush.msra.mxu0 %v2465_v3  ;;  %v3264_v3 = vld [vmem:[%s3528_s5 + $0x30] sm:$0xff] }
 0x322   : > { %1323 = vmatpush.msrb.mxu2 %v2470_v19  ;;  %v3258_v19 = vld [vmem:[%s3528_s5 + $0x38] sm:$0xff] }
 0x323   : > { %1301 = vmatpush.msra.mxu0 %v2466_v12  ;;  %937 = vmatpush.msra.mxu1 %v3258_v19  ;;  %v2655_v12 = vld [vmem:[%s3524_s1 + $0x9] ss:$0 sm:$0xff] }
 0x324   : > { %1324 = vmatpush.msrb.mxu2 %v2471_v22  ;;  %v2654_v22 = vld [vmem:[%s3524_s1 + $0x8] ss:$0 sm:$0xff] }
 0x325   : > { %2174 = vmatmul.msk.f32.vlgmr.msrb.gmra.mxu2 %vm451_vm1, %v2978_v15  ;;  %1302 = vmatpush.msra.mxu0 %v3036_v21  ;;  %v1381_v16 = vpop.permute.xlu0 %1380  ;;  %v2648_v21 = vld [vmem:[%s3524_s1 + $0x6] ss:$0 sm:$0xff] }
 0x326   : > { %v1383_v11 = vmul.f32 %v2992_v31, %v1381_v16  ;;  %v1398_v44 = vmul.f32 %v3010_v54, %v1381_v16  ;;  %v1408_v24 = vmul.f32 %v2190_v18, %v1381_v16  ;;  %v1388_v15 = vpop.permute.xlu1 %1387  ;;  %v2649_v31 = vld [vmem:[%s3524_s1 + $0x7] ss:$0 sm:$0xff]  ;;  %v2652_v54 = vld [vmem:[%s3524_s1 + $0x8] ss:$0 sm:$0xff]  ;;  %938 = vmatpush.msra.mxu1 %v3264_v3 }
 0x327   : > { %1303 = vmatpush.msra.mxu0 %v3058_v29  ;;  %v2192_v29 = vld [vmem:[%s2747_s14 + $0x40] sm:$0xff] }
 0x328   : > { %v1399_v27 = vadd.f32 %v1398_v44, %v1388_v15  ;;  %v1409_v9 = vadd.f32 %v1408_v24, %v1388_v15  ;;  %v1390_v32 = vadd.f32 %v1388_v15, %v1383_v11  ;;  %v1616_v37 = vmul.f32 %v2192_v29, %v1589_v30  ;;  %939 = vmatpush.msra.mxu1 %v3146_v17  ;;  %v890_v30 = vpop.f32.mrf.mxu0 }
 0x329   : > { %1304 = vmatpush.msra.mxu0 %v3034_v8  ;;  %v2647_v8 = vld [vmem:[%s3524_s1 + $0x5] ss:$0 sm:$0xff] }
 0x32a   : > { %v1400_v33 = vmax.f32 %v1399_v27, 0.0  ;;  %v1410_v35 = vmax.f32 %v1409_v9, 0.0  ;;  %1305 = vmatmul.f32.vlgmr.msra.gmra.mxu0 %v2973_v14  ;;  %v1391_v46 = vmax.f32 %v1390_v32, 0.0  ;;  %v2650_v14 = vld [vmem:[%s3524_s1 + $0x6] ss:$0 sm:$0xff]  ;;  %940 = vmatpush.msra.mxu1 %v3158_v6 }
 0x32b   : > { %v1338_v32 = vld [vmem:[%s3528_s5 + $0x48] sm:$0x3f] }
 0x32c   : > { %v3196_v38 = vmul.f32 %v2648_v21, %v1400_v33  ;;  %v3198_v39 = vmul.f32 %v2649_v31, %v1410_v35  ;;  %v3215_v55 = vmul.f32 %v2647_v8, %v1391_v46  ;;  %v3298_v21 = vld [vmem:[%s3528_s5 + $0x10] sm:$0xff]  ;;  %941 = vmatpush.msra.mxu1 %v3292_v25  ;;  %2175 = vmatpush.msk.msrb.mxu3 %vm509_vm0, %v1338_v32 }
 0x32d   : > { %v1596_v41 = vpop.permute.xlu0 %1595 }
 0x32e   : > { %v1598_v47 = vadd.f32 %v1596_v41, %v1591_v36  ;;  %v1617_v48 = vadd.f32 %v1616_v37, %v1596_v41  ;;  %v3211_v49 = vpack.i.bf16 %v3196_v38, %v3198_v39  ;;  %v1607_v2 = vadd.f32 %v1606_v40, %v1596_v41  ;;  %v1797_v60 = vpop.permute.xlu1 %1796  ;;  %942 = vmatpush.msra.mxu1 %v3298_v21 }
 0x32f   : > { %v1799_v43 = vmul.f32 %v2190_v18, %v1797_v60  ;;  %v1814_v51 = vmul.f32 %v2192_v29, %v1797_v60  ;;  %v1824_v61 = vmul.f32 %v2202_v52, %v1797_v60  ;;  %v1130_v29 = vld [vmem:[%s3528_s5 + $0x48] sm:$0x3f]  ;;  %1352 = vmatpush.msrb.mxu3 %v3253_v13 }
 0x330   : > { %v1599_v0 = vmax.f32 %v1598_v47, 0.0  ;;  %v1618_v45 = vmax.f32 %v1617_v48, 0.0  ;;  %2478 = vrot.lane.b32.xlu1 %v3211_v49, %s2668_s24  ;;  %v1608_v34 = vmax.f32 %v1607_v2, 0.0  ;;  %943 = vmatpush.msra.mxu1 %v3175_v10 }
 0x331   : > { %v1806_v58 = vadd.f32 %v1804_v62, %v1799_v43  ;;  %v1815_v63 = vadd.f32 %v1814_v51, %v1804_v62  ;;  %v1825_v1 = vadd.f32 %v1824_v61, %v1804_v62  ;;  %1353 = vmatpush.msrb.mxu3 %v3258_v19 }
 0x332   : > { %v3217_v56 = vmul.f32 %v2650_v14, %v1599_v0  ;;  %v3219_v57 = vmul.f32 %v2652_v54, %v1618_v45  ;;  %v3230_v7 = vmul.f32 %v2651_v53, %v1608_v34  ;;  %944 = vmatpush.msra.mxu1 %v3188_v28 }
 0x333   : > { %v1807_v18 = vmax.f32 %v1806_v58, 0.0  ;;  %v1816_v16 = vmax.f32 %v1815_v63, 0.0  ;;  %v1826_v23 = vmax.f32 %v1825_v1, 0.0  ;;  %1354 = vmatpush.msrb.mxu3 %v3264_v3 }
 0x334   : > { %v2482_v42 = vpack.i.bf16 %v3215_v55, %v3219_v57  ;;  %v2472_v5 = vpack.i.bf16 %v3217_v56, %v3215_v55  ;;  %v2487_v59 = vpack.i.bf16 %v3217_v56, %v3230_v7  ;;  %v2517_v11 = vpack.i.bf16 %v3219_v57, %v3215_v55  ;;  %2165 = vmatpush.msk.msrb.mxu1 %vm509_vm0, %v1130_v29 }
 0x335   : > { %v3282_v44 = vmul.f32 %v2653_v4, %v1807_v18  ;;  %v3284_v24 = vmul.f32 %v2654_v22, %v1816_v16  ;;  %v3286_v15 = vmul.f32 %v2655_v12, %v1826_v23  ;;  %v2602_v36 = vpack.i.bf16 %v3219_v57, %v3196_v38  ;;  %1355 = vmatpush.msrb.mxu3 %v3146_v17 }
 0x336   : > { %2483 = vrot.lane.b32.xlu2 %v2482_v42, %s2668_s24  ;;  %2473 = vrot.lane.b32.xlu0 %v2472_v5, %s2671_s29  ;;  %v539_v22 = vmul.f32 %v3150_v20, %v3150_v20 }
 0x337   : > { %v2542_v31 = vpack.i.bf16 %v3284_v24, %v3286_v15  ;;  %v2532_v27 = vpack.i.bf16 %v3198_v39, %v3282_v44  ;;  %v2557_v9 = vpack.i.bf16 %v3286_v15, %v3230_v7  ;;  %v2572_v26 = vpack.i.bf16 %v3284_v24, %v3217_v56  ;;  %1144 = vmatpush.msrb.mxu1 %v3253_v13 }
 0x338   : > { %2493 = vrot.lane.b32.xlu1 %v3211_v49, %s2665_s19  ;;  %1356 = vmatpush.msrb.mxu3 %v3158_v6  ;;  %v540_v12 = vsel %vm327_vm3, %v539_v22, 0.0 }
 0x339   : > { %1145 = vmatpush.msrb.mxu1 %v3258_v19 }
 0x33a   : > { %1357 = vmatpush.msrb.mxu3 %v3292_v25 }
 0x33b   : > { %1146 = vmatpush.msrb.mxu1 %v3264_v3 }
 0x33c   : > { %1358 = vmatpush.msrb.mxu3 %v3298_v21 }
 0x33d   : > { %1147 = vmatpush.msrb.mxu1 %v3146_v17 }
 0x33e   : > { %2488 = vrot.lane.b32.xlu0 %v2487_v59, %s2668_s24  ;;  %2498 = vrot.lane.b32.xlu2 %v3211_v49, %s2672_s30 }
 0x33f   : > { %1148 = vmatpush.msrb.mxu1 %v3158_v6  ;;  %1359 = vmatpush.msrb.mxu3 %v3175_v10 }
 0x340   : > { %2508 = vrot.lane.b32.xlu1 %v2487_v59, %s2665_s19 }
 0x341   : > { %1149 = vmatpush.msrb.mxu1 %v3292_v25  ;;  %1360 = vmatpush.msrb.mxu3 %v3188_v28 }
 0x343   : > { %1150 = vmatpush.msrb.mxu1 %v3298_v21 }
 0x345   : > { %1151 = vmatpush.msrb.mxu1 %v3175_v10 }
 0x346   : > { %2503 = vrot.lane.b32.xlu0 %v2482_v42, %s2665_s19  ;;  %2513 = vrot.lane.b32.xlu2 %v3211_v49, %s2666_s20 }
 0x347   : > { %1152 = vmatpush.msrb.mxu1 %v3188_v28 }
 0x348   : > { %2523 = vrot.lane.b32.xlu1 %v3211_v49, %s2670_s26 }
 0x34e   : > { %2518 = vrot.lane.b32.xlu0 %v2517_v11, %s2672_s30  ;;  %2528 = vrot.lane.b32.xlu2 %v2482_v42, %s2666_s20 }
 0x350   : > { %2538 = vrot.lane.b32.xlu1 %v2487_v59, %s2666_s20 }
 0x356   : > { %2543 = vrot.lane.b32.xlu2 %v2542_v31, %s2668_s24  ;;  %2533 = vrot.lane.b32.xlu0 %v2532_v27, %s2671_s29 }
 0x358   : > { %2553 = vrot.lane.b32.xlu1 %v2517_v11, %s2670_s26 }
 0x35e   : > { %2558 = vrot.lane.b32.xlu2 %v2557_v9, %s2672_s30  ;;  %2548 = vrot.lane.b32.xlu0 %v3211_v49, %s2667_s21 }
 0x360   : > { %2568 = vrot.lane.b32.xlu1 %v2482_v42, %s2667_s21 }
 0x366   : > { %2573 = vrot.lane.b32.xlu2 %v2572_v26, %s2672_s30  ;;  %2563 = vrot.lane.b32.xlu0 %v3211_v49, %s2669_s25 }
 0x368   : > { %2578 = vrot.lane.b32.xlu1 %v2487_v59, %s2667_s21 }
 0x36e   : > { %2583 = vrot.lane.b32.xlu2 %v2542_v31, %s2665_s19  ;;  %1863 = vrot.lane.b32.xlu0 %v3282_v44, %s2668_s24 }
 0x370   : > { %2588 = vrot.lane.b32.xlu1 %v2517_v11, %s2669_s25 }
 0x376   : > { %2593 = vrot.lane.b32.xlu2 %v2557_v9, %s2670_s26  ;;  %1899 = vrot.lane.b32.xlu0 %v3282_v44, %s2672_s30 }
 0x377   : > { %v910_v33 = vpop.f32.mrf.mxu3 }
 0x378   : > { %v911_v35 = vadd.f32 %v910_v33, %v890_v30  ;;  %1854 = vrot.lane.b32.xlu1 %v3282_v44, %s2665_s19 }
 0x37a   : > { %2156 = vmatmul.msk.f32.vlgmr.msra.gmra.mxu1 %vm505_vm2, %v911_v35 }
 0x37e   : > { %2603 = vrot.lane.b32.xlu2 %v2602_v36, %s2671_s29  ;;  %2598 = vrot.lane.b32.xlu0 %v2572_v26, %s2670_s26 }
 0x37f   : > { %v3379_v5 = vpop.f32.mrf.mxu1 }
 0x380   : > { %1890 = vrot.lane.b32.xlu1 %v3282_v44, %s2670_s26  ;;  %2147 = vst.msk [vmem:[%s3141_s12 + $0x10] sm:$0xff] %vm327_vm3, %v3379_v5  ;;  %v743_v33 = vsel %vm327_vm3, %v3379_v5, 0.0 }
 0x386   : > { %2613 = vrot.lane.b32.xlu2 %v2557_v9, %s2669_s25  ;;  %2608 = vrot.lane.b32.xlu0 %v2542_v31, %s2666_s20 }
 0x388   : > { %1845 = vrot.lane.b32.xlu1 %v3282_v44, %s2666_s20 }
 0x38e   : > { %2623 = vrot.lane.b32.xlu2 %v2542_v31, %s2667_s21  ;;  %2618 = vrot.lane.b32.xlu0 %v2572_v26, %s2669_s25 }
 0x390   : > { %v2484_v37 = vpop.permute.xlu2 %2483  ;;  %2628 = vrot.lane.b32.xlu1 %v2557_v9, %s2671_s29 }
 0x391   : > { %v2485_v52 = vunpack.i.l.bf16 %v2484_v37  ;;  %v2486_v51 = vunpack.i.h.bf16 %v2484_v37 }
 0x392   : > { %v1098_v46 = vpop.f32.mrf.mxu2 }
 0x396   : > { %1836 = vrot.lane.b32.xlu2 %v3282_v44, %s2667_s21  ;;  %1881 = vrot.lane.b32.xlu0 %v3282_v44, %s2669_s25 }
 0x398   : > { %v2499_v40 = vpop.permute.xlu2 %2498 }
 0x399   : > { %v2500_v8 = vunpack.i.l.bf16 %v2499_v40  ;;  %v2501_v41 = vunpack.i.h.bf16 %v2499_v40 }
 0x39b   : > { %1522 = vmatpush.msrb.mxu0 %v2500_v8 }
 0x39d   : > { %1523 = vmatpush.msrb.mxu0 %v2501_v41 }
 0x39e   : > { %1874 = vrot.lane.b32.xlu0 %v3284_v24, %s2671_s29 }
 0x3a0   : > { %v2514_v14 = vpop.permute.xlu2 %2513 }
 0x3a1   : > { %v1118_v54 = vpop.f32.mrf.mxu3  ;;  %v2515_v31 = vunpack.i.l.bf16 %v2514_v14  ;;  %v2516_v26 = vunpack.i.h.bf16 %v2514_v14 }
 0x3a2   : > { %v1119_v47 = vadd.f32 %v1118_v54, %v1098_v46  ;;  %v2479_v48 = vpop.permute.xlu1 %2478  ;;  %v535_v54 = vsel %vm327_vm3, %v3150_v20, 0.0 }
 0x3a3   : > { %v2480_v60 = vunpack.i.l.bf16 %v2479_v48  ;;  %v2481_v43 = vunpack.i.h.bf16 %v2479_v48  ;;  %v747_v48 = vmul.f32 %v3379_v5, %v3379_v5 }
 0x3a4   : > { %2166 = vmatmul.msk.f32.vlgmr.msrb.gmra.mxu1 %vm505_vm2, %v1119_v47 }
 0x3a7   : > { %v1306_v49 = vpop.f32.mrf.mxu0 }
 0x3a8   : > { %v1326_v0 = vpop.f32.mrf.mxu2  ;;  %v2474_v45 = vpop.permute.xlu0 %2473 }
 0x3a9   : > { %v1327_v2 = vadd.f32 %v1326_v0, %v1306_v49  ;;  %v2529_v53 = vpop.permute.xlu2 %2528  ;;  %v2476_v34 = vunpack.i.h.bf16 %v2474_v45  ;;  %v2475_v42 = vunpack.i.l.bf16 %v2474_v45 }
 0x3aa   : > { %v2494_v59 = vpop.permute.xlu1 %2493  ;;  %v2531_v30 = vunpack.i.h.bf16 %v2529_v53  ;;  %v2530_v32 = vunpack.i.l.bf16 %v2529_v53 }
 0x3ab   : > { %2176 = vmatmul.msk.f32.vlgmr.msrb.gmra.mxu3 %vm505_vm2, %v1327_v2  ;;  %1497 = vmatpush.msra.mxu1 %v2475_v42  ;;  %v2495_v50 = vunpack.i.l.bf16 %v2494_v59  ;;  %v2496_v1 = vunpack.i.h.bf16 %v2494_v59  ;;  %v748_v2 = vsel %vm327_vm3, %v747_v48, 0.0 }
 0x3ac   : > { %1705 = vmatpush.msra.mxu3 %v2476_v34 }
 0x3ad   : > { %1498 = vmatpush.msra.mxu1 %v2480_v60 }
 0x3ae   : > { %1706 = vmatpush.msra.mxu3 %v2485_v52 }
 0x3af   : > { %1499 = vmatpush.msra.mxu1 %v2481_v43 }
 0x3b0   : > { %v2489_v61 = vpop.permute.xlu0 %2488 }
 0x3b1   : > { %v2490_v62 = vunpack.i.l.bf16 %v2489_v61  ;;  %1500 = vmatpush.msra.mxu1 %v2486_v51  ;;  %v3385_v58 = vpop.permute.xlu2 %2543  ;;  %v2491_v4 = vunpack.i.h.bf16 %v2489_v61 }
 0x3b2   : > { %v2509_v63 = vpop.permute.xlu1 %2508 }
 0x3b3   : > { %1501 = vmatpush.msra.mxu1 %v2495_v50  ;;  %1707 = vmatpush.msra.mxu3 %v2490_v62  ;;  %v2510_v27 = vunpack.i.l.bf16 %v2509_v63  ;;  %v2511_v29 = vunpack.i.h.bf16 %v2509_v63  ;;  %v3410_v63 = vld [vmem:[%s3527_s4] sm:$0xff] }
 0x3b5   : > { %1502 = vmatpush.msra.mxu1 %v2496_v1  ;;  %1708 = vmatpush.msra.mxu3 %v2491_v4 }
 0x3b8   : > { %v2504_v18 = vpop.permute.xlu0 %2503 }
 0x3b9   : > { %v2506_v16 = vunpack.i.h.bf16 %v2504_v18  ;;  %v2505_v23 = vunpack.i.l.bf16 %v2504_v18  ;;  %v3390_v9 = vpop.permute.xlu2 %2558 }
 0x3ba   : > { %v2524_v11 = vpop.permute.xlu1 %2523  ;;  %541 = vadd.xlane.f32.xlu1 %v540_v12  ;;  %v2560_v1 = vunpack.i.l.bf16 %v3390_v9 }
 0x3bb   : > { %1503 = vmatpush.msra.mxu1 %v2506_v16  ;;  %1709 = vmatpush.msra.mxu3 %v2505_v23  ;;  %v2525_v40 = vunpack.i.l.bf16 %v2524_v11  ;;  %v2526_v41 = vunpack.i.h.bf16 %v2524_v11  ;;  %v2561_v23 = vunpack.i.h.bf16 %v3390_v9 }
 0x3bd   : > { %1504 = vmatpush.msra.mxu1 %v2515_v31  ;;  %1710 = vmatpush.msra.mxu3 %v2510_v27  ;;  %v3428_v27 = vld [vmem:[%s3527_s4 + $0x8] sm:$0xff] }
 0x3bf   : > { %1505 = vmatpush.msra.mxu1 %v2516_v26  ;;  %1711 = vmatpush.msra.mxu3 %v2511_v29  ;;  %v2545_v26 = vunpack.i.l.bf16 %v3385_v58 }
 0x3c0   : > { %v2519_v35 = vpop.permute.xlu0 %2518 }
 0x3c1   : > { %v2520_v36 = vunpack.i.l.bf16 %v2519_v35  ;;  %1506 = vmatpush.msra.mxu1 %v2531_v30  ;;  %1712 = vmatpush.msra.mxu3 %v2530_v32  ;;  %v3394_v14 = vpop.permute.xlu2 %2573  ;;  %v2521_v62 = vunpack.i.h.bf16 %v2519_v35  ;;  %v2546_v30 = vunpack.i.h.bf16 %v3385_v58 }
 0x3c2   : > { %v2539_v37 = vpop.permute.xlu1 %2538  ;;  %744 = vadd.xlane.f32.xlu1 %v743_v33  ;;  %v2576_v31 = vunpack.i.h.bf16 %v3394_v14 }
 0x3c3   : > { %v2540_v8 = vunpack.i.l.bf16 %v2539_v37  ;;  %1524 = vmatpush.msrb.mxu0 %v2520_v36  ;;  %v2541_v46 = vunpack.i.h.bf16 %v2539_v37 }
 0x3c5   : > { %1525 = vmatpush.msrb.mxu0 %v2525_v40  ;;  %1713 = vmatpush.msra.mxu3 %v2540_v8 }
 0x3c7   : > { %1526 = vmatpush.msrb.mxu0 %v2526_v41  ;;  %1714 = vmatpush.msra.mxu3 %v2541_v46 }
 0x3c8   : > { %v3398_v47 = vpop.permute.xlu0 %2533  ;;  %536 = vadd.xlane.f32.xlu0 %v535_v54 }
 0x3c9   : > { %v3403_v45 = vpop.permute.xlu2 %2583  ;;  %v2536_v11 = vunpack.i.h.bf16 %v3398_v47  ;;  %v2535_v9 = vunpack.i.l.bf16 %v3398_v47 }
 0x3ca   : > { %v2554_v49 = vpop.permute.xlu1 %2553  ;;  %v2585_v35 = vunpack.i.l.bf16 %v3403_v45  ;;  %v2586_v8 = vunpack.i.h.bf16 %v3403_v45 }
 0x3cb   : > { %v2555_v0 = vunpack.i.l.bf16 %v2554_v49  ;;  %v2556_v22 = vunpack.i.h.bf16 %v2554_v49 }
 0x3cd   : > { %1527 = vmatpush.msrb.mxu0 %v2555_v0 }
 0x3d0   : > { %v2549_v53 = vpop.permute.xlu0 %2548  ;;  %749 = vadd.xlane.f32.xlu0 %v748_v2 }
 0x3d1   : > { %v2550_v34 = vunpack.i.l.bf16 %v2549_v53  ;;  %v2551_v59 = vunpack.i.h.bf16 %v2549_v53  ;;  %v2594_v43 = vpop.permute.xlu2 %2593 }
 0x3d2   : > { %v2569_v42 = vpop.permute.xlu1 %2568  ;;  %v2596_v29 = vunpack.i.h.bf16 %v2594_v43 }
 0x3d3   : > { %v2570_v52 = vunpack.i.l.bf16 %v2569_v42  ;;  %1507 = vmatpush.msra.mxu1 %v2550_v34  ;;  %v2571_v20 = vunpack.i.h.bf16 %v2569_v42 }
 0x3d5   : > { %1508 = vmatpush.msra.mxu1 %v2551_v59  ;;  %1715 = vmatpush.msra.mxu3 %v2570_v52 }
 0x3d7   : > { %1509 = vmatpush.msra.mxu1 %v2571_v20 }
 0x3d8   : > { %v2564_v60 = vpop.permute.xlu0 %2563 }
 0x3d9   : > { %v2565_v5 = vunpack.i.l.bf16 %v2564_v60  ;;  %1510 = vmatpush.msra.mxu1 %v3198_v39  ;;  %v2566_v61 = vunpack.i.h.bf16 %v2564_v60  ;;  %v2575_v39 = vunpack.i.l.bf16 %v3394_v14  ;;  %v3417_v16 = vpop.permute.xlu2 %2603 }
 0x3da   : > { %v2579_v51 = vpop.permute.xlu1 %2578 }
 0x3db   : > { %v2580_v50 = vunpack.i.l.bf16 %v2579_v51  ;;  %1511 = vmatpush.msra.mxu1 %v3196_v38  ;;  %1528 = vmatpush.msrb.mxu0 %v2565_v5  ;;  %v2581_v4 = vunpack.i.h.bf16 %v2579_v51  ;;  %v2606_v5 = vunpack.i.h.bf16 %v3417_v16 }
 0x3dd   : > { %1512 = vmatpush.msra.mxu1 %v3215_v55  ;;  %1529 = vmatpush.msrb.mxu0 %v2566_v61  ;;  %v2595_v55 = vunpack.i.l.bf16 %v2594_v43 }
 0x3de   : > { %1716 = vmatpush.msra.mxu3 %v2580_v50  ;;  %1513 = vmatmul.f32.vlgmr.msra.gmra.mxu1 %v3410_v63 }
 0x3df   : > { %1730 = vmatpush.msrb.mxu1 %v2521_v62 }
 0x3e0   : > { %1717 = vmatpush.msra.mxu3 %v2581_v4  ;;  %v1864_v38 = vpop.permute.xlu0 %1863 }
 0x3e1   : > { %1731 = vmatpush.msrb.mxu1 %v2560_v1  ;;  %v2614_v32 = vpop.permute.xlu2 %2613 }
 0x3e2   : > { %1718 = vmatpush.msra.mxu3 %v3219_v57  ;;  %v2589_v12 = vpop.permute.xlu1 %2588  ;;  %v2605_v57 = vunpack.i.l.bf16 %v3417_v16  ;;  %v2615_v46 = vunpack.i.l.bf16 %v2614_v32  ;;  %v2616_v58 = vunpack.i.h.bf16 %v2614_v32 }
 0x3e3   : > { %1732 = vmatpush.msrb.mxu1 %v2575_v39  ;;  %v2590_v18 = vunpack.i.l.bf16 %v2589_v12  ;;  %v2591_v41 = vunpack.i.h.bf16 %v2589_v12  ;;  %v1754_v12 = vld [vmem:[%s3528_s5 + $0x48] sm:$0x3f] }
 0x3e4   : > { %1719 = vmatpush.msra.mxu3 %v3230_v7 }
 0x3e5   : > { %1733 = vmatpush.msrb.mxu1 %v2556_v22  ;;  %1530 = vmatpush.msrb.mxu0 %v2590_v18 }
 0x3e6   : > { %1720 = vmatpush.msra.mxu3 %v3217_v56 }
 0x3e7   : > { %1734 = vmatpush.msrb.mxu1 %v2595_v55  ;;  %1531 = vmatpush.msrb.mxu0 %v2536_v11  ;;  %v1962_v55 = vld [vmem:[%s3528_s5 + $0x48] sm:$0x3f] }
 0x3e8   : > { %1938 = vmatpush.msrb.mxu3 %v2561_v23  ;;  %v1900_v7 = vpop.permute.xlu0 %1899 }
 0x3e9   : > { %1721 = vmatmul.f32.vlgmr.msra.gmra.mxu3 %v3410_v63  ;;  %1532 = vmatpush.msrb.mxu0 %v2605_v57  ;;  %v2624_v0 = vpop.permute.xlu2 %2623 }
 0x3ea   : > { %1939 = vmatpush.msrb.mxu3 %v2576_v31  ;;  %v1855_v56 = vpop.permute.xlu1 %1854  ;;  %2184 = vmatmul.msk.f32.vlgmr.msrb.gmra.mxu0 %vm451_vm1, %v3428_v27  ;;  %v2625_v34 = vunpack.i.l.bf16 %v2624_v0  ;;  %v2626_v59 = vunpack.i.h.bf16 %v2624_v0 }
 0x3eb   : > { %1913 = vmatpush.msra.mxu0 %v2535_v9 }
 0x3ec   : > { %1940 = vmatpush.msrb.mxu3 %v1900_v7 }
 0x3ed   : > { %1914 = vmatpush.msra.mxu0 %v2545_v26 }
 0x3ee   : > { %1941 = vmatpush.msrb.mxu3 %v2596_v29 }
 0x3ef   : > { %1915 = vmatpush.msra.mxu0 %v2546_v30 }
 0x3f0   : > { %v2599_v33 = vpop.permute.xlu0 %2598 }
 0x3f1   : > { %v2601_v36 = vunpack.i.h.bf16 %v2599_v33  ;;  %v2600_v37 = vunpack.i.l.bf16 %v2599_v33  ;;  %1916 = vmatpush.msra.mxu0 %v1864_v38  ;;  %v1837_v43 = vpop.permute.xlu2 %1836 }
 0x3f2   : > { %v1891_v40 = vpop.permute.xlu1 %1890 }
 0x3f3   : > { %1917 = vmatpush.msra.mxu0 %v2585_v35  ;;  %1735 = vmatpush.msrb.mxu1 %v2600_v37 }
 0x3f4   : > { %1942 = vmatpush.msrb.mxu3 %v2601_v36 }
 0x3f5   : > { %1918 = vmatpush.msra.mxu0 %v2586_v8  ;;  %1736 = vmatpush.msrb.mxu1 %v2591_v41 }
 0x3f6   : > { %1943 = vmatpush.msrb.mxu3 %v1891_v40 }
 0x3f7   : > { %v946_v14 = vpop.f32.mrf.mxu1  ;;  %1919 = vmatpush.msra.mxu0 %v1855_v56  ;;  %1737 = vmatpush.msrb.mxu1 %v2615_v46 }
 0x3f8   : > { %2157 = vst.msk [vmem:[%s3141_s12 + $0x18] sm:$0xff] %vm327_vm3, %v946_v14  ;;  %v955_v54 = vmul.f32 %v946_v14, %v946_v14  ;;  %1944 = vmatpush.msrb.mxu3 %v2616_v58  ;;  %v2609_v47 = vpop.permute.xlu0 %2608  ;;  %v951_v48 = vsel %vm327_vm3, %v946_v14, 0.0 }
 0x3f9   : > { %v2610_v49 = vunpack.i.l.bf16 %v2609_v47  ;;  %952 = vadd.xlane.f32.xlu1 %v951_v48  ;;  %v2611_v53 = vunpack.i.h.bf16 %v2609_v47 }
 0x3fa   : > { %v1846_v2 = vpop.permute.xlu1 %1845  ;;  %v956_v45 = vsel %vm327_vm3, %v955_v54, 0.0 }
 0x3fb   : > { %957 = vadd.xlane.f32.xlu2 %v956_v45  ;;  %1920 = vmatpush.msra.mxu0 %v2610_v49 }
 0x3fd   : > { %1921 = vmatpush.msra.mxu0 %v2611_v53 }
 0x3ff   : > { %1922 = vmatpush.msra.mxu0 %v1846_v2 }
 0x400   : > { %v2619_v42 = vpop.permute.xlu0 %2618 }
 0x401   : > { %v2621_v52 = vunpack.i.h.bf16 %v2619_v42  ;;  %v2620_v20 = vunpack.i.l.bf16 %v2619_v42  ;;  %1923 = vmatpush.msra.mxu0 %v2625_v34 }
 0x402   : > { %v2629_v60 = vpop.permute.xlu1 %2628 }
 0x403   : > { %1738 = vmatpush.msrb.mxu1 %v2620_v20  ;;  %1924 = vmatpush.msra.mxu0 %v2626_v59  ;;  %v2630_v51 = vunpack.i.l.bf16 %v2629_v60  ;;  %v2631_v50 = vunpack.i.h.bf16 %v2629_v60 }
 0x404   : > { %1945 = vmatpush.msrb.mxu3 %v2621_v52 }
 0x405   : > { %1739 = vmatpush.msrb.mxu1 %v2606_v5  ;;  %1925 = vmatpush.msra.mxu0 %v1837_v43 }
 0x407   : > { %1740 = vmatpush.msrb.mxu1 %v2630_v51  ;;  %1926 = vmatpush.msra.mxu0 %v3286_v15 }
 0x408   : > { %v1882_v61 = vpop.permute.xlu0 %1881  ;;  %2194 = vmatmul.msk.f32.vlgmr.msrb.gmra.mxu1 %vm451_vm1, %v3428_v27 }
 0x409   : > { %1927 = vmatpush.msra.mxu0 %v3284_v24  ;;  %1946 = vmatpush.msrb.mxu3 %v1882_v61 }
 0x40a   : > { %2205 = vmatpush.msk.msra.mxu1 %vm509_vm0, %v1962_v55 }
 0x40b   : > { %1928 = vmatpush.msra.mxu0 %v3282_v44  ;;  %1947 = vmatpush.msrb.mxu3 %v2631_v50  ;;  %v1546_v44 = vld [vmem:[%s3528_s5 + $0x48] sm:$0x3f] }
 0x40c   : > { %1929 = vmatmul.f32.vlgmr.msra.gmra.mxu0 %v3410_v63  ;;  %2185 = vmatpush.msk.msra.mxu2 %vm509_vm0, %v1546_v44 }
 0x40d   : > { %1976 = vmatpush.msra.mxu1 %v3253_v13 }
 0x40e   : > { %1560 = vmatpush.msra.mxu2 %v3253_v13 }
 0x40f   : > { %1977 = vmatpush.msra.mxu1 %v3258_v19 }
 0x410   : > { %v1875_v62 = vpop.permute.xlu0 %1874  ;;  %1561 = vmatpush.msra.mxu2 %v3258_v19 }
 0x411   : > { %1948 = vmatpush.msrb.mxu3 %v1875_v62  ;;  %1978 = vmatpush.msra.mxu1 %v3264_v3 }
 0x412   : > { %2204 = vmatmul.msk.f32.vlgmr.msrb.gmra.mxu3 %vm451_vm1, %v3428_v27  ;;  %1562 = vmatpush.msra.mxu2 %v3264_v3 }
 0x413   : > { %1979 = vmatpush.msra.mxu1 %v3146_v17 }
 0x414   : > { %1563 = vmatpush.msra.mxu2 %v3146_v17 }
 0x415   : > { %1980 = vmatpush.msra.mxu1 %v3158_v6 }
 0x416   : > { %1564 = vmatpush.msra.mxu2 %v3158_v6 }
 0x417   : > { %1981 = vmatpush.msra.mxu1 %v3292_v25 }
 0x418   : > { %1565 = vmatpush.msra.mxu2 %v3292_v25 }
 0x419   : > { %1982 = vmatpush.msra.mxu1 %v3298_v21 }
 0x41a   : > { %1566 = vmatpush.msra.mxu2 %v3298_v21 }
 0x41b   : > { %1983 = vmatpush.msra.mxu1 %v3175_v10 }
 0x41c   : > { %1567 = vmatpush.msra.mxu2 %v3175_v10 }
 0x41d   : > { %1984 = vmatpush.msra.mxu1 %v3188_v28 }
 0x41e   : > { %1568 = vmatpush.msra.mxu2 %v3188_v28 }
 0x420   : > { %2195 = vmatpush.msk.msrb.mxu2 %vm509_vm0, %v1754_v12 }
 0x421   : > { %v1154_v15 = vpop.f32.mrf.mxu1 }
 0x422   : > { %2167 = vst.msk [vmem:[%s3141_s12 + $0x20] sm:$0xff] %vm327_vm3, %v1154_v15  ;;  %v1159_v1 = vsel %vm327_vm3, %v1154_v15, 0.0  ;;  %v1163_v4 = vmul.f32 %v1154_v15, %v1154_v15  ;;  %1768 = vmatpush.msrb.mxu2 %v3253_v13 }
 0x423   : > { %1160 = vadd.xlane.f32.xlu0 %v1159_v1 }
 0x424   : > { %v1164_v24 = vsel %vm327_vm3, %v1163_v4, 0.0  ;;  %1769 = vmatpush.msrb.mxu2 %v3258_v19 }
 0x425   : > { %1165 = vadd.xlane.f32.xlu1 %v1164_v24 }
 0x426   : > { %1770 = vmatpush.msrb.mxu2 %v3264_v3 }
 0x428   : > { %1771 = vmatpush.msrb.mxu2 %v3146_v17 }
 0x42a   : > { %1772 = vmatpush.msrb.mxu2 %v3158_v6 }
 0x42c   : > { %1773 = vmatpush.msrb.mxu2 %v3292_v25 }
 0x42d   : > { %v542_v30 = vpop.xlane.xlu1 %541 }
 0x42e   : > { %v1362_v63 = vpop.f32.mrf.mxu3  ;;  %1774 = vmatpush.msrb.mxu2 %v3298_v21 }
 0x42f   : > { %2177 = vst.msk [vmem:[%s3141_s12 + $0x28] sm:$0xff] %vm327_vm3, %v1362_v63  ;;  %v1367_v39 = vsel %vm327_vm3, %v1362_v63, 0.0  ;;  %v1371_v38 = vmul.f32 %v1362_v63, %v1362_v63 }
 0x430   : > { %1368 = vadd.xlane.f32.xlu2 %v1367_v39  ;;  %1775 = vmatpush.msrb.mxu2 %v3175_v10 }
 0x431   : > { %v1372_v22 = vsel %vm327_vm3, %v1371_v38, 0.0 }
 0x432   : > { %1373 = vadd.xlane.f32.xlu0 %v1372_v22  ;;  %1776 = vmatpush.msrb.mxu2 %v3188_v28 }
 0x435   : > { %v745_v33 = vpop.xlane.xlu1 %744 }
 0x43b   : > { %v537_v32 = vpop.xlane.xlu0 %536 }
 0x43c   : > { %v746_v58 = vadd.f32 %v745_v33, %v537_v32 }
 0x443   : > { %v750_v35 = vpop.xlane.xlu0 %749 }
 0x444   : > { %v751_v54 = vadd.f32 %v750_v35, %v542_v30 }
 0x45b   : > { %v1514_v18 = vpop.f32.mrf.mxu1 }
 0x467   : > { %v1534_v16 = vpop.f32.mrf.mxu0 }
 0x468   : > { %v1535_v23 = vadd.f32 %v1534_v16, %v1514_v18 }
 0x46a   : > { %2186 = vmatmul.msk.f32.vlgmr.msra.gmra.mxu2 %vm505_vm2, %v1535_v23 }
 0x46c   : > { %v1722_v13 = vpop.f32.mrf.mxu3  ;;  %v953_v36 = vpop.xlane.xlu1 %952 }
 0x46d   : > { %v954_v47 = vadd.f32 %v953_v36, %v746_v58 }
 0x46e   : > { %v958_v37 = vpop.xlane.xlu2 %957 }
 0x46f   : > { %v959_v49 = vadd.f32 %v958_v37, %v751_v54 }
 0x485   : > { %v1742_v11 = vpop.f32.mrf.mxu1 }
 0x486   : > { %v1743_v31 = vadd.f32 %v1742_v11, %v1722_v13 }
 0x488   : > { %2196 = vmatmul.msk.f32.vlgmr.msrb.gmra.mxu2 %vm505_vm2, %v1743_v31 }
 0x489   : > { %v1930_v19 = vpop.f32.mrf.mxu0 }
 0x495   : > { %v1950_v3 = vpop.f32.mrf.mxu3 }
 0x496   : > { %v1951_v57 = vadd.f32 %v1950_v3, %v1930_v19  ;;  %v1161_v40 = vpop.xlane.xlu0 %1160 }
 0x497   : > { %v1162_v0 = vadd.f32 %v1161_v40, %v954_v47 }
 0x498   : > { %2206 = vmatmul.msk.f32.vlgmr.msra.gmra.mxu1 %vm505_vm2, %v1951_v57  ;;  %v1166_v8 = vpop.xlane.xlu1 %1165 }
 0x499   : > { %v1167_v45 = vadd.f32 %v1166_v8, %v959_v49 }
 0x4a3   : > { %v1369_v41 = vpop.xlane.xlu2 %1368 }
 0x4a4   : > { %v1370_v53 = vadd.f32 %v1369_v41, %v1162_v0 }
 0x4a5   : > { %v1374_v46 = vpop.xlane.xlu0 %1373 }
 0x4a6   : > { %v1375_v34 = vadd.f32 %v1374_v46, %v1167_v45 }
 0x4ed   : > { %v1570_v17 = vpop.f32.mrf.mxu2 }
 0x4ee   : > { %2187 = vst.msk [vmem:[%s3141_s12 + $0x30] sm:$0xff] %vm327_vm3, %v1570_v17  ;;  %v1579_v6 = vmul.f32 %v1570_v17, %v1570_v17  ;;  %v1575_v10 = vsel %vm327_vm3, %v1570_v17, 0.0 }
 0x4ef   : > { %1576 = vadd.xlane.f32.xlu1 %v1575_v10 }
 0x4f0   : > { %v1580_v28 = vsel %vm327_vm3, %v1579_v6, 0.0 }
 0x4f1   : > { %1581 = vadd.xlane.f32.xlu2 %v1580_v28 }
 0x50b   : > { %v1778_v25 = vpop.f32.mrf.mxu2 }
 0x50c   : > { %2197 = vst.msk [vmem:[%s3141_s12 + $0x38] sm:$0xff] %vm327_vm3, %v1778_v25  ;;  %v1787_v21 = vmul.f32 %v1778_v25, %v1778_v25  ;;  %v1783_v27 = vsel %vm327_vm3, %v1778_v25, 0.0 }
 0x50d   : > { %1784 = vadd.xlane.f32.xlu0 %v1783_v27 }
 0x50e   : > { %v1788_v7 = vsel %vm327_vm3, %v1787_v21, 0.0 }
 0x50f   : > { %1789 = vadd.xlane.f32.xlu1 %v1788_v7 }
 0x515   : > { %v1986_v9 = vpop.f32.mrf.mxu1 }
 0x516   : > { %2207 = vst.msk [vmem:[%s3141_s12 + $0x40] sm:$0xff] %vm327_vm3, %v1986_v9  ;;  %v1995_v56 = vmul.f32 %v1986_v9, %v1986_v9  ;;  %v1991_v26 = vsel %vm327_vm3, %v1986_v9, 0.0  ;;  %s2127_s12 = sshll.u32 %s3533_s28, 3 }
 0x517   : > { %1992 = vadd.xlane.f32.xlu2 %v1991_v26  ;;  %s322_s16 = scalar_lea.vmem %s3530_s7, %s2127_s12  ;;  %s326_s22 = scalar_lea.vmem %s3531_s8, %s2127_s12 }
 0x518   : > { %v1996_v29 = vsel %vm327_vm3, %v1995_v56, 0.0 }
 0x519   : > { %1997 = vadd.xlane.f32.xlu0 %v1996_v29 }
 0x562   : > { %v1577_v14 = vpop.xlane.xlu1 %1576 }
 0x563   : > { %v1578_v42 = vadd.f32 %v1577_v14, %v1370_v53 }
 0x564   : > { %v1582_v48 = vpop.xlane.xlu2 %1581 }
 0x565   : > { %v1583_v52 = vadd.f32 %v1582_v48, %v1375_v34 }
 0x580   : > { %v1785_v2 = vpop.xlane.xlu0 %1784 }
 0x581   : > { %v1786_v20 = vadd.f32 %v1785_v2, %v1578_v42 }
 0x582   : > { %v1790_v59 = vpop.xlane.xlu1 %1789 }
 0x583   : > { %v1791_v5 = vadd.f32 %v1790_v59, %v1583_v52 }
 0x58a   : > { %v1993_v60 = vpop.xlane.xlu2 %1992 }
 0x58b   : > { %v1994_v43 = vadd.f32 %v1993_v60, %v1786_v20 }
 0x58c   : > { %v1998_v51 = vpop.xlane.xlu0 %1997 }
 0x58d   : > { %2001 = vst.msk [vmem:[%s322_s16] sm:$0xff] %vm2000_vm4, %v1994_v43  ;;  %v1999_v61 = vadd.f32 %v1998_v51, %v1791_v5 }
 0x58f   : > { %2002 = vst.msk [vmem:[%s326_s22] sm:$0xff] %vm2000_vm4, %v1999_v61 }
 0x590 PF: > { %s19_s27 = sadd.s32 1, %s2662_s27  }
 0x591   : > { %p16_p4 = scmp.ge.s32.totalorder %s19_s27, 4  }
 0x593   :  { %18 = sbr.rel (!%p16_p4) target bundleno = 1 (0x1), region = 125 }

</bundles_post_ra>
